<compile_context>
chip_gen: v6e
topology: v6e:2x2x1
jax: 0.10.0
libtpu: 0.0.40
codegen_flags: <defaults>
</compile_context>

<pallas_src>
import functools
import math

import jax
import jax.numpy as jnp
from jax.experimental import pallas as pl
from jax.experimental.pallas import tpu as pltpu

EPS = 1e-5


# ----------------------------------------------------------------------------
# 1) Feature branch: Linear(300->256)+ReLU, then 4x [Conv1d(k=3,pad=1)+BN+ReLU].
#    One grid step, whole batch.  PyTorch Conv1d cross-correlation:
#       y[co, l] = sum_{ci,t} w[co,ci,t] * x[ci, l+t-1]   (zero padded)
#    Taps l-1 / l+1 are built with pltpu.roll + edge masks (128-lane aligned).
# ----------------------------------------------------------------------------
def _feature_branch_kernel(x_ref, wl_ref, bl_ref,
                           w1_ref, s1_ref, t1_ref,
                           w2_ref, s2_ref, t2_ref,
                           w3_ref, s3_ref, t3_ref,
                           w4_ref, s4_ref, t4_ref,
                           o_ref, *, B, L):
    # f_l1 + ReLU (dropout = identity in eval mode).
    f = jnp.dot(x_ref[...], wl_ref[...], preferred_element_type=jnp.float32)
    f = jnp.maximum(f + bl_ref[...], 0.0)                        # (B, L)

    layers = ((w1_ref, s1_ref, t1_ref),
              (w2_ref, s2_ref, t2_ref),
              (w3_ref, s3_ref, t3_ref),
              (w4_ref, s4_ref, t4_ref))

    for b in range(B):                                           # B is tiny; unrolled
        x = f[b:b + 1, :]                                        # (C_in=1, L)
        for (w_ref, s_ref, t_ref) in layers:
            c_in = w_ref.shape[2]
            wk0 = w_ref[0]                                       # (C_out, C_in) tap l-1
            wk1 = w_ref[1]                                       # tap l
            wk2 = w_ref[2]                                       # tap l+1
            lane = jax.lax.broadcasted_iota(jnp.int32, x.shape, 1)
            # x[l-1] (zero at l==0) and x[l+1] (zero at l==L-1), lane-aligned rolls.
            x_m1 = jnp.where(lane == 0, 0.0, pltpu.roll(x, shift=1, axis=1))
            x_p1 = jnp.where(lane == L - 1, 0.0, pltpu.roll(x, shift=L - 1, axis=1))
            if c_in == 1:
                y = wk0 * x_m1 + wk1 * x + wk2 * x_p1            # (C_out,1)*(1,L)
            else:
                y = (jnp.dot(wk0, x_m1, preferred_element_type=jnp.float32)
                     + jnp.dot(wk1, x, preferred_element_type=jnp.float32)
                     + jnp.dot(wk2, x_p1, preferred_element_type=jnp.float32))
            # Conv bias is folded into the BN shift; BN (eval) then ReLU.
            x = jnp.maximum(y * s_ref[...] + t_ref[...], 0.0)    # (C_out, L)
        o_ref[b] = x


def feature_branch_pallas(x, wl, bl, conv_ws, conv_scales, conv_shifts):
    """x: (B, 300); wl: (300, 256) pre-transposed; bl: (256,).
    conv_ws[i]: (3, C_out_i, C_in_i); conv_scales/shifts[i]: (C_out_i,)."""
    B, Fin = x.shape
    L = wl.shape[1]
    C_last = conv_ws[-1].shape[1]

    args = [x, wl, bl.reshape(1, L)]
    in_specs = [
        pl.BlockSpec((B, Fin), lambda i: (0, 0)),
        pl.BlockSpec((Fin, L), lambda i: (0, 0)),
        pl.BlockSpec((1, L), lambda i: (0, 0)),
    ]
    for w, sc, sh in zip(conv_ws, conv_scales, conv_shifts):
        c_out, c_in = w.shape[1], w.shape[2]
        args += [w, sc.reshape(c_out, 1), sh.reshape(c_out, 1)]
        in_specs += [
            pl.BlockSpec((3, c_out, c_in), lambda i: (0, 0, 0)),
            pl.BlockSpec((c_out, 1), lambda i: (0, 0)),
            pl.BlockSpec((c_out, 1), lambda i: (0, 0)),
        ]

    kernel = functools.partial(_feature_branch_kernel, B=B, L=L)
    return pl.pallas_call(
        kernel,
        out_shape=jax.ShapeDtypeStruct((B, C_last, L), jnp.float32),
        grid_spec=pltpu.PrefetchScalarGridSpec(
            num_scalar_prefetch=0,
            grid=(1,),
            in_specs=in_specs,
            out_specs=pl.BlockSpec((B, C_last, L), lambda i: (0, 0, 0)),
        ),
    )(*args)


# ----------------------------------------------------------------------------
# 2) id branch: Linear(1->8)+ReLU, Linear(8->64)+ReLU, Linear(64->64)+ReLU,
#    then eval-mode BatchNorm folded to scale/shift (applied AFTER ReLU, as in
#    the reference: id_l3 -> dropout -> relu -> id_bn).
# ----------------------------------------------------------------------------
def _id_branch_kernel(x_ref, w1_ref, b1_ref, w2_ref, b2_ref, w3_ref, b3_ref,
                      s_ref, t_ref, o_ref):
    x = x_ref[...]                                               # (B, 1)
    h = jnp.maximum(x * w1_ref[...] + b1_ref[...], 0.0)          # (B, 8)  (K==1 matmul)
    h = jnp.maximum(jnp.dot(h, w2_ref[...], preferred_element_type=jnp.float32)
                    + b2_ref[...], 0.0)                          # (B, 64)
    h = jnp.maximum(jnp.dot(h, w3_ref[...], preferred_element_type=jnp.float32)
                    + b3_ref[...], 0.0)                          # (B, 64)
    o_ref[...] = h * s_ref[...] + t_ref[...]


def id_branch_pallas(idv, w1, b1, w2, b2, w3, b3, bn_scale, bn_shift):
    B = idv.shape[0]
    N = w3.shape[1]
    args = [idv, w1, b1.reshape(1, -1), w2, b2.reshape(1, -1),
            w3, b3.reshape(1, -1), bn_scale.reshape(1, -1), bn_shift.reshape(1, -1)]
    in_specs = [pl.BlockSpec(a.shape, lambda i: (0, 0)) for a in args]
    return pl.pallas_call(
        _id_branch_kernel,
        out_shape=jax.ShapeDtypeStruct((B, N), jnp.float32),
        grid_spec=pltpu.PrefetchScalarGridSpec(
            num_scalar_prefetch=0,
            grid=(1,),
            in_specs=in_specs,
            out_specs=pl.BlockSpec((B, N), lambda i: (0, 0)),
        ),
    )(*args)


# ----------------------------------------------------------------------------
# 3) Fusion: all_l1 (16448 -> 512) + ReLU, without materializing the concat.
#    y = relu(f_flat @ Wf + idf @ Wid + b).  Wf (16384,512) streams over a
#    (N parallel, K arbitrary) grid; Wid (64,512) + bias handled in the epilogue.
#    Accumulates directly into the resident output block (no acc scratch).
# ----------------------------------------------------------------------------
def _fusion_kernel(xf_ref, wf_ref, xid_ref, wid_ref, b_ref, o_ref):
    k = pl.program_id(1)

    @pl.when(k == 0)
    def _():
        o_ref[...] = jnp.zeros_like(o_ref)

    o_ref[...] += jnp.dot(xf_ref[...], wf_ref[...],
                          preferred_element_type=jnp.float32)

    @pl.when(k == pl.num_programs(1) - 1)
    def _():
        y = (o_ref[...]
             + jnp.dot(xid_ref[...], wid_ref[...],
                       preferred_element_type=jnp.float32)
             + b_ref[...])
        o_ref[...] = jnp.maximum(y, 0.0)


def fusion_pallas(xf, xid, wf, wid, bias, *, tk=4096, tn=256):
    """xf: (B, 16384); xid: (B, 64); wf: (16384, 512); wid: (64, 512); bias: (512,)."""
    B, Kf = xf.shape
    Kid = xid.shape[1]
    N = wf.shape[1]
    assert Kf % tk == 0 and N % tn == 0, (Kf, tk, N, tn)
    b2 = bias.reshape(1, N)

    return pl.pallas_call(
        _fusion_kernel,
        out_shape=jax.ShapeDtypeStruct((B, N), jnp.float32),
        grid_spec=pltpu.PrefetchScalarGridSpec(
            num_scalar_prefetch=0,
            grid=(N // tn, Kf // tk),          # (parallel N, arbitrary K) — K innermost
            in_specs=[
                pl.BlockSpec((B, tk), lambda j, k: (0, k)),
                pl.BlockSpec((tk, tn), lambda j, k: (k, j)),
                pl.BlockSpec((B, Kid), lambda j, k: (0, 0)),
                pl.BlockSpec((Kid, tn), lambda j, k: (0, j)),
                pl.BlockSpec((1, tn), lambda j, k: (0, j)),
            ],
            out_specs=pl.BlockSpec((B, tn), lambda j, k: (0, j)),
        ),
        compiler_params=pltpu.CompilerParams(
            dimension_semantics=("parallel", "arbitrary"),
            vmem_limit_bytes=32 * 1024 * 1024),
    )(xf, wf, xid, wid, b2)


# ----------------------------------------------------------------------------
# 4) LSTM tail: lstm1 (zero init state) -> lstm2 (input = lstm1 output,
#    init state = lstm1's (hn, cn), matching the reference plumbing) -> all_l2.
#    PyTorch gate order i, f, g, o.  seq_len == 1 throughout.
# ----------------------------------------------------------------------------
def _lstm_tail_kernel(x_ref, wih1_ref, b1_ref, wih2_ref, whh2_ref, b2_ref,
                      wo_ref, bo_ref, o_ref, *, H):
    x = x_ref[...]                                               # (B, 512)
    # lstm1 with zero initial (h0, c0): the Whh@h0 and f*c0 terms are exactly 0.
    g1 = jnp.dot(x, wih1_ref[...], preferred_element_type=jnp.float32) + b1_ref[...]
    i1 = jax.nn.sigmoid(g1[:, 0 * H:1 * H])
    gg1 = jnp.tanh(g1[:, 2 * H:3 * H])
    o1 = jax.nn.sigmoid(g1[:, 3 * H:4 * H])
    c1 = i1 * gg1
    h1 = o1 * jnp.tanh(c1)
    # lstm2: input = h1, initial state = (h1, c1)
    g2 = (jnp.dot(h1, wih2_ref[...], preferred_element_type=jnp.float32)
          + jnp.dot(h1, whh2_ref[...], preferred_element_type=jnp.float32)
          + b2_ref[...])
    i2 = jax.nn.sigmoid(g2[:, 0 * H:1 * H])
    f2 = jax.nn.sigmoid(g2[:, 1 * H:2 * H])
    gg2 = jnp.tanh(g2[:, 2 * H:3 * H])
    o2 = jax.nn.sigmoid(g2[:, 3 * H:4 * H])
    c2 = f2 * c1 + i2 * gg2
    h2 = o2 * jnp.tanh(c2)
    # all_l2
    o_ref[...] = (jnp.dot(h2, wo_ref[...], preferred_element_type=jnp.float32)
                  + bo_ref[...])


def lstm_tail_pallas(x, wih1, b1, wih2, whh2, b2, wo, bo):
    B = x.shape[0]
    H = whh2.shape[0]
    args = [x, wih1, b1.reshape(1, -1), wih2, whh2, b2.reshape(1, -1),
            wo, bo.reshape(1, -1)]
    in_specs = [pl.BlockSpec(a.shape, lambda i: (0, 0)) for a in args]
    kernel = functools.partial(_lstm_tail_kernel, H=H)
    return pl.pallas_call(
        kernel,
        out_shape=jax.ShapeDtypeStruct((B, wo.shape[1]), jnp.float32),
        grid_spec=pltpu.PrefetchScalarGridSpec(
            num_scalar_prefetch=0,
            grid=(1,),
            in_specs=in_specs,
            out_specs=pl.BlockSpec((B, wo.shape[1]), lambda i: (0, 0)),
        ),
    )(*args)


# ----------------------------------------------------------------------------
# Deterministic parameter initialization (PyTorch-default-style bounds).
# All dense / LSTM weights are stored pre-transposed as (K, N) so no transpose
# is materialized at call time; all_l1 is additionally pre-split (16384 | 64).
# ----------------------------------------------------------------------------
def init_params(key):
    keys = iter(jax.random.split(key, 32))
    p = {}

    def u(k, shape, bnd):
        return jax.random.uniform(k, shape, jnp.float32, -bnd, bnd)

    def lin(name, in_f, out_f):
        k1, k2 = jax.random.split(next(keys))
        bnd = 1.0 / math.sqrt(in_f)
        p[name + '_w'] = u(k1, (in_f, out_f), bnd)          # (K, N)
        p[name + '_b'] = u(k2, (out_f,), bnd)

    def conv(name, in_c, out_c, ksz=3):
        k1, k2 = jax.random.split(next(keys))
        bnd = 1.0 / math.sqrt(in_c * ksz)
        p[name + '_w'] = u(k1, (ksz, out_c, in_c), bnd)     # (tap, C_out, C_in)
        p[name + '_b'] = u(k2, (out_c,), bnd)

    def bn(name, c):
        p[name + '_gamma'] = jnp.ones((c,), jnp.float32)
        p[name + '_beta'] = jnp.zeros((c,), jnp.float32)
        p[name + '_mean'] = jnp.zeros((c,), jnp.float32)
        p[name + '_var'] = jnp.ones((c,), jnp.float32)

    def lstm(name, in_f, hid):
        k1, k2, k3, k4 = jax.random.split(next(keys), 4)
        bnd = 1.0 / math.sqrt(hid)
        p[name + '_wih'] = u(k1, (in_f, 4 * hid), bnd)      # (In, 4H)
        p[name + '_whh'] = u(k2, (hid, 4 * hid), bnd)       # (H, 4H)
        p[name + '_bih'] = u(k3, (4 * hid,), bnd)
        p[name + '_bhh'] = u(k4, (4 * hid,), bnd)

    lin('f_l1', 300, 256)
    conv('f_cnn1', 1, 16);  bn('f_bn1', 16)
    conv('f_cnn2', 16, 16); bn('f_bn2', 16)
    conv('f_cnn3', 16, 64); bn('f_bn3', 64)
    conv('f_cnn4', 64, 64); bn('f_bn4', 64)
    lin('id_l1', 1, 8)
    lin('id_l2', 8, 64)
    lin('id_l3', 64, 64)
    bn('id_bn', 64)
    # all_l1 (16448 -> 512): pre-transposed and pre-split (no runtime concat/pad).
    k1, k2, k3 = jax.random.split(next(keys), 3)
    bnd = 1.0 / math.sqrt(16448)
    p['all_l1_wf'] = u(k1, (16384, 512), bnd)
    p['all_l1_wid'] = u(k2, (64, 512), bnd)
    p['all_l1_b'] = u(k3, (512,), bnd)
    lstm('lstm1', 512, 64)
    lstm('lstm2', 64, 64)
    lin('all_l2', 64, 1)
    return p


# ----------------------------------------------------------------------------
# Full forward pass (4 pallas_calls).
# ----------------------------------------------------------------------------
def lsdnn_forward(p, feature, idv):
    B = feature.shape[0]

    # ----- feature branch: f_l1+ReLU + 4x conv/BN/ReLU (1 kernel) -----
    conv_ws, conv_scales, conv_shifts = [], [], []
    for i in (1, 2, 3, 4):
        sc = p[f'f_bn{i}_gamma'] / jnp.sqrt(p[f'f_bn{i}_var'] + EPS)
        sh = p[f'f_bn{i}_beta'] + sc * (p[f'f_cnn{i}_b'] - p[f'f_bn{i}_mean'])
        conv_ws.append(p[f'f_cnn{i}_w'])
        conv_scales.append(sc)
        conv_shifts.append(sh)
    f = feature_branch_pallas(feature, p['f_l1_w'], p['f_l1_b'],
                              conv_ws, conv_scales, conv_shifts)       # (B, 64, 256)
    f_flat = f.reshape(B, -1)                                          # (B, 16384), free reshape

    # ----- id branch (1 kernel) -----
    id_sc = p['id_bn_gamma'] / jnp.sqrt(p['id_bn_var'] + EPS)
    id_sh = p['id_bn_beta'] - p['id_bn_mean'] * id_sc
    idf = id_branch_pallas(idv, p['id_l1_w'], p['id_l1_b'],
                           p['id_l2_w'], p['id_l2_b'],
                           p['id_l3_w'], p['id_l3_b'], id_sc, id_sh)   # (B, 64)

    # ----- fusion: all_l1 + ReLU (dominant weight stream, 1 kernel) -----
    c = fusion_pallas(f_flat, idf, p['all_l1_wf'], p['all_l1_wid'],
                      p['all_l1_b'])                                   # (B, 512)

    # ----- lstm1 + lstm2 + all_l2 (1 kernel) -----
    out = lstm_tail_pallas(
        c,
        p['lstm1_wih'], p['lstm1_bih'] + p['lstm1_bhh'],
        p['lstm2_wih'], p['lstm2_whh'], p['lstm2_bih'] + p['lstm2_bhh'],
        p['all_l2_w'], p['all_l2_b'])                                  # (B, 1)
    return out


if __name__ == "__main__":
    root = jax.random.PRNGKey(0)
    k_params, k_feat, k_id = jax.random.split(root, 3)

    params = init_params(k_params)

    B = 2
    feature = jax.random.normal(k_feat, (B, 300), jnp.float32)
    idv = jax.random.normal(k_id, (B, 1), jnp.float32)

    fwd = jax.jit(lsdnn_forward)
    out = jax.block_until_ready(fwd(params, feature, idv))

    assert out.shape == (B, 1), out.shape
    assert bool(jnp.all(jnp.isfinite(out)))
    print("KERNEL_OK")
</pallas_src>

<mosaic_0001>
module attributes {stable_mosaic.version = 11 : i64} {
  func.func @_id_branch_kernel(%arg0: i32, %arg1: memref<2x1xf32, #tpu.memory_space<vmem>>, %arg2: memref<1x8xf32, #tpu.memory_space<vmem>>, %arg3: memref<1x8xf32, #tpu.memory_space<vmem>>, %arg4: memref<8x64xf32, #tpu.memory_space<vmem>>, %arg5: memref<1x64xf32, #tpu.memory_space<vmem>>, %arg6: memref<64x64xf32, #tpu.memory_space<vmem>>, %arg7: memref<1x64xf32, #tpu.memory_space<vmem>>, %arg8: memref<1x64xf32, #tpu.memory_space<vmem>>, %arg9: memref<1x64xf32, #tpu.memory_space<vmem>>, %arg10: memref<2x64xf32, #tpu.memory_space<vmem>>) attributes {dimension_semantics = [#tpu.dimension_semantics<arbitrary>], iteration_bounds = array<i64: 1>, scalar_prefetch = 0 : i64, scratch_operands = 0 : i64, tpu.core_type = #tpu.core_type<tc>, window_params = [{pipeline_mode = #tpu.pipeline_mode<synchronous>, transform_indices = @transform_0, window_bounds = array<i64: 2, 1>}, {pipeline_mode = #tpu.pipeline_mode<synchronous>, transform_indices = @transform_1, window_bounds = array<i64: 1, 8>}, {pipeline_mode = #tpu.pipeline_mode<synchronous>, transform_indices = @transform_2, window_bounds = array<i64: 1, 8>}, {pipeline_mode = #tpu.pipeline_mode<synchronous>, transform_indices = @transform_3, window_bounds = array<i64: 8, 64>}, {pipeline_mode = #tpu.pipeline_mode<synchronous>, transform_indices = @transform_4, window_bounds = array<i64: 1, 64>}, {pipeline_mode = #tpu.pipeline_mode<synchronous>, transform_indices = @transform_5, window_bounds = array<i64: 64, 64>}, {pipeline_mode = #tpu.pipeline_mode<synchronous>, transform_indices = @transform_6, window_bounds = array<i64: 1, 64>}, {pipeline_mode = #tpu.pipeline_mode<synchronous>, transform_indices = @transform_7, window_bounds = array<i64: 1, 64>}, {pipeline_mode = #tpu.pipeline_mode<synchronous>, transform_indices = @transform_8, window_bounds = array<i64: 1, 64>}, {pipeline_mode = #tpu.pipeline_mode<synchronous>, transform_indices = @transform_9, window_bounds = array<i64: 2, 64>}]} {
    %c0 = arith.constant 0 : index
    %c0_0 = arith.constant 0 : index
    %0 = vector.load %arg1[%c0, %c0_0] : memref<2x1xf32, #tpu.memory_space<vmem>>, vector<2x1xf32>
    %c0_1 = arith.constant 0 : index
    %c0_2 = arith.constant 0 : index
    %1 = vector.load %arg2[%c0_1, %c0_2] : memref<1x8xf32, #tpu.memory_space<vmem>>, vector<1x8xf32>
    %2 = vector.broadcast %0 : vector<2x1xf32> to vector<2x8xf32>
    %3 = vector.broadcast %1 : vector<1x8xf32> to vector<2x8xf32>
    %4 = arith.mulf %2, %3 : vector<2x8xf32>
    %c0_3 = arith.constant 0 : index
    %c0_4 = arith.constant 0 : index
    %5 = vector.load %arg3[%c0_3, %c0_4] : memref<1x8xf32, #tpu.memory_space<vmem>>, vector<1x8xf32>
    %6 = vector.broadcast %5 : vector<1x8xf32> to vector<2x8xf32>
    %7 = arith.addf %4, %6 : vector<2x8xf32>
    %cst = arith.constant 0.000000e+00 : f32
    %8 = vector.broadcast %cst : f32 to vector<2x8xf32>
    %9 = arith.maximumf %7, %8 : vector<2x8xf32>
    %c0_5 = arith.constant 0 : index
    %c0_6 = arith.constant 0 : index
    %10 = vector.load %arg4[%c0_5, %c0_6] : memref<8x64xf32, #tpu.memory_space<vmem>>, vector<8x64xf32>
    %cst_7 = arith.constant dense<0.000000e+00> : vector<2x64xf32>
    %11 = tpu.matmul %9, %10, %cst_7 {dimension_numbers = #tpu.dot_dimension_numbers<[1], [0], [0], [1], [0, 0, 1, 1], [], []>} : vector<2x8xf32>, vector<8x64xf32>, vector<2x64xf32> -> vector<2x64xf32>
    %c0_8 = arith.constant 0 : index
    %c0_9 = arith.constant 0 : index
    %12 = vector.load %arg5[%c0_8, %c0_9] : memref<1x64xf32, #tpu.memory_space<vmem>>, vector<1x64xf32>
    %13 = vector.broadcast %12 : vector<1x64xf32> to vector<2x64xf32>
    %14 = arith.addf %11, %13 : vector<2x64xf32>
    %cst_10 = arith.constant 0.000000e+00 : f32
    %15 = vector.broadcast %cst_10 : f32 to vector<2x64xf32>
    %16 = arith.maximumf %14, %15 : vector<2x64xf32>
    %c0_11 = arith.constant 0 : index
    %c0_12 = arith.constant 0 : index
    %17 = vector.load %arg6[%c0_11, %c0_12] : memref<64x64xf32, #tpu.memory_space<vmem>>, vector<64x64xf32>
    %cst_13 = arith.constant dense<0.000000e+00> : vector<2x64xf32>
    %18 = tpu.matmul %16, %17, %cst_13 {dimension_numbers = #tpu.dot_dimension_numbers<[1], [0], [0], [1], [0, 0, 1, 1], [], []>} : vector<2x64xf32>, vector<64x64xf32>, vector<2x64xf32> -> vector<2x64xf32>
    %c0_14 = arith.constant 0 : index
    %c0_15 = arith.constant 0 : index
    %19 = vector.load %arg7[%c0_14, %c0_15] : memref<1x64xf32, #tpu.memory_space<vmem>>, vector<1x64xf32>
    %20 = vector.broadcast %19 : vector<1x64xf32> to vector<2x64xf32>
    %21 = arith.addf %18, %20 : vector<2x64xf32>
    %cst_16 = arith.constant 0.000000e+00 : f32
    %22 = vector.broadcast %cst_16 : f32 to vector<2x64xf32>
    %23 = arith.maximumf %21, %22 : vector<2x64xf32>
    %c0_17 = arith.constant 0 : index
    %c0_18 = arith.constant 0 : index
    %24 = vector.load %arg8[%c0_17, %c0_18] : memref<1x64xf32, #tpu.memory_space<vmem>>, vector<1x64xf32>
    %25 = vector.broadcast %24 : vector<1x64xf32> to vector<2x64xf32>
    %26 = arith.mulf %23, %25 : vector<2x64xf32>
    %c0_19 = arith.constant 0 : index
    %c0_20 = arith.constant 0 : index
    %27 = vector.load %arg9[%c0_19, %c0_20] : memref<1x64xf32, #tpu.memory_space<vmem>>, vector<1x64xf32>
    %28 = vector.broadcast %27 : vector<1x64xf32> to vector<2x64xf32>
    %29 = arith.addf %26, %28 : vector<2x64xf32>
    %c0_21 = arith.constant 0 : index
    %c0_22 = arith.constant 0 : index
    %30 = vector.load %arg10[%c0_21, %c0_22] : memref<2x64xf32, #tpu.memory_space<vmem>>, vector<2x64xf32>
    tpu.vector_store %arg10[%c0_21, %c0_22], %29 {strides = array<i32>} : memref<2x64xf32, #tpu.memory_space<vmem>>, vector<2x64xf32>,
    return
  }
  func.func @transform_0(%arg0: i32) -> (i32, i32) {
    %c0_i32 = arith.constant 0 : i32
    %c0_i32_0 = arith.constant 0 : i32
    %c0_i32_1 = arith.constant 0 : i32
    return %c0_i32, %c0_i32_0 : i32, i32
  }
  func.func @transform_1(%arg0: i32) -> (i32, i32) {
    %c0_i32 = arith.constant 0 : i32
    %c0_i32_0 = arith.constant 0 : i32
    %c0_i32_1 = arith.constant 0 : i32
    return %c0_i32, %c0_i32_0 : i32, i32
  }
  func.func @transform_2(%arg0: i32) -> (i32, i32) {
    %c0_i32 = arith.constant 0 : i32
    %c0_i32_0 = arith.constant 0 : i32
    %c0_i32_1 = arith.constant 0 : i32
    return %c0_i32, %c0_i32_0 : i32, i32
  }
  func.func @transform_3(%arg0: i32) -> (i32, i32) {
    %c0_i32 = arith.constant 0 : i32
    %c0_i32_0 = arith.constant 0 : i32
    %c0_i32_1 = arith.constant 0 : i32
    return %c0_i32, %c0_i32_0 : i32, i32
  }
  func.func @transform_4(%arg0: i32) -> (i32, i32) {
    %c0_i32 = arith.constant 0 : i32
    %c0_i32_0 = arith.constant 0 : i32
    %c0_i32_1 = arith.constant 0 : i32
    return %c0_i32, %c0_i32_0 : i32, i32
  }
  func.func @transform_5(%arg0: i32) -> (i32, i32) {
    %c0_i32 = arith.constant 0 : i32
    %c0_i32_0 = arith.constant 0 : i32
    %c0_i32_1 = arith.constant 0 : i32
    return %c0_i32, %c0_i32_0 : i32, i32
  }
  func.func @transform_6(%arg0: i32) -> (i32, i32) {
    %c0_i32 = arith.constant 0 : i32
    %c0_i32_0 = arith.constant 0 : i32
    %c0_i32_1 = arith.constant 0 : i32
    return %c0_i32, %c0_i32_0 : i32, i32
  }
  func.func @transform_7(%arg0: i32) -> (i32, i32) {
    %c0_i32 = arith.constant 0 : i32
    %c0_i32_0 = arith.constant 0 : i32
    %c0_i32_1 = arith.constant 0 : i32
    return %c0_i32, %c0_i32_0 : i32, i32
  }
  func.func @transform_8(%arg0: i32) -> (i32, i32) {
    %c0_i32 = arith.constant 0 : i32
    %c0_i32_0 = arith.constant 0 : i32
    %c0_i32_1 = arith.constant 0 : i32
    return %c0_i32, %c0_i32_0 : i32, i32
  }
  func.func @transform_9(%arg0: i32) -> (i32, i32) {
    %c0_i32 = arith.constant 0 : i32
    %c0_i32_0 = arith.constant 0 : i32
    %c0_i32_1 = arith.constant 0 : i32
    return %c0_i32, %c0_i32_0 : i32, i32
  }
}

module attributes {stable_mosaic.version = 11 : i64} {
  func.func @_feature_branch_kernel(%arg0: i32, %arg1: memref<2x300xf32, #tpu.memory_space<vmem>>, %arg2: memref<300x256xf32, #tpu.memory_space<vmem>>, %arg3: memref<1x256xf32, #tpu.memory_space<vmem>>, %arg4: memref<3x16x1xf32, #tpu.memory_space<vmem>>, %arg5: memref<16x1xf32, #tpu.memory_space<vmem>>, %arg6: memref<16x1xf32, #tpu.memory_space<vmem>>, %arg7: memref<3x16x16xf32, #tpu.memory_space<vmem>>, %arg8: memref<16x1xf32, #tpu.memory_space<vmem>>, %arg9: memref<16x1xf32, #tpu.memory_space<vmem>>, %arg10: memref<3x64x16xf32, #tpu.memory_space<vmem>>, %arg11: memref<64x1xf32, #tpu.memory_space<vmem>>, %arg12: memref<64x1xf32, #tpu.memory_space<vmem>>, %arg13: memref<3x64x64xf32, #tpu.memory_space<vmem>>, %arg14: memref<64x1xf32, #tpu.memory_space<vmem>>, %arg15: memref<64x1xf32, #tpu.memory_space<vmem>>, %arg16: memref<2x64x256xf32, #tpu.memory_space<vmem>>) attributes {dimension_semantics = [#tpu.dimension_semantics<arbitrary>], iteration_bounds = array<i64: 1>, scalar_prefetch = 0 : i64, scratch_operands = 0 : i64, tpu.core_type = #tpu.core_type<tc>, window_params = [{pipeline_mode = #tpu.pipeline_mode<synchronous>, transform_indices = @transform_0, window_bounds = array<i64: 2, 300>}, {pipeline_mode = #tpu.pipeline_mode<synchronous>, transform_indices = @transform_1, window_bounds = array<i64: 300, 256>}, {pipeline_mode = #tpu.pipeline_mode<synchronous>, transform_indices = @transform_2, window_bounds = array<i64: 1, 256>}, {pipeline_mode = #tpu.pipeline_mode<synchronous>, transform_indices = @transform_3, window_bounds = array<i64: 3, 16, 1>}, {pipeline_mode = #tpu.pipeline_mode<synchronous>, transform_indices = @transform_4, window_bounds = array<i64: 16, 1>}, {pipeline_mode = #tpu.pipeline_mode<synchronous>, transform_indices = @transform_5, window_bounds = array<i64: 16, 1>}, {pipeline_mode = #tpu.pipeline_mode<synchronous>, transform_indices = @transform_6, window_bounds = array<i64: 3, 16, 16>}, {pipeline_mode = #tpu.pipeline_mode<synchronous>, transform_indices = @transform_7, window_bounds = array<i64: 16, 1>}, {pipeline_mode = #tpu.pipeline_mode<synchronous>, transform_indices = @transform_8, window_bounds = array<i64: 16, 1>}, {pipeline_mode = #tpu.pipeline_mode<synchronous>, transform_indices = @transform_9, window_bounds = array<i64: 3, 64, 16>}, {pipeline_mode = #tpu.pipeline_mode<synchronous>, transform_indices = @transform_10, window_bounds = array<i64: 64, 1>}, {pipeline_mode = #tpu.pipeline_mode<synchronous>, transform_indices = @transform_11, window_bounds = array<i64: 64, 1>}, {pipeline_mode = #tpu.pipeline_mode<synchronous>, transform_indices = @transform_12, window_bounds = array<i64: 3, 64, 64>}, {pipeline_mode = #tpu.pipeline_mode<synchronous>, transform_indices = @transform_13, window_bounds = array<i64: 64, 1>}, {pipeline_mode = #tpu.pipeline_mode<synchronous>, transform_indices = @transform_14, window_bounds = array<i64: 64, 1>}, {pipeline_mode = #tpu.pipeline_mode<synchronous>, transform_indices = @transform_15, window_bounds = array<i64: 2, 64, 256>}]} {
    %c0 = arith.constant 0 : index
    %c0_0 = arith.constant 0 : index
    %0 = vector.load %arg1[%c0, %c0_0] : memref<2x300xf32, #tpu.memory_space<vmem>>, vector<2x300xf32>
    %c0_1 = arith.constant 0 : index
    %c0_2 = arith.constant 0 : index
    %1 = vector.load %arg2[%c0_1, %c0_2] : memref<300x256xf32, #tpu.memory_space<vmem>>, vector<300x256xf32>
    %cst = arith.constant dense<0.000000e+00> : vector<2x256xf32>
    %2 = tpu.matmul %0, %1, %cst {dimension_numbers = #tpu.dot_dimension_numbers<[1], [0], [0], [1], [0, 0, 1, 1], [], []>} : vector<2x300xf32>, vector<300x256xf32>, vector<2x256xf32> -> vector<2x256xf32>
    %c0_3 = arith.constant 0 : index
    %c0_4 = arith.constant 0 : index
    %3 = vector.load %arg3[%c0_3, %c0_4] : memref<1x256xf32, #tpu.memory_space<vmem>>, vector<1x256xf32>
    %4 = vector.broadcast %3 : vector<1x256xf32> to vector<2x256xf32>
    %5 = arith.addf %2, %4 : vector<2x256xf32>
    %cst_5 = arith.constant 0.000000e+00 : f32
    %6 = vector.broadcast %cst_5 : f32 to vector<2x256xf32>
    %7 = arith.maximumf %5, %6 : vector<2x256xf32>
    %8 = vector.extract_strided_slice %7 {offsets = [0, 0], sizes = [1, 256], strides = [1, 1]} : vector<2x256xf32> to vector<1x256xf32>
    %c0_6 = arith.constant 0 : index
    %c0_7 = arith.constant 0 : index
    %c0_8 = arith.constant 0 : index
    %9 = vector.load %arg4[%c0_6, %c0_7, %c0_8] : memref<3x16x1xf32, #tpu.memory_space<vmem>>, vector<1x16x1xf32>
    %10 = vector.shape_cast %9 : vector<1x16x1xf32> to vector<16x1xf32>
    %c1 = arith.constant 1 : index
    %c0_9 = arith.constant 0 : index
    %c0_10 = arith.constant 0 : index
    %11 = vector.load %arg4[%c1, %c0_9, %c0_10] : memref<3x16x1xf32, #tpu.memory_space<vmem>>, vector<1x16x1xf32>
    %12 = vector.shape_cast %11 : vector<1x16x1xf32> to vector<16x1xf32>
    %c2 = arith.constant 2 : index
    %c0_11 = arith.constant 0 : index
    %c0_12 = arith.constant 0 : index
    %13 = vector.load %arg4[%c2, %c0_11, %c0_12] : memref<3x16x1xf32, #tpu.memory_space<vmem>>, vector<1x16x1xf32>
    %14 = vector.shape_cast %13 : vector<1x16x1xf32> to vector<16x1xf32>
    %15 = tpu.iota {dimensions = array<i32: 1>} : vector<1x256xi32>
    %c0_i32 = arith.constant 0 : i32
    %16 = vector.broadcast %c0_i32 : i32 to vector<1x256xi32>
    %17 = arith.cmpi eq, %15, %16 : vector<1x256xi32>
    %c1_i32 = arith.constant 1 : i32
    %18 = tpu.dynamic_rotate %8 by %c1_i32 dim 1 : vector<1x256xf32>, i32 -> vector<1x256xf32>
    %cst_13 = arith.constant 0.000000e+00 : f32
    %19 = vector.broadcast %cst_13 : f32 to vector<1x256xf32>
    %20 = arith.select %17, %19, %18 : vector<1x256xi1>, vector<1x256xf32>
    %c255_i32 = arith.constant 255 : i32
    %21 = vector.broadcast %c255_i32 : i32 to vector<1x256xi32>
    %22 = arith.cmpi eq, %15, %21 : vector<1x256xi32>
    %c255_i32_14 = arith.constant 255 : i32
    %23 = tpu.dynamic_rotate %8 by %c255_i32_14 dim 1 : vector<1x256xf32>, i32 -> vector<1x256xf32>
    %cst_15 = arith.constant 0.000000e+00 : f32
    %24 = vector.broadcast %cst_15 : f32 to vector<1x256xf32>
    %25 = arith.select %22, %24, %23 : vector<1x256xi1>, vector<1x256xf32>
    %26 = vector.broadcast %10 : vector<16x1xf32> to vector<16x256xf32>
    %27 = vector.broadcast %20 : vector<1x256xf32> to vector<16x256xf32>
    %28 = arith.mulf %26, %27 : vector<16x256xf32>
    %29 = vector.broadcast %12 : vector<16x1xf32> to vector<16x256xf32>
    %30 = vector.broadcast %8 : vector<1x256xf32> to vector<16x256xf32>
    %31 = arith.mulf %29, %30 : vector<16x256xf32>
    %32 = arith.addf %28, %31 : vector<16x256xf32>
    %33 = vector.broadcast %14 : vector<16x1xf32> to vector<16x256xf32>
    %34 = vector.broadcast %25 : vector<1x256xf32> to vector<16x256xf32>
    %35 = arith.mulf %33, %34 : vector<16x256xf32>
    %36 = arith.addf %32, %35 : vector<16x256xf32>
    %c0_16 = arith.constant 0 : index
    %c0_17 = arith.constant 0 : index
    %37 = vector.load %arg5[%c0_16, %c0_17] : memref<16x1xf32, #tpu.memory_space<vmem>>, vector<16x1xf32>
    %38 = vector.broadcast %37 : vector<16x1xf32> to vector<16x256xf32>
    %39 = arith.mulf %36, %38 : vector<16x256xf32>
    %c0_18 = arith.constant 0 : index
    %c0_19 = arith.constant 0 : index
    %40 = vector.load %arg6[%c0_18, %c0_19] : memref<16x1xf32, #tpu.memory_space<vmem>>, vector<16x1xf32>
    %41 = vector.broadcast %40 : vector<16x1xf32> to vector<16x256xf32>
    %42 = arith.addf %39, %41 : vector<16x256xf32>
    %cst_20 = arith.constant 0.000000e+00 : f32
    %43 = vector.broadcast %cst_20 : f32 to vector<16x256xf32>
    %44 = arith.maximumf %42, %43 : vector<16x256xf32>
    %c0_21 = arith.constant 0 : index
    %c0_22 = arith.constant 0 : index
    %c0_23 = arith.constant 0 : index
    %45 = vector.load %arg7[%c0_21, %c0_22, %c0_23] : memref<3x16x16xf32, #tpu.memory_space<vmem>>, vector<1x16x16xf32>
    %46 = vector.shape_cast %45 : vector<1x16x16xf32> to vector<16x16xf32>
    %c1_24 = arith.constant 1 : index
    %c0_25 = arith.constant 0 : index
    %c0_26 = arith.constant 0 : index
    %47 = vector.load %arg7[%c1_24, %c0_25, %c0_26] : memref<3x16x16xf32, #tpu.memory_space<vmem>>, vector<1x16x16xf32>
    %48 = vector.shape_cast %47 : vector<1x16x16xf32> to vector<16x16xf32>
    %c2_27 = arith.constant 2 : index
    %c0_28 = arith.constant 0 : index
    %c0_29 = arith.constant 0 : index
    %49 = vector.load %arg7[%c2_27, %c0_28, %c0_29] : memref<3x16x16xf32, #tpu.memory_space<vmem>>, vector<1x16x16xf32>
    %50 = vector.shape_cast %49 : vector<1x16x16xf32> to vector<16x16xf32>
    %51 = tpu.iota {dimensions = array<i32: 1>} : vector<16x256xi32>
    %c0_i32_30 = arith.constant 0 : i32
    %52 = vector.broadcast %c0_i32_30 : i32 to vector<16x256xi32>
    %53 = arith.cmpi eq, %51, %52 : vector<16x256xi32>
    %c1_i32_31 = arith.constant 1 : i32
    %54 = tpu.dynamic_rotate %44 by %c1_i32_31 dim 1 : vector<16x256xf32>, i32 -> vector<16x256xf32>
    %cst_32 = arith.constant 0.000000e+00 : f32
    %55 = vector.broadcast %cst_32 : f32 to vector<16x256xf32>
    %56 = arith.select %53, %55, %54 : vector<16x256xi1>, vector<16x256xf32>
    %c255_i32_33 = arith.constant 255 : i32
    %57 = vector.broadcast %c255_i32_33 : i32 to vector<16x256xi32>
    %58 = arith.cmpi eq, %51, %57 : vector<16x256xi32>
    %c255_i32_34 = arith.constant 255 : i32
    %59 = tpu.dynamic_rotate %44 by %c255_i32_34 dim 1 : vector<16x256xf32>, i32 -> vector<16x256xf32>
    %cst_35 = arith.constant 0.000000e+00 : f32
    %60 = vector.broadcast %cst_35 : f32 to vector<16x256xf32>
    %61 = arith.select %58, %60, %59 : vector<16x256xi1>, vector<16x256xf32>
    %cst_36 = arith.constant dense<0.000000e+00> : vector<16x256xf32>
    %62 = tpu.matmul %46, %56, %cst_36 {dimension_numbers = #tpu.dot_dimension_numbers<[1], [0], [0], [1], [0, 0, 1, 1], [], []>} : vector<16x16xf32>, vector<16x256xf32>, vector<16x256xf32> -> vector<16x256xf32>
    %cst_37 = arith.constant dense<0.000000e+00> : vector<16x256xf32>
    %63 = tpu.matmul %48, %44, %cst_37 {dimension_numbers = #tpu.dot_dimension_numbers<[1], [0], [0], [1], [0, 0, 1, 1], [], []>} : vector<16x16xf32>, vector<16x256xf32>, vector<16x256xf32> -> vector<16x256xf32>
    %64 = arith.addf %62, %63 : vector<16x256xf32>
    %cst_38 = arith.constant dense<0.000000e+00> : vector<16x256xf32>
    %65 = tpu.matmul %50, %61, %cst_38 {dimension_numbers = #tpu.dot_dimension_numbers<[1], [0], [0], [1], [0, 0, 1, 1], [], []>} : vector<16x16xf32>, vector<16x256xf32>, vector<16x256xf32> -> vector<16x256xf32>
    %66 = arith.addf %64, %65 : vector<16x256xf32>
    %c0_39 = arith.constant 0 : index
    %c0_40 = arith.constant 0 : index
    %67 = vector.load %arg8[%c0_39, %c0_40] : memref<16x1xf32, #tpu.memory_space<vmem>>, vector<16x1xf32>
    %68 = vector.broadcast %67 : vector<16x1xf32> to vector<16x256xf32>
    %69 = arith.mulf %66, %68 : vector<16x256xf32>
    %c0_41 = arith.constant 0 : index
    %c0_42 = arith.constant 0 : index
    %70 = vector.load %arg9[%c0_41, %c0_42] : memref<16x1xf32, #tpu.memory_space<vmem>>, vector<16x1xf32>
    %71 = vector.broadcast %70 : vector<16x1xf32> to vector<16x256xf32>
    %72 = arith.addf %69, %71 : vector<16x256xf32>
    %cst_43 = arith.constant 0.000000e+00 : f32
    %73 = vector.broadcast %cst_43 : f32 to vector<16x256xf32>
    %74 = arith.maximumf %72, %73 : vector<16x256xf32>
    %c0_44 = arith.constant 0 : index
    %c0_45 = arith.constant 0 : index
    %c0_46 = arith.constant 0 : index
    %75 = vector.load %arg10[%c0_44, %c0_45, %c0_46] : memref<3x64x16xf32, #tpu.memory_space<vmem>>, vector<1x64x16xf32>
    %76 = vector.shape_cast %75 : vector<1x64x16xf32> to vector<64x16xf32>
    %c1_47 = arith.constant 1 : index
    %c0_48 = arith.constant 0 : index
    %c0_49 = arith.constant 0 : index
    %77 = vector.load %arg10[%c1_47, %c0_48, %c0_49] : memref<3x64x16xf32, #tpu.memory_space<vmem>>, vector<1x64x16xf32>
    %78 = vector.shape_cast %77 : vector<1x64x16xf32> to vector<64x16xf32>
    %c2_50 = arith.constant 2 : index
    %c0_51 = arith.constant 0 : index
    %c0_52 = arith.constant 0 : index
    %79 = vector.load %arg10[%c2_50, %c0_51, %c0_52] : memref<3x64x16xf32, #tpu.memory_space<vmem>>, vector<1x64x16xf32>
    %80 = vector.shape_cast %79 : vector<1x64x16xf32> to vector<64x16xf32>
    %81 = tpu.iota {dimensions = array<i32: 1>} : vector<16x256xi32>
    %c0_i32_53 = arith.constant 0 : i32
    %82 = vector.broadcast %c0_i32_53 : i32 to vector<16x256xi32>
    %83 = arith.cmpi eq, %81, %82 : vector<16x256xi32>
    %c1_i32_54 = arith.constant 1 : i32
    %84 = tpu.dynamic_rotate %74 by %c1_i32_54 dim 1 : vector<16x256xf32>, i32 -> vector<16x256xf32>
    %cst_55 = arith.constant 0.000000e+00 : f32
    %85 = vector.broadcast %cst_55 : f32 to vector<16x256xf32>
    %86 = arith.select %83, %85, %84 : vector<16x256xi1>, vector<16x256xf32>
    %c255_i32_56 = arith.constant 255 : i32
    %87 = vector.broadcast %c255_i32_56 : i32 to vector<16x256xi32>
    %88 = arith.cmpi eq, %81, %87 : vector<16x256xi32>
    %c255_i32_57 = arith.constant 255 : i32
    %89 = tpu.dynamic_rotate %74 by %c255_i32_57 dim 1 : vector<16x256xf32>, i32 -> vector<16x256xf32>
    %cst_58 = arith.constant 0.000000e+00 : f32
    %90 = vector.broadcast %cst_58 : f32 to vector<16x256xf32>
    %91 = arith.select %88, %90, %89 : vector<16x256xi1>, vector<16x256xf32>
    %cst_59 = arith.constant dense<0.000000e+00> : vector<64x256xf32>
    %92 = tpu.matmul %76, %86, %cst_59 {dimension_numbers = #tpu.dot_dimension_numbers<[1], [0], [0], [1], [0, 0, 1, 1], [], []>} : vector<64x16xf32>, vector<16x256xf32>, vector<64x256xf32> -> vector<64x256xf32>
    %cst_60 = arith.constant dense<0.000000e+00> : vector<64x256xf32>
    %93 = tpu.matmul %78, %74, %cst_60 {dimension_numbers = #tpu.dot_dimension_numbers<[1], [0], [0], [1], [0, 0, 1, 1], [], []>} : vector<64x16xf32>, vector<16x256xf32>, vector<64x256xf32> -> vector<64x256xf32>
    %94 = arith.addf %92, %93 : vector<64x256xf32>
    %cst_61 = arith.constant dense<0.000000e+00> : vector<64x256xf32>
    %95 = tpu.matmul %80, %91, %cst_61 {dimension_numbers = #tpu.dot_dimension_numbers<[1], [0], [0], [1], [0, 0, 1, 1], [], []>} : vector<64x16xf32>, vector<16x256xf32>, vector<64x256xf32> -> vector<64x256xf32>
    %96 = arith.addf %94, %95 : vector<64x256xf32>
    %c0_62 = arith.constant 0 : index
    %c0_63 = arith.constant 0 : index
    %97 = vector.load %arg11[%c0_62, %c0_63] : memref<64x1xf32, #tpu.memory_space<vmem>>, vector<64x1xf32>
    %98 = vector.broadcast %97 : vector<64x1xf32> to vector<64x256xf32>
    %99 = arith.mulf %96, %98 : vector<64x256xf32>
    %c0_64 = arith.constant 0 : index
    %c0_65 = arith.constant 0 : index
    %100 = vector.load %arg12[%c0_64, %c0_65] : memref<64x1xf32, #tpu.memory_space<vmem>>, vector<64x1xf32>
    %101 = vector.broadcast %100 : vector<64x1xf32> to vector<64x256xf32>
    %102 = arith.addf %99, %101 : vector<64x256xf32>
    %cst_66 = arith.constant 0.000000e+00 : f32
    %103 = vector.broadcast %cst_66 : f32 to vector<64x256xf32>
    %104 = arith.maximumf %102, %103 : vector<64x256xf32>
    %c0_67 = arith.constant 0 : index
    %c0_68 = arith.constant 0 : index
    %c0_69 = arith.constant 0 : index
    %105 = vector.load %arg13[%c0_67, %c0_68, %c0_69] : memref<3x64x64xf32, #tpu.memory_space<vmem>>, vector<1x64x64xf32>
    %106 = vector.shape_cast %105 : vector<1x64x64xf32> to vector<64x64xf32>
    %c1_70 = arith.constant 1 : index
    %c0_71 = arith.constant 0 : index
    %c0_72 = arith.constant 0 : index
    %107 = vector.load %arg13[%c1_70, %c0_71, %c0_72] : memref<3x64x64xf32, #tpu.memory_space<vmem>>, vector<1x64x64xf32>
    %108 = vector.shape_cast %107 : vector<1x64x64xf32> to vector<64x64xf32>
    %c2_73 = arith.constant 2 : index
    %c0_74 = arith.constant 0 : index
    %c0_75 = arith.constant 0 : index
    %109 = vector.load %arg13[%c2_73, %c0_74, %c0_75] : memref<3x64x64xf32, #tpu.memory_space<vmem>>, vector<1x64x64xf32>
    %110 = vector.shape_cast %109 : vector<1x64x64xf32> to vector<64x64xf32>
    %111 = tpu.iota {dimensions = array<i32: 1>} : vector<64x256xi32>
    %c0_i32_76 = arith.constant 0 : i32
    %112 = vector.broadcast %c0_i32_76 : i32 to vector<64x256xi32>
    %113 = arith.cmpi eq, %111, %112 : vector<64x256xi32>
    %c1_i32_77 = arith.constant 1 : i32
    %114 = tpu.dynamic_rotate %104 by %c1_i32_77 dim 1 : vector<64x256xf32>, i32 -> vector<64x256xf32>
    %cst_78 = arith.constant 0.000000e+00 : f32
    %115 = vector.broadcast %cst_78 : f32 to vector<64x256xf32>
    %116 = arith.select %113, %115, %114 : vector<64x256xi1>, vector<64x256xf32>
    %c255_i32_79 = arith.constant 255 : i32
    %117 = vector.broadcast %c255_i32_79 : i32 to vector<64x256xi32>
    %118 = arith.cmpi eq, %111, %117 : vector<64x256xi32>
    %c255_i32_80 = arith.constant 255 : i32
    %119 = tpu.dynamic_rotate %104 by %c255_i32_80 dim 1 : vector<64x256xf32>, i32 -> vector<64x256xf32>
    %cst_81 = arith.constant 0.000000e+00 : f32
    %120 = vector.broadcast %cst_81 : f32 to vector<64x256xf32>
    %121 = arith.select %118, %120, %119 : vector<64x256xi1>, vector<64x256xf32>
    %cst_82 = arith.constant dense<0.000000e+00> : vector<64x256xf32>
    %122 = tpu.matmul %106, %116, %cst_82 {dimension_numbers = #tpu.dot_dimension_numbers<[1], [0], [0], [1], [0, 0, 1, 1], [], []>} : vector<64x64xf32>, vector<64x256xf32>, vector<64x256xf32> -> vector<64x256xf32>
    %cst_83 = arith.constant dense<0.000000e+00> : vector<64x256xf32>
    %123 = tpu.matmul %108, %104, %cst_83 {dimension_numbers = #tpu.dot_dimension_numbers<[1], [0], [0], [1], [0, 0, 1, 1], [], []>} : vector<64x64xf32>, vector<64x256xf32>, vector<64x256xf32> -> vector<64x256xf32>
    %124 = arith.addf %122, %123 : vector<64x256xf32>
    %cst_84 = arith.constant dense<0.000000e+00> : vector<64x256xf32>
    %125 = tpu.matmul %110, %121, %cst_84 {dimension_numbers = #tpu.dot_dimension_numbers<[1], [0], [0], [1], [0, 0, 1, 1], [], []>} : vector<64x64xf32>, vector<64x256xf32>, vector<64x256xf32> -> vector<64x256xf32>
    %126 = arith.addf %124, %125 : vector<64x256xf32>
    %c0_85 = arith.constant 0 : index
    %c0_86 = arith.constant 0 : index
    %127 = vector.load %arg14[%c0_85, %c0_86] : memref<64x1xf32, #tpu.memory_space<vmem>>, vector<64x1xf32>
    %128 = vector.broadcast %127 : vector<64x1xf32> to vector<64x256xf32>
    %129 = arith.mulf %126, %128 : vector<64x256xf32>
    %c0_87 = arith.constant 0 : index
    %c0_88 = arith.constant 0 : index
    %130 = vector.load %arg15[%c0_87, %c0_88] : memref<64x1xf32, #tpu.memory_space<vmem>>, vector<64x1xf32>
    %131 = vector.broadcast %130 : vector<64x1xf32> to vector<64x256xf32>
    %132 = arith.addf %129, %131 : vector<64x256xf32>
    %cst_89 = arith.constant 0.000000e+00 : f32
    %133 = vector.broadcast %cst_89 : f32 to vector<64x256xf32>
    %134 = arith.maximumf %132, %133 : vector<64x256xf32>
    %c0_90 = arith.constant 0 : index
    %c0_91 = arith.constant 0 : index
    %c0_92 = arith.constant 0 : index
    %135 = vector.load %arg16[%c0_90, %c0_91, %c0_92] : memref<2x64x256xf32, #tpu.memory_space<vmem>>, vector<1x64x256xf32>
    %136 = vector.shape_cast %135 : vector<1x64x256xf32> to vector<64x256xf32>
    %137 = vector.shape_cast %134 : vector<64x256xf32> to vector<1x64x256xf32>
    tpu.vector_store %arg16[%c0_90, %c0_91, %c0_92], %137 {strides = array<i32>} : memref<2x64x256xf32, #tpu.memory_space<vmem>>, vector<1x64x256xf32>,
    %138 = vector.extract_strided_slice %7 {offsets = [1, 0], sizes = [1, 256], strides = [1, 1]} : vector<2x256xf32> to vector<1x256xf32>
    %c0_93 = arith.constant 0 : index
    %c0_94 = arith.constant 0 : index
    %c0_95 = arith.constant 0 : index
    %139 = vector.load %arg4[%c0_93, %c0_94, %c0_95] : memref<3x16x1xf32, #tpu.memory_space<vmem>>, vector<1x16x1xf32>
    %140 = vector.shape_cast %139 : vector<1x16x1xf32> to vector<16x1xf32>
    %c1_96 = arith.constant 1 : index
    %c0_97 = arith.constant 0 : index
    %c0_98 = arith.constant 0 : index
    %141 = vector.load %arg4[%c1_96, %c0_97, %c0_98] : memref<3x16x1xf32, #tpu.memory_space<vmem>>, vector<1x16x1xf32>
    %142 = vector.shape_cast %141 : vector<1x16x1xf32> to vector<16x1xf32>
    %c2_99 = arith.constant 2 : index
    %c0_100 = arith.constant 0 : index
    %c0_101 = arith.constant 0 : index
    %143 = vector.load %arg4[%c2_99, %c0_100, %c0_101] : memref<3x16x1xf32, #tpu.memory_space<vmem>>, vector<1x16x1xf32>
    %144 = vector.shape_cast %143 : vector<1x16x1xf32> to vector<16x1xf32>
    %145 = tpu.iota {dimensions = array<i32: 1>} : vector<1x256xi32>
    %c0_i32_102 = arith.constant 0 : i32
    %146 = vector.broadcast %c0_i32_102 : i32 to vector<1x256xi32>
    %147 = arith.cmpi eq, %145, %146 : vector<1x256xi32>
    %c1_i32_103 = arith.constant 1 : i32
    %148 = tpu.dynamic_rotate %138 by %c1_i32_103 dim 1 : vector<1x256xf32>, i32 -> vector<1x256xf32>
    %cst_104 = arith.constant 0.000000e+00 : f32
    %149 = vector.broadcast %cst_104 : f32 to vector<1x256xf32>
    %150 = arith.select %147, %149, %148 : vector<1x256xi1>, vector<1x256xf32>
    %c255_i32_105 = arith.constant 255 : i32
    %151 = vector.broadcast %c255_i32_105 : i32 to vector<1x256xi32>
    %152 = arith.cmpi eq, %145, %151 : vector<1x256xi32>
    %c255_i32_106 = arith.constant 255 : i32
    %153 = tpu.dynamic_rotate %138 by %c255_i32_106 dim 1 : vector<1x256xf32>, i32 -> vector<1x256xf32>
    %cst_107 = arith.constant 0.000000e+00 : f32
    %154 = vector.broadcast %cst_107 : f32 to vector<1x256xf32>
    %155 = arith.select %152, %154, %153 : vector<1x256xi1>, vector<1x256xf32>
    %156 = vector.broadcast %140 : vector<16x1xf32> to vector<16x256xf32>
    %157 = vector.broadcast %150 : vector<1x256xf32> to vector<16x256xf32>
    %158 = arith.mulf %156, %157 : vector<16x256xf32>
    %159 = vector.broadcast %142 : vector<16x1xf32> to vector<16x256xf32>
    %160 = vector.broadcast %138 : vector<1x256xf32> to vector<16x256xf32>
    %161 = arith.mulf %159, %160 : vector<16x256xf32>
    %162 = arith.addf %158, %161 : vector<16x256xf32>
    %163 = vector.broadcast %144 : vector<16x1xf32> to vector<16x256xf32>
    %164 = vector.broadcast %155 : vector<1x256xf32> to vector<16x256xf32>
    %165 = arith.mulf %163, %164 : vector<16x256xf32>
    %166 = arith.addf %162, %165 : vector<16x256xf32>
    %c0_108 = arith.constant 0 : index
    %c0_109 = arith.constant 0 : index
    %167 = vector.load %arg5[%c0_108, %c0_109] : memref<16x1xf32, #tpu.memory_space<vmem>>, vector<16x1xf32>
    %168 = vector.broadcast %167 : vector<16x1xf32> to vector<16x256xf32>
    %169 = arith.mulf %166, %168 : vector<16x256xf32>
    %c0_110 = arith.constant 0 : index
    %c0_111 = arith.constant 0 : index
    %170 = vector.load %arg6[%c0_110, %c0_111] : memref<16x1xf32, #tpu.memory_space<vmem>>, vector<16x1xf32>
    %171 = vector.broadcast %170 : vector<16x1xf32> to vector<16x256xf32>
    %172 = arith.addf %169, %171 : vector<16x256xf32>
    %cst_112 = arith.constant 0.000000e+00 : f32
    %173 = vector.broadcast %cst_112 : f32 to vector<16x256xf32>
    %174 = arith.maximumf %172, %173 : vector<16x256xf32>
    %c0_113 = arith.constant 0 : index
    %c0_114 = arith.constant 0 : index
    %c0_115 = arith.constant 0 : index
    %175 = vector.load %arg7[%c0_113, %c0_114, %c0_115] : memref<3x16x16xf32, #tpu.memory_space<vmem>>, vector<1x16x16xf32>
    %176 = vector.shape_cast %175 : vector<1x16x16xf32> to vector<16x16xf32>
    %c1_116 = arith.constant 1 : index
    %c0_117 = arith.constant 0 : index
    %c0_118 = arith.constant 0 : index
    %177 = vector.load %arg7[%c1_116, %c0_117, %c0_118] : memref<3x16x16xf32, #tpu.memory_space<vmem>>, vector<1x16x16xf32>
    %178 = vector.shape_cast %177 : vector<1x16x16xf32> to vector<16x16xf32>
    %c2_119 = arith.constant 2 : index
    %c0_120 = arith.constant 0 : index
    %c0_121 = arith.constant 0 : index
    %179 = vector.load %arg7[%c2_119, %c0_120, %c0_121] : memref<3x16x16xf32, #tpu.memory_space<vmem>>, vector<1x16x16xf32>
    %180 = vector.shape_cast %179 : vector<1x16x16xf32> to vector<16x16xf32>
    %181 = tpu.iota {dimensions = array<i32: 1>} : vector<16x256xi32>
    %c0_i32_122 = arith.constant 0 : i32
    %182 = vector.broadcast %c0_i32_122 : i32 to vector<16x256xi32>
    %183 = arith.cmpi eq, %181, %182 : vector<16x256xi32>
    %c1_i32_123 = arith.constant 1 : i32
    %184 = tpu.dynamic_rotate %174 by %c1_i32_123 dim 1 : vector<16x256xf32>, i32 -> vector<16x256xf32>
    %cst_124 = arith.constant 0.000000e+00 : f32
    %185 = vector.broadcast %cst_124 : f32 to vector<16x256xf32>
    %186 = arith.select %183, %185, %184 : vector<16x256xi1>, vector<16x256xf32>
    %c255_i32_125 = arith.constant 255 : i32
    %187 = vector.broadcast %c255_i32_125 : i32 to vector<16x256xi32>
    %188 = arith.cmpi eq, %181, %187 : vector<16x256xi32>
    %c255_i32_126 = arith.constant 255 : i32
    %189 = tpu.dynamic_rotate %174 by %c255_i32_126 dim 1 : vector<16x256xf32>, i32 -> vector<16x256xf32>
    %cst_127 = arith.constant 0.000000e+00 : f32
    %190 = vector.broadcast %cst_127 : f32 to vector<16x256xf32>
    %191 = arith.select %188, %190, %189 : vector<16x256xi1>, vector<16x256xf32>
    %cst_128 = arith.constant dense<0.000000e+00> : vector<16x256xf32>
    %192 = tpu.matmul %176, %186, %cst_128 {dimension_numbers = #tpu.dot_dimension_numbers<[1], [0], [0], [1], [0, 0, 1, 1], [], []>} : vector<16x16xf32>, vector<16x256xf32>, vector<16x256xf32> -> vector<16x256xf32>
    %cst_129 = arith.constant dense<0.000000e+00> : vector<16x256xf32>
    %193 = tpu.matmul %178, %174, %cst_129 {dimension_numbers = #tpu.dot_dimension_numbers<[1], [0], [0], [1], [0, 0, 1, 1], [], []>} : vector<16x16xf32>, vector<16x256xf32>, vector<16x256xf32> -> vector<16x256xf32>
    %194 = arith.addf %192, %193 : vector<16x256xf32>
    %cst_130 = arith.constant dense<0.000000e+00> : vector<16x256xf32>
    %195 = tpu.matmul %180, %191, %cst_130 {dimension_numbers = #tpu.dot_dimension_numbers<[1], [0], [0], [1], [0, 0, 1, 1], [], []>} : vector<16x16xf32>, vector<16x256xf32>, vector<16x256xf32> -> vector<16x256xf32>
    %196 = arith.addf %194, %195 : vector<16x256xf32>
    %c0_131 = arith.constant 0 : index
    %c0_132 = arith.constant 0 : index
    %197 = vector.load %arg8[%c0_131, %c0_132] : memref<16x1xf32, #tpu.memory_space<vmem>>, vector<16x1xf32>
    %198 = vector.broadcast %197 : vector<16x1xf32> to vector<16x256xf32>
    %199 = arith.mulf %196, %198 : vector<16x256xf32>
    %c0_133 = arith.constant 0 : index
    %c0_134 = arith.constant 0 : index
    %200 = vector.load %arg9[%c0_133, %c0_134] : memref<16x1xf32, #tpu.memory_space<vmem>>, vector<16x1xf32>
    %201 = vector.broadcast %200 : vector<16x1xf32> to vector<16x256xf32>
    %202 = arith.addf %199, %201 : vector<16x256xf32>
    %cst_135 = arith.constant 0.000000e+00 : f32
    %203 = vector.broadcast %cst_135 : f32 to vector<16x256xf32>
    %204 = arith.maximumf %202, %203 : vector<16x256xf32>
    %c0_136 = arith.constant 0 : index
    %c0_137 = arith.constant 0 : index
    %c0_138 = arith.constant 0 : index
    %205 = vector.load %arg10[%c0_136, %c0_137, %c0_138] : memref<3x64x16xf32, #tpu.memory_space<vmem>>, vector<1x64x16xf32>
    %206 = vector.shape_cast %205 : vector<1x64x16xf32> to vector<64x16xf32>
    %c1_139 = arith.constant 1 : index
    %c0_140 = arith.constant 0 : index
    %c0_141 = arith.constant 0 : index
    %207 = vector.load %arg10[%c1_139, %c0_140, %c0_141] : memref<3x64x16xf32, #tpu.memory_space<vmem>>, vector<1x64x16xf32>
    %208 = vector.shape_cast %207 : vector<1x64x16xf32> to vector<64x16xf32>
    %c2_142 = arith.constant 2 : index
    %c0_143 = arith.constant 0 : index
    %c0_144 = arith.constant 0 : index
    %209 = vector.load %arg10[%c2_142, %c0_143, %c0_144] : memref<3x64x16xf32, #tpu.memory_space<vmem>>, vector<1x64x16xf32>
    %210 = vector.shape_cast %209 : vector<1x64x16xf32> to vector<64x16xf32>
    %211 = tpu.iota {dimensions = array<i32: 1>} : vector<16x256xi32>
    %c0_i32_145 = arith.constant 0 : i32
    %212 = vector.broadcast %c0_i32_145 : i32 to vector<16x256xi32>
    %213 = arith.cmpi eq, %211, %212 : vector<16x256xi32>
    %c1_i32_146 = arith.constant 1 : i32
    %214 = tpu.dynamic_rotate %204 by %c1_i32_146 dim 1 : vector<16x256xf32>, i32 -> vector<16x256xf32>
    %cst_147 = arith.constant 0.000000e+00 : f32
    %215 = vector.broadcast %cst_147 : f32 to vector<16x256xf32>
    %216 = arith.select %213, %215, %214 : vector<16x256xi1>, vector<16x256xf32>
    %c255_i32_148 = arith.constant 255 : i32
    %217 = vector.broadcast %c255_i32_148 : i32 to vector<16x256xi32>
    %218 = arith.cmpi eq, %211, %217 : vector<16x256xi32>
    %c255_i32_149 = arith.constant 255 : i32
    %219 = tpu.dynamic_rotate %204 by %c255_i32_149 dim 1 : vector<16x256xf32>, i32 -> vector<16x256xf32>
    %cst_150 = arith.constant 0.000000e+00 : f32
    %220 = vector.broadcast %cst_150 : f32 to vector<16x256xf32>
    %221 = arith.select %218, %220, %219 : vector<16x256xi1>, vector<16x256xf32>
    %cst_151 = arith.constant dense<0.000000e+00> : vector<64x256xf32>
    %222 = tpu.matmul %206, %216, %cst_151 {dimension_numbers = #tpu.dot_dimension_numbers<[1], [0], [0], [1], [0, 0, 1, 1], [], []>} : vector<64x16xf32>, vector<16x256xf32>, vector<64x256xf32> -> vector<64x256xf32>
    %cst_152 = arith.constant dense<0.000000e+00> : vector<64x256xf32>
    %223 = tpu.matmul %208, %204, %cst_152 {dimension_numbers = #tpu.dot_dimension_numbers<[1], [0], [0], [1], [0, 0, 1, 1], [], []>} : vector<64x16xf32>, vector<16x256xf32>, vector<64x256xf32> -> vector<64x256xf32>
    %224 = arith.addf %222, %223 : vector<64x256xf32>
    %cst_153 = arith.constant dense<0.000000e+00> : vector<64x256xf32>
    %225 = tpu.matmul %210, %221, %cst_153 {dimension_numbers = #tpu.dot_dimension_numbers<[1], [0], [0], [1], [0, 0, 1, 1], [], []>} : vector<64x16xf32>, vector<16x256xf32>, vector<64x256xf32> -> vector<64x256xf32>
    %226 = arith.addf %224, %225 : vector<64x256xf32>
    %c0_154 = arith.constant 0 : index
    %c0_155 = arith.constant 0 : index
    %227 = vector.load %arg11[%c0_154, %c0_155] : memref<64x1xf32, #tpu.memory_space<vmem>>, vector<64x1xf32>
    %228 = vector.broadcast %227 : vector<64x1xf32> to vector<64x256xf32>
    %229 = arith.mulf %226, %228 : vector<64x256xf32>
    %c0_156 = arith.constant 0 : index
    %c0_157 = arith.constant 0 : index
    %230 = vector.load %arg12[%c0_156, %c0_157] : memref<64x1xf32, #tpu.memory_space<vmem>>, vector<64x1xf32>
    %231 = vector.broadcast %230 : vector<64x1xf32> to vector<64x256xf32>
    %232 = arith.addf %229, %231 : vector<64x256xf32>
    %cst_158 = arith.constant 0.000000e+00 : f32
    %233 = vector.broadcast %cst_158 : f32 to vector<64x256xf32>
    %234 = arith.maximumf %232, %233 : vector<64x256xf32>
    %c0_159 = arith.constant 0 : index
    %c0_160 = arith.constant 0 : index
    %c0_161 = arith.constant 0 : index
    %235 = vector.load %arg13[%c0_159, %c0_160, %c0_161] : memref<3x64x64xf32, #tpu.memory_space<vmem>>, vector<1x64x64xf32>
    %236 = vector.shape_cast %235 : vector<1x64x64xf32> to vector<64x64xf32>
    %c1_162 = arith.constant 1 : index
    %c0_163 = arith.constant 0 : index
    %c0_164 = arith.constant 0 : index
    %237 = vector.load %arg13[%c1_162, %c0_163, %c0_164] : memref<3x64x64xf32, #tpu.memory_space<vmem>>, vector<1x64x64xf32>
    %238 = vector.shape_cast %237 : vector<1x64x64xf32> to vector<64x64xf32>
    %c2_165 = arith.constant 2 : index
    %c0_166 = arith.constant 0 : index
    %c0_167 = arith.constant 0 : index
    %239 = vector.load %arg13[%c2_165, %c0_166, %c0_167] : memref<3x64x64xf32, #tpu.memory_space<vmem>>, vector<1x64x64xf32>
    %240 = vector.shape_cast %239 : vector<1x64x64xf32> to vector<64x64xf32>
    %241 = tpu.iota {dimensions = array<i32: 1>} : vector<64x256xi32>
    %c0_i32_168 = arith.constant 0 : i32
    %242 = vector.broadcast %c0_i32_168 : i32 to vector<64x256xi32>
    %243 = arith.cmpi eq, %241, %242 : vector<64x256xi32>
    %c1_i32_169 = arith.constant 1 : i32
    %244 = tpu.dynamic_rotate %234 by %c1_i32_169 dim 1 : vector<64x256xf32>, i32 -> vector<64x256xf32>
    %cst_170 = arith.constant 0.000000e+00 : f32
    %245 = vector.broadcast %cst_170 : f32 to vector<64x256xf32>
    %246 = arith.select %243, %245, %244 : vector<64x256xi1>, vector<64x256xf32>
    %c255_i32_171 = arith.constant 255 : i32
    %247 = vector.broadcast %c255_i32_171 : i32 to vector<64x256xi32>
    %248 = arith.cmpi eq, %241, %247 : vector<64x256xi32>
    %c255_i32_172 = arith.constant 255 : i32
    %249 = tpu.dynamic_rotate %234 by %c255_i32_172 dim 1 : vector<64x256xf32>, i32 -> vector<64x256xf32>
    %cst_173 = arith.constant 0.000000e+00 : f32
    %250 = vector.broadcast %cst_173 : f32 to vector<64x256xf32>
    %251 = arith.select %248, %250, %249 : vector<64x256xi1>, vector<64x256xf32>
    %cst_174 = arith.constant dense<0.000000e+00> : vector<64x256xf32>
    %252 = tpu.matmul %236, %246, %cst_174 {dimension_numbers = #tpu.dot_dimension_numbers<[1], [0], [0], [1], [0, 0, 1, 1], [], []>} : vector<64x64xf32>, vector<64x256xf32>, vector<64x256xf32> -> vector<64x256xf32>
    %cst_175 = arith.constant dense<0.000000e+00> : vector<64x256xf32>
    %253 = tpu.matmul %238, %234, %cst_175 {dimension_numbers = #tpu.dot_dimension_numbers<[1], [0], [0], [1], [0, 0, 1, 1], [], []>} : vector<64x64xf32>, vector<64x256xf32>, vector<64x256xf32> -> vector<64x256xf32>
    %254 = arith.addf %252, %253 : vector<64x256xf32>
    %cst_176 = arith.constant dense<0.000000e+00> : vector<64x256xf32>
    %255 = tpu.matmul %240, %251, %cst_176 {dimension_numbers = #tpu.dot_dimension_numbers<[1], [0], [0], [1], [0, 0, 1, 1], [], []>} : vector<64x64xf32>, vector<64x256xf32>, vector<64x256xf32> -> vector<64x256xf32>
    %256 = arith.addf %254, %255 : vector<64x256xf32>
    %c0_177 = arith.constant 0 : index
    %c0_178 = arith.constant 0 : index
    %257 = vector.load %arg14[%c0_177, %c0_178] : memref<64x1xf32, #tpu.memory_space<vmem>>, vector<64x1xf32>
    %258 = vector.broadcast %257 : vector<64x1xf32> to vector<64x256xf32>
    %259 = arith.mulf %256, %258 : vector<64x256xf32>
    %c0_179 = arith.constant 0 : index
    %c0_180 = arith.constant 0 : index
    %260 = vector.load %arg15[%c0_179, %c0_180] : memref<64x1xf32, #tpu.memory_space<vmem>>, vector<64x1xf32>
    %261 = vector.broadcast %260 : vector<64x1xf32> to vector<64x256xf32>
    %262 = arith.addf %259, %261 : vector<64x256xf32>
    %cst_181 = arith.constant 0.000000e+00 : f32
    %263 = vector.broadcast %cst_181 : f32 to vector<64x256xf32>
    %264 = arith.maximumf %262, %263 : vector<64x256xf32>
    %c1_182 = arith.constant 1 : index
    %c0_183 = arith.constant 0 : index
    %c0_184 = arith.constant 0 : index
    %265 = vector.load %arg16[%c1_182, %c0_183, %c0_184] : memref<2x64x256xf32, #tpu.memory_space<vmem>>, vector<1x64x256xf32>
    %266 = vector.shape_cast %265 : vector<1x64x256xf32> to vector<64x256xf32>
    %267 = vector.shape_cast %264 : vector<64x256xf32> to vector<1x64x256xf32>
    tpu.vector_store %arg16[%c1_182, %c0_183, %c0_184], %267 {strides = array<i32>} : memref<2x64x256xf32, #tpu.memory_space<vmem>>, vector<1x64x256xf32>,
    return
  }
  func.func @transform_0(%arg0: i32) -> (i32, i32) {
    %c0_i32 = arith.constant 0 : i32
    %c0_i32_0 = arith.constant 0 : i32
    %c0_i32_1 = arith.constant 0 : i32
    return %c0_i32, %c0_i32_0 : i32, i32
  }
  func.func @transform_1(%arg0: i32) -> (i32, i32) {
    %c0_i32 = arith.constant 0 : i32
    %c0_i32_0 = arith.constant 0 : i32
    %c0_i32_1 = arith.constant 0 : i32
    return %c0_i32, %c0_i32_0 : i32, i32
  }
  func.func @transform_2(%arg0: i32) -> (i32, i32) {
    %c0_i32 = arith.constant 0 : i32
    %c0_i32_0 = arith.constant 0 : i32
    %c0_i32_1 = arith.constant 0 : i32
    return %c0_i32, %c0_i32_0 : i32, i32
  }
  func.func @transform_3(%arg0: i32) -> (i32, i32, i32) {
    %c0_i32 = arith.constant 0 : i32
    %c0_i32_0 = arith.constant 0 : i32
    %c0_i32_1 = arith.constant 0 : i32
    %c0_i32_2 = arith.constant 0 : i32
    return %c0_i32, %c0_i32_0, %c0_i32_1 : i32, i32, i32
  }
  func.func @transform_4(%arg0: i32) -> (i32, i32) {
    %c0_i32 = arith.constant 0 : i32
    %c0_i32_0 = arith.constant 0 : i32
    %c0_i32_1 = arith.constant 0 : i32
    return %c0_i32, %c0_i32_0 : i32, i32
  }
  func.func @transform_5(%arg0: i32) -> (i32, i32) {
    %c0_i32 = arith.constant 0 : i32
    %c0_i32_0 = arith.constant 0 : i32
    %c0_i32_1 = arith.constant 0 : i32
    return %c0_i32, %c0_i32_0 : i32, i32
  }
  func.func @transform_6(%arg0: i32) -> (i32, i32, i32) {
    %c0_i32 = arith.constant 0 : i32
    %c0_i32_0 = arith.constant 0 : i32
    %c0_i32_1 = arith.constant 0 : i32
    %c0_i32_2 = arith.constant 0 : i32
    return %c0_i32, %c0_i32_0, %c0_i32_1 : i32, i32, i32
  }
  func.func @transform_7(%arg0: i32) -> (i32, i32) {
    %c0_i32 = arith.constant 0 : i32
    %c0_i32_0 = arith.constant 0 : i32
    %c0_i32_1 = arith.constant 0 : i32
    return %c0_i32, %c0_i32_0 : i32, i32
  }
  func.func @transform_8(%arg0: i32) -> (i32, i32) {
    %c0_i32 = arith.constant 0 : i32
    %c0_i32_0 = arith.constant 0 : i32
    %c0_i32_1 = arith.constant 0 : i32
    return %c0_i32, %c0_i32_0 : i32, i32
  }
  func.func @transform_9(%arg0: i32) -> (i32, i32, i32) {
    %c0_i32 = arith.constant 0 : i32
    %c0_i32_0 = arith.constant 0 : i32
    %c0_i32_1 = arith.constant 0 : i32
    %c0_i32_2 = arith.constant 0 : i32
    return %c0_i32, %c0_i32_0, %c0_i32_1 : i32, i32, i32
  }
  func.func @transform_10(%arg0: i32) -> (i32, i32) {
    %c0_i32 = arith.constant 0 : i32
    %c0_i32_0 = arith.constant 0 : i32
    %c0_i32_1 = arith.constant 0 : i32
    return %c0_i32, %c0_i32_0 : i32, i32
  }
  func.func @transform_11(%arg0: i32) -> (i32, i32) {
    %c0_i32 = arith.constant 0 : i32
    %c0_i32_0 = arith.constant 0 : i32
    %c0_i32_1 = arith.constant 0 : i32
    return %c0_i32, %c0_i32_0 : i32, i32
  }
  func.func @transform_12(%arg0: i32) -> (i32, i32, i32) {
    %c0_i32 = arith.constant 0 : i32
    %c0_i32_0 = arith.constant 0 : i32
    %c0_i32_1 = arith.constant 0 : i32
    %c0_i32_2 = arith.constant 0 : i32
    return %c0_i32, %c0_i32_0, %c0_i32_1 : i32, i32, i32
  }
  func.func @transform_13(%arg0: i32) -> (i32, i32) {
    %c0_i32 = arith.constant 0 : i32
    %c0_i32_0 = arith.constant 0 : i32
    %c0_i32_1 = arith.constant 0 : i32
    return %c0_i32, %c0_i32_0 : i32, i32
  }
  func.func @transform_14(%arg0: i32) -> (i32, i32) {
    %c0_i32 = arith.constant 0 : i32
    %c0_i32_0 = arith.constant 0 : i32
    %c0_i32_1 = arith.constant 0 : i32
    return %c0_i32, %c0_i32_0 : i32, i32
  }
  func.func @transform_15(%arg0: i32) -> (i32, i32, i32) {
    %c0_i32 = arith.constant 0 : i32
    %c0_i32_0 = arith.constant 0 : i32
    %c0_i32_1 = arith.constant 0 : i32
    %c0_i32_2 = arith.constant 0 : i32
    return %c0_i32, %c0_i32_0, %c0_i32_1 : i32, i32, i32
  }
}

module attributes {stable_mosaic.version = 11 : i64} {
  func.func @_fusion_kernel(%arg0: i32, %arg1: i32, %arg2: memref<2x4096xf32, #tpu.memory_space<vmem>>, %arg3: memref<4096x256xf32, #tpu.memory_space<vmem>>, %arg4: memref<2x64xf32, #tpu.memory_space<vmem>>, %arg5: memref<64x256xf32, #tpu.memory_space<vmem>>, %arg6: memref<1x256xf32, #tpu.memory_space<vmem>>, %arg7: memref<2x256xf32, #tpu.memory_space<vmem>>) attributes {dimension_semantics = [#tpu.dimension_semantics<parallel>, #tpu.dimension_semantics<arbitrary>], iteration_bounds = array<i64: 2, 4>, scalar_prefetch = 0 : i64, scratch_operands = 0 : i64, tpu.core_type = #tpu.core_type<tc>, window_params = [{transform_indices = @transform_0, window_bounds = array<i64: 2, 4096>}, {transform_indices = @transform_1, window_bounds = array<i64: 4096, 256>}, {pipeline_mode = #tpu.pipeline_mode<synchronous>, transform_indices = @transform_2, window_bounds = array<i64: 2, 64>}, {transform_indices = @transform_3, window_bounds = array<i64: 64, 256>}, {transform_indices = @transform_4, window_bounds = array<i64: 1, 256>}, {transform_indices = @transform_5, window_bounds = array<i64: 2, 256>}]} {
    %c0_i32 = arith.constant 0 : i32
    %0 = arith.cmpi eq, %arg1, %c0_i32 : i32
    %1 = arith.extui %0 : i1 to i32
    %c0_i32_0 = arith.constant 0 : i32
    %2 = arith.cmpi ne, %1, %c0_i32_0 : i32
    scf.if %2 {
      %cst_9 = arith.constant 0.000000e+00 : f32
      %12 = vector.broadcast %cst_9 : f32 to vector<2x256xf32>
      %c0_10 = arith.constant 0 : index
      %c0_11 = arith.constant 0 : index
      %13 = vector.load %arg7[%c0_10, %c0_11] : memref<2x256xf32, #tpu.memory_space<vmem>>, vector<2x256xf32>
      tpu.vector_store %arg7[%c0_10, %c0_11], %12 {strides = array<i32>} : memref<2x256xf32, #tpu.memory_space<vmem>>, vector<2x256xf32>,
    } else {
    }
    %c0 = arith.constant 0 : index
    %c0_1 = arith.constant 0 : index
    %3 = vector.load %arg7[%c0, %c0_1] : memref<2x256xf32, #tpu.memory_space<vmem>>, vector<2x256xf32>
    %c0_2 = arith.constant 0 : index
    %c0_3 = arith.constant 0 : index
    %4 = vector.load %arg2[%c0_2, %c0_3] : memref<2x4096xf32, #tpu.memory_space<vmem>>, vector<2x4096xf32>
    %c0_4 = arith.constant 0 : index
    %c0_5 = arith.constant 0 : index
    %5 = vector.load %arg3[%c0_4, %c0_5] : memref<4096x256xf32, #tpu.memory_space<vmem>>, vector<4096x256xf32>
    %cst = arith.constant dense<0.000000e+00> : vector<2x256xf32>
    %6 = tpu.matmul %4, %5, %cst {dimension_numbers = #tpu.dot_dimension_numbers<[1], [0], [0], [1], [0, 0, 1, 1], [], []>} : vector<2x4096xf32>, vector<4096x256xf32>, vector<2x256xf32> -> vector<2x256xf32>
    %7 = arith.addf %3, %6 : vector<2x256xf32>
    %c0_6 = arith.constant 0 : index
    %c0_7 = arith.constant 0 : index
    %8 = vector.load %arg7[%c0_6, %c0_7] : memref<2x256xf32, #tpu.memory_space<vmem>>, vector<2x256xf32>
    tpu.vector_store %arg7[%c0_6, %c0_7], %7 {strides = array<i32>} : memref<2x256xf32, #tpu.memory_space<vmem>>, vector<2x256xf32>,
    %c3_i32 = arith.constant 3 : i32
    %9 = arith.cmpi eq, %arg1, %c3_i32 : i32
    %10 = arith.extui %9 : i1 to i32
    %c0_i32_8 = arith.constant 0 : i32
    %11 = arith.cmpi ne, %10, %c0_i32_8 : i32
    scf.if %11 {
      %c0_9 = arith.constant 0 : index
      %c0_10 = arith.constant 0 : index
      %12 = vector.load %arg7[%c0_9, %c0_10] : memref<2x256xf32, #tpu.memory_space<vmem>>, vector<2x256xf32>
      %c0_11 = arith.constant 0 : index
      %c0_12 = arith.constant 0 : index
      %13 = vector.load %arg4[%c0_11, %c0_12] : memref<2x64xf32, #tpu.memory_space<vmem>>, vector<2x64xf32>
      %c0_13 = arith.constant 0 : index
      %c0_14 = arith.constant 0 : index
      %14 = vector.load %arg5[%c0_13, %c0_14] : memref<64x256xf32, #tpu.memory_space<vmem>>, vector<64x256xf32>
      %cst_15 = arith.constant dense<0.000000e+00> : vector<2x256xf32>
      %15 = tpu.matmul %13, %14, %cst_15 {dimension_numbers = #tpu.dot_dimension_numbers<[1], [0], [0], [1], [0, 0, 1, 1], [], []>} : vector<2x64xf32>, vector<64x256xf32>, vector<2x256xf32> -> vector<2x256xf32>
      %16 = arith.addf %12, %15 : vector<2x256xf32>
      %c0_16 = arith.constant 0 : index
      %c0_17 = arith.constant 0 : index
      %17 = vector.load %arg6[%c0_16, %c0_17] : memref<1x256xf32, #tpu.memory_space<vmem>>, vector<1x256xf32>
      %18 = vector.broadcast %17 : vector<1x256xf32> to vector<2x256xf32>
      %19 = arith.addf %16, %18 : vector<2x256xf32>
      %cst_18 = arith.constant 0.000000e+00 : f32
      %20 = vector.broadcast %cst_18 : f32 to vector<2x256xf32>
      %21 = arith.maximumf %19, %20 : vector<2x256xf32>
      %c0_19 = arith.constant 0 : index
      %c0_20 = arith.constant 0 : index
      %22 = vector.load %arg7[%c0_19, %c0_20] : memref<2x256xf32, #tpu.memory_space<vmem>>, vector<2x256xf32>
      tpu.vector_store %arg7[%c0_19, %c0_20], %21 {strides = array<i32>} : memref<2x256xf32, #tpu.memory_space<vmem>>, vector<2x256xf32>,
    } else {
    }
    return
  }
  func.func @transform_0(%arg0: i32, %arg1: i32) -> (i32, i32) {
    %c0_i32 = arith.constant 0 : i32
    %c0_i32_0 = arith.constant 0 : i32
    return %c0_i32, %arg1 : i32, i32
  }
  func.func @transform_1(%arg0: i32, %arg1: i32) -> (i32, i32) {
    %c0_i32 = arith.constant 0 : i32
    return %arg1, %arg0 : i32, i32
  }
  func.func @transform_2(%arg0: i32, %arg1: i32) -> (i32, i32) {
    %c0_i32 = arith.constant 0 : i32
    %c0_i32_0 = arith.constant 0 : i32
    %c0_i32_1 = arith.constant 0 : i32
    return %c0_i32, %c0_i32_0 : i32, i32
  }
  func.func @transform_3(%arg0: i32, %arg1: i32) -> (i32, i32) {
    %c0_i32 = arith.constant 0 : i32
    %c0_i32_0 = arith.constant 0 : i32
    return %c0_i32, %arg0 : i32, i32
  }
  func.func @transform_4(%arg0: i32, %arg1: i32) -> (i32, i32) {
    %c0_i32 = arith.constant 0 : i32
    %c0_i32_0 = arith.constant 0 : i32
    return %c0_i32, %arg0 : i32, i32
  }
  func.func @transform_5(%arg0: i32, %arg1: i32) -> (i32, i32) {
    %c0_i32 = arith.constant 0 : i32
    %c0_i32_0 = arith.constant 0 : i32
    return %c0_i32, %arg0 : i32, i32
  }
}

module attributes {stable_mosaic.version = 11 : i64} {
  func.func @_lstm_tail_kernel(%arg0: i32, %arg1: memref<2x512xf32, #tpu.memory_space<vmem>>, %arg2: memref<512x256xf32, #tpu.memory_space<vmem>>, %arg3: memref<1x256xf32, #tpu.memory_space<vmem>>, %arg4: memref<64x256xf32, #tpu.memory_space<vmem>>, %arg5: memref<64x256xf32, #tpu.memory_space<vmem>>, %arg6: memref<1x256xf32, #tpu.memory_space<vmem>>, %arg7: memref<64x1xf32, #tpu.memory_space<vmem>>, %arg8: memref<1x1xf32, #tpu.memory_space<vmem>>, %arg9: memref<2x1xf32, #tpu.memory_space<vmem>>) attributes {dimension_semantics = [#tpu.dimension_semantics<arbitrary>], iteration_bounds = array<i64: 1>, scalar_prefetch = 0 : i64, scratch_operands = 0 : i64, tpu.core_type = #tpu.core_type<tc>, window_params = [{pipeline_mode = #tpu.pipeline_mode<synchronous>, transform_indices = @transform_0, window_bounds = array<i64: 2, 512>}, {pipeline_mode = #tpu.pipeline_mode<synchronous>, transform_indices = @transform_1, window_bounds = array<i64: 512, 256>}, {pipeline_mode = #tpu.pipeline_mode<synchronous>, transform_indices = @transform_2, window_bounds = array<i64: 1, 256>}, {pipeline_mode = #tpu.pipeline_mode<synchronous>, transform_indices = @transform_3, window_bounds = array<i64: 64, 256>}, {pipeline_mode = #tpu.pipeline_mode<synchronous>, transform_indices = @transform_4, window_bounds = array<i64: 64, 256>}, {pipeline_mode = #tpu.pipeline_mode<synchronous>, transform_indices = @transform_5, window_bounds = array<i64: 1, 256>}, {pipeline_mode = #tpu.pipeline_mode<synchronous>, transform_indices = @transform_6, window_bounds = array<i64: 64, 1>}, {pipeline_mode = #tpu.pipeline_mode<synchronous>, transform_indices = @transform_7, window_bounds = array<i64: 1, 1>}, {pipeline_mode = #tpu.pipeline_mode<synchronous>, transform_indices = @transform_8, window_bounds = array<i64: 2, 1>}]} {
    %c0 = arith.constant 0 : index
    %c0_0 = arith.constant 0 : index
    %0 = vector.load %arg1[%c0, %c0_0] : memref<2x512xf32, #tpu.memory_space<vmem>>, vector<2x512xf32>
    %c0_1 = arith.constant 0 : index
    %c0_2 = arith.constant 0 : index
    %1 = vector.load %arg2[%c0_1, %c0_2] : memref<512x256xf32, #tpu.memory_space<vmem>>, vector<512x256xf32>
    %cst = arith.constant dense<0.000000e+00> : vector<2x256xf32>
    %2 = tpu.matmul %0, %1, %cst {dimension_numbers = #tpu.dot_dimension_numbers<[1], [0], [0], [1], [0, 0, 1, 1], [], []>} : vector<2x512xf32>, vector<512x256xf32>, vector<2x256xf32> -> vector<2x256xf32>
    %c0_3 = arith.constant 0 : index
    %c0_4 = arith.constant 0 : index
    %3 = vector.load %arg3[%c0_3, %c0_4] : memref<1x256xf32, #tpu.memory_space<vmem>>, vector<1x256xf32>
    %4 = vector.broadcast %3 : vector<1x256xf32> to vector<2x256xf32>
    %5 = arith.addf %2, %4 : vector<2x256xf32>
    %6 = vector.extract_strided_slice %5 {offsets = [0, 0], sizes = [2, 64], strides = [1, 1]} : vector<2x256xf32> to vector<2x64xf32>
    %7 = arith.negf %6 : vector<2x64xf32>
    %8 = math.exp %7 : vector<2x64xf32>
    %cst_5 = arith.constant 1.000000e+00 : f32
    %9 = vector.broadcast %cst_5 : f32 to vector<2x64xf32>
    %10 = arith.addf %9, %8 : vector<2x64xf32>
    %11 = arith.divf %9, %10 : vector<2x64xf32>
    %12 = vector.extract_strided_slice %5 {offsets = [0, 128], sizes = [2, 64], strides = [1, 1]} : vector<2x256xf32> to vector<2x64xf32>
    %13 = math.tanh %12 : vector<2x64xf32>
    %14 = vector.extract_strided_slice %5 {offsets = [0, 192], sizes = [2, 64], strides = [1, 1]} : vector<2x256xf32> to vector<2x64xf32>
    %15 = arith.negf %14 : vector<2x64xf32>
    %16 = math.exp %15 : vector<2x64xf32>
    %cst_6 = arith.constant 1.000000e+00 : f32
    %17 = vector.broadcast %cst_6 : f32 to vector<2x64xf32>
    %18 = arith.addf %17, %16 : vector<2x64xf32>
    %19 = arith.divf %17, %18 : vector<2x64xf32>
    %20 = arith.mulf %11, %13 : vector<2x64xf32>
    %21 = math.tanh %20 : vector<2x64xf32>
    %22 = arith.mulf %19, %21 : vector<2x64xf32>
    %c0_7 = arith.constant 0 : index
    %c0_8 = arith.constant 0 : index
    %23 = vector.load %arg4[%c0_7, %c0_8] : memref<64x256xf32, #tpu.memory_space<vmem>>, vector<64x256xf32>
    %cst_9 = arith.constant dense<0.000000e+00> : vector<2x256xf32>
    %24 = tpu.matmul %22, %23, %cst_9 {dimension_numbers = #tpu.dot_dimension_numbers<[1], [0], [0], [1], [0, 0, 1, 1], [], []>} : vector<2x64xf32>, vector<64x256xf32>, vector<2x256xf32> -> vector<2x256xf32>
    %c0_10 = arith.constant 0 : index
    %c0_11 = arith.constant 0 : index
    %25 = vector.load %arg5[%c0_10, %c0_11] : memref<64x256xf32, #tpu.memory_space<vmem>>, vector<64x256xf32>
    %cst_12 = arith.constant dense<0.000000e+00> : vector<2x256xf32>
    %26 = tpu.matmul %22, %25, %cst_12 {dimension_numbers = #tpu.dot_dimension_numbers<[1], [0], [0], [1], [0, 0, 1, 1], [], []>} : vector<2x64xf32>, vector<64x256xf32>, vector<2x256xf32> -> vector<2x256xf32>
    %27 = arith.addf %24, %26 : vector<2x256xf32>
    %c0_13 = arith.constant 0 : index
    %c0_14 = arith.constant 0 : index
    %28 = vector.load %arg6[%c0_13, %c0_14] : memref<1x256xf32, #tpu.memory_space<vmem>>, vector<1x256xf32>
    %29 = vector.broadcast %28 : vector<1x256xf32> to vector<2x256xf32>
    %30 = arith.addf %27, %29 : vector<2x256xf32>
    %31 = vector.extract_strided_slice %30 {offsets = [0, 0], sizes = [2, 64], strides = [1, 1]} : vector<2x256xf32> to vector<2x64xf32>
    %32 = arith.negf %31 : vector<2x64xf32>
    %33 = math.exp %32 : vector<2x64xf32>
    %cst_15 = arith.constant 1.000000e+00 : f32
    %34 = vector.broadcast %cst_15 : f32 to vector<2x64xf32>
    %35 = arith.addf %34, %33 : vector<2x64xf32>
    %36 = arith.divf %34, %35 : vector<2x64xf32>
    %37 = vector.extract_strided_slice %30 {offsets = [0, 64], sizes = [2, 64], strides = [1, 1]} : vector<2x256xf32> to vector<2x64xf32>
    %38 = arith.negf %37 : vector<2x64xf32>
    %39 = math.exp %38 : vector<2x64xf32>
    %cst_16 = arith.constant 1.000000e+00 : f32
    %40 = vector.broadcast %cst_16 : f32 to vector<2x64xf32>
    %41 = arith.addf %40, %39 : vector<2x64xf32>
    %42 = arith.divf %40, %41 : vector<2x64xf32>
    %43 = vector.extract_strided_slice %30 {offsets = [0, 128], sizes = [2, 64], strides = [1, 1]} : vector<2x256xf32> to vector<2x64xf32>
    %44 = math.tanh %43 : vector<2x64xf32>
    %45 = vector.extract_strided_slice %30 {offsets = [0, 192], sizes = [2, 64], strides = [1, 1]} : vector<2x256xf32> to vector<2x64xf32>
    %46 = arith.negf %45 : vector<2x64xf32>
    %47 = math.exp %46 : vector<2x64xf32>
    %cst_17 = arith.constant 1.000000e+00 : f32
    %48 = vector.broadcast %cst_17 : f32 to vector<2x64xf32>
    %49 = arith.addf %48, %47 : vector<2x64xf32>
    %50 = arith.divf %48, %49 : vector<2x64xf32>
    %51 = arith.mulf %42, %20 : vector<2x64xf32>
    %52 = arith.mulf %36, %44 : vector<2x64xf32>
    %53 = arith.addf %51, %52 : vector<2x64xf32>
    %54 = math.tanh %53 : vector<2x64xf32>
    %55 = arith.mulf %50, %54 : vector<2x64xf32>
    %c0_18 = arith.constant 0 : index
    %c0_19 = arith.constant 0 : index
    %56 = vector.load %arg7[%c0_18, %c0_19] : memref<64x1xf32, #tpu.memory_space<vmem>>, vector<64x1xf32>
    %cst_20 = arith.constant dense<0.000000e+00> : vector<2x1xf32>
    %57 = tpu.matmul %55, %56, %cst_20 {dimension_numbers = #tpu.dot_dimension_numbers<[1], [0], [0], [1], [0, 0, 1, 1], [], []>} : vector<2x64xf32>, vector<64x1xf32>, vector<2x1xf32> -> vector<2x1xf32>
    %c0_21 = arith.constant 0 : index
    %c0_22 = arith.constant 0 : index
    %58 = vector.load %arg8[%c0_21, %c0_22] : memref<1x1xf32, #tpu.memory_space<vmem>>, vector<1x1xf32>
    %59 = vector.broadcast %58 : vector<1x1xf32> to vector<2x1xf32>
    %60 = arith.addf %57, %59 : vector<2x1xf32>
    %c0_23 = arith.constant 0 : index
    %c0_24 = arith.constant 0 : index
    %61 = vector.load %arg9[%c0_23, %c0_24] : memref<2x1xf32, #tpu.memory_space<vmem>>, vector<2x1xf32>
    tpu.vector_store %arg9[%c0_23, %c0_24], %60 {strides = array<i32>} : memref<2x1xf32, #tpu.memory_space<vmem>>, vector<2x1xf32>,
    return
  }
  func.func @transform_0(%arg0: i32) -> (i32, i32) {
    %c0_i32 = arith.constant 0 : i32
    %c0_i32_0 = arith.constant 0 : i32
    %c0_i32_1 = arith.constant 0 : i32
    return %c0_i32, %c0_i32_0 : i32, i32
  }
  func.func @transform_1(%arg0: i32) -> (i32, i32) {
    %c0_i32 = arith.constant 0 : i32
    %c0_i32_0 = arith.constant 0 : i32
    %c0_i32_1 = arith.constant 0 : i32
    return %c0_i32, %c0_i32_0 : i32, i32
  }
  func.func @transform_2(%arg0: i32) -> (i32, i32) {
    %c0_i32 = arith.constant 0 : i32
    %c0_i32_0 = arith.constant 0 : i32
    %c0_i32_1 = arith.constant 0 : i32
    return %c0_i32, %c0_i32_0 : i32, i32
  }
  func.func @transform_3(%arg0: i32) -> (i32, i32) {
    %c0_i32 = arith.constant 0 : i32
    %c0_i32_0 = arith.constant 0 : i32
    %c0_i32_1 = arith.constant 0 : i32
    return %c0_i32, %c0_i32_0 : i32, i32
  }
  func.func @transform_4(%arg0: i32) -> (i32, i32) {
    %c0_i32 = arith.constant 0 : i32
    %c0_i32_0 = arith.constant 0 : i32
    %c0_i32_1 = arith.constant 0 : i32
    return %c0_i32, %c0_i32_0 : i32, i32
  }
  func.func @transform_5(%arg0: i32) -> (i32, i32) {
    %c0_i32 = arith.constant 0 : i32
    %c0_i32_0 = arith.constant 0 : i32
    %c0_i32_1 = arith.constant 0 : i32
    return %c0_i32, %c0_i32_0 : i32, i32
  }
  func.func @transform_6(%arg0: i32) -> (i32, i32) {
    %c0_i32 = arith.constant 0 : i32
    %c0_i32_0 = arith.constant 0 : i32
    %c0_i32_1 = arith.constant 0 : i32
    return %c0_i32, %c0_i32_0 : i32, i32
  }
  func.func @transform_7(%arg0: i32) -> (i32, i32) {
    %c0_i32 = arith.constant 0 : i32
    %c0_i32_0 = arith.constant 0 : i32
    %c0_i32_1 = arith.constant 0 : i32
    return %c0_i32, %c0_i32_0 : i32, i32
  }
  func.func @transform_8(%arg0: i32) -> (i32, i32) {
    %c0_i32 = arith.constant 0 : i32
    %c0_i32_0 = arith.constant 0 : i32
    %c0_i32_1 = arith.constant 0 : i32
    return %c0_i32, %c0_i32_0 : i32, i32
  }
}

</mosaic_0001>

<bundles_post_ra>
// kernel: lsdnn_forward.5
= control target key start
LH: loop header
LB: loop body
LE: loop exit
PB: predicated region body
PF: predicated region fallthrough
CT: control target
= control target key end

     0   :  { %14 = vsyncpa [#allocation3], 0  ;;  %s600_s0 = inlined_call_operand.vmem [shape: f32[2,1], index: 0, kind: input, shape index: {}]   ;;  %s601_s1 = inlined_call_operand.hbm [shape: f32[1,8], index: 1, kind: input, shape index: {}]   ;;  %s602_s2 = inlined_call_operand.hbm [shape: f32[1,8], index: 2, kind: input, shape index: {}]   ;;  %s603_s3 = inlined_call_operand.hbm [shape: f32[8,64], index: 3, kind: input, shape index: {}]   ;;  %s604_s4 = inlined_call_operand.hbm [shape: f32[1,64], index: 4, kind: input, shape index: {}]   ;;  %s605_s5 = inlined_call_operand.hbm [shape: f32[64,64], index: 5, kind: input, shape index: {}]   ;;  %s606_s6 = inlined_call_operand.hbm [shape: f32[1,64], index: 6, kind: input, shape index: {}]   ;;  %s607_s7 = inlined_call_operand.vmem [shape: f32[1,64], index: 7, kind: input, shape index: {}]   ;;  %s608_s8 = inlined_call_operand.vmem [shape: f32[1,64], index: 8, kind: input, shape index: {}]   ;;  %s609_s9 = inlined_call_operand.vmem [shape: f32[2,64], index: 9, kind: output, shape index: {}]  }
   0x1   :  { %15 = vsyncpa [#allocation5], 0 }
   0x2   :  { %16 = vsyncpa [#allocation8], 0 }
   0x3   :  { %17 = vsyncpa [#allocation11], 0  ;;  %s509_s30 = smov [#allocation4]   ;;  %s510_s11 = smov [#allocation7]  }
   0x4   :  { %s36_s10 = sshll.u32 %s509_s30, 4  ;;  %s56_s12 = sshll.u32 %s510_s11, 4  ;;  %s37_s10 = int_to_ptr.vmem [resolvable:$true] %s36_s10  ;;  %s57_s12 = int_to_ptr.vmem [resolvable:$true] %s56_s12 }
   0x5   :  { %s389_s13 = scalar_lea.vmem %s37_s10, 16  ;;  %s393_s14 = scalar_lea.vmem %s37_s10, 32 }
   0x6   :  { %p390_p0 = scmp.ne.s32.totalorder %s37_s10, %s389_s13  ;;  %p394_p1 = scmp.lt.s32.totalorder %s37_s10, %s37_s10 }
   0x7   :  { %p395_p2 = scmp.lt.s32.totalorder %s393_s14, %s389_s13 }
   0x9   :  { %p396_p3 = por %p395_p2, %p394_p1 }
   0xb   :  { %p397_p4 = pnand %p396_p3, %p390_p0 }
   0xd   :  { %400 = shalt.err (!%p397_p4)
}
   0xe   :  { %39 = dma.hbm_to_vmem [thread:$0]  %s602_s2, 16, %s37_s10, [#allocation5]  }
   0xf   :  { %s409_s17 = scalar_lea.vmem %s57_s12, 16  ;;  %s413_s18 = scalar_lea.vmem %s57_s12, 32 }
  0x10   :  { %p410_p5 = scmp.ne.s32.totalorder %s57_s12, %s409_s17  ;;  %p414_p6 = scmp.lt.s32.totalorder %s57_s12, %s57_s12 }
  0x11   :  { %p415_p7 = scmp.lt.s32.totalorder %s413_s18, %s409_s17 }
  0x13   :  { %p416_p8 = por %p415_p7, %p414_p6 }
  0x15   :  { %p417_p9 = pnand %p416_p8, %p410_p5 }
  0x17   :  { %420 = shalt.err (!%p417_p9)
}
  0x18   :  { %59 = dma.hbm_to_vmem [thread:$0]  %s604_s4, 16, %s57_s12, [#allocation8]  }
  0x19   :  { %s511_s21 = smov [#allocation2]   ;;  %s512_s23 = smov [#allocation6]  }
  0x1a   :  { %s26_s22 = sshll.u32 %s511_s21, 4  ;;  %s46_s24 = sshll.u32 %s512_s23, 4  ;;  %s27_s22 = int_to_ptr.vmem [resolvable:$true] %s26_s22  ;;  %s47_s24 = int_to_ptr.vmem [resolvable:$true] %s46_s24 }
  0x1b   :  { %s429_s25 = scalar_lea.vmem %s27_s22, 16  ;;  %s433_s2 = scalar_lea.vmem %s27_s22, 32 }
  0x1c   :  { %p430_p10 = scmp.ne.s32.totalorder %s27_s22, %s429_s25  ;;  %p434_p11 = scmp.lt.s32.totalorder %s27_s22, %s27_s22 }
  0x1d   :  { %p435_p12 = scmp.lt.s32.totalorder %s433_s2, %s429_s25 }
  0x1f   :  { %p436_p13 = por %p435_p12, %p434_p11 }
  0x21   :  { %p437_p0 = pnand %p436_p13, %p430_p10 }
  0x23   :  { %440 = shalt.err (!%p437_p0)
}
  0x24   :  { %29 = dma.hbm_to_vmem [thread:$0]  %s601_s1, 16, %s27_s22, [#allocation3]  }
  0x25   :  { %s449_s28 = scalar_lea.vmem %s47_s24, 128  ;;  %p454_p2 = scmp.lt.s32.totalorder %s47_s24, %s47_s24 }
  0x26   :  { %p450_p1 = scmp.ne.s32.totalorder %s47_s24, %s449_s28  ;;  %p455_p3 = scmp.lt.s32.totalorder %s449_s28, %s449_s28 }
  0x28   :  { %p456_p4 = por %p455_p3, %p454_p2 }
  0x2a   :  { %p457_p5 = pnand %p456_p4, %p450_p1 }
  0x2c   :  { %460 = shalt.err (!%p457_p5)
}
  0x2d   :  { %49 = dma.hbm_to_vmem [thread:$0]  %s603_s3, 128, %s47_s24, [#allocation5]  }
  0x2e   :  { %s513_s30 = smov [#allocation9]  }
  0x2f   :  { %s65_s10 = sshll.u32 %s513_s30, 4  ;;  %s66_s10 = int_to_ptr.vmem [resolvable:$true] %s65_s10 }
  0x30   :  { %s469_s11 = scalar_lea.vmem %s66_s10, 1024  ;;  %p474_p7 = scmp.lt.s32.totalorder %s66_s10, %s66_s10 }
  0x31   :  { %p470_p6 = scmp.ne.s32.totalorder %s66_s10, %s469_s11  ;;  %p475_p8 = scmp.lt.s32.totalorder %s469_s11, %s469_s11 }
  0x33   :  { %p476_p9 = por %p475_p8, %p474_p7 }
  0x35   :  { %p477_p10 = pnand %p476_p9, %p470_p6 }
  0x37   :  { %480 = shalt.err (!%p477_p10)
}
  0x38   :  { %s514_s1 = smov 128   ;;  %s515_s12 = smov 8  }
  0x39   :  { %71 = dma.hbm_to_vmem [thread:$0]  %s605_s5, 1024, %s66_s10, [#allocation8], %s514_s1, %s514_s1, %s515_s12  }
  0x3a   :  { %s516_s15 = smov [#allocation10]  }
  0x3b   :  { %s78_s16 = sshll.u32 %s516_s15, 4  ;;  %s79_s16 = int_to_ptr.vmem [resolvable:$true] %s78_s16 }
  0x3c   :  { %s489_s3 = scalar_lea.vmem %s79_s16, 16  ;;  %s493_s17 = scalar_lea.vmem %s79_s16, 32 }
  0x3d   :  { %p490_p11 = scmp.ne.s32.totalorder %s79_s16, %s489_s3  ;;  %p494_p12 = scmp.lt.s32.totalorder %s79_s16, %s79_s16 }
  0x3e   :  { %p495_p13 = scmp.lt.s32.totalorder %s493_s17, %s489_s3 }
  0x40   :  { %p496_p0 = por %p495_p13, %p494_p12 }
  0x42   :  { %p497_p1 = pnand %p496_p0, %p490_p11 }
  0x44   :  { %500 = shalt.err (!%p497_p1)
}
  0x45   :  { %81 = dma.hbm_to_vmem [thread:$0]  %s606_s6, 16, %s79_s16, [#allocation11]  }
  0x46   :  { %501 = dma.done.wait [#allocation3], 16  }
  0x47   :  { %502 = vsyncadd [#allocation3], 4294967280 }
  0x48   :  { %503 = dma.done.wait [#allocation5], 144  }
  0x49   :  { %504 = vsyncadd [#allocation5], 4294967152 }
  0x4a   :  { %505 = dma.done.wait [#allocation8], 1040  }
  0x4b   :  { %506 = vsyncadd [#allocation8], 4294966256 }
  0x4c   :  { %507 = dma.done.wait [#allocation11], 16  }
  0x4d   :  { %508 = vsyncadd [#allocation11], 4294967280  ;;  %v517_v0 = vmov 0   ;;  %v104_v1 = vld [vmem:[%s600_s0] sm:$0x3]  ;;  %v127_v2 = vld [vmem:[#allocation6] sm:$0xff] }
  0x4e   :  { %380 = vset.pattern.permute.xlu0 %v517_v0  ;;  %v518_v3 = vmov 0.0   ;;  %vm519_vm0 = vmmov 0   ;;  %v217_v4 = vld [vmem:[#allocation9 + $0x38] sm:$0xff]  ;;  %v216_v5 = vld [vmem:[#allocation9 + $0x30] sm:$0xff]  ;;  %v215_v6 = vld [vmem:[#allocation9 + $0x28] sm:$0xff]  ;;  %vm135_vm1 = vcmask 64512  }
  0x4f   :  { %108 = vperm.xlu0 %380, %v104_v1   ;;  %345 = vmatprep.subr.mxu0 %v518_v3  ;;  %v214_v7 = vld [vmem:[#allocation9 + $0x20] sm:$0xff]  ;;  %v213_v8 = vld [vmem:[#allocation9 + $0x18] sm:$0xff]  ;;  %v326_v9 = vld [vmem:[#allocation2] ss:$0 sm:$0xff]  ;;  %vm225_vm2 = vcmask 523264   ;;  %vm316_vm3 = vcmask 517120  }
  0x50   :  { %347 = vmatprep.mubr.msk.f32.mxu0 %vm519_vm0, %v518_v3  ;;  %346 = vmatpush3.msra.mxu0 %v127_v2  ;;  %v327_v10 = vld [vmem:[#allocation4] ss:$0 sm:$0xff]  ;;  %v211_v16 = vld [vmem:[#allocation9 + $0x8] sm:$0xff]  ;;  %v210_v17 = vld [vmem:[#allocation9] sm:$0xff] }
  0x51   :  { %350 = vmatprep.subr.mxu1 %v518_v3  ;;  %366 = vmatprep.mubr.msk.f32.mxu1 %vm519_vm0, %v518_v3  ;;  %v212_v15 = vld [vmem:[#allocation9 + $0x10] sm:$0xff]  ;;  %v328_v18 = vld [vmem:[#allocation7] ss:$0 sm:$0xff]  ;;  %v330_v23 = vld [vmem:[#allocation10] ss:$0 sm:$0xff] }
  0x52   :  { %351 = vmatpush3.msra.mxu1 %v217_v4  ;;  %v332_v26 = vld [vmem:[%s607_s7] ss:$0 sm:$0xff] }
  0x53   :  { %352 = vmatprep.subr.mxu1 %v518_v3  ;;  %v333_v29 = vld [vmem:[%s608_s8] ss:$0 sm:$0xff] }
  0x54   :  { %353 = vmatpush3.msra.mxu1 %v216_v5 }
  0x55   :  { %354 = vmatprep.subr.mxu1 %v518_v3 }
  0x56   :  { %355 = vmatpush3.msra.mxu1 %v215_v6 }
  0x57   :  { %356 = vmatprep.subr.mxu1 %v518_v3 }
  0x58   :  { %357 = vmatpush3.msra.mxu1 %v214_v7 }
  0x59   :  { %358 = vmatprep.subr.mxu1 %v518_v3 }
  0x5a   :  { %359 = vmatpush3.msra.mxu1 %v213_v8 }
  0x5b   :  { %360 = vmatprep.subr.mxu1 %v518_v3 }
  0x5c   :  { %361 = vmatpush3.msra.mxu1 %v212_v15 }
  0x5d   :  { %362 = vmatprep.subr.mxu1 %v518_v3 }
  0x5e   :  { %363 = vmatpush3.msra.mxu1 %v211_v16 }
  0x5f   :  { %364 = vmatprep.subr.mxu1 %v518_v3 }
  0x60   :  { %365 = vmatpush3.msra.mxu1 %v210_v17 }
  0xca   :  { %v109_v11 = vpop.permute.xlu0 %108 }
  0xcb   :  { %v117_v12 = vmul.f32 %v326_v9, %v109_v11 }
  0xcd   :  { %v125_v13 = vadd.f32 %v327_v10, %v117_v12 }
  0xcf   :  { %v126_v14 = vmax.f32 %v125_v13, 0.0 }
  0xd1   :  { %348 = vmatmul.mubr.msk.f32.vlgmr.msra.gmra.mxu0 %vm135_vm1, %v126_v14 }
 0x191   :  { %v205_v19 = vpop.f32.mrf.mxu0 }
 0x192   :  { %v206_v20 = vadd.f32 %v328_v18, %v205_v19 }
 0x193   :  { %v349_v21 = vpop.f32.mrf.mxu0 }
 0x194   :  { %v209_v22 = vmax.f32 %v206_v20, 0.0 }
 0x196   :  { %367 = vmatmul.mubr.msk.f32.vlgmr.msra.gmra.mxu1 %vm225_vm2, %v209_v22 }
 0x256   :  { %v295_v24 = vpop.f32.mrf.mxu1 }
 0x257   :  { %v296_v25 = vadd.f32 %v330_v23, %v295_v24 }
 0x258   :  { %v368_v27 = vpop.f32.mrf.mxu1 }
 0x259   :  { %v299_v28 = vmax.f32 %v296_v25, 0.0 }
 0x25b   :  { %v307_v30 = vmul.f32 %v332_v26, %v299_v28 }
 0x25d   :  { %v315_v31 = vadd.f32 %v333_v29, %v307_v30 }
 0x25f   :  { %317 = vst.msk [vmem:[%s609_s9] sm:$0x3] %vm316_vm3, %v315_v31 }
 0x260   :  { %322 = vsyncpa [#allocation3], 1 }
 0x261   :  { %323 = vsyncpa [#allocation5], 1 }
 0x262   :  { %324 = vsyncpa [#allocation8], 1 }
 0x263   :  { %325 = vsyncpa [#allocation11], 1 }

// kernel: lsdnn_forward.7
= control target key start
LH: loop header
LB: loop body
LE: loop exit
PB: predicated region body
PF: predicated region fallthrough
CT: control target
= control target key end

     0   :  { %vm391_vm0 = vcmask 523264   ;;  %vm740_vm1 = vmmov 0   ;;  %vm666_vm2 = vcmask 1024   ;;  %s1341_s1 = inlined_call_operand.vmem [shape: f32[512,256], index: 1, kind: input, shape index: {}]   ;;  %s1342_s0 = inlined_call_operand.vmem [shape: f32[2,512], index: 0, kind: input, shape index: {}]   ;;  %s1343_s2 = inlined_call_operand.vmem [shape: f32[1,256], index: 2, kind: input, shape index: {}]   ;;  %s1344_s4 = inlined_call_operand.vmem [shape: f32[64,256], index: 4, kind: input, shape index: {}]   ;;  %s1345_s3 = inlined_call_operand.vmem [shape: f32[64,256], index: 3, kind: input, shape index: {}]   ;;  %s1346_s5 = inlined_call_operand.vmem [shape: f32[1,256], index: 5, kind: input, shape index: {}]   ;;  %s1347_s6 = inlined_call_operand.vmem [shape: f32[64,1], index: 6, kind: input, shape index: {}]   ;;  %s1348_s7 = inlined_call_operand.<no memory space> [shape: f32[1,1], index: 7, kind: input, shape index: {}]   ;;  %s1349_s8 = inlined_call_operand.vmem [shape: f32[2,1], index: 8, kind: output, shape index: {}]  }
   0x1   :  { %v63_v0 = vld [vmem:[%s1341_s1 + $0xf8] sm:$0xff]  ;;  %v62_v2 = vld [vmem:[%s1341_s1 + $0xf0] sm:$0xff]  ;;  %v61_v4 = vld [vmem:[%s1341_s1 + $0xe8] sm:$0xff] }
   0x2   :  { %v127_v1 = vld [vmem:[%s1341_s1 + $0x2f8] sm:$0xff]  ;;  %194 = vmatprep.subr.mxu0 %v63_v0  ;;  %v126_v3 = vld [vmem:[%s1341_s1 + $0x2f0] sm:$0xff]  ;;  %v125_v5 = vld [vmem:[%s1341_s1 + $0x2e8] sm:$0xff] }
   0x3   :  { %265 = vmatprep.subr.mxu1 %v127_v1  ;;  %195 = vmatpush1.msra.mxu0 %v62_v2  ;;  %v60_v6 = vld [vmem:[%s1341_s1 + $0xe0] sm:$0xff]  ;;  %v59_v8 = vld [vmem:[%s1341_s1 + $0xd8] sm:$0xff]  ;;  %v58_v10 = vld [vmem:[%s1341_s1 + $0xd0] sm:$0xff] }
   0x4   :  { %266 = vmatpush1.msra.mxu1 %v126_v3  ;;  %v124_v7 = vld [vmem:[%s1341_s1 + $0x2e0] sm:$0xff]  ;;  %196 = vmatprep.subr.mxu0 %v61_v4  ;;  %v123_v9 = vld [vmem:[%s1341_s1 + $0x2d8] sm:$0xff]  ;;  %v122_v11 = vld [vmem:[%s1341_s1 + $0x2d0] sm:$0xff] }
   0x5   :  { %267 = vmatprep.subr.mxu1 %v125_v5  ;;  %197 = vmatpush1.msra.mxu0 %v60_v6  ;;  %v57_v12 = vld [vmem:[%s1341_s1 + $0xc8] sm:$0xff]  ;;  %v56_v14 = vld [vmem:[%s1341_s1 + $0xc0] sm:$0xff]  ;;  %v55_v16 = vld [vmem:[%s1341_s1 + $0xb8] sm:$0xff] }
   0x6   :  { %268 = vmatpush1.msra.mxu1 %v124_v7  ;;  %v121_v13 = vld [vmem:[%s1341_s1 + $0x2c8] sm:$0xff]  ;;  %198 = vmatprep.subr.mxu0 %v59_v8  ;;  %v120_v15 = vld [vmem:[%s1341_s1 + $0x2c0] sm:$0xff]  ;;  %v119_v17 = vld [vmem:[%s1341_s1 + $0x2b8] sm:$0xff] }
   0x7   :  { %269 = vmatprep.subr.mxu1 %v123_v9  ;;  %199 = vmatpush1.msra.mxu0 %v58_v10  ;;  %v54_v18 = vld [vmem:[%s1341_s1 + $0xb0] sm:$0xff]  ;;  %v53_v20 = vld [vmem:[%s1341_s1 + $0xa8] sm:$0xff]  ;;  %v52_v22 = vld [vmem:[%s1341_s1 + $0xa0] sm:$0xff] }
   0x8   :  { %270 = vmatpush1.msra.mxu1 %v122_v11  ;;  %200 = vmatprep.subr.mxu0 %v57_v12  ;;  %v118_v19 = vld [vmem:[%s1341_s1 + $0x2b0] sm:$0xff]  ;;  %v117_v21 = vld [vmem:[%s1341_s1 + $0x2a8] sm:$0xff]  ;;  %v116_v23 = vld [vmem:[%s1341_s1 + $0x2a0] sm:$0xff] }
   0x9   :  { %271 = vmatprep.subr.mxu1 %v121_v13  ;;  %201 = vmatpush1.msra.mxu0 %v56_v14  ;;  %v51_v24 = vld [vmem:[%s1341_s1 + $0x98] sm:$0xff]  ;;  %v50_v26 = vld [vmem:[%s1341_s1 + $0x90] sm:$0xff]  ;;  %v49_v28 = vld [vmem:[%s1341_s1 + $0x88] sm:$0xff] }
   0xa   :  { %272 = vmatpush1.msra.mxu1 %v120_v15  ;;  %202 = vmatprep.subr.mxu0 %v55_v16  ;;  %v115_v25 = vld [vmem:[%s1341_s1 + $0x298] sm:$0xff]  ;;  %v114_v27 = vld [vmem:[%s1341_s1 + $0x290] sm:$0xff]  ;;  %v113_v29 = vld [vmem:[%s1341_s1 + $0x288] sm:$0xff] }
   0xb   :  { %273 = vmatprep.subr.mxu1 %v119_v17  ;;  %203 = vmatpush1.msra.mxu0 %v54_v18  ;;  %v48_v30 = vld [vmem:[%s1341_s1 + $0x80] sm:$0xff]  ;;  %v47_v32 = vld [vmem:[%s1341_s1 + $0x78] sm:$0xff]  ;;  %v46_v34 = vld [vmem:[%s1341_s1 + $0x70] sm:$0xff] }
   0xc   :  { %274 = vmatpush1.msra.mxu1 %v118_v19  ;;  %204 = vmatprep.subr.mxu0 %v53_v20  ;;  %v112_v31 = vld [vmem:[%s1341_s1 + $0x280] sm:$0xff]  ;;  %v111_v33 = vld [vmem:[%s1341_s1 + $0x278] sm:$0xff]  ;;  %v110_v35 = vld [vmem:[%s1341_s1 + $0x270] sm:$0xff] }
   0xd   :  { %275 = vmatprep.subr.mxu1 %v117_v21  ;;  %205 = vmatpush1.msra.mxu0 %v52_v22  ;;  %v45_v36 = vld [vmem:[%s1341_s1 + $0x68] sm:$0xff]  ;;  %v44_v38 = vld [vmem:[%s1341_s1 + $0x60] sm:$0xff]  ;;  %v43_v40 = vld [vmem:[%s1341_s1 + $0x58] sm:$0xff] }
   0xe   :  { %276 = vmatpush1.msra.mxu1 %v116_v23  ;;  %206 = vmatprep.subr.mxu0 %v51_v24  ;;  %v109_v37 = vld [vmem:[%s1341_s1 + $0x268] sm:$0xff]  ;;  %v108_v39 = vld [vmem:[%s1341_s1 + $0x260] sm:$0xff]  ;;  %v107_v41 = vld [vmem:[%s1341_s1 + $0x258] sm:$0xff] }
   0xf   :  { %277 = vmatprep.subr.mxu1 %v115_v25  ;;  %207 = vmatpush1.msra.mxu0 %v50_v26  ;;  %v42_v42 = vld [vmem:[%s1341_s1 + $0x50] sm:$0xff]  ;;  %v41_v44 = vld [vmem:[%s1341_s1 + $0x48] sm:$0xff]  ;;  %v40_v46 = vld [vmem:[%s1341_s1 + $0x40] sm:$0xff] }
  0x10   :  { %278 = vmatpush1.msra.mxu1 %v114_v27  ;;  %208 = vmatprep.subr.mxu0 %v49_v28  ;;  %v106_v43 = vld [vmem:[%s1341_s1 + $0x250] sm:$0xff]  ;;  %v105_v45 = vld [vmem:[%s1341_s1 + $0x248] sm:$0xff]  ;;  %v104_v47 = vld [vmem:[%s1341_s1 + $0x240] sm:$0xff] }
  0x11   :  { %279 = vmatprep.subr.mxu1 %v113_v29  ;;  %209 = vmatpush1.msra.mxu0 %v48_v30  ;;  %v39_v48 = vld [vmem:[%s1341_s1 + $0x38] sm:$0xff]  ;;  %v38_v50 = vld [vmem:[%s1341_s1 + $0x30] sm:$0xff]  ;;  %v37_v52 = vld [vmem:[%s1341_s1 + $0x28] sm:$0xff]  ;;  %v162_v30 = vlaneseq }
  0x12   :  { %280 = vmatpush1.msra.mxu1 %v112_v31  ;;  %210 = vmatprep.subr.mxu0 %v47_v32  ;;  %v103_v49 = vld [vmem:[%s1341_s1 + $0x238] sm:$0xff]  ;;  %v102_v51 = vld [vmem:[%s1341_s1 + $0x230] sm:$0xff]  ;;  %v101_v53 = vld [vmem:[%s1341_s1 + $0x228] sm:$0xff]  ;;  %v737_v31 = vmov 1983009808  }
  0x13   :  { %281 = vmatprep.subr.mxu1 %v111_v33  ;;  %211 = vmatpush1.msra.mxu0 %v46_v34  ;;  %v36_v54 = vld [vmem:[%s1341_s1 + $0x20] sm:$0xff]  ;;  %v35_v56 = vld [vmem:[%s1341_s1 + $0x18] sm:$0xff]  ;;  %v34_v58 = vld [vmem:[%s1341_s1 + $0x10] sm:$0xff]  ;;  %v175_v32 = vunpack.c.l.s4 %v737_v31 }
  0x14   :  { %282 = vmatpush1.msra.mxu1 %v110_v35  ;;  %212 = vmatprep.subr.mxu0 %v45_v36  ;;  %v100_v55 = vld [vmem:[%s1341_s1 + $0x220] sm:$0xff]  ;;  %v99_v57 = vld [vmem:[%s1341_s1 + $0x218] sm:$0xff]  ;;  %v98_v59 = vld [vmem:[%s1341_s1 + $0x210] sm:$0xff] }
  0x15   :  { %283 = vmatprep.subr.mxu1 %v109_v37  ;;  %213 = vmatpush1.msra.mxu0 %v44_v38  ;;  %v33_v60 = vld [vmem:[%s1341_s1 + $0x8] sm:$0xff]  ;;  %v32_v62 = vld [vmem:[%s1341_s1] sm:$0xff]  ;;  %v95_v0 = vld [vmem:[%s1341_s1 + $0x1f8] sm:$0xff] }
  0x16   :  { %284 = vmatpush1.msra.mxu1 %v108_v39  ;;  %214 = vmatprep.subr.mxu0 %v43_v40  ;;  %v97_v61 = vld [vmem:[%s1341_s1 + $0x208] sm:$0xff]  ;;  %v96_v63 = vld [vmem:[%s1341_s1 + $0x200] sm:$0xff]  ;;  %v159_v1 = vld [vmem:[%s1341_s1 + $0x3f8] sm:$0xff] }
  0x17   :  { %285 = vmatprep.subr.mxu1 %v107_v41  ;;  %215 = vmatpush1.msra.mxu0 %v42_v42  ;;  %v94_v2 = vld [vmem:[%s1341_s1 + $0x1f0] sm:$0xff]  ;;  %v93_v4 = vld [vmem:[%s1341_s1 + $0x1e8] sm:$0xff]  ;;  %v92_v6 = vld [vmem:[%s1341_s1 + $0x1e0] sm:$0xff]  ;;  %v1092_v41 = vshrl.u32 %v162_v30, 7  ;;  %v176_v42 = vunpack.c.0.s8 %v175_v32 }
  0x18   :  { %286 = vmatpush1.msra.mxu1 %v106_v43  ;;  %216 = vmatprep.subr.mxu0 %v41_v44  ;;  %v158_v3 = vld [vmem:[%s1341_s1 + $0x3f0] sm:$0xff]  ;;  %v157_v5 = vld [vmem:[%s1341_s1 + $0x3e8] sm:$0xff]  ;;  %v156_v7 = vld [vmem:[%s1341_s1 + $0x3e0] sm:$0xff] }
  0x19   :  { %287 = vmatprep.subr.mxu1 %v105_v45  ;;  %217 = vmatpush1.msra.mxu0 %v40_v46  ;;  %v91_v8 = vld [vmem:[%s1341_s1 + $0x1d8] sm:$0xff]  ;;  %v90_v10 = vld [vmem:[%s1341_s1 + $0x1d0] sm:$0xff]  ;;  %v89_v12 = vld [vmem:[%s1341_s1 + $0x1c8] sm:$0xff] }
  0x1a   :  { %288 = vmatpush1.msra.mxu1 %v104_v47  ;;  %218 = vmatprep.subr.mxu0 %v39_v48  ;;  %v155_v9 = vld [vmem:[%s1341_s1 + $0x3d8] sm:$0xff]  ;;  %v154_v11 = vld [vmem:[%s1341_s1 + $0x3d0] sm:$0xff]  ;;  %v153_v13 = vld [vmem:[%s1341_s1 + $0x3c8] sm:$0xff] }
  0x1b   :  { %289 = vmatprep.subr.mxu1 %v103_v49  ;;  %219 = vmatpush1.msra.mxu0 %v38_v50  ;;  %v88_v14 = vld [vmem:[%s1341_s1 + $0x1c0] sm:$0xff]  ;;  %v87_v16 = vld [vmem:[%s1341_s1 + $0x1b8] sm:$0xff]  ;;  %v86_v18 = vld [vmem:[%s1341_s1 + $0x1b0] sm:$0xff] }
  0x1c   :  { %290 = vmatpush1.msra.mxu1 %v102_v51  ;;  %220 = vmatprep.subr.mxu0 %v37_v52  ;;  %v152_v15 = vld [vmem:[%s1341_s1 + $0x3c0] sm:$0xff]  ;;  %v151_v17 = vld [vmem:[%s1341_s1 + $0x3b8] sm:$0xff]  ;;  %v150_v19 = vld [vmem:[%s1341_s1 + $0x3b0] sm:$0xff]  ;;  %v179_v52 = vsub.s32 %v176_v42, %v1092_v41 }
  0x1d   :  { %291 = vmatprep.subr.mxu1 %v101_v53  ;;  %221 = vmatpush1.msra.mxu0 %v36_v54  ;;  %v85_v20 = vld [vmem:[%s1341_s1 + $0x1a8] sm:$0xff]  ;;  %v84_v22 = vld [vmem:[%s1341_s1 + $0x1a0] sm:$0xff]  ;;  %v83_v24 = vld [vmem:[%s1341_s1 + $0x198] sm:$0xff] }
  0x1e   :  { %292 = vmatpush1.msra.mxu1 %v100_v55  ;;  %222 = vmatprep.subr.mxu0 %v35_v56  ;;  %v149_v21 = vld [vmem:[%s1341_s1 + $0x3a8] sm:$0xff]  ;;  %v148_v23 = vld [vmem:[%s1341_s1 + $0x3a0] sm:$0xff]  ;;  %v147_v25 = vld [vmem:[%s1341_s1 + $0x398] sm:$0xff] }
  0x1f   :  { %293 = vmatprep.subr.mxu1 %v99_v57  ;;  %223 = vmatpush1.msra.mxu0 %v34_v58  ;;  %v82_v26 = vld [vmem:[%s1341_s1 + $0x190] sm:$0xff]  ;;  %v81_v28 = vld [vmem:[%s1341_s1 + $0x188] sm:$0xff]  ;;  %v80_v33 = vld [vmem:[%s1341_s1 + $0x180] sm:$0xff] }
  0x20   :  { %294 = vmatpush1.msra.mxu1 %v98_v59  ;;  %224 = vmatprep.subr.mxu0 %v33_v60  ;;  %v146_v27 = vld [vmem:[%s1341_s1 + $0x390] sm:$0xff]  ;;  %v145_v29 = vld [vmem:[%s1341_s1 + $0x388] sm:$0xff]  ;;  %v144_v34 = vld [vmem:[%s1341_s1 + $0x380] sm:$0xff] }
  0x21   :  { %295 = vmatprep.subr.mxu1 %v97_v61  ;;  %225 = vmatpush1.msra.mxu0 %v32_v62  ;;  %v79_v35 = vld [vmem:[%s1341_s1 + $0x178] sm:$0xff]  ;;  %v78_v37 = vld [vmem:[%s1341_s1 + $0x170] sm:$0xff]  ;;  %v77_v39 = vld [vmem:[%s1341_s1 + $0x168] sm:$0xff] }
  0x22   :  { %296 = vmatpush1.msra.mxu1 %v96_v63  ;;  %226 = vmatprep.subr.mxu0 %v95_v0  ;;  %v143_v36 = vld [vmem:[%s1341_s1 + $0x378] sm:$0xff]  ;;  %v142_v38 = vld [vmem:[%s1341_s1 + $0x370] sm:$0xff]  ;;  %v141_v40 = vld [vmem:[%s1341_s1 + $0x368] sm:$0xff] }
  0x23   :  { %297 = vmatprep.subr.mxu1 %v159_v1  ;;  %227 = vmatpush2.msra.mxu0 %v94_v2  ;;  %v76_v43 = vld [vmem:[%s1341_s1 + $0x160] sm:$0xff]  ;;  %v75_v45 = vld [vmem:[%s1341_s1 + $0x158] sm:$0xff]  ;;  %v74_v48 = vld [vmem:[%s1341_s1 + $0x150] sm:$0xff] }
  0x24   :  { %298 = vmatpush2.msra.mxu1 %v158_v3  ;;  %228 = vmatprep.subr.mxu0 %v93_v4  ;;  %v140_v44 = vld [vmem:[%s1341_s1 + $0x360] sm:$0xff]  ;;  %v139_v46 = vld [vmem:[%s1341_s1 + $0x358] sm:$0xff]  ;;  %v138_v49 = vld [vmem:[%s1341_s1 + $0x350] sm:$0xff] }
  0x25   :  { %299 = vmatprep.subr.mxu1 %v157_v5  ;;  %229 = vmatpush2.msra.mxu0 %v92_v6  ;;  %v31_v47 = vld [vmem:[%s1342_s0] sm:$0xff]  ;;  %v73_v50 = vld [vmem:[%s1341_s1 + $0x148] sm:$0xff]  ;;  %v71_v56 = vld [vmem:[%s1341_s1 + $0x138] sm:$0xff] }
  0x26   :  { %300 = vmatpush2.msra.mxu1 %v156_v7  ;;  %230 = vmatprep.subr.mxu0 %v91_v8  ;;  %v137_v51 = vld [vmem:[%s1341_s1 + $0x348] sm:$0xff]  ;;  %v72_v53 = vld [vmem:[%s1341_s1 + $0x140] sm:$0xff]  ;;  %v173_v55 = vcombine.high %v31_v47, %v31_v47  ;;  %v135_v57 = vld [vmem:[%s1341_s1 + $0x338] sm:$0xff]  ;;  %v180_v62 = vrot.slane %v31_v47, %v179_v52 }
  0x27   :  { %301 = vmatprep.subr.mxu1 %v155_v9  ;;  %231 = vmatpush2.msra.mxu0 %v90_v10  ;;  %v136_v54 = vld [vmem:[%s1341_s1 + $0x340] sm:$0xff]  ;;  %v70_v58 = vld [vmem:[%s1341_s1 + $0x130] sm:$0xff]  ;;  %v69_v60 = vld [vmem:[%s1341_s1 + $0x128] sm:$0xff] }
  0x28   :  { %302 = vmatpush2.msra.mxu1 %v154_v11  ;;  %232 = vmatprep.subr.mxu0 %v89_v12  ;;  %v134_v59 = vld [vmem:[%s1341_s1 + $0x330] sm:$0xff]  ;;  %v133_v61 = vld [vmem:[%s1341_s1 + $0x328] sm:$0xff]  ;;  %v68_v63 = vld [vmem:[%s1341_s1 + $0x120] sm:$0xff]  ;;  %v187_v1 = vrot.slane %v173_v55, %v179_v52  ;;  %v188_v8 = vcombine.high %v180_v62, %v180_v62  ;;  %v164_v12 = vsub.s32 0, %v1092_v41 }
  0x29   :  { %303 = vmatprep.subr.mxu1 %v153_v13  ;;  %233 = vmatpush2.msra.mxu0 %v88_v14  ;;  %v132_v0 = vld [vmem:[%s1341_s1 + $0x320] sm:$0xff]  ;;  %v67_v2 = vld [vmem:[%s1341_s1 + $0x118] sm:$0xff]  ;;  %v66_v4 = vld [vmem:[%s1341_s1 + $0x110] sm:$0xff] }
  0x2a   :  { %304 = vmatpush2.msra.mxu1 %v152_v15  ;;  %234 = vmatprep.subr.mxu0 %v87_v16  ;;  %v131_v3 = vld [vmem:[%s1341_s1 + $0x318] sm:$0xff]  ;;  %v130_v5 = vld [vmem:[%s1341_s1 + $0x310] sm:$0xff]  ;;  %v65_v6 = vld [vmem:[%s1341_s1 + $0x108] sm:$0xff]  ;;  %v189_v10 = vcombine.high %v187_v1, %v187_v1 }
  0x2b   :  { %305 = vmatprep.subr.mxu1 %v151_v17  ;;  %235 = vmatpush2.msra.mxu0 %v86_v18  ;;  %v129_v7 = vld [vmem:[%s1341_s1 + $0x308] sm:$0xff]  ;;  %v64_v9 = vld [vmem:[%s1341_s1 + $0x100] sm:$0xff]  ;;  %v387_v31 = vld [vmem:[%s1344_s4 + $0x78] sm:$0xff] }
  0x2c   :  { %306 = vmatpush2.msra.mxu1 %v150_v19  ;;  %236 = vmatprep.subr.mxu0 %v85_v20  ;;  %v128_v11 = vld [vmem:[%s1341_s1 + $0x300] sm:$0xff]  ;;  %v168_v20 = vsub.s32 1, %v1092_v41  ;;  %s738_s1 = smov 64   ;;  %v371_v32 = vld [vmem:[%s1345_s3 + $0x78] sm:$0xff]  ;;  %v362_v52 = vld [vmem:[%s1345_s3 + $0x30] sm:$0xff] }
  0x2d   :  { %307 = vmatprep.subr.mxu1 %v149_v21  ;;  %237 = vmatpush2.msra.mxu0 %v84_v22  ;;  %v160_v13 = vld [vmem:[%s1343_s2] sm:$0x3]  ;;  %v367_v42 = vld [vmem:[%s1345_s3 + $0x58] sm:$0xff]  ;;  %v361_v55 = vld [vmem:[%s1345_s3 + $0x28] sm:$0xff] }
  0x2e   :  { %308 = vmatpush2.msra.mxu1 %v148_v23  ;;  %238 = vmatprep.subr.mxu0 %v83_v24  ;;  %v165_v14 = vrot.slane %v160_v13, %v164_v12  ;;  %v169_v21 = vrot.slane %v160_v13, %v168_v20  ;;  %v380_v47 = vld [vmem:[%s1344_s4 + $0x40] sm:$0xff]  ;;  %v581_v41 = vld [vmem:[%s1347_s6 + $0x28] sm:$0xff] }
  0x2f   :  { %309 = vmatprep.subr.mxu1 %v147_v25  ;;  %239 = vmatpush2.msra.mxu0 %v82_v26 }
  0x30   :  { %310 = vmatpush2.msra.mxu1 %v146_v27  ;;  %240 = vmatprep.subr.mxu0 %v81_v28 }
  0x31   :  { %311 = vmatprep.subr.mxu1 %v145_v29  ;;  %241 = vmatpush2.msra.mxu0 %v80_v33  ;;  %v386_v33 = vld [vmem:[%s1344_s4 + $0x70] sm:$0xff] }
  0x32   :  { %312 = vmatpush2.msra.mxu1 %v144_v34  ;;  %242 = vmatprep.subr.mxu0 %v79_v35  ;;  %v739_v34 = vmov 0.0   ;;  %v370_v35 = vld [vmem:[%s1345_s3 + $0x70] sm:$0xff] }
  0x33   :  { %313 = vmatprep.subr.mxu1 %v143_v36  ;;  %243 = vmatpush2.msra.mxu0 %v78_v37  ;;  %v385_v36 = vld [vmem:[%s1344_s4 + $0x68] sm:$0xff] }
  0x34   :  { %314 = vmatpush2.msra.mxu1 %v142_v38  ;;  %244 = vmatprep.subr.mxu0 %v77_v39  ;;  %v369_v37 = vld [vmem:[%s1345_s3 + $0x68] sm:$0xff]  ;;  %v384_v38 = vld [vmem:[%s1344_s4 + $0x60] sm:$0xff] }
  0x35   :  { %315 = vmatprep.subr.mxu1 %v141_v40  ;;  %245 = vmatpush2.msra.mxu0 %v76_v43  ;;  %v368_v39 = vld [vmem:[%s1345_s3 + $0x60] sm:$0xff]  ;;  %v383_v40 = vld [vmem:[%s1344_s4 + $0x58] sm:$0xff]  ;;  %v382_v43 = vld [vmem:[%s1344_s4 + $0x50] sm:$0xff] }
  0x36   :  { %316 = vmatpush2.msra.mxu1 %v140_v44  ;;  %246 = vmatprep.subr.mxu0 %v75_v45  ;;  %v366_v44 = vld [vmem:[%s1345_s3 + $0x50] sm:$0xff]  ;;  %v381_v45 = vld [vmem:[%s1344_s4 + $0x48] sm:$0xff] }
  0x37   :  { %317 = vmatprep.subr.mxu1 %v139_v46  ;;  %247 = vmatpush2.msra.mxu0 %v74_v48  ;;  %v365_v46 = vld [vmem:[%s1345_s3 + $0x48] sm:$0xff]  ;;  %v364_v48 = vld [vmem:[%s1345_s3 + $0x40] sm:$0xff] }
  0x38   :  { %318 = vmatpush2.msra.mxu1 %v138_v49  ;;  %248 = vmatprep.subr.mxu0 %v73_v50  ;;  %v379_v49 = vld [vmem:[%s1344_s4 + $0x38] sm:$0xff] }
  0x39   :  { %319 = vmatprep.subr.mxu1 %v137_v51  ;;  %249 = vmatpush2.msra.mxu0 %v72_v53  ;;  %v363_v50 = vld [vmem:[%s1345_s3 + $0x38] sm:$0xff]  ;;  %v378_v51 = vld [vmem:[%s1344_s4 + $0x30] sm:$0xff]  ;;  %v377_v53 = vld [vmem:[%s1344_s4 + $0x28] sm:$0xff] }
  0x3a   :  { %320 = vmatpush2.msra.mxu1 %v136_v54  ;;  %250 = vmatprep.subr.mxu0 %v71_v56  ;;  %v376_v56 = vld [vmem:[%s1344_s4 + $0x20] sm:$0xff] }
  0x3b   :  { %321 = vmatprep.subr.mxu1 %v135_v57  ;;  %251 = vmatpush2.msra.mxu0 %v70_v58  ;;  %v360_v57 = vld [vmem:[%s1345_s3 + $0x20] sm:$0xff]  ;;  %v375_v58 = vld [vmem:[%s1344_s4 + $0x18] sm:$0xff] }
  0x3c   :  { %322 = vmatpush2.msra.mxu1 %v134_v59  ;;  %252 = vmatprep.subr.mxu0 %v69_v60  ;;  %v359_v59 = vld [vmem:[%s1345_s3 + $0x18] sm:$0xff]  ;;  %v374_v60 = vld [vmem:[%s1344_s4 + $0x10] sm:$0xff] }
  0x3d   :  { %323 = vmatprep.subr.mxu1 %v133_v61  ;;  %253 = vmatpush2.msra.mxu0 %v68_v63  ;;  %v358_v61 = vld [vmem:[%s1345_s3 + $0x10] sm:$0xff]  ;;  %v357_v63 = vld [vmem:[%s1345_s3 + $0x8] sm:$0xff] }
  0x3e   :  { %324 = vmatpush2.msra.mxu1 %v132_v0  ;;  %254 = vmatprep.subr.mxu0 %v67_v2  ;;  %v372_v0 = vld [vmem:[%s1344_s4] sm:$0xff] }
  0x3f   :  { %325 = vmatprep.subr.mxu1 %v131_v3  ;;  %255 = vmatpush2.msra.mxu0 %v66_v4 }
  0x40   :  { %326 = vmatpush2.msra.mxu1 %v130_v5  ;;  %256 = vmatprep.subr.mxu0 %v65_v6 }
  0x41   :  { %327 = vmatprep.subr.mxu1 %v129_v7  ;;  %257 = vmatpush2.msra.mxu0 %v64_v9  ;;  %v536_v9 = vld [vmem:[%s1346_s5] sm:$0x3] }
  0x42   :  { %258 = vmatprep.mubr.f32.mxu0 %v188_v8  ;;  %328 = vmatpush2.msra.mxu1 %v128_v11 }
  0x43   :  { %329 = vmatprep.mubr.f32.mxu1 %v189_v10  ;;  %259 = vmatmul.mubr.f32.vlgmr.msra.gmra.mxu0 %v180_v62  ;;  %v373_v62 = vld [vmem:[%s1344_s4 + $0x8] sm:$0xff]  ;;  %v541_v10 = vrot.slane %v536_v9, %v164_v12 }
  0x44   :  { %330 = vmatmul.mubr.f32.vlgmr.msra.gmra.mxu1 %v187_v1  ;;  %458 = vmatprep.mubr.f32.mxu0 %v739_v34  ;;  %v356_v1 = vld [vmem:[%s1345_s3] sm:$0xff] }
  0x45   :  { %529 = vmatprep.mubr.f32.mxu1 %v739_v34  ;;  %410 = vmatprep.subr.mxu0 %v387_v31  ;;  %v577_v31 = vld [vmem:[%s1347_s6 + $0x8] sm:$0xff] }
  0x46   :  { %481 = vmatprep.subr.mxu1 %v371_v32  ;;  %411 = vmatpush1.msra.mxu0 %v386_v33  ;;  %v576_v32 = vld [vmem:[%s1347_s6] sm:$0xff] }
  0x47   :  { %482 = vmatpush1.msra.mxu1 %v370_v35  ;;  %412 = vmatprep.subr.mxu0 %v385_v36 }
  0x48   :  { %483 = vmatprep.subr.mxu1 %v369_v37  ;;  %413 = vmatpush1.msra.mxu0 %v384_v38 }
  0x49   :  { %484 = vmatpush1.msra.mxu1 %v368_v39  ;;  %414 = vmatprep.subr.mxu0 %v383_v40 }
  0x4a   :  { %485 = vmatprep.subr.mxu1 %v367_v42  ;;  %415 = vmatpush1.msra.mxu0 %v382_v43  ;;  %v13_v42 = vstv %s1348_s7 }
  0x4b   :  { %486 = vmatpush1.msra.mxu1 %v366_v44  ;;  %416 = vmatprep.subr.mxu0 %v381_v45  ;;  %14 = vst [vmem:[#allocation2] sm:$0x1] %v13_v42 }
  0x4c   :  { %487 = vmatprep.subr.mxu1 %v365_v46  ;;  %417 = vmatpush1.msra.mxu0 %v380_v47 }
  0x4d   :  { %488 = vmatpush1.msra.mxu1 %v364_v48  ;;  %418 = vmatprep.subr.mxu0 %v379_v49 }
  0x4e   :  { %489 = vmatprep.subr.mxu1 %v363_v50  ;;  %419 = vmatpush1.msra.mxu0 %v378_v51 }
  0x4f   :  { %490 = vmatpush1.msra.mxu1 %v362_v52  ;;  %420 = vmatprep.subr.mxu0 %v377_v53 }
  0x50   :  { %491 = vmatprep.subr.mxu1 %v361_v55  ;;  %421 = vmatpush1.msra.mxu0 %v376_v56 }
  0x51   :  { %492 = vmatpush1.msra.mxu1 %v360_v57  ;;  %422 = vmatprep.subr.mxu0 %v375_v58 }
  0x52   :  { %493 = vmatprep.subr.mxu1 %v359_v59  ;;  %423 = vmatpush1.msra.mxu0 %v374_v60  ;;  %v678_v46 = vld [vmem:[#allocation2] ss:$0 sm:$0xff] }
  0x53   :  { %494 = vmatpush1.msra.mxu1 %v358_v61  ;;  %424 = vmatprep.subr.mxu0 %v373_v62 }
  0x54   :  { %495 = vmatprep.subr.mxu1 %v357_v63  ;;  %425 = vmatpush1.msra.mxu0 %v372_v0 }
  0x55   :  { %496 = vmatpush1.msra.mxu1 %v356_v1  ;;  %689 = vmatprep.subr.mxu0 %v739_v34 }
 0x103   :  { %v260_v15 = vpop.f32.mrf.mxu0 }
 0x104   :  { %v261_v16 = vadd.f32 %v260_v15, %v165_v14  ;;  %v331_v17 = vpop.f32.mrf.mxu1 }
 0x105   :  { %v262_v22 = vpop.f32.mrf.mxu0 }
 0x106   :  { %v332_v18 = vadd.f32 %v331_v17, %v261_v16  ;;  %v263_v23 = vadd.f32 %v262_v22, %v169_v21  ;;  %v333_v24 = vpop.f32.mrf.mxu1  ;;  %v545_v21 = vrot.slane %v536_v9, %v168_v20  ;;  %v580_v20 = vld [vmem:[%s1347_s6 + $0x20] sm:$0xff] }
 0x108   :  { %v672_v19 = vmul.f32 -1.442695, %v332_v18  ;;  %v1185_v25 = vadd.f32 %v333_v24, %v263_v23 }
 0x10a   :  { %713 = vpow2.f32 %v672_v19  ;;  %v673_v2 = vmul.f32 -1.442695, %v1185_v25 }
 0x10b   :  { %715 = vtanh.f32 %v1185_v25 }
 0x117   :  { %v714_v26 = vpop.eup %713 }
 0x118   :  { %v339_v27 = vadd.f32 1.0, %v714_v26  ;;  %v716_v28 = vpop.eup %715 }
 0x11a   :  { %717 = vrcp.f32 %v339_v27  ;;  %v583_v27 = vld [vmem:[%s1347_s6 + $0x38] sm:$0xff] }
 0x127   :  { %v718_v29 = vpop.eup %717 }
 0x128   :  { %v349_v30 = vmul.f32 %v718_v29, %v716_v28  ;;  %v582_v28 = vld [vmem:[%s1347_s6 + $0x30] sm:$0xff]  ;;  %v579_v29 = vld [vmem:[%s1347_s6 + $0x18] sm:$0xff] }
 0x12a   :  { %564 = vrot.lane.b32.xlu1 %v349_v30, %s738_s1  ;;  %719 = vtanh.f32 %v349_v30  ;;  %v578_v30 = vld [vmem:[%s1347_s6 + $0x10] sm:$0xff] }
 0x12b   :  { %721 = vpow2.f32 %v673_v2 }
 0x137   :  { %v720_v54 = vpop.eup %719 }
 0x138   :  { %352 = vrot.lane.b32.xlu0 %v720_v54, %s738_s1  ;;  %v722_v3 = vpop.eup %721 }
 0x139   :  { %v346_v4 = vadd.f32 1.0, %v722_v3 }
 0x13b   :  { %723 = vrcp.f32 %v346_v4 }
 0x148   :  { %v724_v5 = vpop.eup %723 }
 0x19c   :  { %v565_v36 = vpop.permute.xlu1 %564 }
 0x1aa   :  { %v353_v6 = vpop.permute.xlu0 %352 }
 0x1ab   :  { %v355_v7 = vmul.f32 %v724_v5, %v353_v6 }
 0x1ad   :  { %389 = vrot.lane.b32.xlu0 %v355_v7, %s738_s1 }
 0x21f   :  { %v390_v8 = vpop.permute.xlu0 %389 }
 0x220   :  { %674 = vmatmul.mubr.msk.f32.vlgmr.msra.gmra.mxu0 %vm391_vm0, %v390_v8  ;;  %675 = vmatmul.mubr.msk.f32.vlgmr.msra.gmra.mxu1 %vm391_vm0, %v390_v8 }
 0x221   :  { %705 = vmatprep.mubr.msk.f32.mxu0 %vm740_vm1, %v739_v34  ;;  %690 = vmatpush3.msra.mxu0 %v583_v27 }
 0x222   :  { %691 = vmatprep.subr.mxu0 %v739_v34 }
 0x223   :  { %692 = vmatpush3.msra.mxu0 %v582_v28 }
 0x224   :  { %693 = vmatprep.subr.mxu0 %v739_v34 }
 0x225   :  { %694 = vmatpush3.msra.mxu0 %v581_v41 }
 0x226   :  { %695 = vmatprep.subr.mxu0 %v739_v34 }
 0x227   :  { %696 = vmatpush3.msra.mxu0 %v580_v20 }
 0x228   :  { %697 = vmatprep.subr.mxu0 %v739_v34 }
 0x229   :  { %698 = vmatpush3.msra.mxu0 %v579_v29 }
 0x22a   :  { %699 = vmatprep.subr.mxu0 %v739_v34 }
 0x22b   :  { %700 = vmatpush3.msra.mxu0 %v578_v30 }
 0x22c   :  { %701 = vmatprep.subr.mxu0 %v739_v34 }
 0x22d   :  { %702 = vmatpush3.msra.mxu0 %v577_v31 }
 0x22e   :  { %703 = vmatprep.subr.mxu0 %v739_v34 }
 0x22f   :  { %704 = vmatpush3.msra.mxu0 %v576_v32 }
 0x2e0   :  { %v460_v11 = vpop.f32.mrf.mxu0  ;;  %v531_v13 = vpop.f32.mrf.mxu1 }
 0x2e1   :  { %v532_v14 = vadd.f32 %v531_v13, %v460_v11 }
 0x2e2   :  { %v462_v17 = vpop.f32.mrf.mxu0  ;;  %v533_v18 = vpop.f32.mrf.mxu1 }
 0x2e3   :  { %v548_v15 = vadd.f32 %v541_v10, %v532_v14  ;;  %v534_v19 = vadd.f32 %v533_v18, %v462_v17 }
 0x2e5   :  { %v676_v16 = vmul.f32 -1.442695, %v548_v15  ;;  %v549_v22 = vadd.f32 %v545_v21, %v534_v19 }
 0x2e7   :  { %725 = vpow2.f32 %v676_v16  ;;  %v677_v33 = vmul.f32 -1.442695, %v549_v22 }
 0x2e8   :  { %727 = vtanh.f32 %v549_v22 }
 0x2f4   :  { %v726_v23 = vpop.eup %725 }
 0x2f5   :  { %v553_v24 = vadd.f32 1.0, %v726_v23  ;;  %v728_v25 = vpop.eup %727 }
 0x2f7   :  { %729 = vrcp.f32 %v553_v24 }
 0x2f8   :  { %731 = vpow2.f32 %v677_v33 }
 0x304   :  { %v730_v26 = vpop.eup %729 }
 0x305   :  { %v568_v12 = vmul.f32 %v730_v26, %v728_v25  ;;  %v732_v35 = vpop.eup %731  ;;  %v567_v38 = vmul.f32 %v730_v26, %v565_v36 }
 0x306   :  { %v560_v37 = vadd.f32 1.0, %v732_v35 }
 0x307   :  { %570 = vrot.lane.b32.xlu1 %v568_v12, %s738_s1 }
 0x308   :  { %733 = vrcp.f32 %v560_v37 }
 0x315   :  { %v734_v43 = vpop.eup %733 }
 0x379   :  { %v571_v39 = vpop.permute.xlu1 %570 }
 0x37a   :  { %v573_v40 = vadd.f32 %v571_v39, %v567_v38 }
 0x37c   :  { %735 = vtanh.f32 %v573_v40 }
 0x389   :  { %v736_v44 = vpop.eup %735 }
 0x38a   :  { %v575_v45 = vmul.f32 %v736_v44, %v734_v43 }
 0x38c   :  { %592 = vrot.lane.b32.xlu0 %v575_v45, %s738_s1 }
 0x3fe   :  { %v593_v34 = vpop.permute.xlu0 %592 }
 0x3ff   :  { %706 = vmatmul.mubr.msk.f32.vlgmr.msra.gmra.mxu0 %vm391_vm0, %v593_v34 }
 0x4bf   :  { %v662_v47 = vpop.f32.mrf.mxu0 }
 0x4c0   :  { %v663_v48 = vadd.f32 %v678_v46, %v662_v47 }
 0x4c1   :  { %v707_v49 = vpop.f32.mrf.mxu0 }
 0x4c2   :  { %667 = vst.msk [vmem:[%s1349_s8] sm:$0x3] %vm666_vm2, %v663_v48 }

// kernel: lsdnn_forward.4
= control target key start
LH: loop header
LB: loop body
LE: loop exit
PB: predicated region body
PF: predicated region fallthrough
CT: control target
= control target key end

     0   :  { %20 = vsyncpa [#allocation3], 0  ;;  %s6339_s0 = inlined_call_operand.hbm [shape: f32[2,300], index: 0, kind: input, shape index: {}]   ;;  %s6340_s1 = inlined_call_operand.hbm [shape: f32[300,256], index: 1, kind: input, shape index: {}]   ;;  %s6341_s2 = inlined_call_operand.hbm [shape: f32[1,256], index: 2, kind: input, shape index: {}]   ;;  %s6342_s3 = inlined_call_operand.vmem [shape: f32[3,16,1], index: 3, kind: input, shape index: {}]   ;;  %s6343_s4 = inlined_call_operand.vmem [shape: f32[16,1], index: 4, kind: input, shape index: {}]   ;;  %s6344_s5 = inlined_call_operand.vmem [shape: f32[16,1], index: 5, kind: input, shape index: {}]   ;;  %s6345_s6 = inlined_call_operand.hbm [shape: f32[3,16,16], index: 6, kind: input, shape index: {}]   ;;  %s6346_s7 = inlined_call_operand.vmem [shape: f32[16,1], index: 7, kind: input, shape index: {}]   ;;  %s6347_s8 = inlined_call_operand.vmem [shape: f32[16,1], index: 8, kind: input, shape index: {}]   ;;  %s6348_s9 = inlined_call_operand.vmem [shape: f32[3,64,16], index: 9, kind: input, shape index: {}]   ;;  %s6349_s10 = inlined_call_operand.vmem [shape: f32[64,1], index: 10, kind: input, shape index: {}]   ;;  %s6350_s11 = inlined_call_operand.vmem [shape: f32[64,1], index: 11, kind: input, shape index: {}]   ;;  %s6351_s12 = inlined_call_operand.hbm [shape: f32[3,64,64], index: 12, kind: input, shape index: {}]   ;;  %s6352_s13 = inlined_call_operand.vmem [shape: f32[64,1], index: 13, kind: input, shape index: {}]   ;;  %s6353_s14 = inlined_call_operand.vmem [shape: f32[64,1], index: 14, kind: input, shape index: {}]   ;;  %s6354_s15 = inlined_call_operand.vmem [shape: f32[2,64,256], index: 15, kind: output, shape index: {}]  }
   0x1   :  { %21 = vsyncpa [#allocation5], 0 }
   0x2   :  { %22 = vsyncpa [#allocation8], 0  ;;  %s4445_s18 = smov [#allocation4]  }
   0x3   :  { %s38_s19 = sshll.u32 %s4445_s18, 4  ;;  %s39_s19 = int_to_ptr.vmem [resolvable:$true] %s38_s19 }
   0x4   :  { %s4347_s20 = scalar_lea.vmem %s39_s19, 9728  ;;  %p4352_p1 = scmp.lt.s32.totalorder %s39_s19, %s39_s19 }
   0x5   :  { %p4348_p0 = scmp.ne.s32.totalorder %s39_s19, %s4347_s20  ;;  %p4353_p2 = scmp.lt.s32.totalorder %s4347_s20, %s4347_s20 }
   0x7   :  { %p4354_p3 = por %p4353_p2, %p4352_p1 }
   0x9   :  { %p4355_p4 = pnand %p4354_p3, %p4348_p0 }
   0xb   :  { %4358 = shalt.err (!%p4355_p4)
}
   0xc   :  { %s4446_s21 = smov 256   ;;  %s4447_s22 = smov 16  }
   0xd   :  { %44 = dma.hbm_to_vmem [thread:$0]  %s6340_s1, 9728, %s39_s19, [#allocation5], %s4446_s21, %s4446_s21, %s4447_s22  }
   0xe   :  { %s4448_s25 = smov [#allocation7]  }
   0xf   :  { %s66_s26 = sshll.u32 %s4448_s25, 4  ;;  %s67_s26 = int_to_ptr.vmem [resolvable:$true] %s66_s26 }
  0x10   :  { %s4367_s27 = scalar_lea.vmem %s67_s26, 768  ;;  %p4372_p6 = scmp.lt.s32.totalorder %s67_s26, %s67_s26 }
  0x11   :  { %p4368_p5 = scmp.ne.s32.totalorder %s67_s26, %s4367_s27  ;;  %p4373_p7 = scmp.lt.s32.totalorder %s4367_s27, %s4367_s27 }
  0x13   :  { %p4374_p8 = por %p4373_p7, %p4372_p6 }
  0x15   :  { %p4375_p9 = pnand %p4374_p8, %p4368_p5 }
  0x17   :  { %4378 = shalt.err (!%p4375_p9)
}
  0x18   :  { %s4449_s28 = smov 128   ;;  %s4450_s29 = smov 8  }
  0x19   :  { %72 = dma.hbm_to_vmem [thread:$0]  %s6345_s6, 768, %s67_s26, [#allocation8], %s4449_s28, %s4449_s28, %s4450_s29  }
  0x1a   :  { %s4451_s1 = smov [#allocation2]   ;;  %s4452_s18 = smov [#allocation6]  }
  0x1b   :  { %s29_s17 = sshll.u32 %s4451_s1, 4  ;;  %s51_s19 = sshll.u32 %s4452_s18, 4  ;;  %s30_s17 = int_to_ptr.vmem [resolvable:$true] %s29_s17  ;;  %s52_s19 = int_to_ptr.vmem [resolvable:$true] %s51_s19 }
  0x1c   :  { %s4387_s20 = scalar_lea.vmem %s30_s17, 96  ;;  %p4392_p11 = scmp.lt.s32.totalorder %s30_s17, %s30_s17 }
  0x1d   :  { %p4388_p10 = scmp.ne.s32.totalorder %s30_s17, %s4387_s20  ;;  %p4393_p12 = scmp.lt.s32.totalorder %s4387_s20, %s4387_s20 }
  0x1f   :  { %p4394_p13 = por %p4393_p12, %p4392_p11 }
  0x21   :  { %p4395_p0 = pnand %p4394_p13, %p4388_p10 }
  0x23   :  { %4398 = shalt.err (!%p4395_p0)
}
  0x24   :  { %32 = dma.hbm_to_vmem [thread:$0]  %s6339_s0, 96, %s30_s17, [#allocation3]  }
  0x25   :  { %s4407_s23 = scalar_lea.vmem %s52_s19, 32  ;;  %p4412_p2 = scmp.lt.s32.totalorder %s52_s19, %s52_s19 }
  0x26   :  { %p4408_p1 = scmp.ne.s32.totalorder %s52_s19, %s4407_s23  ;;  %p4413_p3 = scmp.lt.s32.totalorder %s4407_s23, %s4407_s23 }
  0x28   :  { %p4414_p4 = por %p4413_p3, %p4412_p2 }
  0x2a   :  { %p4415_p5 = pnand %p4414_p4, %p4408_p1 }
  0x2c   :  { %4418 = shalt.err (!%p4415_p5)
}
  0x2d   :  { %54 = dma.hbm_to_vmem [thread:$0]  %s6341_s2, 32, %s52_s19, [#allocation5]  }
  0x2e   :  { %s4453_s25 = smov [#allocation9]  }
  0x2f   :  { %s88_s26 = sshll.u32 %s4453_s25, 4  ;;  %s89_s26 = int_to_ptr.vmem [resolvable:$true] %s88_s26 }
  0x30   :  { %s4427_s27 = scalar_lea.vmem %s89_s26, 3072  ;;  %p4432_p7 = scmp.lt.s32.totalorder %s89_s26, %s89_s26 }
  0x31   :  { %p4428_p6 = scmp.ne.s32.totalorder %s89_s26, %s4427_s27  ;;  %p4433_p8 = scmp.lt.s32.totalorder %s4427_s27, %s4427_s27 }
  0x33   :  { %p4434_p9 = por %p4433_p8, %p4432_p7 }
  0x35   :  { %p4435_p10 = pnand %p4434_p9, %p4428_p6 }
  0x37   :  { %4438 = shalt.err (!%p4435_p10)
}
  0x38   :  { %94 = dma.hbm_to_vmem [thread:$0]  %s6351_s12, 3072, %s89_s26, [#allocation8], %s4449_s28, %s4449_s28, %s4450_s29  }
  0x39   :  { %4439 = dma.done.wait [#allocation3], 96  }
  0x3a   :  { %4440 = vsyncadd [#allocation3], 4294967200 }
  0x3b   :  { %4441 = dma.done.wait [#allocation5], 9760  }
  0x3c   :  { %4442 = vsyncadd [#allocation5], 4294957536 }
  0x3d   :  { %4443 = dma.done.wait [#allocation8], 3840  }
  0x3e   :  { %4444 = vsyncadd [#allocation8], 4294963456  ;;  %v6355_v0 = vmov 0.0   ;;  %v4455_v1 = vmov 0   ;;  %v146_v2 = vld [vmem:[#allocation4 + $0xf8] sm:$0xff]  ;;  %v145_v3 = vld [vmem:[#allocation4 + $0xf0] sm:$0xff]  ;;  %v193_v19 = vlaneseq }
  0x3f   :  { %367 = vmatprep.mubr.f32.mxu1 %v6355_v0  ;;  %4336 = vset.pattern.permute.xlu0 %v4455_v1  ;;  %v144_v4 = vld [vmem:[#allocation4 + $0xe8] sm:$0xff]  ;;  %v143_v5 = vld [vmem:[#allocation4 + $0xe0] sm:$0xff]  ;;  %v142_v6 = vld [vmem:[#allocation4 + $0xd8] sm:$0xff]  ;;  %v4456_v20 = vmov 1983009808   ;;  %vm225_vm0 = vcmask 1043456  }
  0x40   :  { %4337 = vset.pattern.permute.xlu1 %v4455_v1  ;;  %232 = vmatprep.subr.mxu0 %v146_v2  ;;  %v141_v7 = vld [vmem:[#allocation4 + $0xd0] sm:$0xff]  ;;  %v140_v8 = vld [vmem:[#allocation4 + $0xc8] sm:$0xff]  ;;  %v139_v9 = vld [vmem:[#allocation4 + $0xc0] sm:$0xff]  ;;  %v206_v21 = vunpack.c.l.s4 %v4456_v20  ;;  %v4562_v28 = vshrl.u32 %v193_v19, 7  ;;  %vm222_vm1 = vcmask 359424   ;;  %s4457_s21 = smov 1  }
  0x41   :  { %233 = vmatpush1.msra.mxu0 %v145_v3  ;;  %v138_v10 = vld [vmem:[#allocation4 + $0xb8] sm:$0xff]  ;;  %v137_v11 = vld [vmem:[#allocation4 + $0xb0] sm:$0xff]  ;;  %v136_v12 = vld [vmem:[#allocation4 + $0xa8] sm:$0xff]  ;;  %s4458_s22 = smov 127   ;;  %vm559_vm6 = vcmask 130048   ;;  %vm1632_vm9 = vcmask 523264  }
  0x42   :  { %234 = vmatprep.subr.mxu0 %v144_v4  ;;  %v135_v13 = vld [vmem:[#allocation4 + $0xa0] sm:$0xff]  ;;  %v134_v14 = vld [vmem:[#allocation4 + $0x98] sm:$0xff]  ;;  %v133_v15 = vld [vmem:[#allocation4 + $0x90] sm:$0xff]  ;;  %v207_v29 = vunpack.c.0.s8 %v206_v21 }
  0x43   :  { %235 = vmatpush1.msra.mxu0 %v143_v5  ;;  %v132_v16 = vld [vmem:[#allocation4 + $0x88] sm:$0xff]  ;;  %v131_v17 = vld [vmem:[#allocation4 + $0x80] sm:$0xff]  ;;  %v130_v18 = vld [vmem:[#allocation4 + $0x78] sm:$0xff] }
  0x44   :  { %236 = vmatprep.subr.mxu0 %v142_v6  ;;  %v129_v22 = vld [vmem:[#allocation4 + $0x70] sm:$0xff]  ;;  %v128_v23 = vld [vmem:[#allocation4 + $0x68] sm:$0xff]  ;;  %v127_v24 = vld [vmem:[#allocation4 + $0x60] sm:$0xff]  ;;  %v210_v40 = vsub.s32 %v207_v29, %v4562_v28 }
  0x45   :  { %237 = vmatpush1.msra.mxu0 %v141_v7  ;;  %v190_v25 = vld [vmem:[#allocation4 + $0x258] sm:$0xf]  ;;  %v189_v27 = vld [vmem:[#allocation4 + $0x250] sm:$0xf]  ;;  %v188_v31 = vld [vmem:[#allocation4 + $0x248] sm:$0xff] }
  0x46   :  { %238 = vmatprep.subr.mxu0 %v140_v8  ;;  %v126_v26 = vld [vmem:[#allocation4 + $0x58] sm:$0xff]  ;;  %4059 = vmatprep.subr.msk.mxu1 %vm225_vm0, %v190_v25  ;;  %v125_v30 = vld [vmem:[#allocation4 + $0x50] sm:$0xff]  ;;  %v187_v32 = vld [vmem:[#allocation4 + $0x240] sm:$0xff] }
  0x47   :  { %239 = vmatpush1.msra.mxu0 %v139_v9  ;;  %4060 = vmatpush1.msk.msra.mxu1 %vm225_vm0, %v189_v27  ;;  %v124_v33 = vld [vmem:[#allocation4 + $0x48] sm:$0xff]  ;;  %v186_v34 = vld [vmem:[#allocation4 + $0x238] sm:$0xff]  ;;  %v123_v35 = vld [vmem:[#allocation4 + $0x40] sm:$0xff] }
  0x48   :  { %240 = vmatprep.subr.mxu0 %v138_v10  ;;  %325 = vmatprep.subr.mxu1 %v188_v31  ;;  %v185_v36 = vld [vmem:[#allocation4 + $0x230] sm:$0xff]  ;;  %v184_v37 = vld [vmem:[#allocation4 + $0x228] sm:$0xff]  ;;  %v122_v38 = vld [vmem:[#allocation4 + $0x38] sm:$0xff] }
  0x49   :  { %241 = vmatpush1.msra.mxu0 %v137_v11  ;;  %326 = vmatpush1.msra.mxu1 %v187_v32  ;;  %v183_v39 = vld [vmem:[#allocation4 + $0x220] sm:$0xff]  ;;  %v121_v41 = vld [vmem:[#allocation4 + $0x30] sm:$0xff]  ;;  %v182_v42 = vld [vmem:[#allocation4 + $0x218] sm:$0xff] }
  0x4a   :  { %242 = vmatprep.subr.mxu0 %v136_v12  ;;  %327 = vmatprep.subr.mxu1 %v186_v34  ;;  %v120_v43 = vld [vmem:[#allocation4 + $0x28] sm:$0xff]  ;;  %v181_v44 = vld [vmem:[#allocation4 + $0x210] sm:$0xff]  ;;  %v119_v45 = vld [vmem:[#allocation4 + $0x20] sm:$0xff] }
  0x4b   :  { %243 = vmatpush1.msra.mxu0 %v135_v13  ;;  %328 = vmatpush1.msra.mxu1 %v185_v36  ;;  %v180_v46 = vld [vmem:[#allocation4 + $0x208] sm:$0xff]  ;;  %v114_v47 = vld [vmem:[#allocation2] sm:$0x3f]  ;;  %v179_v51 = vld [vmem:[#allocation4 + $0x200] sm:$0xff] }
  0x4c   :  { %244 = vmatprep.subr.mxu0 %v134_v14  ;;  %329 = vmatprep.subr.mxu1 %v184_v37  ;;  %v118_v48 = vld [vmem:[#allocation4 + $0x18] sm:$0xff]  ;;  %v204_v49 = vcombine.high %v114_v47, %v114_v47  ;;  %v4565_v50 = vrot.slane %v114_v47, %v210_v40  ;;  %v117_v52 = vld [vmem:[#allocation4 + $0x10] sm:$0xff]  ;;  %v116_v53 = vld [vmem:[#allocation4 + $0x8] sm:$0xff] }
  0x4d   :  { %245 = vmatpush1.msra.mxu0 %v133_v15  ;;  %330 = vmatpush1.msra.mxu1 %v183_v39  ;;  %v115_v56 = vld [vmem:[#allocation4] sm:$0xff]  ;;  %v178_v58 = vld [vmem:[#allocation4 + $0x1f8] sm:$0xff]  ;;  %v4577_v59 = vld [vmem:[%s6342_s3 + $0x10] sm:$0xff] }
  0x4e   :  { %246 = vmatprep.subr.mxu0 %v132_v16  ;;  %331 = vmatprep.subr.mxu1 %v182_v42  ;;  %v218_v54 = vrot.slane %v204_v49, %v210_v40  ;;  %v219_v55 = vcombine.high %v4565_v50, %v4565_v50  ;;  %v4572_v57 = vld [vmem:[%s6342_s3 + $0x8] sm:$0xff]  ;;  %v177_v60 = vld [vmem:[#allocation4 + $0x1f0] sm:$0xff]  ;;  %v174_v1 = vld [vmem:[#allocation4 + $0x1d8] sm:$0xff] }
  0x4f   :  { %247 = vmatpush1.msra.mxu0 %v131_v17  ;;  %332 = vmatpush1.msra.mxu1 %v181_v44  ;;  %v176_v61 = vld [vmem:[#allocation4 + $0x1e8] sm:$0xff]  ;;  %v175_v62 = vld [vmem:[#allocation4 + $0x1e0] sm:$0xff]  ;;  %v4584_v63 = vld [vmem:[%s6342_s3 + $0x18] sm:$0xff] }
  0x50   :  { %248 = vmatprep.subr.mxu0 %v130_v18  ;;  %333 = vmatprep.subr.mxu1 %v180_v46  ;;  %v173_v2 = vld [vmem:[#allocation4 + $0x1d0] sm:$0xff]  ;;  %v172_v3 = vld [vmem:[#allocation4 + $0x1c8] sm:$0xff]  ;;  %v171_v4 = vld [vmem:[#allocation4 + $0x1c0] sm:$0xff] }
  0x51   :  { %249 = vmatpush1.msra.mxu0 %v129_v22  ;;  %334 = vmatpush1.msra.mxu1 %v179_v51  ;;  %v4591_v5 = vld [vmem:[%s6342_s3] sm:$0xff]  ;;  %v169_v7 = vld [vmem:[#allocation4 + $0x1b0] sm:$0xff]  ;;  %v168_v8 = vld [vmem:[#allocation4 + $0x1a8] sm:$0xff] }
  0x52   :  { %250 = vmatprep.subr.mxu0 %v128_v23  ;;  %296 = vmatprep.mubr.f32.mxu0 %v219_v55  ;;  %v170_v6 = vld [vmem:[#allocation4 + $0x1b8] sm:$0xff]  ;;  %v167_v9 = vld [vmem:[#allocation4 + $0x1a0] sm:$0xff]  ;;  %v165_v12 = vld [vmem:[#allocation4 + $0x190] sm:$0xff]  ;;  %v4653_v55 = vand.u32 127, %v193_v19 }
  0x53   :  { %251 = vmatpush1.msra.mxu0 %v127_v24  ;;  %4061 = vmatmul.mubr.msk.f32.vlgmr.msra.gmra.mxu1 %vm222_vm1, %v218_v54  ;;  %v4597_v10 = vld [vmem:[%s6342_s3 + $0x28] sm:$0xff]  ;;  %v166_v11 = vld [vmem:[#allocation4 + $0x198] sm:$0xff]  ;;  %v161_v16 = vld [vmem:[#allocation4 + $0x170] sm:$0xff] }
  0x54   :  { %252 = vmatprep.subr.mxu0 %v126_v26  ;;  %416 = vperm.xlu0 %4336, %v4572_v57   ;;  %v164_v13 = vld [vmem:[#allocation4 + $0x188] sm:$0xff]  ;;  %v163_v14 = vld [vmem:[#allocation4 + $0x180] sm:$0xff]  ;;  %v162_v15 = vld [vmem:[#allocation4 + $0x178] sm:$0xff]  ;;  %vm404_vm2 = vcmp.lt.s32.totalorder %v4653_v55, 127  ;;  %vm393_vm4 = vcmp.lt.s32.totalorder %v4653_v55, 1  ;;  %vm387_vm5 = vcmp.eq.s32.totalorder %v4653_v55, 0 }
  0x55   :  { %253 = vmatpush1.msra.mxu0 %v125_v30  ;;  %433 = vperm.xlu1 %4337, %v4577_v59   ;;  %v160_v17 = vld [vmem:[#allocation4 + $0x168] sm:$0xff]  ;;  %v159_v18 = vld [vmem:[#allocation4 + $0x160] sm:$0xff]  ;;  %v158_v20 = vld [vmem:[#allocation4 + $0x158] sm:$0xff] }
  0x56   :  { %254 = vmatprep.subr.mxu0 %v124_v33  ;;  %630 = vmatprep.mubr.f32.mxu1 %v6355_v0  ;;  %v157_v21 = vld [vmem:[#allocation4 + $0x150] sm:$0xff]  ;;  %v156_v22 = vld [vmem:[#allocation4 + $0x148] sm:$0xff]  ;;  %v155_v23 = vld [vmem:[#allocation4 + $0x140] sm:$0xff]  ;;  %v4603_v33 = vsub.s32 0, %v4562_v28 }
  0x57   :  { %255 = vmatpush1.msra.mxu0 %v123_v35  ;;  %v154_v24 = vld [vmem:[#allocation4 + $0x138] sm:$0xff]  ;;  %v153_v25 = vld [vmem:[#allocation4 + $0x130] sm:$0xff]  ;;  %v152_v26 = vld [vmem:[#allocation4 + $0x128] sm:$0xff]  ;;  %v4606_v35 = vsub.s32 1, %v4562_v28 }
  0x58   :  { %256 = vmatprep.subr.mxu0 %v122_v38  ;;  %438 = vperm.xlu0 %4336, %v4584_v63   ;;  %v151_v27 = vld [vmem:[#allocation4 + $0x120] sm:$0xff]  ;;  %v150_v29 = vld [vmem:[#allocation4 + $0x118] sm:$0xff]  ;;  %v149_v30 = vld [vmem:[#allocation4 + $0x110] sm:$0xff] }
  0x59   :  { %257 = vmatpush1.msra.mxu0 %v121_v41  ;;  %v148_v31 = vld [vmem:[#allocation4 + $0x108] sm:$0xff]  ;;  %v147_v32 = vld [vmem:[#allocation4 + $0x100] sm:$0xff]  ;;  %vm4720_vm7 = vmneg %vm387_vm5 }
  0x5a   :  { %258 = vmatprep.subr.mxu0 %v120_v43  ;;  %v191_v34 = vld [vmem:[#allocation6] sm:$0x3]  ;;  %v4621_v28 = vld [vmem:[%s6343_s4 + $0x8] sm:$0xff] }
  0x5b   :  { %259 = vmatpush1.msra.mxu0 %v119_v45  ;;  %v196_v36 = vrot.slane %v191_v34, %v4603_v33  ;;  %v200_v37 = vrot.slane %v191_v34, %v4606_v35  ;;  %v4636_v49 = vld [vmem:[%s6342_s3 + $0x20] sm:$0xff] }
  0x5c   :  { %260 = vmatprep.subr.mxu0 %v118_v48  ;;  %411 = vperm.xlu0 %4336, %v4591_v5   ;;  %v4629_v48 = vld [vmem:[%s6344_s5 + $0x8] sm:$0xff]  ;;  %v4649_v51 = vld [vmem:[%s6344_s5] sm:$0xff] }
  0x5d   :  { %261 = vmatpush1.msra.mxu0 %v117_v52 }
  0x5e   :  { %262 = vmatprep.subr.mxu0 %v116_v53 }
  0x5f   :  { %263 = vmatpush1.msra.mxu0 %v115_v56 }
  0x60   :  { %264 = vmatprep.subr.mxu0 %v178_v58  ;;  %464 = vperm.xlu0 %4336, %v4597_v10  }
  0x61   :  { %265 = vmatpush2.msra.mxu0 %v177_v60 }
  0x62   :  { %266 = vmatprep.subr.mxu0 %v176_v61  ;;  %v4656_v61 = vadd.s32 128, %v4653_v55  ;;  %v3315_v55 = vld [vmem:[#allocation9 + $0x18] sm:$0xff] }
  0x63   :  { %267 = vmatpush2.msra.mxu0 %v175_v62 }
  0x64   :  { %268 = vmatprep.subr.mxu0 %v174_v1  ;;  %vm399_vm3 = vcmp.eq.s32.totalorder %v4656_v61, 255 }
  0x65   :  { %269 = vmatpush2.msra.mxu0 %v173_v2  ;;  %vm4736_vm8 = vmneg %vm399_vm3 }
  0x66   :  { %270 = vmatprep.subr.mxu0 %v172_v3 }
  0x67   :  { %271 = vmatpush2.msra.mxu0 %v171_v4 }
  0x68   :  { %272 = vmatprep.subr.mxu0 %v170_v6 }
  0x69   :  { %273 = vmatpush2.msra.mxu0 %v169_v7 }
  0x6a   :  { %274 = vmatprep.subr.mxu0 %v168_v8 }
  0x6b   :  { %275 = vmatpush2.msra.mxu0 %v167_v9 }
  0x6c   :  { %276 = vmatprep.subr.mxu0 %v166_v11 }
  0x6d   :  { %277 = vmatpush2.msra.mxu0 %v165_v12 }
  0x6e   :  { %278 = vmatprep.subr.mxu0 %v164_v13 }
  0x6f   :  { %279 = vmatpush2.msra.mxu0 %v163_v14 }
  0x70   :  { %280 = vmatprep.subr.mxu0 %v162_v15 }
  0x71   :  { %281 = vmatpush2.msra.mxu0 %v161_v16 }
  0x72   :  { %282 = vmatprep.subr.mxu0 %v160_v17 }
  0x73   :  { %283 = vmatpush2.msra.mxu0 %v159_v18 }
  0x74   :  { %284 = vmatprep.subr.mxu0 %v158_v20 }
  0x75   :  { %285 = vmatpush2.msra.mxu0 %v157_v21 }
  0x76   :  { %286 = vmatprep.subr.mxu0 %v156_v22 }
  0x77   :  { %287 = vmatpush2.msra.mxu0 %v155_v23 }
  0x78   :  { %288 = vmatprep.subr.mxu0 %v154_v24 }
  0x79   :  { %289 = vmatpush2.msra.mxu0 %v153_v25 }
  0x7a   :  { %290 = vmatprep.subr.mxu0 %v152_v26 }
  0x7b   :  { %291 = vmatpush2.msra.mxu0 %v151_v27 }
  0x7c   :  { %292 = vmatprep.subr.mxu0 %v150_v29 }
  0x7d   :  { %293 = vmatpush2.msra.mxu0 %v149_v30 }
  0x7e   :  { %294 = vmatprep.subr.mxu0 %v148_v31 }
  0x7f   :  { %295 = vmatpush2.msra.mxu0 %v147_v32 }
  0x80   :  { %297 = vmatmul.mubr.f32.vlgmr.msra.gmra.mxu0 %v4565_v50  ;;  %v4643_v50 = vld [vmem:[%s6343_s4] sm:$0xff] }
  0x81   :  { %1132 = vmatprep.mubr.f32.mxu0 %v6355_v0 }
  0xcf   :  { %v417_v52 = vpop.permute.xlu0 %416 }
  0xd0   :  { %v434_v56 = vpop.permute.xlu1 %433 }
  0xd3   :  { %v439_v53 = vpop.permute.xlu0 %438 }
  0xd7   :  { %v412_v54 = vpop.permute.xlu0 %411 }
  0xdb   :  { %v465_v58 = vpop.permute.xlu0 %464 }
 0x113   :  { %v369_v39 = vpop.f32.mrf.mxu1 }
 0x115   :  { %v371_v44 = vpop.f32.mrf.mxu1 }
 0x140   :  { %v298_v38 = vpop.f32.mrf.mxu0 }
 0x141   :  { %v299_v40 = vadd.f32 %v298_v38, %v196_v36 }
 0x142   :  { %v300_v41 = vpop.f32.mrf.mxu0 }
 0x143   :  { %v370_v42 = vadd.f32 %v369_v39, %v299_v40  ;;  %v301_v43 = vadd.f32 %v300_v41, %v200_v37 }
 0x145   :  { %v4610_v45 = vmax.f32 %v370_v42, 0.0  ;;  %v372_v46 = vadd.f32 %v371_v44, %v301_v43 }
 0x147   :  { %v4612_v47 = vmax.f32 %v372_v46, 0.0  ;;  %389 = vrot.lane.b32.xlu1 %v4610_v45, %s4457_s21  ;;  %v444_v7 = vrot.slane %v4610_v45, %v4603_v33 }
 0x149   :  { %402 = vrot.lane.b32.xlu0 %v4612_v47, %s4458_s22  ;;  %v448_v3 = vrot.slane %v4612_v47, %v4603_v33  ;;  %v451_v18 = vmul.f32 %v444_v7, %v439_v53  ;;  %v449_v37 = vmul.f32 %v444_v7, %v434_v56  ;;  %v4697_v7 = vld [vmem:[%s6346_s7] sm:$0xff] }
 0x14a   :  { %6372 = vst [vmem:[#allocation13_spill] sm:$0xff] %v4697_v7 }
 0x14b   :  { %400 = vrot.lane.b32.xlu1 %v4610_v45, %s4458_s22  ;;  %v452_v16 = vmul.f32 %v448_v3, %v439_v53  ;;  %v450_v32 = vmul.f32 %v448_v3, %v434_v56 }
 0x14d   :  { %492 = vperm.xlu0 %4336, %v4621_v28  }
 0x14f   :  { %391 = vrot.lane.b32.xlu1 %v4612_v47, %s4457_s21 }
 0x151   :  { %508 = vperm.xlu0 %4336, %v4629_v48  }
 0x153   :  { %459 = vperm.xlu1 %4337, %v4636_v49  }
 0x157   :  { %487 = vperm.xlu1 %4337, %v4643_v50  }
 0x15b   :  { %503 = vperm.xlu1 %4337, %v4649_v51  }
 0x1b9   :  { %v390_v60 = vpop.permute.xlu1 %389 }
 0x1bb   :  { %v403_v62 = vpop.permute.xlu0 %402 }
 0x1bd   :  { %v401_v1 = vpop.permute.xlu1 %400 }
 0x1be   :  { %v406_v2 = vsel %vm404_vm2, %v403_v62, %v401_v1  ;;  %v405_v4 = vsel %vm404_vm2, %v401_v1, %v403_v62 }
 0x1bf   :  { %v408_v19 = vsel %vm399_vm3, 0.0, %v406_v2  ;;  %v470_v14 = vrot.slane %v405_v4, %v4603_v33  ;;  %v522_v4 = vld [vmem:[#allocation7 + $0x10] sm:$0xff] }
 0x1c0   :  { %v474_v11 = vrot.slane %v408_v19, %v4603_v33 }
 0x1c1   :  { %v392_v6 = vpop.permute.xlu1 %391  ;;  %v477_v23 = vmul.f32 %v470_v14, %v465_v58 }
 0x1c2   :  { %v394_v8 = vsel %vm393_vm4, %v390_v60, %v392_v6  ;;  %v395_v9 = vsel %vm393_vm4, %v392_v6, %v390_v60  ;;  %v478_v22 = vmul.f32 %v474_v11, %v465_v58  ;;  %v523_v6 = vld [vmem:[#allocation7 + $0x18] sm:$0xff] }
 0x1c3   :  { %v396_v12 = vsel %vm387_vm5, 0.0, %v395_v9  ;;  %v426_v13 = vrot.slane %v394_v8, %v4603_v33  ;;  %v4702_v8 = vld [vmem:[%s6346_s7 + $0x8] sm:$0xff]  ;;  %v4709_v9 = vld [vmem:[%s6347_s8] sm:$0xff] }
 0x1c4   :  { %v422_v15 = vrot.slane %v396_v12, %v4603_v33  ;;  %6373 = vst [vmem:[#allocation14_spill] sm:$0xff] %v4702_v8  ;;  %6374 = vst [vmem:[#allocation15_spill] sm:$0xff] %v4709_v9 }
 0x1c5   :  { %v430_v17 = vmul.f32 %v426_v13, %v417_v52  ;;  %v428_v27 = vmul.f32 %v426_v13, %v412_v54  ;;  %v6376_v13 = vmov 0 }
 0x1c6   :  { %v429_v20 = vmul.f32 %v422_v15, %v417_v52  ;;  %v427_v30 = vmul.f32 %v422_v15, %v412_v54  ;;  %v6377_v13 = vsel %vm4720_vm7, 4294967295, %v6376_v13 }
 0x1c7   :  { %v456_v21 = vadd.f32 %v452_v16, %v430_v17  ;;  %v454_v41 = vadd.f32 %v450_v32, %v428_v27  ;;  %6378 = vst [vmem:[#allocation17_spill] sm:$0xff] %v6377_v13 }
 0x1c8   :  { %v493_v24 = vpop.permute.xlu0 %492  ;;  %v455_v25 = vadd.f32 %v451_v18, %v429_v20  ;;  %v453_v46 = vadd.f32 %v449_v37, %v427_v30  ;;  %v526_v37 = vld [vmem:[#allocation7 + $0x28] sm:$0xff] }
 0x1c9   :  { %v482_v26 = vadd.f32 %v478_v22, %v456_v21  ;;  %v519_v22 = vld [vmem:[#allocation7] sm:$0xff] }
 0x1ca   :  { %v481_v29 = vadd.f32 %v477_v23, %v455_v25  ;;  %v6379_v23 = vmov 0 }
 0x1cb   :  { %v498_v31 = vmul.f32 %v493_v24, %v482_v26  ;;  %v6380_v23 = vsel %vm4736_vm8, 4294967295, %v6379_v23 }
 0x1cc   :  { %v497_v34 = vmul.f32 %v493_v24, %v481_v29  ;;  %v509_v36 = vpop.permute.xlu0 %508  ;;  %6381 = vst [vmem:[#allocation18_spill] sm:$0xff] %v6380_v23  ;;  %v520_v29 = vld [vmem:[#allocation7 + $0x8] sm:$0xff] }
 0x1cd   :  { %v514_v38 = vadd.f32 %v509_v36, %v498_v31 }
 0x1ce   :  { %v513_v39 = vadd.f32 %v509_v36, %v497_v34  ;;  %v460_v40 = vpop.permute.xlu1 %459  ;;  %v525_v36 = vld [vmem:[#allocation7 + $0x20] sm:$0xff] }
 0x1cf   :  { %v475_v42 = vmul.f32 %v470_v14, %v460_v40  ;;  %v476_v43 = vmul.f32 %v474_v11, %v460_v40  ;;  %v518_v44 = vmax.f32 %v514_v38, 0.0  ;;  %v4714_v11 = vld [vmem:[%s6347_s8 + $0x8] sm:$0xff] }
 0x1d0   :  { %v517_v52 = vmax.f32 %v513_v39, 0.0  ;;  %6375 = vst [vmem:[#allocation16_spill] sm:$0xff] %v4714_v11 }
 0x1d1   :  { %533 = vrot.lane.b32.xlu1 %v518_v44, %s4457_s21  ;;  %594 = vmatprep.subr.mxu1 %v518_v44  ;;  %v480_v53 = vadd.f32 %v476_v43, %v454_v41  ;;  %v479_v58 = vadd.f32 %v475_v42, %v453_v46 }
 0x1d2   :  { %v488_v54 = vpop.permute.xlu1 %487  ;;  %529 = vrot.lane.b32.xlu0 %v517_v52, %s4457_s21  ;;  %595 = vmatpush1.msra.mxu1 %v517_v52 }
 0x1d3   :  { %v495_v60 = vmul.f32 %v488_v54, %v479_v58  ;;  %v496_v56 = vmul.f32 %v488_v54, %v480_v53 }
 0x1d6   :  { %v504_v62 = vpop.permute.xlu1 %503 }
 0x1d7   :  { %v511_v1 = vadd.f32 %v504_v62, %v495_v60  ;;  %v512_v2 = vadd.f32 %v504_v62, %v496_v56 }
 0x1d9   :  { %v516_v19 = vmax.f32 %v512_v2, 0.0  ;;  %v515_v3 = vmax.f32 %v511_v1, 0.0 }
 0x1db   :  { %531 = vrot.lane.b32.xlu1 %v516_v19, %s4457_s21  ;;  %596 = vmatprep.subr.mxu1 %v516_v19 }
 0x1dc   :  { %527 = vrot.lane.b32.xlu0 %v515_v3, %s4457_s21  ;;  %597 = vmatpush1.msra.mxu1 %v515_v3 }
 0x1dd   :  { %4066 = vmatmul.mubr.msk.f32.vlgmr.msra.gmra.mxu1 %vm559_vm6, %v522_v4 }
 0x1de   :  { %636 = vmatprep.mubr.f32.mxu1 %v6355_v0 }
 0x1df   :  { %549 = vrot.lane.b32.xlu1 %v518_v44, %s4458_s22 }
 0x1e0   :  { %545 = vrot.lane.b32.xlu0 %v517_v52, %s4458_s22 }
 0x1e1   :  { %4067 = vmatmul.mubr.msk.f32.gmra.mxu1 %vm559_vm6, %v523_v6 }
 0x1e2   :  { %713 = vmatprep.mubr.f32.mxu1 %v6355_v0 }
 0x1e3   :  { %547 = vrot.lane.b32.xlu1 %v516_v19, %s4458_s22 }
 0x1e4   :  { %543 = vrot.lane.b32.xlu0 %v515_v3, %s4458_s22 }
 0x1e7   :  { %817 = vperm.xlu1 %4337, %v4697_v7  }
 0x1e8   :  { %822 = vperm.xlu0 %4336, %v4702_v8  }
 0x1eb   :  { %833 = vperm.xlu1 %4337, %v4709_v9  }
 0x1ec   :  { %838 = vperm.xlu0 %4336, %v4714_v11  }
 0x243   :  { %v534_v12 = vpop.permute.xlu1 %533 }
 0x244   :  { %v530_v14 = vpop.permute.xlu0 %529 }
 0x245   :  { %v538_v15 = vsel %vm393_vm4, %v534_v12, %v530_v14  ;;  %v536_v16 = vsel %vm393_vm4, %v530_v14, %v534_v12 }
 0x246   :  { %677 = vmatprep.subr.mxu1 %v536_v16 }
 0x247   :  { %4069 = vmatpush1.msk.msra.mxu1 %vm4720_vm7, %v538_v15 }
 0x24d   :  { %v532_v17 = vpop.permute.xlu1 %531 }
 0x24e   :  { %v528_v18 = vpop.permute.xlu0 %527 }
 0x24f   :  { %v537_v20 = vsel %vm393_vm4, %v532_v17, %v528_v18  ;;  %v535_v21 = vsel %vm393_vm4, %v528_v18, %v532_v17 }
 0x250   :  { %679 = vmatprep.subr.mxu1 %v535_v21 }
 0x251   :  { %4071 = vmatpush1.msk.msra.mxu1 %vm4720_vm7, %v537_v20  ;;  %v550_v24 = vpop.permute.xlu1 %549 }
 0x252   :  { %v546_v25 = vpop.permute.xlu0 %545  ;;  %4072 = vmatmul.mubr.msk.f32.vlgmr.msra.gmra.mxu1 %vm559_vm6, %v519_v22 }
 0x253   :  { %v554_v26 = vsel %vm404_vm2, %v550_v24, %v546_v25  ;;  %719 = vmatprep.mubr.f32.mxu1 %v6355_v0  ;;  %v552_v27 = vsel %vm404_vm2, %v546_v25, %v550_v24 }
 0x254   :  { %4075 = vmatprep.subr.msk.mxu1 %vm4736_vm8, %v554_v26 }
 0x255   :  { %761 = vmatpush1.msra.mxu1 %v552_v27  ;;  %v548_v30 = vpop.permute.xlu1 %547 }
 0x256   :  { %v544_v31 = vpop.permute.xlu0 %543  ;;  %4073 = vmatmul.mubr.msk.f32.gmra.mxu1 %vm559_vm6, %v520_v29 }
 0x257   :  { %v553_v32 = vsel %vm404_vm2, %v548_v30, %v544_v31  ;;  %v551_v34 = vsel %vm404_vm2, %v544_v31, %v548_v30  ;;  %796 = vmatprep.mubr.f32.mxu1 %v6355_v0  ;;  %v4080_v31 = vld [vmem:[%s6348_s9 + $0x40] sm:$0xff] }
 0x258   :  { %4077 = vmatprep.subr.msk.mxu1 %vm4736_vm8, %v553_v32  ;;  %v4081_v32 = vld [vmem:[%s6348_s9 + $0x48] sm:$0xff] }
 0x259   :  { %763 = vmatpush1.msra.mxu1 %v551_v34  ;;  %v1341_v34 = vld [vmem:[%s6349_s10 + $0x38] sm:$0xff] }
 0x25a   :  { %4078 = vmatmul.mubr.msk.f32.vlgmr.msra.gmra.mxu1 %vm559_vm6, %v525_v36  ;;  %v1340_v36 = vld [vmem:[%s6349_s10 + $0x30] sm:$0xff] }
 0x25b   :  { %802 = vmatprep.mubr.f32.mxu1 %v6355_v0 }
 0x25e   :  { %4079 = vmatmul.mubr.msk.f32.gmra.mxu1 %vm559_vm6, %v526_v37  ;;  %v4082_v37 = vld [vmem:[%s6348_s9 + $0x50] sm:$0xff] }
 0x25f   :  { %995 = vmatprep.mubr.f32.mxu1 %v6355_v0 }
 0x262   :  { %v818_v46 = vpop.permute.xlu1 %817 }
 0x263   :  { %v823_v56 = vpop.permute.xlu0 %822 }
 0x266   :  { %v834_v3 = vpop.permute.xlu1 %833 }
 0x267   :  { %v839_v22 = vpop.permute.xlu0 %838 }
 0x29d   :  { %v632_v38 = vpop.f32.mrf.mxu1 }
 0x29f   :  { %v634_v39 = vpop.f32.mrf.mxu1 }
 0x2a1   :  { %v638_v40 = vpop.f32.mrf.mxu1 }
 0x2a3   :  { %v640_v41 = vpop.f32.mrf.mxu1 }
 0x312   :  { %v715_v42 = vpop.f32.mrf.mxu1 }
 0x313   :  { %v716_v53 = vadd.f32 %v715_v42, %v632_v38  ;;  %v1405_v38 = vld [vmem:[%s6350_s11 + $0x38] sm:$0xff]  ;;  %v1338_v42 = vld [vmem:[%s6349_s10 + $0x20] sm:$0xff] }
 0x314   :  { %v717_v43 = vpop.f32.mrf.mxu1 }
 0x315   :  { %v718_v54 = vadd.f32 %v717_v43, %v634_v39  ;;  %v1339_v39 = vld [vmem:[%s6349_s10 + $0x28] sm:$0xff]  ;;  %v4084_v43 = vld [vmem:[%s6348_s9 + $0x60] sm:$0xff] }
 0x316   :  { %v721_v44 = vpop.f32.mrf.mxu1 }
 0x317   :  { %v722_v1 = vadd.f32 %v721_v44, %v638_v40  ;;  %v4083_v40 = vld [vmem:[%s6348_s9 + $0x58] sm:$0xff]  ;;  %v1403_v44 = vld [vmem:[%s6350_s11 + $0x28] sm:$0xff] }
 0x318   :  { %v723_v52 = vpop.f32.mrf.mxu1 }
 0x319   :  { %v724_v6 = vadd.f32 %v723_v52, %v640_v41  ;;  %v1404_v41 = vld [vmem:[%s6350_s11 + $0x30] sm:$0xff]  ;;  %v4085_v52 = vld [vmem:[%s6348_s9 + $0x68] sm:$0xff] }
 0x31a   :  { %v798_v58 = vpop.f32.mrf.mxu1 }
 0x31b   :  { %v809_v60 = vadd.f32 %v798_v58, %v716_v53  ;;  %v1402_v53 = vld [vmem:[%s6350_s11 + $0x20] sm:$0xff]  ;;  %v1336_v58 = vld [vmem:[%s6349_s10 + $0x10] sm:$0xff] }
 0x31c   :  { %v800_v62 = vpop.f32.mrf.mxu1 }
 0x31d   :  { %v825_v2 = vmul.f32 %v818_v46, %v809_v60  ;;  %v810_v19 = vadd.f32 %v800_v62, %v718_v54  ;;  %v4086_v54 = vld [vmem:[%s6348_s9 + $0x70] sm:$0xff]  ;;  %v1401_v60 = vld [vmem:[%s6350_s11 + $0x18] sm:$0xff] }
 0x31e   :  { %v804_v4 = vpop.f32.mrf.mxu1  ;;  %v4087_v62 = vld [vmem:[%s6348_s9 + $0x78] sm:$0xff] }
 0x31f   :  { %v826_v12 = vmul.f32 %v818_v46, %v810_v19  ;;  %v811_v14 = vadd.f32 %v804_v4, %v722_v1  ;;  %v841_v15 = vadd.f32 %v834_v3, %v825_v2  ;;  %v1337_v46 = vld [vmem:[%s6349_s10 + $0x18] sm:$0xff]  ;;  %v1400_v1 = vld [vmem:[%s6350_s11 + $0x10] sm:$0xff]  ;;  %v1334_v2 = vld [vmem:[%s6349_s10] sm:$0xff]  ;;  %v2228_v4 = vrot.slane %v4610_v45, 1 }
 0x320   :  { %v806_v16 = vpop.f32.mrf.mxu1  ;;  %v1399_v19 = vld [vmem:[%s6350_s11 + $0x8] sm:$0xff] }
 0x321   :  { %v827_v17 = vmul.f32 %v823_v56, %v811_v14  ;;  %v812_v18 = vadd.f32 %v806_v16, %v724_v6  ;;  %v845_v20 = vmax.f32 %v841_v15, 0.0  ;;  %v842_v21 = vadd.f32 %v834_v3, %v826_v12  ;;  %v1398_v3 = vld [vmem:[%s6350_s11] sm:$0xff]  ;;  %v850_v16 = vld [vmem:[%s6348_s9 + $0x8] sm:$0xff] }
 0x322   :  { %v2229_v6 = vrot.slane %v4612_v47, 1 }
 0x323   :  { %v828_v24 = vmul.f32 %v823_v56, %v812_v18  ;;  %875 = vrot.lane.b32.xlu0 %v845_v20, %s4457_s21  ;;  %v846_v25 = vmax.f32 %v842_v21, 0.0  ;;  %v843_v26 = vadd.f32 %v839_v22, %v827_v17  ;;  %v1335_v56 = vld [vmem:[%s6349_s10 + $0x8] sm:$0xff] }
 0x325   :  { %879 = vrot.lane.b32.xlu1 %v846_v25, %s4457_s21  ;;  %v847_v27 = vmax.f32 %v843_v26, 0.0  ;;  %v844_v29 = vadd.f32 %v839_v22, %v828_v24  ;;  %v4088_v22 = vld [vmem:[%s6348_s9 + $0x80] sm:$0xff]  ;;  %v851_v24 = vld [vmem:[%s6348_s9 + $0x10] sm:$0xff]  ;;  %v852_v26 = vld [vmem:[%s6348_s9 + $0x18] sm:$0xff] }
 0x327   :  { %877 = vrot.lane.b32.xlu0 %v847_v27, %s4457_s21  ;;  %v848_v30 = vmax.f32 %v844_v29, 0.0  ;;  %v853_v29 = vld [vmem:[%s6348_s9 + $0x20] sm:$0xff] }
 0x329   :  { %959 = vmatprep.subr.mxu1 %v848_v30  ;;  %881 = vrot.lane.b32.xlu1 %v848_v30, %s4457_s21 }
 0x32a   :  { %960 = vmatpush1.msra.mxu1 %v847_v27 }
 0x32b   :  { %961 = vmatprep.subr.mxu1 %v846_v25  ;;  %893 = vrot.lane.b32.xlu0 %v847_v27, %s4458_s22  ;;  %v4090_v27 = vld [vmem:[%s6348_s9 + $0x90] sm:$0xff] }
 0x32c   :  { %962 = vmatpush1.msra.mxu1 %v845_v20 }
 0x32d   :  { %897 = vrot.lane.b32.xlu1 %v848_v30, %s4458_s22  ;;  %4096 = vmatmul.mubr.msk.f32.vlgmr.msra.gmra.mxu1 %vm559_vm6, %v4080_v31  ;;  %v4091_v30 = vld [vmem:[%s6348_s9 + $0x98] sm:$0xff]  ;;  %v854_v31 = vld [vmem:[%s6348_s9 + $0x28] sm:$0xff] }
 0x32e   :  { %1001 = vmatprep.mubr.f32.mxu1 %v6355_v0 }
 0x32f   :  { %891 = vrot.lane.b32.xlu0 %v845_v20, %s4458_s22 }
 0x331   :  { %895 = vrot.lane.b32.xlu1 %v846_v25, %s4458_s22  ;;  %4097 = vmatmul.mubr.msk.f32.gmra.mxu1 %vm559_vm6, %v4081_v32  ;;  %v4089_v25 = vld [vmem:[%s6348_s9 + $0x88] sm:$0xff]  ;;  %v4092_v32 = vld [vmem:[%s6348_s9 + $0xa0] sm:$0xff] }
 0x332   :  { %1007 = vmatprep.mubr.f32.mxu1 %v6355_v0 }
 0x333   :  { %1379 = vperm.xlu0 %4336, %v1341_v34   ;;  %v855_v34 = vld [vmem:[%s6348_s9 + $0x30] sm:$0xff] }
 0x335   :  { %1374 = vperm.xlu1 %4337, %v1340_v36   ;;  %4098 = vmatmul.mubr.msk.f32.gmra.mxu1 %vm559_vm6, %v4082_v37  ;;  %v4093_v36 = vld [vmem:[%s6348_s9 + $0xa8] sm:$0xff]  ;;  %v856_v37 = vld [vmem:[%s6348_s9 + $0x38] sm:$0xff] }
 0x336   :  { %1013 = vmatprep.mubr.f32.mxu1 %v6355_v0 }
 0x337   :  { %1443 = vperm.xlu0 %4336, %v1405_v38   ;;  %v4094_v38 = vld [vmem:[%s6348_s9 + $0xb0] sm:$0xff] }
 0x339   :  { %1369 = vperm.xlu1 %4337, %v1339_v39   ;;  %4099 = vmatmul.mubr.msk.f32.gmra.mxu1 %vm559_vm6, %v4083_v40  ;;  %v4095_v39 = vld [vmem:[%s6348_s9 + $0xb8] sm:$0xff] }
 0x33a   :  { %1019 = vmatprep.mubr.f32.mxu1 %v6355_v0 }
 0x33b   :  { %1438 = vperm.xlu0 %4336, %v1404_v41  }
 0x33d   :  { %1364 = vperm.xlu1 %4337, %v1338_v42   ;;  %4100 = vmatmul.mubr.msk.f32.gmra.mxu1 %vm559_vm6, %v4084_v43 }
 0x33e   :  { %1025 = vmatprep.mubr.f32.mxu1 %v6355_v0 }
 0x33f   :  { %1433 = vperm.xlu0 %4336, %v1403_v44  }
 0x341   :  { %1359 = vperm.xlu1 %4337, %v1337_v46   ;;  %4101 = vmatmul.mubr.msk.f32.gmra.mxu1 %vm559_vm6, %v4085_v52 }
 0x342   :  { %1031 = vmatprep.mubr.f32.mxu1 %v6355_v0 }
 0x343   :  { %1428 = vperm.xlu0 %4336, %v1402_v53  }
 0x345   :  { %1354 = vperm.xlu1 %4337, %v1336_v58   ;;  %4102 = vmatmul.mubr.msk.f32.gmra.mxu1 %vm559_vm6, %v4086_v54 }
 0x346   :  { %1037 = vmatprep.mubr.f32.mxu1 %v6355_v0 }
 0x347   :  { %1423 = vperm.xlu0 %4336, %v1401_v60  }
 0x349   :  { %1349 = vperm.xlu1 %4337, %v1335_v56   ;;  %4103 = vmatmul.mubr.msk.f32.gmra.mxu1 %vm559_vm6, %v4087_v62 }
 0x34a   :  { %1269 = vmatprep.mubr.f32.mxu1 %v6355_v0 }
 0x34b   :  { %1418 = vperm.xlu0 %4336, %v1400_v1  }
 0x34d   :  { %1344 = vperm.xlu1 %4337, %v1334_v2  }
 0x34f   :  { %1413 = vperm.xlu0 %4336, %v1399_v19  }
 0x351   :  { %1408 = vperm.xlu1 %4337, %v1398_v3  }
 0x353   :  { %2255 = vperm.xlu0 %4336, %v4572_v57  }
 0x355   :  { %2277 = vperm.xlu1 %4337, %v4584_v63  }
 0x357   :  { %2232 = vrot.lane.b32.xlu0 %v2228_v4, %s4457_s21 }
 0x359   :  { %2234 = vrot.lane.b32.xlu1 %v2229_v6, %s4457_s21 }
 0x35b   :  { %2250 = vperm.xlu0 %4336, %v4591_v5  }
 0x35d   :  { %2272 = vperm.xlu1 %4337, %v4577_v59  }
 0x35f   :  { %2303 = vperm.xlu0 %4336, %v4597_v10  }
 0x361   :  { %2240 = vrot.lane.b32.xlu1 %v2228_v4, %s4458_s22 }
 0x363   :  { %2242 = vrot.lane.b32.xlu0 %v2229_v6, %s4458_s22 }
 0x365   :  { %2298 = vperm.xlu1 %4337, %v4636_v49  }
 0x367   :  { %2331 = vperm.xlu0 %4336, %v4621_v28  }
 0x369   :  { %2326 = vperm.xlu1 %4337, %v4643_v50  }
 0x36b   :  { %2347 = vperm.xlu0 %4336, %v4629_v48   ;;  %v849_v48 = vld [vmem:[%s6348_s9] sm:$0xff] }
 0x36d   :  { %2342 = vperm.xlu1 %4337, %v4649_v51  }
 0x395   :  { %v876_v57 = vpop.permute.xlu0 %875 }
 0x397   :  { %v880_v63 = vpop.permute.xlu1 %879 }
 0x398   :  { %v883_v28 = vsel %vm393_vm4, %v876_v57, %v880_v63  ;;  %v885_v50 = vsel %vm393_vm4, %v880_v63, %v876_v57 }
 0x399   :  { %v878_v5 = vpop.permute.xlu0 %877 }
 0x39b   :  { %v882_v59 = vpop.permute.xlu1 %881 }
 0x39c   :  { %v886_v10 = vsel %vm393_vm4, %v882_v59, %v878_v5  ;;  %v884_v12 = vsel %vm393_vm4, %v878_v5, %v882_v59 }
 0x39d   :  { %1096 = vmatprep.subr.mxu0 %v884_v12  ;;  %v894_v49 = vpop.permute.xlu0 %893 }
 0x39e   :  { %4105 = vmatpush1.msk.msra.mxu0 %vm4720_vm7, %v886_v10 }
 0x39f   :  { %v898_v51 = vpop.permute.xlu1 %897  ;;  %1098 = vmatprep.subr.mxu0 %v883_v28 }
 0x3a0   :  { %4107 = vmatpush1.msk.msra.mxu0 %vm4720_vm7, %v885_v50  ;;  %v902_v14 = vsel %vm404_vm2, %v898_v51, %v894_v49  ;;  %v900_v15 = vsel %vm404_vm2, %v894_v49, %v898_v51 }
 0x3a1   :  { %4108 = vmatmul.mubr.msk.f32.vlgmr.msra.gmra.mxu0 %vm559_vm6, %v849_v48  ;;  %4117 = vmatprep.subr.msk.mxu1 %vm4736_vm8, %v902_v14  ;;  %v892_v17 = vpop.permute.xlu0 %891 }
 0x3a2   :  { %1234 = vmatpush1.msra.mxu1 %v900_v15  ;;  %1138 = vmatprep.mubr.f32.mxu0 %v6355_v0 }
 0x3a3   :  { %v896_v18 = vpop.permute.xlu1 %895 }
 0x3a4   :  { %v901_v20 = vsel %vm404_vm2, %v896_v18, %v892_v17  ;;  %v899_v21 = vsel %vm404_vm2, %v892_v17, %v896_v18 }
 0x3a5   :  { %4109 = vmatmul.mubr.msk.f32.gmra.mxu0 %vm559_vm6, %v850_v16  ;;  %4119 = vmatprep.subr.msk.mxu1 %vm4736_vm8, %v901_v20 }
 0x3a6   :  { %1236 = vmatpush1.msra.mxu1 %v899_v21  ;;  %1144 = vmatprep.mubr.f32.mxu0 %v6355_v0 }
 0x3a7   :  { %4120 = vmatmul.mubr.msk.f32.vlgmr.msra.gmra.mxu1 %vm559_vm6, %v4088_v22 }
 0x3a8   :  { %1275 = vmatprep.mubr.f32.mxu1 %v6355_v0 }
 0x3a9   :  { %4110 = vmatmul.mubr.msk.f32.gmra.mxu0 %vm559_vm6, %v851_v24 }
 0x3aa   :  { %1150 = vmatprep.mubr.f32.mxu0 %v6355_v0 }
 0x3ab   :  { %4121 = vmatmul.mubr.msk.f32.gmra.mxu1 %vm559_vm6, %v4089_v25 }
 0x3ac   :  { %1281 = vmatprep.mubr.f32.mxu1 %v6355_v0 }
 0x3ad   :  { %4111 = vmatmul.mubr.msk.f32.gmra.mxu0 %vm559_vm6, %v852_v26 }
 0x3ae   :  { %1156 = vmatprep.mubr.f32.mxu0 %v6355_v0  ;;  %v4986_v44 = vpop.permute.xlu0 %1379 }
 0x3af   :  { %4122 = vmatmul.mubr.msk.f32.gmra.mxu1 %vm559_vm6, %v4090_v27 }
 0x3b0   :  { %1287 = vmatprep.mubr.f32.mxu1 %v6355_v0  ;;  %v4994_v58 = vpop.permute.xlu1 %1374 }
 0x3b1   :  { %4112 = vmatmul.mubr.msk.f32.gmra.mxu0 %vm559_vm6, %v853_v29 }
 0x3b2   :  { %1162 = vmatprep.mubr.f32.mxu0 %v6355_v0  ;;  %v4992_v53 = vpop.permute.xlu0 %1443 }
 0x3b3   :  { %4123 = vmatmul.mubr.msk.f32.gmra.mxu1 %vm559_vm6, %v4091_v30 }
 0x3b4   :  { %1293 = vmatprep.mubr.f32.mxu1 %v6355_v0  ;;  %v5002_v62 = vpop.permute.xlu1 %1369 }
 0x3b5   :  { %4113 = vmatmul.mubr.msk.f32.gmra.mxu0 %vm559_vm6, %v854_v31 }
 0x3b6   :  { %1168 = vmatprep.mubr.f32.mxu0 %v6355_v0  ;;  %v4998_v60 = vpop.permute.xlu0 %1438 }
 0x3b7   :  { %4124 = vmatmul.mubr.msk.f32.gmra.mxu1 %vm559_vm6, %v4092_v32 }
 0x3b8   :  { %1299 = vmatprep.mubr.f32.mxu1 %v6355_v0  ;;  %v1365_v19 = vpop.permute.xlu1 %1364 }
 0x3b9   :  { %4114 = vmatmul.mubr.msk.f32.gmra.mxu0 %vm559_vm6, %v855_v34 }
 0x3ba   :  { %1174 = vmatprep.mubr.f32.mxu0 %v6355_v0  ;;  %v5004_v2 = vpop.permute.xlu0 %1433 }
 0x3bb   :  { %4125 = vmatmul.mubr.msk.f32.gmra.mxu1 %vm559_vm6, %v4093_v36 }
 0x3bc   :  { %1305 = vmatprep.mubr.f32.mxu1 %v6355_v0  ;;  %v5008_v57 = vpop.permute.xlu1 %1359 }
 0x3bd   :  { %4115 = vmatmul.mubr.msk.f32.gmra.mxu0 %vm559_vm6, %v856_v37 }
 0x3be   :  { %1721 = vmatprep.mubr.f32.mxu0 %v6355_v0  ;;  %v5006_v4 = vpop.permute.xlu0 %1428 }
 0x3bf   :  { %4126 = vmatmul.mubr.msk.f32.gmra.mxu1 %vm559_vm6, %v4094_v38 }
 0x3c0   :  { %1311 = vmatprep.mubr.f32.mxu1 %v6355_v0  ;;  %v5012_v59 = vpop.permute.xlu1 %1354 }
 0x3c2   :  { %v5010_v5 = vpop.permute.xlu0 %1423 }
 0x3c3   :  { %4127 = vmatmul.mubr.msk.f32.gmra.mxu1 %vm559_vm6, %v4095_v39 }
 0x3c4   :  { %1858 = vmatprep.mubr.f32.mxu1 %v6355_v0  ;;  %v5018_v28 = vpop.permute.xlu1 %1349 }
 0x3c5   :  { %6385 = vst [vmem:[#allocation22_spill] sm:$0xff] %v5018_v28 }
 0x3c6   :  { %v5014_v12 = vpop.permute.xlu0 %1418 }
 0x3c7   :  { %6384 = vst [vmem:[#allocation21_spill] sm:$0xff] %v5014_v12 }
 0x3c8   :  { %v5028_v15 = vpop.permute.xlu1 %1344 }
 0x3c9   :  { %6389 = vst [vmem:[#allocation26_spill] sm:$0xff] %v5028_v15 }
 0x3ca   :  { %v5024_v51 = vpop.permute.xlu0 %1413 }
 0x3cb   :  { %6387 = vst [vmem:[#allocation24_spill] sm:$0xff] %v5024_v51 }
 0x3cc   :  { %v5044_v25 = vpop.permute.xlu1 %1408 }
 0x3cd   :  { %6393 = vst [vmem:[#allocation30_spill] sm:$0xff] %v5044_v25 }
 0x3ce   :  { %v5038_v21 = vpop.permute.xlu0 %2255 }
 0x3cf   :  { %6391 = vst [vmem:[#allocation28_spill] sm:$0xff] %v5038_v21 }
 0x3d0   :  { %v5056_v36 = vpop.permute.xlu1 %2277 }
 0x3d2   :  { %v2233_v31 = vpop.permute.xlu0 %2232 }
 0x3d4   :  { %v2235_v11 = vpop.permute.xlu1 %2234 }
 0x3d6   :  { %v5060_v23 = vpop.permute.xlu0 %2250 }
 0x3d7   :  { %6395 = vst [vmem:[#allocation32_spill] sm:$0xff] %v5060_v23 }
 0x3ed   :  { %v4978_v40 = vpop.f32.mrf.mxu1 }
 0x3ee   :  { %6382 = vst [vmem:[#allocation19_spill] sm:$0xff] %v4978_v40  ;;  %v5068_v40 = vpop.permute.xlu1 %2272 }
 0x3ef   :  { %v4980_v41 = vpop.f32.mrf.mxu1 }
 0x3f0   :  { %6383 = vst [vmem:[#allocation20_spill] sm:$0xff] %v4980_v41  ;;  %v2237_v41 = vsel %vm393_vm4, %v2235_v11, %v2233_v31 }
 0x3f1   :  { %v4982_v42 = vpop.f32.mrf.mxu1 }
 0x3f3   :  { %v4984_v43 = vpop.f32.mrf.mxu1 }
 0x3f5   :  { %v4988_v46 = vpop.f32.mrf.mxu1 }
 0x3f7   :  { %v4990_v52 = vpop.f32.mrf.mxu1 }
 0x3f9   :  { %v4996_v54 = vpop.f32.mrf.mxu1 }
 0x3fb   :  { %v5000_v56 = vpop.f32.mrf.mxu1 }
 0x3fd   :  { %v1021_v1 = vpop.f32.mrf.mxu1 }
 0x3ff   :  { %v1023_v3 = vpop.f32.mrf.mxu1 }
 0x401   :  { %v1027_v6 = vpop.f32.mrf.mxu1 }
 0x403   :  { %v1029_v63 = vpop.f32.mrf.mxu1 }
 0x405   :  { %v1033_v10 = vpop.f32.mrf.mxu1 }
 0x407   :  { %v5016_v49 = vpop.f32.mrf.mxu1 }
 0x409   :  { %v5020_v48 = vpop.f32.mrf.mxu1 }
 0x40b   :  { %v5030_v16 = vpop.f32.mrf.mxu1 }
 0x461   :  { %v5022_v50 = vpop.f32.mrf.mxu0 }
 0x462   :  { %6386 = vst [vmem:[#allocation23_spill] sm:$0xff] %v5022_v50 }
 0x463   :  { %v5026_v14 = vpop.f32.mrf.mxu0 }
 0x464   :  { %6388 = vst [vmem:[#allocation25_spill] sm:$0xff] %v5026_v14 }
 0x465   :  { %v5032_v17 = vpop.f32.mrf.mxu0 }
 0x467   :  { %v5034_v18 = vpop.f32.mrf.mxu0  ;;  %v5036_v20 = vpop.f32.mrf.mxu1 }
 0x468   :  { %6390 = vst [vmem:[#allocation27_spill] sm:$0xff] %v5036_v20 }
 0x469   :  { %v5040_v22 = vpop.f32.mrf.mxu0  ;;  %v5042_v24 = vpop.f32.mrf.mxu1 }
 0x46a   :  { %6392 = vst [vmem:[#allocation29_spill] sm:$0xff] %v5042_v24  ;;  %v5064_v24 = vpop.permute.xlu0 %2303 }
 0x46b   :  { %v5046_v26 = vpop.f32.mrf.mxu0  ;;  %v5048_v27 = vpop.f32.mrf.mxu1 }
 0x46d   :  { %v1152_v29 = vpop.f32.mrf.mxu0  ;;  %v5050_v30 = vpop.f32.mrf.mxu1 }
 0x46e   :  { %6394 = vst [vmem:[#allocation31_spill] sm:$0xff] %v5050_v30 }
 0x46f   :  { %v5052_v32 = vpop.f32.mrf.mxu0  ;;  %v5054_v34 = vpop.f32.mrf.mxu1 }
 0x471   :  { %v1158_v37 = vpop.f32.mrf.mxu0  ;;  %v5058_v38 = vpop.f32.mrf.mxu1 }
 0x472   :  { %v1159_v7 = vadd.f32 %v1158_v37, %v1021_v1 }
 0x473   :  { %v1160_v39 = vpop.f32.mrf.mxu0  ;;  %v1289_v0 = vpop.f32.mrf.mxu1 }
 0x474   :  { %v1161_v51 = vadd.f32 %v1160_v39, %v1023_v3 }
 0x475   :  { %v1164_v13 = vpop.f32.mrf.mxu0  ;;  %v5062_v9 = vpop.f32.mrf.mxu1 }
 0x476   :  { %v1165_v20 = vadd.f32 %v1164_v13, %v1027_v6  ;;  %v5077_v13 = vrot.slane %v4612_v47, %v4606_v35  ;;  %v2236_v6 = vsel %vm393_vm4, %v2233_v31, %v2235_v11  ;;  %v2241_v31 = vpop.permute.xlu1 %2240 }
 0x477   :  { %v1166_v8 = vpop.f32.mrf.mxu0  ;;  %v1295_v25 = vpop.f32.mrf.mxu1 }
 0x478   :  { %v1326_v15 = vadd.f32 %v1295_v25, %v1159_v7  ;;  %v1167_v21 = vadd.f32 %v1166_v8, %v1029_v63  ;;  %v5073_v7 = vrot.slane %v4610_v45, %v4606_v35  ;;  %v2238_v45 = vsel %vm387_vm5, 0.0, %v2237_v41 }
 0x479   :  { %v1170_v12 = vpop.f32.mrf.mxu0  ;;  %v1297_v28 = vpop.f32.mrf.mxu1  ;;  %v1153_v35 = vadd.f32 %v1152_v29, %v4996_v54 }
 0x47a   :  { %v1390_v30 = vmul.f32 %v1365_v19, %v1326_v15  ;;  %v1327_v14 = vadd.f32 %v1297_v28, %v1161_v51  ;;  %v1171_v15 = vadd.f32 %v1170_v12, %v1033_v10 }
 0x47b   :  { %v1172_v23 = vpop.f32.mrf.mxu0  ;;  %v1301_v50 = vpop.f32.mrf.mxu1  ;;  %v1324_v41 = vadd.f32 %v1289_v0, %v1153_v35  ;;  %v1155_v0 = vadd.f32 %v5052_v32, %v5000_v56  ;;  %v2261_v35 = vrot.slane %v2238_v45, %v4603_v33 }
 0x47c   :  { %v1391_v1 = vmul.f32 %v1365_v19, %v1327_v14  ;;  %v1328_v37 = vadd.f32 %v1301_v50, %v1165_v20  ;;  %v1454_v3 = vadd.f32 %v5006_v4, %v1390_v30  ;;  %v5086_v50 = vmul.f32 %v5073_v7, %v5056_v36  ;;  %v2243_v14 = vpop.permute.xlu0 %2242 }
 0x47d   :  { %v1176_v28 = vpop.f32.mrf.mxu0  ;;  %v1303_v51 = vpop.f32.mrf.mxu1  ;;  %v1173_v10 = vadd.f32 %v1172_v23, %v5016_v49  ;;  %v5098_v30 = vrot.slane %v2236_v6, %v4603_v33 }
 0x47e   :  { %v1392_v8 = vmul.f32 %v5002_v62, %v1328_v37  ;;  %v1329_v19 = vadd.f32 %v1303_v51, %v1167_v21  ;;  %v5082_v63 = vmax.f32 %v1454_v3, 0.0  ;;  %v1455_v11 = vadd.f32 %v5006_v4, %v1391_v1 }
 0x47f   :  { %v1307_v47 = vpop.f32.mrf.mxu1  ;;  %v1178_v20 = vpop.f32.mrf.mxu0  ;;  %v1177_v54 = vadd.f32 %v1176_v28, %v5020_v48  ;;  %v2245_v1 = vsel %vm404_vm2, %v2243_v14, %v2241_v31  ;;  %v1147_v37 = vadd.f32 %v5040_v22, %v4988_v46  ;;  %v2244_v46 = vsel %vm404_vm2, %v2241_v31, %v2243_v14 }
 0x480   :  { %v1393_v12 = vmul.f32 %v5002_v62, %v1329_v19  ;;  %v1330_v21 = vadd.f32 %v1307_v47, %v1171_v15  ;;  %1512 = vrot.lane.b32.xlu0 %v5082_v63, %s4457_s21  ;;  %v1456_v25 = vadd.f32 %v5004_v2, %v1392_v8  ;;  %v5101_v4 = vmax.f32 %v1455_v11, 0.0 }
 0x481   :  { %v1309_v29 = vpop.f32.mrf.mxu1  ;;  %v1179_v48 = vadd.f32 %v1178_v20, %v5030_v16  ;;  %v1322_v56 = vadd.f32 %v5054_v34, %v1147_v37  ;;  %v1388_v16 = vmul.f32 %v5008_v57, %v1324_v41  ;;  %v1325_v22 = vadd.f32 %v5062_v9, %v1155_v0  ;;  %v6399_v41 = vld [vmem:[#allocation20_spill] sm:$0xff] }
 0x482   :  { %v1394_v23 = vmul.f32 %v4994_v58, %v1330_v21  ;;  %v1331_v62 = vadd.f32 %v1309_v29, %v1173_v10  ;;  %v5104_v49 = vmax.f32 %v1456_v25, 0.0  ;;  %v1457_v39 = vadd.f32 %v5004_v2, %v1393_v12  ;;  %1528 = vrot.lane.b32.xlu1 %v5101_v4, %s4457_s21  ;;  %v6396_v21 = vld [vmem:[#allocation28_spill] sm:$0xff]  ;;  %v6401_v29 = vld [vmem:[#allocation31_spill] sm:$0xff] }
 0x483   :  { %v1313_v3 = vpop.f32.mrf.mxu1  ;;  %v2247_v47 = vsel %vm399_vm3, 0.0, %v2245_v1  ;;  %v1141_v34 = vadd.f32 %v5032_v17, %v4982_v42  ;;  %v1149_v11 = vadd.f32 %v5046_v26, %v4990_v52  ;;  %v2309_v9 = vrot.slane %v2244_v46, %v4603_v33 }
 0x484   :  { %v1395_v6 = vmul.f32 %v4994_v58, %v1331_v62  ;;  %v1332_v28 = vadd.f32 %v1313_v3, %v1177_v54  ;;  %1514 = vrot.lane.b32.xlu0 %v5104_v49, %s4457_s21  ;;  %v5119_v2 = vmax.f32 %v1457_v39, 0.0  ;;  %v1458_v51 = vadd.f32 %v4998_v60, %v1394_v23  ;;  %v2299_v62 = vpop.permute.xlu1 %2298  ;;  %v6402_v39 = vld [vmem:[#allocation27_spill] sm:$0xff]  ;;  %v6404_v3 = vld [vmem:[#allocation22_spill] sm:$0xff] }
 0x485   :  { %v1315_v32 = vpop.f32.mrf.mxu1  ;;  %v1143_v42 = vadd.f32 %v5034_v18, %v4984_v43  ;;  %v1320_v17 = vadd.f32 %v5048_v27, %v1141_v34  ;;  %v1323_v52 = vadd.f32 %v5058_v38, %v1149_v11  ;;  %v1389_v26 = vmul.f32 %v5008_v57, %v1325_v22  ;;  %v6397_v27 = vld [vmem:[#allocation19_spill] sm:$0xff] }
 0x486   :  { %v1396_v58 = vmul.f32 %v4986_v44, %v1332_v28  ;;  %v1333_v15 = vadd.f32 %v1315_v32, %v1179_v48  ;;  %v5128_v8 = vmax.f32 %v1458_v51, 0.0  ;;  %v1459_v19 = vadd.f32 %v4998_v60, %v1395_v6  ;;  %1530 = vrot.lane.b32.xlu1 %v5119_v2, %s4457_s21  ;;  %v6398_v38 = vld [vmem:[#allocation23_spill] sm:$0xff]  ;;  %v6405_v51 = vld [vmem:[#allocation21_spill] sm:$0xff] }
 0x487   :  { %v1386_v45 = vmul.f32 %v5012_v59, %v1322_v56  ;;  %v1452_v12 = vadd.f32 %v5010_v5, %v1388_v16  ;;  %v2291_v20 = vmul.f32 %v5077_v13, %v5056_v36  ;;  %v2269_v43 = vmul.f32 %v5098_v30, %v6396_v21  ;;  %v6406_v56 = vld [vmem:[#allocation32_spill] sm:$0xff] }
 0x488   :  { %v1397_v14 = vmul.f32 %v4986_v44, %v1333_v15  ;;  %1516 = vrot.lane.b32.xlu0 %v5128_v8, %s4457_s21  ;;  %v5144_v60 = vmax.f32 %v1459_v19, 0.0  ;;  %v1460_v61 = vadd.f32 %v4992_v53, %v1396_v58  ;;  %v2268_v18 = vmul.f32 %v2261_v35, %v6396_v21 }
 0x489   :  { %v1135_v25 = vadd.f32 %v6398_v38, %v6397_v27  ;;  %v2313_v57 = vrot.slane %v2247_v47, %v4603_v33  ;;  %v1321_v31 = vadd.f32 %v6401_v29, %v1143_v42  ;;  %v2316_v23 = vmul.f32 %v2309_v9, %v5064_v24  ;;  %v6403_v33 = vld [vmem:[#allocation29_spill] sm:$0xff]  ;;  %v6407_v47 = vld [vmem:[#allocation26_spill] sm:$0xff] }
 0x48a   :  { %v5153_v10 = vmax.f32 %v1460_v61, 0.0  ;;  %v1461_v44 = vadd.f32 %v4992_v53, %v1397_v14  ;;  %1532 = vrot.lane.b32.xlu1 %v5144_v60, %s4457_s21  ;;  %v6400_v53 = vld [vmem:[#allocation25_spill] sm:$0xff]  ;;  %v1387_v37 = vmul.f32 %v5012_v59, %v1323_v52  ;;  %v1453_v0 = vadd.f32 %v5010_v5, %v1389_v26 }
 0x48b   :  { %v1137_v54 = vadd.f32 %v6400_v53, %v6399_v41  ;;  %v1318_v1 = vadd.f32 %v6402_v39, %v1135_v25  ;;  %v1384_v6 = vmul.f32 %v6404_v3, %v1320_v17  ;;  %v5181_v28 = vmax.f32 %v1452_v12, 0.0 }
 0x48c   :  { %1518 = vrot.lane.b32.xlu0 %v5153_v10, %s4457_s21  ;;  %v5172_v36 = vmax.f32 %v1461_v44, 0.0  ;;  %v1450_v46 = vadd.f32 %v6405_v51, %v1386_v45  ;;  %v2266_v16 = vmul.f32 %v2261_v35, %v6406_v56  ;;  %v2288_v22 = vmul.f32 %v5073_v7, %v5068_v40  ;;  %v2327_v45 = vpop.permute.xlu1 %2326 }
 0x48d   :  { %v1319_v48 = vadd.f32 %v6403_v33, %v1137_v54  ;;  %v2294_v32 = vadd.f32 %v5086_v50, %v2268_v18  ;;  %v2267_v5 = vmul.f32 %v5098_v30, %v6406_v56  ;;  %v2314_v59 = vmul.f32 %v2309_v9, %v2299_v62  ;;  %v2332_v50 = vpop.permute.xlu0 %2331  ;;  %v6408_v9 = vld [vmem:[#allocation24_spill] sm:$0xff]  ;;  %v1488_v33 = vld [vmem:[#allocation9 + $0x48] sm:$0xff] }
 0x48e   :  { %1673 = vmatprep.subr.mxu0 %v5172_v36  ;;  %1534 = vrot.lane.b32.xlu1 %v5172_v36, %s4457_s21  ;;  %v1385_v58 = vmul.f32 %v6404_v3, %v1321_v31  ;;  %v2317_v7 = vmul.f32 %v2313_v57, %v5064_v24  ;;  %v5199_v19 = vmax.f32 %v1453_v0, 0.0  ;;  %v1451_v35 = vadd.f32 %v6405_v51, %v1387_v37  ;;  %v1489_v51 = vld [vmem:[#allocation9 + $0x50] sm:$0xff]  ;;  %v1490_v56 = vld [vmem:[#allocation9 + $0x58] sm:$0xff] }
 0x48f   :  { %1674 = vmatpush1.msra.mxu0 %v5153_v10  ;;  %v2320_v15 = vadd.f32 %v2316_v23, %v2294_v32  ;;  %v1382_v30 = vmul.f32 %v6407_v47, %v1318_v1  ;;  %v1383_v34 = vmul.f32 %v6407_v47, %v1319_v48  ;;  %v5205_v11 = vmax.f32 %v1450_v46, 0.0  ;;  %v1487_v23 = vld [vmem:[#allocation9 + $0x40] sm:$0xff]  ;;  %v6411_v32 = vld [vmem:[#allocation14_spill] sm:$0xff] }
 0x490   :  { %1510 = vrot.lane.b32.xlu0 %v5181_v28, %s4457_s21  ;;  %1675 = vmatprep.subr.mxu0 %v5144_v60  ;;  %v1448_v14 = vadd.f32 %v6408_v9, %v1384_v6  ;;  %v2289_v24 = vmul.f32 %v5077_v13, %v5068_v40  ;;  %v2292_v61 = vadd.f32 %v2288_v22, %v2266_v16  ;;  %v5218_v40 = vmax.f32 %v1451_v35, 0.0  ;;  %v2343_v31 = vpop.permute.xlu1 %2342  ;;  %v1491_v16 = vld [vmem:[#allocation9 + $0x60] sm:$0xff]  ;;  %v1492_v22 = vld [vmem:[#allocation9 + $0x68] sm:$0xff] }
 0x491   :  { %1676 = vmatpush1.msra.mxu0 %v5128_v8  ;;  %v2295_v42 = vadd.f32 %v2291_v20, %v2269_v43  ;;  %v1449_v17 = vadd.f32 %v6408_v9, %v1385_v58  ;;  %v2315_v52 = vmul.f32 %v2313_v57, %v2299_v62  ;;  %v2336_v13 = vmul.f32 %v2332_v50, %v2320_v15  ;;  %v6409_v20 = vld [vmem:[#allocation30_spill] sm:$0xff]  ;;  %v2348_v27 = vpop.permute.xlu0 %2347  ;;  %v6413_v58 = vld [vmem:[#allocation16_spill] sm:$0xff]  ;;  %v3328_v35 = vld [vmem:[#allocation9 + $0x80] sm:$0xff] }
 0x492   :  { %1677 = vmatprep.subr.mxu0 %v5119_v2  ;;  %1526 = vrot.lane.b32.xlu1 %v5199_v19, %s4457_s21  ;;  %v2318_v44 = vadd.f32 %v2314_v59, %v2292_v61  ;;  %v5221_v12 = vmax.f32 %v1448_v14, 0.0  ;;  %v1446_v21 = vadd.f32 %v6409_v20, %v1382_v30  ;;  %v1447_v43 = vadd.f32 %v6409_v20, %v1383_v34  ;;  %v1493_v59 = vld [vmem:[#allocation9 + $0x70] sm:$0xff]  ;;  %v1494_v15 = vld [vmem:[#allocation9 + $0x78] sm:$0xff] }
 0x493   :  { %1678 = vmatpush1.msra.mxu0 %v5104_v49  ;;  %v2321_v26 = vadd.f32 %v2317_v7, %v2295_v42  ;;  %v2293_v18 = vadd.f32 %v2289_v24, %v2267_v5  ;;  %v5231_v38 = vmax.f32 %v1449_v17, 0.0  ;;  %v2352_v53 = vadd.f32 %v2348_v27, %v2336_v13  ;;  %v6412_v5 = vld [vmem:[#allocation13_spill] sm:$0xff]  ;;  %v6414_v7 = vld [vmem:[#allocation15_spill] sm:$0xff] }
 0x494   :  { %1508 = vrot.lane.b32.xlu0 %v5205_v11, %s4457_s21  ;;  %1679 = vmatprep.subr.mxu0 %v5101_v4  ;;  %v2334_v41 = vmul.f32 %v2327_v45, %v2318_v44  ;;  %v5235_v54 = vmax.f32 %v1446_v21, 0.0  ;;  %v5237_v29 = vmax.f32 %v1447_v43, 0.0  ;;  %v6410_v0 = vmov 0.0  }
 0x495   :  { %1680 = vmatpush1.msra.mxu0 %v5082_v63  ;;  %v2337_v25 = vmul.f32 %v2332_v50, %v2321_v26  ;;  %v2319_v57 = vadd.f32 %v2315_v52, %v2293_v18  ;;  %v5246_v37 = vmax.f32 %v2352_v53, 0.0  ;;  %v1480_v53 = vld [vmem:[#allocation9 + $0x10] sm:$0xff] }
 0x496   :  { %1681 = vmatprep.subr.mxu0 %v5199_v19  ;;  %1524 = vrot.lane.b32.xlu1 %v5218_v40, %s4457_s21  ;;  %v2350_v1 = vadd.f32 %v2343_v31, %v2334_v41 }
 0x497   :  { %1682 = vmatpush1.msra.mxu0 %v5181_v28  ;;  %v2335_v62 = vmul.f32 %v2327_v45, %v2319_v57  ;;  %v2353_v39 = vadd.f32 %v2348_v27, %v2337_v25  ;;  %v1478_v27 = vld [vmem:[#allocation9] sm:$0xff]  ;;  %v1479_v57 = vld [vmem:[#allocation9 + $0x8] sm:$0xff] }
 0x498   :  { %1506 = vrot.lane.b32.xlu0 %v5221_v12, %s4457_s21  ;;  %1683 = vmatprep.subr.mxu0 %v5218_v40  ;;  %v5256_v6 = vmax.f32 %v2350_v1, 0.0  ;;  %v1483_v1 = vld [vmem:[#allocation9 + $0x28] sm:$0xff] }
 0x499   :  { %1684 = vmatpush1.msra.mxu0 %v5205_v11  ;;  %v2351_v48 = vadd.f32 %v2343_v31, %v2335_v62  ;;  %v5254_v3 = vmax.f32 %v2353_v39, 0.0  ;;  %v1481_v31 = vld [vmem:[#allocation9 + $0x18] sm:$0xff]  ;;  %v1482_v62 = vld [vmem:[#allocation9 + $0x20] sm:$0xff] }
 0x49a   :  { %1685 = vmatprep.subr.mxu0 %v5231_v38  ;;  %1522 = vrot.lane.b32.xlu1 %v5231_v38, %s4457_s21 }
 0x49b   :  { %1686 = vmatpush1.msra.mxu0 %v5221_v12  ;;  %v5264_v46 = vmax.f32 %v2351_v48, 0.0  ;;  %v1484_v48 = vld [vmem:[#allocation9 + $0x30] sm:$0xff] }
 0x49c   :  { %1504 = vrot.lane.b32.xlu0 %v5235_v54, %s4457_s21  ;;  %1687 = vmatprep.subr.mxu0 %v5237_v29 }
 0x49d   :  { %1688 = vmatpush1.msra.mxu0 %v5235_v54 }
 0x49e   :  { %4128 = vmatmul.mubr.msk.f32.vlgmr.msra.gmra.mxu0 %vm1632_vm9, %v1487_v23  ;;  %1520 = vrot.lane.b32.xlu1 %v5237_v29, %s4457_s21 }
 0x49f   :  { %1727 = vmatprep.mubr.f32.mxu0 %v6410_v0 }
 0x4a0   :  { %2366 = vrot.lane.b32.xlu0 %v5246_v37, %s4457_s21 }
 0x4a2   :  { %4129 = vmatmul.mubr.msk.f32.gmra.mxu0 %vm1632_vm9, %v1488_v33  ;;  %2370 = vrot.lane.b32.xlu1 %v5254_v3, %s4457_s21 }
 0x4a3   :  { %1733 = vmatprep.mubr.f32.mxu0 %v6410_v0 }
 0x4a4   :  { %2364 = vrot.lane.b32.xlu0 %v5256_v6, %s4457_s21 }
 0x4a6   :  { %4130 = vmatmul.mubr.msk.f32.gmra.mxu0 %vm1632_vm9, %v1489_v51  ;;  %2368 = vrot.lane.b32.xlu1 %v5264_v46, %s4457_s21  ;;  %v1485_v51 = vld [vmem:[#allocation9 + $0x38] sm:$0xff] }
 0x4a7   :  { %1739 = vmatprep.mubr.f32.mxu0 %v6410_v0 }
 0x4a8   :  { %2382 = vrot.lane.b32.xlu0 %v5246_v37, %s4458_s22 }
 0x4aa   :  { %4131 = vmatmul.mubr.msk.f32.gmra.mxu0 %vm1632_vm9, %v1490_v56  ;;  %2386 = vrot.lane.b32.xlu1 %v5254_v3, %s4458_s22 }
 0x4ab   :  { %1745 = vmatprep.mubr.f32.mxu0 %v6410_v0 }
 0x4ac   :  { %2380 = vrot.lane.b32.xlu0 %v5256_v6, %s4458_s22 }
 0x4ae   :  { %4132 = vmatmul.mubr.msk.f32.gmra.mxu0 %vm1632_vm9, %v1491_v16  ;;  %2384 = vrot.lane.b32.xlu1 %v5264_v46, %s4458_s22  ;;  %v2360_v16 = vld [vmem:[#allocation7 + $0x10] sm:$0xff] }
 0x4af   :  { %1751 = vmatprep.mubr.f32.mxu0 %v6410_v0 }
 0x4b0   :  { %2658 = vperm.xlu0 %4336, %v6411_v32  }
 0x4b2   :  { %4133 = vmatmul.mubr.msk.f32.gmra.mxu0 %vm1632_vm9, %v1492_v22  ;;  %2653 = vperm.xlu1 %4337, %v6412_v5  }
 0x4b3   :  { %1757 = vmatprep.mubr.f32.mxu0 %v6410_v0 }
 0x4b4   :  { %2674 = vperm.xlu0 %4336, %v6413_v58   ;;  %v2361_v58 = vld [vmem:[#allocation7 + $0x18] sm:$0xff] }
 0x4b6   :  { %4134 = vmatmul.mubr.msk.f32.gmra.mxu0 %vm1632_vm9, %v1493_v59  ;;  %2669 = vperm.xlu1 %4337, %v6414_v7  }
 0x4b7   :  { %1763 = vmatprep.mubr.f32.mxu0 %v6410_v0 }
 0x4b8   :  { %1582 = vrot.lane.b32.xlu0 %v5153_v10, %s4458_s22 }
 0x4ba   :  { %4135 = vmatmul.mubr.msk.f32.gmra.mxu0 %vm1632_vm9, %v1494_v15  ;;  %1596 = vrot.lane.b32.xlu1 %v5144_v60, %s4458_s22 }
 0x4bb   :  { %1995 = vmatprep.mubr.f32.mxu0 %v6410_v0 }
 0x4bc   :  { %1580 = vrot.lane.b32.xlu0 %v5128_v8, %s4458_s22 }
 0x4be   :  { %1594 = vrot.lane.b32.xlu1 %v5119_v2, %s4458_s22 }
 0x4c0   :  { %1578 = vrot.lane.b32.xlu0 %v5104_v49, %s4458_s22 }
 0x4c2   :  { %1592 = vrot.lane.b32.xlu1 %v5101_v4, %s4458_s22 }
 0x4c4   :  { %1576 = vrot.lane.b32.xlu0 %v5082_v63, %s4458_s22 }
 0x4c6   :  { %1598 = vrot.lane.b32.xlu1 %v5172_v36, %s4458_s22 }
 0x4c8   :  { %1574 = vrot.lane.b32.xlu0 %v5181_v28, %s4458_s22 }
 0x4ca   :  { %1590 = vrot.lane.b32.xlu1 %v5199_v19, %s4458_s22 }
 0x4cc   :  { %1572 = vrot.lane.b32.xlu0 %v5205_v11, %s4458_s22 }
 0x4ce   :  { %1588 = vrot.lane.b32.xlu1 %v5218_v40, %s4458_s22 }
 0x4d0   :  { %1570 = vrot.lane.b32.xlu0 %v5221_v12, %s4458_s22 }
 0x4d2   :  { %1586 = vrot.lane.b32.xlu1 %v5231_v38, %s4458_s22 }
 0x4d4   :  { %1568 = vrot.lane.b32.xlu0 %v5235_v54, %s4458_s22 }
 0x4d6   :  { %1584 = vrot.lane.b32.xlu1 %v5237_v29, %s4458_s22 }
 0x4f2   :  { %v1513_v63 = vpop.permute.xlu0 %1512 }
 0x4f4   :  { %v1529_v4 = vpop.permute.xlu1 %1528 }
 0x4f5   :  { %v1540_v24 = vsel %vm393_vm4, %v1513_v63, %v1529_v4  ;;  %v1548_v61 = vsel %vm393_vm4, %v1529_v4, %v1513_v63  ;;  %v3330_v4 = vld [vmem:[#allocation9 + $0x90] sm:$0xff] }
 0x4f6   :  { %v1515_v49 = vpop.permute.xlu0 %1514 }
 0x4f8   :  { %v1531_v2 = vpop.permute.xlu1 %1530 }
 0x4f9   :  { %v1541_v9 = vsel %vm393_vm4, %v1515_v49, %v1531_v2  ;;  %v1549_v14 = vsel %vm393_vm4, %v1531_v2, %v1515_v49  ;;  %v2358_v2 = vld [vmem:[#allocation7] sm:$0xff] }
 0x4fa   :  { %v1517_v8 = vpop.permute.xlu0 %1516 }
 0x4fc   :  { %v1533_v60 = vpop.permute.xlu1 %1532 }
 0x4fd   :  { %v1542_v47 = vsel %vm393_vm4, %v1517_v8, %v1533_v60  ;;  %v1550_v30 = vsel %vm393_vm4, %v1533_v60, %v1517_v8 }
 0x4fe   :  { %v1519_v10 = vpop.permute.xlu0 %1518 }
 0x500   :  { %v1535_v36 = vpop.permute.xlu1 %1534 }
 0x501   :  { %v1551_v28 = vsel %vm393_vm4, %v1535_v36, %v1519_v10  ;;  %v1543_v19 = vsel %vm393_vm4, %v1519_v10, %v1535_v36 }
 0x502   :  { %v1511_v50 = vpop.permute.xlu0 %1510  ;;  %1810 = vmatprep.subr.mxu1 %v1543_v19 }
 0x503   :  { %4137 = vmatpush1.msk.msra.mxu1 %vm4720_vm7, %v1551_v28  ;;  %v2359_v28 = vld [vmem:[#allocation7 + $0x8] sm:$0xff] }
 0x504   :  { %1812 = vmatprep.subr.mxu1 %v1542_v47  ;;  %v1527_v34 = vpop.permute.xlu1 %1526 }
 0x505   :  { %4139 = vmatpush1.msk.msra.mxu1 %vm4720_vm7, %v1550_v30  ;;  %v1539_v52 = vsel %vm393_vm4, %v1511_v50, %v1527_v34  ;;  %v1547_v26 = vsel %vm393_vm4, %v1527_v34, %v1511_v50  ;;  %v2362_v30 = vld [vmem:[#allocation7 + $0x20] sm:$0xff] }
 0x506   :  { %v1509_v11 = vpop.permute.xlu0 %1508  ;;  %1814 = vmatprep.subr.mxu1 %v1541_v9 }
 0x507   :  { %4141 = vmatpush1.msk.msra.mxu1 %vm4720_vm7, %v1549_v14 }
 0x508   :  { %1816 = vmatprep.subr.mxu1 %v1540_v24  ;;  %v1525_v42 = vpop.permute.xlu1 %1524 }
 0x509   :  { %4143 = vmatpush1.msk.msra.mxu1 %vm4720_vm7, %v1548_v61  ;;  %v1538_v45 = vsel %vm393_vm4, %v1509_v11, %v1525_v42  ;;  %v1546_v44 = vsel %vm393_vm4, %v1525_v42, %v1509_v11  ;;  %v2363_v42 = vld [vmem:[#allocation7 + $0x28] sm:$0xff] }
 0x50a   :  { %v1507_v17 = vpop.permute.xlu0 %1506  ;;  %1818 = vmatprep.subr.mxu1 %v1539_v52 }
 0x50b   :  { %4145 = vmatpush1.msk.msra.mxu1 %vm4720_vm7, %v1547_v26 }
 0x50c   :  { %1820 = vmatprep.subr.mxu1 %v1538_v45  ;;  %v1523_v40 = vpop.permute.xlu1 %1522 }
 0x50d   :  { %v1545_v13 = vsel %vm393_vm4, %v1523_v40, %v1507_v17  ;;  %4147 = vmatpush1.msk.msra.mxu1 %vm4720_vm7, %v1546_v44  ;;  %v1537_v12 = vsel %vm393_vm4, %v1507_v17, %v1523_v40 }
 0x50e   :  { %v1505_v20 = vpop.permute.xlu0 %1504  ;;  %1822 = vmatprep.subr.mxu1 %v1537_v12 }
 0x50f   :  { %4149 = vmatpush1.msk.msra.mxu1 %vm4720_vm7, %v1545_v13 }
 0x510   :  { %v1521_v21 = vpop.permute.xlu1 %1520 }
 0x511   :  { %v1544_v43 = vsel %vm393_vm4, %v1521_v21, %v1505_v20  ;;  %v1536_v18 = vsel %vm393_vm4, %v1505_v20, %v1521_v21 }
 0x512   :  { %1824 = vmatprep.subr.mxu1 %v1536_v18  ;;  %v2367_v38 = vpop.permute.xlu0 %2366 }
 0x513   :  { %4151 = vmatpush1.msk.msra.mxu1 %vm4720_vm7, %v1544_v43 }
 0x514   :  { %4152 = vmatmul.mubr.msk.f32.vlgmr.msra.gmra.mxu1 %vm1632_vm9, %v1478_v27  ;;  %2430 = vmatprep.subr.mxu1 %v5254_v3  ;;  %v2371_v25 = vpop.permute.xlu1 %2370 }
 0x515   :  { %2431 = vmatpush1.msra.mxu1 %v5246_v37  ;;  %1864 = vmatprep.mubr.f32.mxu1 %v6410_v0  ;;  %v2373_v41 = vsel %vm393_vm4, %v2367_v38, %v2371_v25  ;;  %v2375_v32 = vsel %vm393_vm4, %v2371_v25, %v2367_v38 }
 0x516   :  { %2432 = vmatprep.subr.mxu1 %v5264_v46  ;;  %v2365_v54 = vpop.permute.xlu0 %2364 }
 0x517   :  { %2433 = vmatpush1.msra.mxu1 %v5256_v6 }
 0x518   :  { %4153 = vmatmul.mubr.msk.f32.gmra.mxu1 %vm1632_vm9, %v1479_v57  ;;  %2513 = vmatprep.subr.mxu1 %v2373_v41  ;;  %v2369_v29 = vpop.permute.xlu1 %2368 }
 0x519   :  { %1870 = vmatprep.mubr.f32.mxu1 %v6410_v0  ;;  %v2372_v5 = vsel %vm393_vm4, %v2365_v54, %v2369_v29  ;;  %v2374_v7 = vsel %vm393_vm4, %v2369_v29, %v2365_v54  ;;  %v1496_v54 = vld [vmem:[#allocation9 + $0x80] sm:$0xff]  ;;  %v1497_v29 = vld [vmem:[#allocation9 + $0x88] sm:$0xff] }
 0x51a   :  { %v2383_v23 = vpop.permute.xlu0 %2382 }
 0x51c   :  { %4154 = vmatmul.mubr.msk.f32.gmra.mxu1 %vm1632_vm9, %v1480_v53  ;;  %v2387_v39 = vpop.permute.xlu1 %2386 }
 0x51d   :  { %1876 = vmatprep.mubr.f32.mxu1 %v6410_v0  ;;  %v2391_v63 = vsel %vm404_vm2, %v2387_v39, %v2383_v23  ;;  %v2389_v60 = vsel %vm404_vm2, %v2383_v23, %v2387_v39  ;;  %v1499_v23 = vld [vmem:[#allocation9 + $0x98] sm:$0xff]  ;;  %v1501_v39 = vld [vmem:[#allocation9 + $0xa8] sm:$0xff] }
 0x51e   :  { %v2381_v37 = vpop.permute.xlu0 %2380 }
 0x520   :  { %4155 = vmatmul.mubr.msk.f32.gmra.mxu1 %vm1632_vm9, %v1481_v31  ;;  %v2385_v33 = vpop.permute.xlu1 %2384  ;;  %v1498_v31 = vld [vmem:[#allocation9 + $0x90] sm:$0xff] }
 0x521   :  { %1882 = vmatprep.mubr.f32.mxu1 %v6410_v0  ;;  %v2390_v10 = vsel %vm404_vm2, %v2385_v33, %v2381_v37  ;;  %v2388_v50 = vsel %vm404_vm2, %v2381_v37, %v2385_v33  ;;  %v1503_v37 = vld [vmem:[#allocation9 + $0xb8] sm:$0xff] }
 0x524   :  { %4156 = vmatmul.mubr.msk.f32.gmra.mxu1 %vm1632_vm9, %v1482_v62  ;;  %v1500_v62 = vld [vmem:[#allocation9 + $0xa0] sm:$0xff] }
 0x525   :  { %1888 = vmatprep.mubr.f32.mxu1 %v6410_v0 }
 0x528   :  { %4157 = vmatmul.mubr.msk.f32.gmra.mxu1 %vm1632_vm9, %v1483_v1  ;;  %v1502_v1 = vld [vmem:[#allocation9 + $0xb0] sm:$0xff] }
 0x529   :  { %1894 = vmatprep.mubr.f32.mxu1 %v6410_v0 }
 0x52b   :  { %v5390_v3 = vpop.permute.xlu0 %2658 }
 0x52c   :  { %4158 = vmatmul.mubr.msk.f32.gmra.mxu1 %vm1632_vm9, %v1484_v48 }
 0x52d   :  { %v5393_v6 = vpop.permute.xlu1 %2653  ;;  %1900 = vmatprep.mubr.f32.mxu1 %v6410_v0 }
 0x52f   :  { %v5396_v46 = vpop.permute.xlu0 %2674 }
 0x530   :  { %4159 = vmatmul.mubr.msk.f32.gmra.mxu1 %vm1632_vm9, %v1485_v51 }
 0x531   :  { %v5399_v56 = vpop.permute.xlu1 %2669  ;;  %2466 = vmatprep.mubr.f32.mxu1 %v6410_v0 }
 0x533   :  { %v1583_v22 = vpop.permute.xlu0 %1582 }
 0x534   :  { %4188 = vmatmul.mubr.msk.f32.vlgmr.msra.gmra.mxu1 %vm559_vm6, %v2360_v16 }
 0x535   :  { %4191 = vmatpush1.msk.msra.mxu1 %vm4720_vm7, %v2375_v32  ;;  %v1597_v59 = vpop.permute.xlu1 %1596  ;;  %2472 = vmatprep.mubr.f32.mxu1 %v6410_v0 }
 0x536   :  { %2515 = vmatprep.subr.mxu1 %v2372_v5 }
 0x537   :  { %v1581_v15 = vpop.permute.xlu0 %1580  ;;  %4193 = vmatpush1.msk.msra.mxu1 %vm4720_vm7, %v2374_v7 }
 0x538   :  { %4197 = vmatprep.subr.msk.mxu1 %vm4736_vm8, %v2391_v63  ;;  %4189 = vmatmul.mubr.msk.f32.gmra.mxu1 %vm559_vm6, %v2361_v58  ;;  %v1614_v14 = vsel %vm404_vm2, %v1597_v59, %v1581_v15  ;;  %v1606_v61 = vsel %vm404_vm2, %v1581_v15, %v1597_v59 }
 0x539   :  { %v1595_v49 = vpop.permute.xlu1 %1594  ;;  %2549 = vmatprep.mubr.f32.mxu1 %v6410_v0 }
 0x53b   :  { %v1579_v8 = vpop.permute.xlu0 %1578 }
 0x53c   :  { %4194 = vmatmul.mubr.msk.f32.vlgmr.msra.gmra.mxu1 %vm559_vm6, %v2358_v2  ;;  %v1613_v52 = vsel %vm404_vm2, %v1595_v49, %v1579_v8  ;;  %v1605_v26 = vsel %vm404_vm2, %v1579_v8, %v1595_v49 }
 0x53d   :  { %2597 = vmatpush1.msra.mxu1 %v2389_v60  ;;  %v1593_v36 = vpop.permute.xlu1 %1592  ;;  %2555 = vmatprep.mubr.f32.mxu1 %v6410_v0 }
 0x53e   :  { %4199 = vmatprep.subr.msk.mxu1 %vm4736_vm8, %v2390_v10 }
 0x53f   :  { %v1577_v19 = vpop.permute.xlu0 %1576  ;;  %2599 = vmatpush1.msra.mxu1 %v2388_v50 }
 0x540   :  { %4195 = vmatmul.mubr.msk.f32.gmra.mxu1 %vm559_vm6, %v2359_v28  ;;  %v1612_v45 = vsel %vm404_vm2, %v1593_v36, %v1577_v19  ;;  %v1604_v44 = vsel %vm404_vm2, %v1577_v19, %v1593_v36 }
 0x541   :  { %v1599_v47 = vpop.permute.xlu1 %1598  ;;  %2632 = vmatprep.mubr.f32.mxu1 %v6410_v0 }
 0x542   :  { %v1607_v34 = vsel %vm404_vm2, %v1583_v22, %v1599_v47  ;;  %v1615_v11 = vsel %vm404_vm2, %v1599_v47, %v1583_v22 }
 0x543   :  { %v1575_v9 = vpop.permute.xlu0 %1574  ;;  %4161 = vmatprep.subr.msk.mxu0 %vm4736_vm8, %v1615_v11 }
 0x544   :  { %1948 = vmatpush1.msra.mxu0 %v1607_v34  ;;  %4200 = vmatmul.mubr.msk.f32.vlgmr.msra.gmra.mxu1 %vm559_vm6, %v2362_v30 }
 0x545   :  { %v1591_v24 = vpop.permute.xlu1 %1590  ;;  %4163 = vmatprep.subr.msk.mxu0 %vm4736_vm8, %v1614_v14  ;;  %2638 = vmatprep.mubr.f32.mxu1 %v6410_v0 }
 0x546   :  { %1950 = vmatpush1.msra.mxu0 %v1606_v61  ;;  %v1611_v13 = vsel %vm404_vm2, %v1591_v24, %v1575_v9  ;;  %v1603_v12 = vsel %vm404_vm2, %v1575_v9, %v1591_v24 }
 0x547   :  { %v1573_v17 = vpop.permute.xlu0 %1572  ;;  %4165 = vmatprep.subr.msk.mxu0 %vm4736_vm8, %v1613_v52 }
 0x548   :  { %1952 = vmatpush1.msra.mxu0 %v1605_v26  ;;  %4201 = vmatmul.mubr.msk.f32.gmra.mxu1 %vm559_vm6, %v2363_v42 }
 0x549   :  { %v1589_v40 = vpop.permute.xlu1 %1588  ;;  %4167 = vmatprep.subr.msk.mxu0 %vm4736_vm8, %v1612_v45  ;;  %2829 = vmatprep.mubr.f32.mxu1 %v6410_v0 }
 0x54a   :  { %1954 = vmatpush1.msra.mxu0 %v1604_v44  ;;  %v1610_v21 = vsel %vm404_vm2, %v1589_v40, %v1573_v17  ;;  %v1602_v43 = vsel %vm404_vm2, %v1573_v17, %v1589_v40 }
 0x54b   :  { %v1571_v20 = vpop.permute.xlu0 %1570  ;;  %4169 = vmatprep.subr.msk.mxu0 %vm4736_vm8, %v1611_v13 }
 0x54c   :  { %1956 = vmatpush1.msra.mxu0 %v1603_v12 }
 0x54d   :  { %v1587_v18 = vpop.permute.xlu1 %1586  ;;  %4171 = vmatprep.subr.msk.mxu0 %vm4736_vm8, %v1610_v21 }
 0x54e   :  { %v1601_v27 = vsel %vm404_vm2, %v1571_v20, %v1587_v18  ;;  %v1609_v38 = vsel %vm404_vm2, %v1587_v18, %v1571_v20  ;;  %1958 = vmatpush1.msra.mxu0 %v1602_v43 }
 0x54f   :  { %4173 = vmatprep.subr.msk.mxu0 %vm4736_vm8, %v1609_v38  ;;  %v1569_v25 = vpop.permute.xlu0 %1568 }
 0x550   :  { %1960 = vmatpush1.msra.mxu0 %v1601_v27 }
 0x551   :  { %v1585_v57 = vpop.permute.xlu1 %1584 }
 0x552   :  { %v1600_v41 = vsel %vm404_vm2, %v1569_v25, %v1585_v57  ;;  %v1608_v53 = vsel %vm404_vm2, %v1585_v57, %v1569_v25 }
 0x553   :  { %4175 = vmatprep.subr.msk.mxu0 %vm4736_vm8, %v1608_v53 }
 0x554   :  { %1962 = vmatpush1.msra.mxu0 %v1600_v41 }
 0x555   :  { %4176 = vmatmul.mubr.msk.f32.vlgmr.msra.gmra.mxu0 %vm1632_vm9, %v1496_v54 }
 0x556   :  { %2001 = vmatprep.mubr.f32.mxu0 %v6410_v0 }
 0x559   :  { %4177 = vmatmul.mubr.msk.f32.gmra.mxu0 %vm1632_vm9, %v1497_v29 }
 0x55a   :  { %2007 = vmatprep.mubr.f32.mxu0 %v6410_v0 }
 0x55d   :  { %4178 = vmatmul.mubr.msk.f32.gmra.mxu0 %vm1632_vm9, %v1498_v31 }
 0x55e   :  { %2013 = vmatprep.mubr.f32.mxu0 %v6410_v0  ;;  %v5500_v33 = vpop.f32.mrf.mxu0 }
 0x560   :  { %v5502_v48 = vpop.f32.mrf.mxu0 }
 0x561   :  { %4179 = vmatmul.mubr.msk.f32.gmra.mxu0 %vm1632_vm9, %v1499_v23 }
 0x562   :  { %2019 = vmatprep.mubr.f32.mxu0 %v6410_v0  ;;  %v5504_v51 = vpop.f32.mrf.mxu0 }
 0x564   :  { %v5506_v16 = vpop.f32.mrf.mxu0 }
 0x565   :  { %4180 = vmatmul.mubr.msk.f32.gmra.mxu0 %vm1632_vm9, %v1500_v62 }
 0x566   :  { %2025 = vmatprep.mubr.f32.mxu0 %v6410_v0  ;;  %v5508_v22 = vpop.f32.mrf.mxu0 }
 0x568   :  { %v5510_v32 = vpop.f32.mrf.mxu0 }
 0x569   :  { %4181 = vmatmul.mubr.msk.f32.gmra.mxu0 %vm1632_vm9, %v1501_v39 }
 0x56a   :  { %2031 = vmatprep.mubr.f32.mxu0 %v6410_v0  ;;  %v5512_v5 = vpop.f32.mrf.mxu0 }
 0x56c   :  { %v5514_v59 = vpop.f32.mrf.mxu0 }
 0x56d   :  { %4182 = vmatmul.mubr.msk.f32.gmra.mxu0 %vm1632_vm9, %v1502_v1 }
 0x56e   :  { %2037 = vmatprep.mubr.f32.mxu0 %v6410_v0  ;;  %v5516_v7 = vpop.f32.mrf.mxu0 }
 0x570   :  { %v5522_v49 = vpop.f32.mrf.mxu0 }
 0x571   :  { %4183 = vmatmul.mubr.msk.f32.gmra.mxu0 %vm1632_vm9, %v1503_v37 }
 0x572   :  { %2966 = vmatprep.mubr.f32.mxu0 %v6410_v0  ;;  %v5528_v60 = vpop.f32.mrf.mxu0 }
 0x574   :  { %v5534_v28 = vpop.f32.mrf.mxu0 }
 0x576   :  { %v5540_v47 = vpop.f32.mrf.mxu0 }
 0x578   :  { %v5546_v11 = vpop.f32.mrf.mxu0 }
 0x57a   :  { %v5552_v24 = vpop.f32.mrf.mxu0 }
 0x57c   :  { %v1767_v17 = vpop.f32.mrf.mxu0 }
 0x5d4   :  { %v1860_v58 = vpop.f32.mrf.mxu1 }
 0x5d6   :  { %v5518_v15 = vpop.f32.mrf.mxu1 }
 0x5d8   :  { %v5520_v63 = vpop.f32.mrf.mxu1 }
 0x5da   :  { %v5524_v2 = vpop.f32.mrf.mxu1 }
 0x5dc   :  { %v5526_v8 = vpop.f32.mrf.mxu1 }
 0x5de   :  { %v5530_v10 = vpop.f32.mrf.mxu1 }
 0x5e0   :  { %v5532_v36 = vpop.f32.mrf.mxu1 }
 0x5e2   :  { %v5536_v50 = vpop.f32.mrf.mxu1 }
 0x5e4   :  { %v5538_v19 = vpop.f32.mrf.mxu1 }
 0x5e6   :  { %v5542_v30 = vpop.f32.mrf.mxu1 }
 0x5e8   :  { %v5544_v34 = vpop.f32.mrf.mxu1 }
 0x5ea   :  { %v5548_v9 = vpop.f32.mrf.mxu1 }
 0x5ec   :  { %v5550_v14 = vpop.f32.mrf.mxu1 }
 0x5ee   :  { %v5554_v61 = vpop.f32.mrf.mxu1 }
 0x5f0   :  { %v5556_v42 = vpop.f32.mrf.mxu1 }
 0x5f2   :  { %v1904_v52 = vpop.f32.mrf.mxu1 }
 0x5f3   :  { %v5558_v26 = vadd.f32 %v1904_v52, %v1767_v17 }
 0x5f4   :  { %v2468_v45 = vpop.f32.mrf.mxu1 }
 0x5f5   :  { %6417 = vst [vmem:[#allocation28_spill] sm:$0xff] %v5558_v26 }
 0x5f6   :  { %v2470_v44 = vpop.f32.mrf.mxu1 }
 0x5f8   :  { %v2474_v40 = vpop.f32.mrf.mxu1 }
 0x5fa   :  { %v2476_v13 = vpop.f32.mrf.mxu1 }
 0x5fc   :  { %v2551_v12 = vpop.f32.mrf.mxu1 }
 0x5fd   :  { %v2552_v18 = vadd.f32 %v2551_v12, %v2468_v45 }
 0x5fe   :  { %v2553_v20 = vpop.f32.mrf.mxu1 }
 0x5ff   :  { %v2554_v38 = vadd.f32 %v2553_v20, %v2470_v44 }
 0x600   :  { %v2557_v21 = vpop.f32.mrf.mxu1 }
 0x601   :  { %v2558_v41 = vadd.f32 %v2557_v21, %v2474_v40 }
 0x602   :  { %v2559_v43 = vpop.f32.mrf.mxu1 }
 0x603   :  { %v2560_v31 = vadd.f32 %v2559_v43, %v2476_v13 }
 0x604   :  { %v2634_v27 = vpop.f32.mrf.mxu1 }
 0x605   :  { %v2645_v25 = vadd.f32 %v2634_v27, %v2552_v18  ;;  %v4203_v27 = vld [vmem:[%s6348_s9 + $0x48] sm:$0xff] }
 0x606   :  { %v2636_v57 = vpop.f32.mrf.mxu1 }
 0x607   :  { %v2661_v53 = vmul.f32 %v5393_v6, %v2645_v25  ;;  %v2646_v54 = vadd.f32 %v2636_v57, %v2554_v38  ;;  %v1873_v25 = vadd.f32 %v5526_v8, %v5508_v22  ;;  %v3239_v22 = vld [vmem:[%s6350_s11 + $0x38] sm:$0xff] }
 0x608   :  { %v2640_v29 = vpop.f32.mrf.mxu1 }
 0x609   :  { %v2677_v23 = vadd.f32 %v5399_v56, %v2661_v53  ;;  %v2662_v62 = vmul.f32 %v5393_v6, %v2646_v54  ;;  %v2647_v39 = vadd.f32 %v2640_v29, %v2558_v41  ;;  %v1875_v53 = vadd.f32 %v5530_v10, %v5510_v32  ;;  %v4205_v32 = vld [vmem:[%s6348_s9 + $0x58] sm:$0xff] }
 0x60a   :  { %v2642_v1 = vpop.f32.mrf.mxu1  ;;  %v1879_v29 = vadd.f32 %v5532_v36, %v5512_v5  ;;  %v3238_v5 = vld [vmem:[%s6350_s11 + $0x30] sm:$0xff] }
 0x60b   :  { %v2681_v37 = vmax.f32 %v2677_v23, 0.0  ;;  %v2678_v17 = vadd.f32 %v5399_v56, %v2662_v62  ;;  %v2663_v52 = vmul.f32 %v5390_v3, %v2647_v39  ;;  %v2648_v45 = vadd.f32 %v2642_v1, %v2560_v31  ;;  %v3173_v23 = vld [vmem:[%s6349_s10 + $0x28] sm:$0xff] }
 0x60c   :  { %v1861_v56 = vadd.f32 %v1860_v58, %v5500_v33  ;;  %v1867_v33 = vadd.f32 %v5520_v63, %v5504_v51  ;;  %v3175_v51 = vld [vmem:[%s6349_s10 + $0x38] sm:$0xff]  ;;  %v1881_v62 = vadd.f32 %v5536_v50, %v5514_v59  ;;  %v1885_v1 = vadd.f32 %v5538_v19, %v5516_v7  ;;  %v4206_v59 = vld [vmem:[%s6348_s9 + $0x60] sm:$0xff]  ;;  %v3237_v7 = vld [vmem:[%s6350_s11 + $0x28] sm:$0xff] }
 0x60d   :  { %v2682_v44 = vmax.f32 %v2678_v17, 0.0  ;;  %v2679_v40 = vadd.f32 %v5396_v46, %v2663_v52  ;;  %v2664_v12 = vmul.f32 %v5390_v3, %v2648_v45  ;;  %2709 = vrot.lane.b32.xlu0 %v2681_v37, %s4457_s21  ;;  %v4202_v3 = vld [vmem:[%s6348_s9 + $0x40] sm:$0xff]  ;;  %v1887_v52 = vadd.f32 %v5542_v30, %v5522_v49  ;;  %v4207_v49 = vld [vmem:[%s6348_s9 + $0x68] sm:$0xff] }
 0x60e   :  { %v3172_v17 = vld [vmem:[%s6349_s10 + $0x20] sm:$0xff] }
 0x60f   :  { %v2683_v13 = vmax.f32 %v2679_v40, 0.0  ;;  %2713 = vrot.lane.b32.xlu1 %v2682_v44, %s4457_s21  ;;  %v2680_v6 = vadd.f32 %v5396_v46, %v2664_v12  ;;  %v1863_v46 = vadd.f32 %v5518_v15, %v5502_v48  ;;  %v1869_v15 = vadd.f32 %v5524_v2, %v5506_v16  ;;  %v3174_v16 = vld [vmem:[%s6349_s10 + $0x30] sm:$0xff]  ;;  %v3171_v12 = vld [vmem:[%s6349_s10 + $0x18] sm:$0xff] }
 0x610   :  { %v4204_v2 = vld [vmem:[%s6348_s9 + $0x50] sm:$0xff] }
 0x611   :  { %2711 = vrot.lane.b32.xlu0 %v2683_v13, %s4457_s21  ;;  %v2684_v20 = vmax.f32 %v2680_v6, 0.0 }
 0x613   :  { %2793 = vmatprep.subr.mxu1 %v2684_v20  ;;  %2715 = vrot.lane.b32.xlu1 %v2684_v20, %s4457_s21 }
 0x614   :  { %2794 = vmatpush1.msra.mxu1 %v2683_v13 }
 0x615   :  { %2795 = vmatprep.subr.mxu1 %v2682_v44  ;;  %2727 = vrot.lane.b32.xlu0 %v2683_v13, %s4458_s22  ;;  %v1997_v21 = vpop.f32.mrf.mxu0  ;;  %v1893_v13 = vadd.f32 %v5548_v9, %v5534_v28  ;;  %v4208_v28 = vld [vmem:[%s6348_s9 + $0x70] sm:$0xff] }
 0x616   :  { %v5579_v43 = vadd.f32 %v1997_v21, %v1861_v56  ;;  %2796 = vmatpush1.msra.mxu1 %v2681_v37  ;;  %v1899_v21 = vadd.f32 %v5554_v61, %v5546_v11  ;;  %v4209_v11 = vld [vmem:[%s6348_s9 + $0x78] sm:$0xff] }
 0x617   :  { %2731 = vrot.lane.b32.xlu1 %v2684_v20, %s4458_s22  ;;  %v1999_v18 = vpop.f32.mrf.mxu0  ;;  %4218 = vmatmul.mubr.msk.f32.vlgmr.msra.gmra.mxu1 %vm559_vm6, %v4202_v3  ;;  %v1897_v20 = vadd.f32 %v5550_v14, %v5540_v47  ;;  %v3170_v3 = vld [vmem:[%s6349_s10 + $0x10] sm:$0xff]  ;;  %v3235_v47 = vld [vmem:[%s6350_s11 + $0x18] sm:$0xff] }
 0x618   :  { %v5585_v58 = vadd.f32 %v1999_v18, %v1863_v46  ;;  %2835 = vmatprep.mubr.f32.mxu1 %v6410_v0  ;;  %v1903_v18 = vadd.f32 %v5556_v42, %v5552_v24  ;;  %v3234_v24 = vld [vmem:[%s6350_s11 + $0x10] sm:$0xff]  ;;  %v3168_v42 = vld [vmem:[%s6349_s10] sm:$0xff] }
 0x619   :  { %2725 = vrot.lane.b32.xlu0 %v2681_v37, %s4458_s22  ;;  %v2003_v48 = vpop.f32.mrf.mxu0 }
 0x61a   :  { %v5594_v38 = vadd.f32 %v2003_v48, %v1867_v33 }
 0x61b   :  { %2729 = vrot.lane.b32.xlu1 %v2682_v44, %s4458_s22  ;;  %v2005_v63 = vpop.f32.mrf.mxu0  ;;  %4219 = vmatmul.mubr.msk.f32.gmra.mxu1 %vm559_vm6, %v4203_v27  ;;  %v1891_v44 = vadd.f32 %v5544_v34, %v5528_v60  ;;  %v3236_v60 = vld [vmem:[%s6350_s11 + $0x20] sm:$0xff]  ;;  %v3169_v27 = vld [vmem:[%s6349_s10 + $0x8] sm:$0xff] }
 0x61c   :  { %v5603_v57 = vadd.f32 %v2005_v63, %v1869_v15  ;;  %2841 = vmatprep.mubr.f32.mxu1 %v6410_v0  ;;  %v3233_v15 = vld [vmem:[%s6350_s11 + $0x8] sm:$0xff] }
 0x61d   :  { %3213 = vperm.xlu0 %4336, %v3175_v51   ;;  %v2009_v41 = vpop.f32.mrf.mxu0  ;;  %v3232_v51 = vld [vmem:[%s6350_s11] sm:$0xff] }
 0x61e   :  { %6418 = vst [vmem:[#allocation19_spill] sm:$0xff] %v5603_v57  ;;  %v5614_v54 = vadd.f32 %v2009_v41, %v1873_v25 }
 0x61f   :  { %3208 = vperm.xlu1 %4337, %v3174_v16   ;;  %v2011_v8 = vpop.f32.mrf.mxu0  ;;  %4220 = vmatmul.mubr.msk.f32.gmra.mxu1 %vm559_vm6, %v4204_v2 }
 0x620   :  { %6419 = vst [vmem:[#allocation23_spill] sm:$0xff] %v5614_v54  ;;  %v5622_v31 = vadd.f32 %v2011_v8, %v1875_v53  ;;  %2847 = vmatprep.mubr.f32.mxu1 %v6410_v0 }
 0x621   :  { %3277 = vperm.xlu0 %4336, %v3239_v22   ;;  %v2015_v10 = vpop.f32.mrf.mxu0 }
 0x622   :  { %6420 = vst [vmem:[#allocation20_spill] sm:$0xff] %v5622_v31  ;;  %v5633_v39 = vadd.f32 %v2015_v10, %v1879_v29  ;;  %v2685_v29 = vld [vmem:[%s6348_s9] sm:$0xff] }
 0x623   :  { %3203 = vperm.xlu1 %4337, %v3173_v23   ;;  %v2017_v36 = vpop.f32.mrf.mxu0  ;;  %4221 = vmatmul.mubr.msk.f32.gmra.mxu1 %vm559_vm6, %v4205_v32 }
 0x624   :  { %6421 = vst [vmem:[#allocation25_spill] sm:$0xff] %v5633_v39  ;;  %v5641_v37 = vadd.f32 %v2017_v36, %v1881_v62  ;;  %2853 = vmatprep.mubr.f32.mxu1 %v6410_v0 }
 0x625   :  { %3272 = vperm.xlu0 %4336, %v3238_v5   ;;  %v2021_v50 = vpop.f32.mrf.mxu0  ;;  %v2686_v5 = vld [vmem:[%s6348_s9 + $0x8] sm:$0xff] }
 0x626   :  { %6422 = vst [vmem:[#allocation31_spill] sm:$0xff] %v5641_v37  ;;  %v5652_v45 = vadd.f32 %v2021_v50, %v1885_v1  ;;  %v4210_v50 = vld [vmem:[%s6348_s9 + $0x80] sm:$0xff] }
 0x627   :  { %3198 = vperm.xlu1 %4337, %v3172_v17   ;;  %v2023_v19 = vpop.f32.mrf.mxu0  ;;  %4222 = vmatmul.mubr.msk.f32.gmra.mxu1 %vm559_vm6, %v4206_v59 }
 0x628   :  { %6423 = vst [vmem:[#allocation27_spill] sm:$0xff] %v5652_v45  ;;  %v5660_v40 = vadd.f32 %v2023_v19, %v1887_v52  ;;  %2859 = vmatprep.mubr.f32.mxu1 %v6410_v0  ;;  %v2687_v52 = vld [vmem:[%s6348_s9 + $0x10] sm:$0xff]  ;;  %v2688_v19 = vld [vmem:[%s6348_s9 + $0x18] sm:$0xff] }
 0x629   :  { %3267 = vperm.xlu0 %4336, %v3237_v7   ;;  %v2027_v30 = vpop.f32.mrf.mxu0  ;;  %v4211_v7 = vld [vmem:[%s6348_s9 + $0x88] sm:$0xff] }
 0x62a   :  { %6424 = vst [vmem:[#allocation29_spill] sm:$0xff] %v5660_v40  ;;  %v5671_v6 = vadd.f32 %v2027_v30, %v1891_v44  ;;  %v4212_v44 = vld [vmem:[%s6348_s9 + $0x90] sm:$0xff]  ;;  %v2690_v30 = vld [vmem:[%s6348_s9 + $0x28] sm:$0xff] }
 0x62b   :  { %3193 = vperm.xlu1 %4337, %v3171_v12   ;;  %v2029_v34 = vpop.f32.mrf.mxu0  ;;  %4223 = vmatmul.mubr.msk.f32.gmra.mxu1 %vm559_vm6, %v4207_v49  ;;  %v2689_v12 = vld [vmem:[%s6348_s9 + $0x20] sm:$0xff]  ;;  %v4213_v49 = vld [vmem:[%s6348_s9 + $0x98] sm:$0xff] }
 0x62c   :  { %6425 = vst [vmem:[#allocation22_spill] sm:$0xff] %v5671_v6  ;;  %v5679_v56 = vadd.f32 %v2029_v34, %v1893_v13  ;;  %2865 = vmatprep.mubr.f32.mxu1 %v6410_v0  ;;  %v4214_v13 = vld [vmem:[%s6348_s9 + $0xa0] sm:$0xff]  ;;  %v4215_v34 = vld [vmem:[%s6348_s9 + $0xa8] sm:$0xff] }
 0x62d   :  { %3262 = vperm.xlu0 %4336, %v3236_v60   ;;  %v2033_v9 = vpop.f32.mrf.mxu0  ;;  %v2691_v60 = vld [vmem:[%s6348_s9 + $0x30] sm:$0xff] }
 0x62e   :  { %6426 = vst [vmem:[#allocation21_spill] sm:$0xff] %v5679_v56  ;;  %v5690_v46 = vadd.f32 %v2033_v9, %v1897_v20  ;;  %v2692_v20 = vld [vmem:[%s6348_s9 + $0x38] sm:$0xff] }
 0x62f   :  { %3188 = vperm.xlu1 %4337, %v3170_v3   ;;  %v2035_v14 = vpop.f32.mrf.mxu0  ;;  %4224 = vmatmul.mubr.msk.f32.gmra.mxu1 %vm559_vm6, %v4208_v28  ;;  %v4216_v3 = vld [vmem:[%s6348_s9 + $0xb0] sm:$0xff]  ;;  %v4217_v28 = vld [vmem:[%s6348_s9 + $0xb8] sm:$0xff] }
 0x630   :  { %6427 = vst [vmem:[#allocation32_spill] sm:$0xff] %v5690_v46  ;;  %v5698_v33 = vadd.f32 %v2035_v14, %v1899_v21  ;;  %2871 = vmatprep.mubr.f32.mxu1 %v6410_v0 }
 0x631   :  { %3257 = vperm.xlu0 %4336, %v3235_v47   ;;  %v2039_v61 = vpop.f32.mrf.mxu0 }
 0x632   :  { %6428 = vst [vmem:[#allocation26_spill] sm:$0xff] %v5698_v33  ;;  %v5707_v48 = vadd.f32 %v2039_v61, %v1903_v18 }
 0x633   :  { %3183 = vperm.xlu1 %4337, %v3169_v27   ;;  %4225 = vmatmul.mubr.msk.f32.gmra.mxu1 %vm559_vm6, %v4209_v11 }
 0x634   :  { %6429 = vst [vmem:[#allocation24_spill] sm:$0xff] %v5707_v48  ;;  %3103 = vmatprep.mubr.f32.mxu1 %v6410_v0 }
 0x635   :  { %3252 = vperm.xlu0 %4336, %v3234_v24  }
 0x637   :  { %3178 = vperm.xlu1 %4337, %v3168_v42  }
 0x639   :  { %3247 = vperm.xlu0 %4336, %v3233_v15  }
 0x63b   :  { %3242 = vperm.xlu1 %4337, %v3232_v51  }
 0x67f   :  { %v2710_v63 = vpop.permute.xlu0 %2709 }
 0x681   :  { %v2714_v25 = vpop.permute.xlu1 %2713 }
 0x682   :  { %v2717_v8 = vsel %vm393_vm4, %v2710_v63, %v2714_v25  ;;  %v2719_v23 = vsel %vm393_vm4, %v2714_v25, %v2710_v63 }
 0x683   :  { %v2712_v16 = vpop.permute.xlu0 %2711 }
 0x685   :  { %v2716_v2 = vpop.permute.xlu1 %2715 }
 0x686   :  { %v2720_v41 = vsel %vm393_vm4, %v2716_v2, %v2712_v16  ;;  %v2718_v53 = vsel %vm393_vm4, %v2712_v16, %v2716_v2 }
 0x687   :  { %v2728_v22 = vpop.permute.xlu0 %2727  ;;  %2930 = vmatprep.subr.mxu0 %v2718_v53 }
 0x688   :  { %4227 = vmatpush1.msk.msra.mxu0 %vm4720_vm7, %v2720_v41 }
 0x689   :  { %v2732_v32 = vpop.permute.xlu1 %2731  ;;  %2932 = vmatprep.subr.mxu0 %v2717_v8 }
 0x68a   :  { %v2734_v10 = vsel %vm404_vm2, %v2728_v22, %v2732_v32  ;;  %v2736_v62 = vsel %vm404_vm2, %v2732_v32, %v2728_v22  ;;  %4229 = vmatpush1.msk.msra.mxu0 %vm4720_vm7, %v2719_v23  ;;  %v5859_v32 = vpop.f32.mrf.mxu0 }
 0x68b   :  { %4230 = vmatmul.mubr.msk.f32.vlgmr.msra.gmra.mxu0 %vm559_vm6, %v2685_v29  ;;  %4239 = vmatprep.subr.msk.mxu1 %vm4736_vm8, %v2736_v62  ;;  %v2726_v36 = vpop.permute.xlu0 %2725  ;;  %6430 = vst [vmem:[#allocation30_spill] sm:$0xff] %v5859_v32 }
 0x68c   :  { %3068 = vmatpush1.msra.mxu1 %v2734_v10  ;;  %2972 = vmatprep.mubr.f32.mxu0 %v6410_v0 }
 0x68d   :  { %v2730_v1 = vpop.permute.xlu1 %2729 }
 0x68e   :  { %v2733_v17 = vsel %vm404_vm2, %v2726_v36, %v2730_v1  ;;  %v2735_v59 = vsel %vm404_vm2, %v2730_v1, %v2726_v36 }
 0x68f   :  { %4231 = vmatmul.mubr.msk.f32.gmra.mxu0 %vm559_vm6, %v2686_v5  ;;  %4241 = vmatprep.subr.msk.mxu1 %vm4736_vm8, %v2735_v59 }
 0x690   :  { %3070 = vmatpush1.msra.mxu1 %v2733_v17  ;;  %2978 = vmatprep.mubr.f32.mxu0 %v6410_v0 }
 0x691   :  { %4242 = vmatmul.mubr.msk.f32.vlgmr.msra.gmra.mxu1 %vm559_vm6, %v4210_v50 }
 0x692   :  { %3109 = vmatprep.mubr.f32.mxu1 %v6410_v0 }
 0x693   :  { %4232 = vmatmul.mubr.msk.f32.gmra.mxu0 %vm559_vm6, %v2687_v52 }
 0x694   :  { %2984 = vmatprep.mubr.f32.mxu0 %v6410_v0 }
 0x695   :  { %4243 = vmatmul.mubr.msk.f32.gmra.mxu1 %vm559_vm6, %v4211_v7 }
 0x696   :  { %3115 = vmatprep.mubr.f32.mxu1 %v6410_v0 }
 0x697   :  { %4233 = vmatmul.mubr.msk.f32.gmra.mxu0 %vm559_vm6, %v2688_v19 }
 0x698   :  { %2990 = vmatprep.mubr.f32.mxu0 %v6410_v0  ;;  %v5831_v61 = vpop.permute.xlu0 %3213 }
 0x699   :  { %4244 = vmatmul.mubr.msk.f32.gmra.mxu1 %vm559_vm6, %v4212_v44 }
 0x69a   :  { %3121 = vmatprep.mubr.f32.mxu1 %v6410_v0  ;;  %v5839_v63 = vpop.permute.xlu1 %3208 }
 0x69b   :  { %4234 = vmatmul.mubr.msk.f32.gmra.mxu0 %vm559_vm6, %v2689_v12 }
 0x69c   :  { %2996 = vmatprep.mubr.f32.mxu0 %v6410_v0  ;;  %v5835_v15 = vpop.permute.xlu0 %3277 }
 0x69d   :  { %4245 = vmatmul.mubr.msk.f32.gmra.mxu1 %vm559_vm6, %v4213_v49 }
 0x69e   :  { %3127 = vmatprep.mubr.f32.mxu1 %v6410_v0  ;;  %v5845_v2 = vpop.permute.xlu1 %3203 }
 0x69f   :  { %4235 = vmatmul.mubr.msk.f32.gmra.mxu0 %vm559_vm6, %v2690_v30 }
 0x6a0   :  { %3002 = vmatprep.mubr.f32.mxu0 %v6410_v0  ;;  %v5841_v25 = vpop.permute.xlu0 %3272 }
 0x6a1   :  { %4246 = vmatmul.mubr.msk.f32.gmra.mxu1 %vm559_vm6, %v4214_v13 }
 0x6a2   :  { %3133 = vmatprep.mubr.f32.mxu1 %v6410_v0  ;;  %v5853_v8 = vpop.permute.xlu1 %3198 }
 0x6a3   :  { %4236 = vmatmul.mubr.msk.f32.gmra.mxu0 %vm559_vm6, %v2691_v60 }
 0x6a4   :  { %3008 = vmatprep.mubr.f32.mxu0 %v6410_v0  ;;  %v5849_v53 = vpop.permute.xlu0 %3267 }
 0x6a5   :  { %4247 = vmatmul.mubr.msk.f32.gmra.mxu1 %vm559_vm6, %v4215_v34 }
 0x6a6   :  { %3139 = vmatprep.mubr.f32.mxu1 %v6410_v0  ;;  %v3194_v10 = vpop.permute.xlu1 %3193 }
 0x6a7   :  { %4237 = vmatmul.mubr.msk.f32.gmra.mxu0 %vm559_vm6, %v2692_v20 }
 0x6a8   :  { %3552 = vmatprep.mubr.f32.mxu0 %v6410_v0  ;;  %v5855_v29 = vpop.permute.xlu0 %3262 }
 0x6a9   :  { %4248 = vmatmul.mubr.msk.f32.gmra.mxu1 %vm559_vm6, %v4216_v3 }
 0x6aa   :  { %3145 = vmatprep.mubr.f32.mxu1 %v6410_v0  ;;  %v3189_v50 = vpop.permute.xlu1 %3188 }
 0x6ac   :  { %v3258_v36 = vpop.permute.xlu0 %3257 }
 0x6ad   :  { %4249 = vmatmul.mubr.msk.f32.gmra.mxu1 %vm559_vm6, %v4217_v28 }
 0x6ae   :  { %3689 = vmatprep.mubr.f32.mxu1 %v6410_v0  ;;  %v3184_v60 = vpop.permute.xlu1 %3183 }
 0x6b0   :  { %v3253_v19 = vpop.permute.xlu0 %3252 }
 0x6b4   :  { %v3248_v48 = vpop.permute.xlu0 %3247 }
 0x6d7   :  { %v5827_v9 = vpop.f32.mrf.mxu1 }
 0x6d9   :  { %v5829_v21 = vpop.f32.mrf.mxu1 }
 0x6db   :  { %v2837_v47 = vpop.f32.mrf.mxu1 }
 0x6dd   :  { %v2839_v14 = vpop.f32.mrf.mxu1 }
 0x6df   :  { %v2843_v18 = vpop.f32.mrf.mxu1 }
 0x6e1   :  { %v2845_v27 = vpop.f32.mrf.mxu1 }
 0x6e3   :  { %v2849_v11 = vpop.f32.mrf.mxu1 }
 0x6e5   :  { %v2851_v24 = vpop.f32.mrf.mxu1 }
 0x6e7   :  { %v5833_v42 = vpop.f32.mrf.mxu1 }
 0x6e9   :  { %v5837_v51 = vpop.f32.mrf.mxu1 }
 0x6eb   :  { %v5843_v16 = vpop.f32.mrf.mxu1 }
 0x6ed   :  { %v5847_v41 = vpop.f32.mrf.mxu1 }
 0x6ef   :  { %v5851_v22 = vpop.f32.mrf.mxu1 }
 0x6f1   :  { %v5857_v23 = vpop.f32.mrf.mxu1 }
 0x6f3   :  { %v5863_v5 = vpop.f32.mrf.mxu1 }
 0x6f5   :  { %v5867_v17 = vpop.f32.mrf.mxu1 }
 0x74b   :  { %v5861_v62 = vpop.f32.mrf.mxu0 }
 0x74d   :  { %v5865_v1 = vpop.f32.mrf.mxu0 }
 0x74f   :  { %v2974_v59 = vpop.f32.mrf.mxu0 }
 0x750   :  { %v2975_v49 = vadd.f32 %v2974_v59, %v2837_v47 }
 0x751   :  { %v2976_v52 = vpop.f32.mrf.mxu0  ;;  %v5869_v7 = vpop.f32.mrf.mxu1 }
 0x752   :  { %v2977_v34 = vadd.f32 %v2976_v52, %v2839_v14 }
 0x753   :  { %v2980_v44 = vpop.f32.mrf.mxu0  ;;  %v5871_v12 = vpop.f32.mrf.mxu1 }
 0x754   :  { %v2981_v32 = vadd.f32 %v2980_v44, %v2843_v18 }
 0x755   :  { %v2982_v30 = vpop.f32.mrf.mxu0  ;;  %v3111_v13 = vpop.f32.mrf.mxu1 }
 0x756   :  { %v3154_v20 = vadd.f32 %v3111_v13, %v2975_v49  ;;  %v2983_v37 = vadd.f32 %v2982_v30, %v2845_v27 }
 0x757   :  { %v2986_v3 = vpop.f32.mrf.mxu0  ;;  %v3113_v28 = vpop.f32.mrf.mxu1 }
 0x758   :  { %v3218_v26 = vmul.f32 %v3184_v60, %v3154_v20  ;;  %v3155_v33 = vadd.f32 %v3113_v28, %v2977_v34  ;;  %v2987_v59 = vadd.f32 %v2986_v3, %v2849_v11 }
 0x759   :  { %v2988_v46 = vpop.f32.mrf.mxu0  ;;  %v3117_v56 = vpop.f32.mrf.mxu1 }
 0x75a   :  { %v3282_v6 = vadd.f32 %v3248_v48, %v3218_v26  ;;  %v3219_v40 = vmul.f32 %v3184_v60, %v3155_v33  ;;  %v3156_v45 = vadd.f32 %v3117_v56, %v2981_v32  ;;  %v2989_v18 = vadd.f32 %v2988_v46, %v2851_v24 }
 0x75b   :  { %v2992_v39 = vpop.f32.mrf.mxu0  ;;  %v3119_v31 = vpop.f32.mrf.mxu1 }
 0x75c   :  { %v5873_v47 = vmax.f32 %v3282_v6, 0.0  ;;  %v3283_v54 = vadd.f32 %v3248_v48, %v3219_v40  ;;  %v3220_v14 = vmul.f32 %v3189_v50, %v3156_v45  ;;  %v3157_v52 = vadd.f32 %v3119_v31, %v2983_v37 }
 0x75d   :  { %v2994_v49 = vpop.f32.mrf.mxu0  ;;  %v3123_v13 = vpop.f32.mrf.mxu1  ;;  %v2993_v6 = vadd.f32 %v2992_v39, %v5833_v42 }
 0x75e   :  { %v5875_v57 = vmax.f32 %v3283_v54, 0.0  ;;  %v3284_v44 = vadd.f32 %v3253_v19, %v3220_v14  ;;  %v3158_v34 = vadd.f32 %v3123_v13, %v2987_v59  ;;  %3338 = vrot.lane.b32.xlu0 %v5873_v47, %s4457_s21  ;;  %v3221_v26 = vmul.f32 %v3189_v50, %v3157_v52 }
 0x75f   :  { %v2998_v56 = vpop.f32.mrf.mxu0  ;;  %v3125_v33 = vpop.f32.mrf.mxu1  ;;  %v2995_v32 = vadd.f32 %v2994_v49, %v5837_v51 }
 0x760   :  { %v5879_v27 = vmax.f32 %v3284_v44, 0.0  ;;  %v3222_v40 = vmul.f32 %v3194_v10, %v3158_v34  ;;  %v3159_v45 = vadd.f32 %v3125_v33, %v2989_v18  ;;  %3354 = vrot.lane.b32.xlu1 %v5875_v57, %s4457_s21  ;;  %v3285_v54 = vadd.f32 %v3253_v19, %v3221_v26 }
 0x761   :  { %v3000_v31 = vpop.f32.mrf.mxu0  ;;  %v3129_v37 = vpop.f32.mrf.mxu1  ;;  %v2999_v3 = vadd.f32 %v2998_v56, %v5843_v16 }
 0x762   :  { %v3286_v46 = vadd.f32 %v3258_v36, %v3222_v40  ;;  %v3223_v48 = vmul.f32 %v3194_v10, %v3159_v45  ;;  %v3160_v11 = vadd.f32 %v3129_v37, %v2993_v6  ;;  %3340 = vrot.lane.b32.xlu0 %v5879_v27, %s4457_s21  ;;  %v5886_v24 = vmax.f32 %v3285_v54, 0.0 }
 0x763   :  { %v3004_v50 = vpop.f32.mrf.mxu0  ;;  %v3131_v39 = vpop.f32.mrf.mxu1  ;;  %v3001_v49 = vadd.f32 %v3000_v31, %v5847_v41 }
 0x764   :  { %v5889_v42 = vmax.f32 %v3286_v46, 0.0  ;;  %v3287_v30 = vadd.f32 %v3258_v36, %v3223_v48  ;;  %v3224_v60 = vmul.f32 %v5853_v8, %v3160_v11  ;;  %v3161_v19 = vadd.f32 %v3131_v39, %v2995_v32  ;;  %3356 = vrot.lane.b32.xlu1 %v5886_v24, %s4457_s21 }
 0x765   :  { %v3006_v10 = vpop.f32.mrf.mxu0  ;;  %v3135_v20 = vpop.f32.mrf.mxu1  ;;  %v3005_v18 = vadd.f32 %v3004_v50, %v5851_v22 }
 0x766   :  { %v5895_v28 = vmax.f32 %v3287_v30, 0.0  ;;  %3342 = vrot.lane.b32.xlu0 %v5889_v42, %s4457_s21  ;;  %v3225_v51 = vmul.f32 %v5853_v8, %v3161_v19  ;;  %v3288_v36 = vadd.f32 %v5855_v29, %v3224_v60  ;;  %v3162_v52 = vadd.f32 %v3135_v20, %v2999_v3  ;;  %v3179_v3 = vpop.permute.xlu1 %3178 }
 0x767   :  { %v3010_v59 = vpop.f32.mrf.mxu0  ;;  %v3137_v14 = vpop.f32.mrf.mxu1  ;;  %v3007_v16 = vadd.f32 %v3006_v10, %v5857_v23 }
 0x768   :  { %3358 = vrot.lane.b32.xlu1 %v5895_v28, %s4457_s21  ;;  %v3289_v8 = vadd.f32 %v5855_v29, %v3225_v51  ;;  %v3163_v44 = vadd.f32 %v3137_v14, %v3001_v49  ;;  %v3304_v56 = vmax.f32 %v3288_v36, 0.0  ;;  %v3226_v33 = vmul.f32 %v5845_v2, %v3162_v52  ;;  %v3322_v14 = vld [vmem:[#allocation9 + $0x50] sm:$0xff]  ;;  %v3323_v36 = vld [vmem:[#allocation9 + $0x58] sm:$0xff]  ;;  %v3324_v52 = vld [vmem:[#allocation9 + $0x60] sm:$0xff] }
 0x769   :  { %v3141_v13 = vpop.f32.mrf.mxu1  ;;  %v3012_v34 = vpop.f32.mrf.mxu0  ;;  %v3011_v41 = vadd.f32 %v3010_v59, %v5863_v5  ;;  %v2062_v49 = vld [vmem:[%s6352_s13 + $0x10] sm:$0xff] }
 0x76a   :  { %3406 = vrot.lane.b32.xlu0 %v5889_v42, %s4458_s22  ;;  %v3164_v40 = vadd.f32 %v3141_v13, %v3005_v18  ;;  %v3013_v45 = vadd.f32 %v3012_v34, %v5867_v17  ;;  %v3305_v22 = vmax.f32 %v3289_v8, 0.0  ;;  %v3227_v29 = vmul.f32 %v5845_v2, %v3163_v44  ;;  %v3327_v13 = vld [vmem:[#allocation9 + $0x78] sm:$0xff]  ;;  %v2064_v18 = vld [vmem:[%s6352_s13 + $0x20] sm:$0xff]  ;;  %v2065_v8 = vld [vmem:[%s6352_s13 + $0x28] sm:$0xff] }
 0x76b   :  { %v3143_v26 = vpop.f32.mrf.mxu1  ;;  %v3290_v37 = vadd.f32 %v5849_v53, %v3226_v33  ;;  %v2066_v44 = vld [vmem:[%s6352_s13 + $0x30] sm:$0xff]  ;;  %v2067_v34 = vld [vmem:[%s6352_s13 + $0x38] sm:$0xff] }
 0x76c   :  { %v3165_v6 = vadd.f32 %v3143_v26, %v3007_v16  ;;  %3422 = vrot.lane.b32.xlu1 %v5895_v28, %s4458_s22  ;;  %v3228_v11 = vmul.f32 %v5839_v63, %v3164_v40  ;;  %v3291_v32 = vadd.f32 %v5849_v53, %v3227_v29  ;;  %v2969_v53 = vadd.f32 %v5861_v62, %v5827_v9  ;;  %v3243_v62 = vpop.permute.xlu1 %3242  ;;  %v2063_v16 = vld [vmem:[%s6352_s13 + $0x18] sm:$0xff]  ;;  %v2124_v26 = vld [vmem:[%s6353_s14] sm:$0xff]  ;;  %v2126_v33 = vld [vmem:[%s6353_s14 + $0x10] sm:$0xff] }
 0x76d   :  { %v3147_v23 = vpop.f32.mrf.mxu1  ;;  %v3306_v50 = vmax.f32 %v3290_v37, 0.0  ;;  %v2129_v40 = vld [vmem:[%s6353_s14 + $0x28] sm:$0xff] }
 0x76e   :  { %v3166_v54 = vadd.f32 %v3147_v23, %v3011_v41  ;;  %3344 = vrot.lane.b32.xlu0 %v3304_v56, %s4457_s21  ;;  %v3229_v46 = vmul.f32 %v5839_v63, %v3165_v6  ;;  %v3292_v60 = vadd.f32 %v5841_v25, %v3228_v11  ;;  %v2971_v63 = vadd.f32 %v5865_v1, %v5829_v21  ;;  %v2127_v41 = vld [vmem:[%s6353_s14 + $0x18] sm:$0xff]  ;;  %v2128_v6 = vld [vmem:[%s6353_s14 + $0x20] sm:$0xff]  ;;  %v2130_v23 = vld [vmem:[%s6353_s14 + $0x30] sm:$0xff] }
 0x76f   :  { %v3149_v31 = vpop.f32.mrf.mxu1  ;;  %v3307_v19 = vmax.f32 %v3291_v32, 0.0 }
 0x770   :  { %v3230_v5 = vmul.f32 %v5831_v61, %v3166_v54  ;;  %v3167_v48 = vadd.f32 %v3149_v31, %v3013_v45  ;;  %3360 = vrot.lane.b32.xlu1 %v3305_v22, %s4457_s21  ;;  %v3293_v30 = vadd.f32 %v5841_v25, %v3229_v46  ;;  %v3153_v20 = vadd.f32 %v5871_v12, %v2971_v63  ;;  %v2131_v45 = vld [vmem:[%s6353_s14 + $0x38] sm:$0xff] }
 0x771   :  { %v3152_v25 = vadd.f32 %v5869_v7, %v2969_v53  ;;  %v3308_v51 = vmax.f32 %v3292_v60, 0.0 }
 0x772   :  { %v3231_v17 = vmul.f32 %v5831_v61, %v3167_v48  ;;  %3408 = vrot.lane.b32.xlu0 %v3304_v56, %s4458_s22  ;;  %v3294_v2 = vadd.f32 %v5835_v15, %v3230_v5  ;;  %v3217_v21 = vmul.f32 %v3179_v3, %v3153_v20 }
 0x773   :  { %v3216_v9 = vmul.f32 %v3179_v3, %v3152_v25 }
 0x774   :  { %v3295_v39 = vadd.f32 %v5835_v15, %v3231_v17  ;;  %3424 = vrot.lane.b32.xlu1 %v3305_v22, %s4458_s22  ;;  %v3310_v10 = vmax.f32 %v3294_v2, 0.0  ;;  %v3309_v15 = vmax.f32 %v3293_v30, 0.0  ;;  %v3281_v1 = vadd.f32 %v3243_v62, %v3217_v21 }
 0x775   :  { %v3280_v7 = vadd.f32 %v3243_v62, %v3216_v9 }
 0x776   :  { %3346 = vrot.lane.b32.xlu0 %v3306_v50, %s4457_s21  ;;  %v3311_v61 = vmax.f32 %v3295_v39, 0.0  ;;  %v3297_v12 = vmax.f32 %v3281_v1, 0.0 }
 0x777   :  { %v3296_v59 = vmax.f32 %v3280_v7, 0.0 }
 0x778   :  { %3504 = vmatprep.subr.mxu0 %v3311_v61  ;;  %3362 = vrot.lane.b32.xlu1 %v3307_v19, %s4457_s21 }
 0x779   :  { %3505 = vmatpush1.msra.mxu0 %v3310_v10 }
 0x77a   :  { %3506 = vmatprep.subr.mxu0 %v3309_v15  ;;  %3410 = vrot.lane.b32.xlu0 %v3306_v50, %s4458_s22 }
 0x77b   :  { %3507 = vmatpush1.msra.mxu0 %v3308_v51 }
 0x77c   :  { %3508 = vmatprep.subr.mxu0 %v3307_v19  ;;  %3426 = vrot.lane.b32.xlu1 %v3307_v19, %s4458_s22 }
 0x77d   :  { %3509 = vmatpush1.msra.mxu0 %v3306_v50 }
 0x77e   :  { %3510 = vmatprep.subr.mxu0 %v3305_v22  ;;  %3348 = vrot.lane.b32.xlu0 %v3308_v51, %s4457_s21 }
 0x77f   :  { %3511 = vmatpush1.msra.mxu0 %v3304_v56  ;;  %v2125_v56 = vld [vmem:[%s6353_s14 + $0x8] sm:$0xff] }
 0x780   :  { %3512 = vmatprep.subr.mxu0 %v5895_v28  ;;  %3364 = vrot.lane.b32.xlu1 %v3309_v15, %s4457_s21  ;;  %v3320_v28 = vld [vmem:[#allocation9 + $0x40] sm:$0xff] }
 0x781   :  { %3513 = vmatpush1.msra.mxu0 %v5889_v42  ;;  %v3321_v42 = vld [vmem:[#allocation9 + $0x48] sm:$0xff] }
 0x782   :  { %3514 = vmatprep.subr.mxu0 %v5886_v24  ;;  %3412 = vrot.lane.b32.xlu0 %v3308_v51, %s4458_s22 }
 0x783   :  { %3515 = vmatpush1.msra.mxu0 %v5879_v27 }
 0x784   :  { %3516 = vmatprep.subr.mxu0 %v5875_v57  ;;  %3428 = vrot.lane.b32.xlu1 %v3309_v15, %s4458_s22 }
 0x785   :  { %3517 = vmatpush1.msra.mxu0 %v5873_v47 }
 0x786   :  { %3350 = vrot.lane.b32.xlu0 %v3310_v10, %s4457_s21  ;;  %3518 = vmatprep.subr.mxu0 %v3297_v12 }
 0x787   :  { %3519 = vmatpush1.msra.mxu0 %v3296_v59 }
 0x788   :  { %4250 = vmatmul.mubr.msk.f32.vlgmr.msra.gmra.mxu0 %vm1632_vm9, %v3320_v28  ;;  %3366 = vrot.lane.b32.xlu1 %v3311_v61, %s4457_s21 }
 0x789   :  { %3558 = vmatprep.mubr.f32.mxu0 %v6410_v0 }
 0x78a   :  { %3414 = vrot.lane.b32.xlu0 %v3310_v10, %s4458_s22 }
 0x78c   :  { %4251 = vmatmul.mubr.msk.f32.gmra.mxu0 %vm1632_vm9, %v3321_v42  ;;  %3430 = vrot.lane.b32.xlu1 %v3311_v61, %s4458_s22 }
 0x78d   :  { %3564 = vmatprep.mubr.f32.mxu0 %v6410_v0 }
 0x78e   :  { %3404 = vrot.lane.b32.xlu0 %v5879_v27, %s4458_s22  ;;  %v3325_v27 = vld [vmem:[#allocation9 + $0x68] sm:$0xff] }
 0x790   :  { %4252 = vmatmul.mubr.msk.f32.gmra.mxu0 %vm1632_vm9, %v3322_v14  ;;  %3420 = vrot.lane.b32.xlu1 %v5886_v24, %s4458_s22  ;;  %v2060_v24 = vld [vmem:[%s6352_s13] sm:$0xff] }
 0x791   :  { %3570 = vmatprep.mubr.f32.mxu0 %v6410_v0 }
 0x792   :  { %3336 = vrot.lane.b32.xlu0 %v3296_v59, %s4457_s21 }
 0x794   :  { %4253 = vmatmul.mubr.msk.f32.gmra.mxu0 %vm1632_vm9, %v3323_v36  ;;  %3352 = vrot.lane.b32.xlu1 %v3297_v12, %s4457_s21 }
 0x795   :  { %3576 = vmatprep.mubr.f32.mxu0 %v6410_v0 }
 0x796   :  { %3402 = vrot.lane.b32.xlu0 %v5873_v47, %s4458_s22  ;;  %v3326_v47 = vld [vmem:[#allocation9 + $0x70] sm:$0xff] }
 0x798   :  { %4254 = vmatmul.mubr.msk.f32.gmra.mxu0 %vm1632_vm9, %v3324_v52  ;;  %3418 = vrot.lane.b32.xlu1 %v5875_v57, %s4458_s22  ;;  %v2061_v57 = vld [vmem:[%s6352_s13 + $0x8] sm:$0xff] }
 0x799   :  { %3582 = vmatprep.mubr.f32.mxu0 %v6410_v0 }
 0x79a   :  { %3400 = vrot.lane.b32.xlu0 %v3296_v59, %s4458_s22 }
 0x79c   :  { %4255 = vmatmul.mubr.msk.f32.gmra.mxu0 %vm1632_vm9, %v3325_v27  ;;  %3416 = vrot.lane.b32.xlu1 %v3297_v12, %s4458_s22 }
 0x79d   :  { %3588 = vmatprep.mubr.f32.mxu0 %v6410_v0 }
 0x79e   :  { %2070 = vperm.xlu0 %4336, %v2060_v24  }
 0x7a0   :  { %4256 = vmatmul.mubr.msk.f32.gmra.mxu0 %vm1632_vm9, %v3326_v47  ;;  %2075 = vperm.xlu1 %4337, %v2061_v57  }
 0x7a1   :  { %3594 = vmatprep.mubr.f32.mxu0 %v6410_v0 }
 0x7a2   :  { %2080 = vperm.xlu0 %4336, %v2062_v49  }
 0x7a4   :  { %4257 = vmatmul.mubr.msk.f32.gmra.mxu0 %vm1632_vm9, %v3327_v13  ;;  %2085 = vperm.xlu1 %4337, %v2063_v16  }
 0x7a5   :  { %3826 = vmatprep.mubr.f32.mxu0 %v6410_v0 }
 0x7a6   :  { %2090 = vperm.xlu0 %4336, %v2064_v18  }
 0x7a8   :  { %2095 = vperm.xlu1 %4337, %v2065_v8  }
 0x7aa   :  { %2100 = vperm.xlu0 %4336, %v2066_v44  }
 0x7ac   :  { %2105 = vperm.xlu1 %4337, %v2067_v34  }
 0x7ae   :  { %2134 = vperm.xlu0 %4336, %v2124_v26  }
 0x7b0   :  { %2139 = vperm.xlu1 %4337, %v2125_v56  }
 0x7b2   :  { %2144 = vperm.xlu0 %4336, %v2126_v33  }
 0x7b4   :  { %2149 = vperm.xlu1 %4337, %v2127_v41  }
 0x7b6   :  { %2154 = vperm.xlu0 %4336, %v2128_v6  }
 0x7b8   :  { %2159 = vperm.xlu1 %4337, %v2129_v40  }
 0x7ba   :  { %2164 = vperm.xlu0 %4336, %v2130_v23  }
 0x7bc   :  { %2169 = vperm.xlu1 %4337, %v2131_v45  }
 0x7be   :  { %3901 = vperm.xlu0 %4336, %v2060_v24  }
 0x7c0   :  { %3906 = vperm.xlu1 %4337, %v2061_v57  }
 0x7c2   :  { %3911 = vperm.xlu0 %4336, %v2062_v49  }
 0x7c4   :  { %3916 = vperm.xlu1 %4337, %v2063_v16  }
 0x7c6   :  { %3921 = vperm.xlu0 %4336, %v2064_v18  }
 0x7c8   :  { %3926 = vperm.xlu1 %4337, %v2065_v8  }
 0x7ca   :  { %3931 = vperm.xlu0 %4336, %v2066_v44  }
 0x7cc   :  { %3936 = vperm.xlu1 %4337, %v2067_v34  }
 0x7ce   :  { %3965 = vperm.xlu0 %4336, %v2124_v26  }
 0x7d0   :  { %v6029_v54 = vpop.permute.xlu0 %3338  ;;  %3970 = vperm.xlu1 %4337, %v2125_v56  }
 0x7d2   :  { %v6031_v22 = vpop.permute.xlu1 %3354  ;;  %3975 = vperm.xlu0 %4336, %v2126_v33  }
 0x7d3   :  { %v3369_v26 = vsel %vm393_vm4, %v6029_v54, %v6031_v22  ;;  %v3377_v56 = vsel %vm393_vm4, %v6031_v22, %v6029_v54 }
 0x7d4   :  { %v6033_v29 = vpop.permute.xlu0 %3340  ;;  %3980 = vperm.xlu1 %4337, %v2127_v41  }
 0x7d6   :  { %3985 = vperm.xlu0 %4336, %v2128_v6   ;;  %v3357_v31 = vpop.permute.xlu1 %3356 }
 0x7d7   :  { %v3370_v16 = vsel %vm393_vm4, %v6033_v29, %v3357_v31  ;;  %v3378_v18 = vsel %vm393_vm4, %v3357_v31, %v6033_v29 }
 0x7d8   :  { %v3343_v37 = vpop.permute.xlu0 %3342  ;;  %3990 = vperm.xlu1 %4337, %v2129_v40  }
 0x7da   :  { %3995 = vperm.xlu0 %4336, %v2130_v23   ;;  %v3359_v46 = vpop.permute.xlu1 %3358  ;;  %v3312_v23 = vld [vmem:[#allocation9] sm:$0xff] }
 0x7db   :  { %v3371_v24 = vsel %vm393_vm4, %v3343_v37, %v3359_v46  ;;  %v3379_v57 = vsel %vm393_vm4, %v3359_v46, %v3343_v37  ;;  %v3313_v37 = vld [vmem:[#allocation9 + $0x8] sm:$0xff] }
 0x7dc   :  { %v6035_v5 = vpop.permute.xlu0 %3406  ;;  %4000 = vperm.xlu1 %4337, %v2131_v45  }
 0x7de   :  { %v6037_v48 = vpop.permute.xlu1 %3422 }
 0x7df   :  { %v3443_v34 = vsel %vm404_vm2, %v6037_v48, %v6035_v5  ;;  %v3435_v33 = vsel %vm404_vm2, %v6035_v5, %v6037_v48 }
 0x7e0   :  { %v3345_v11 = vpop.permute.xlu0 %3344 }
 0x7e2   :  { %v3361_v17 = vpop.permute.xlu1 %3360 }
 0x7e3   :  { %v3372_v42 = vsel %vm393_vm4, %v3345_v11, %v3361_v17  ;;  %v3380_v14 = vsel %vm393_vm4, %v3361_v17, %v3345_v11  ;;  %v3314_v17 = vld [vmem:[#allocation9 + $0x10] sm:$0xff] }
 0x7e4   :  { %v3409_v32 = vpop.permute.xlu0 %3408 }
 0x7e6   :  { %v3425_v2 = vpop.permute.xlu1 %3424 }
 0x7e7   :  { %v3444_v13 = vsel %vm404_vm2, %v3425_v2, %v3409_v32  ;;  %v3436_v8 = vsel %vm404_vm2, %v3409_v32, %v3425_v2  ;;  %v3329_v32 = vld [vmem:[#allocation9 + $0x88] sm:$0xff] }
 0x7e8   :  { %v3347_v50 = vpop.permute.xlu0 %3346 }
 0x7ea   :  { %v3363_v39 = vpop.permute.xlu1 %3362 }
 0x7eb   :  { %v3373_v7 = vsel %vm393_vm4, %v3347_v50, %v3363_v39  ;;  %v3381_v59 = vsel %vm393_vm4, %v3363_v39, %v3347_v50  ;;  %v3316_v50 = vld [vmem:[#allocation9 + $0x20] sm:$0xff] }
 0x7ec   :  { %v3411_v30 = vpop.permute.xlu0 %3410 }
 0x7ee   :  { %v3427_v60 = vpop.permute.xlu1 %3426 }
 0x7ef   :  { %v3445_v27 = vsel %vm404_vm2, %v3427_v60, %v3411_v30  ;;  %v3437_v49 = vsel %vm404_vm2, %v3411_v30, %v3427_v60  ;;  %v3331_v30 = vld [vmem:[#allocation9 + $0x98] sm:$0xff] }
 0x7f0   :  { %v3349_v63 = vpop.permute.xlu0 %3348 }
 0x7f2   :  { %v3365_v61 = vpop.permute.xlu1 %3364 }
 0x7f3   :  { %v3374_v51 = vsel %vm393_vm4, %v3349_v63, %v3365_v61  ;;  %v3382_v21 = vsel %vm393_vm4, %v3365_v61, %v3349_v63  ;;  %v3317_v63 = vld [vmem:[#allocation9 + $0x28] sm:$0xff] }
 0x7f4   :  { %v3413_v53 = vpop.permute.xlu0 %3412 }
 0x7f6   :  { %v3429_v19 = vpop.permute.xlu1 %3428 }
 0x7f7   :  { %v3446_v28 = vsel %vm404_vm2, %v3429_v19, %v3413_v53  ;;  %v3438_v36 = vsel %vm404_vm2, %v3413_v53, %v3429_v19  ;;  %v3332_v53 = vld [vmem:[#allocation9 + $0xa0] sm:$0xff] }
 0x7f8   :  { %v3351_v10 = vpop.permute.xlu0 %3350 }
 0x7fa   :  { %v3367_v20 = vpop.permute.xlu1 %3366 }
 0x7fb   :  { %v3383_v15 = vsel %vm393_vm4, %v3367_v20, %v3351_v10  ;;  %v3375_v3 = vsel %vm393_vm4, %v3351_v10, %v3367_v20  ;;  %v3318_v10 = vld [vmem:[#allocation9 + $0x30] sm:$0xff] }
 0x7fc   :  { %v3415_v25 = vpop.permute.xlu0 %3414  ;;  %3641 = vmatprep.subr.mxu1 %v3375_v3 }
 0x7fd   :  { %4259 = vmatpush1.msk.msra.mxu1 %vm4720_vm7, %v3383_v15  ;;  %v3333_v15 = vld [vmem:[#allocation9 + $0xa8] sm:$0xff] }
 0x7fe   :  { %v3431_v9 = vpop.permute.xlu1 %3430  ;;  %3643 = vmatprep.subr.mxu1 %v3374_v51 }
 0x7ff   :  { %v3439_v62 = vsel %vm404_vm2, %v3415_v25, %v3431_v9  ;;  %v3447_v1 = vsel %vm404_vm2, %v3431_v9, %v3415_v25  ;;  %4261 = vmatpush1.msk.msra.mxu1 %vm4720_vm7, %v3382_v21  ;;  %v3319_v25 = vld [vmem:[#allocation9 + $0x38] sm:$0xff] }
 0x800   :  { %v3405_v12 = vpop.permute.xlu0 %3404  ;;  %3645 = vmatprep.subr.mxu1 %v3373_v7  ;;  %4283 = vmatprep.subr.msk.mxu0 %vm4736_vm8, %v3447_v1 }
 0x801   :  { %4263 = vmatpush1.msk.msra.mxu1 %vm4720_vm7, %v3381_v59  ;;  %3779 = vmatpush1.msra.mxu0 %v3439_v62  ;;  %v3334_v62 = vld [vmem:[#allocation9 + $0xb0] sm:$0xff] }
 0x802   :  { %v3421_v52 = vpop.permute.xlu1 %3420  ;;  %3647 = vmatprep.subr.mxu1 %v3372_v42  ;;  %4285 = vmatprep.subr.msk.mxu0 %vm4736_vm8, %v3446_v28  ;;  %v6431_v28 = vld [vmem:[#allocation19_spill] sm:$0xff] }
 0x803   :  { %4265 = vmatpush1.msk.msra.mxu1 %vm4720_vm7, %v3380_v14  ;;  %3781 = vmatpush1.msra.mxu0 %v3438_v36  ;;  %v3442_v6 = vsel %vm404_vm2, %v3421_v52, %v3405_v12  ;;  %v3434_v45 = vsel %vm404_vm2, %v3405_v12, %v3421_v52  ;;  %v6432_v14 = vld [vmem:[#allocation23_spill] sm:$0xff]  ;;  %v6433_v36 = vld [vmem:[#allocation20_spill] sm:$0xff] }
 0x804   :  { %v3337_v47 = vpop.permute.xlu0 %3336  ;;  %3649 = vmatprep.subr.mxu1 %v3371_v24  ;;  %4287 = vmatprep.subr.msk.mxu0 %vm4736_vm8, %v3445_v27 }
 0x805   :  { %4267 = vmatpush1.msk.msra.mxu1 %vm4720_vm7, %v3379_v57  ;;  %3783 = vmatpush1.msra.mxu0 %v3437_v49 }
 0x806   :  { %3651 = vmatprep.subr.mxu1 %v3370_v16  ;;  %v3353_v44 = vpop.permute.xlu1 %3352  ;;  %4289 = vmatprep.subr.msk.mxu0 %vm4736_vm8, %v3444_v13 }
 0x807   :  { %4269 = vmatpush1.msk.msra.mxu1 %vm4720_vm7, %v3378_v18  ;;  %3785 = vmatpush1.msra.mxu0 %v3436_v8  ;;  %v3368_v40 = vsel %vm393_vm4, %v3337_v47, %v3353_v44  ;;  %v3376_v54 = vsel %vm393_vm4, %v3353_v44, %v3337_v47  ;;  %v3335_v47 = vld [vmem:[#allocation9 + $0xb8] sm:$0xff]  ;;  %v6434_v18 = vld [vmem:[#allocation25_spill] sm:$0xff]  ;;  %v6435_v44 = vld [vmem:[#allocation31_spill] sm:$0xff] }
 0x808   :  { %3653 = vmatprep.subr.mxu1 %v3369_v26  ;;  %v3403_v41 = vpop.permute.xlu0 %3402  ;;  %4291 = vmatprep.subr.msk.mxu0 %vm4736_vm8, %v3443_v34 }
 0x809   :  { %4271 = vmatpush1.msk.msra.mxu1 %vm4720_vm7, %v3377_v56  ;;  %3787 = vmatpush1.msra.mxu0 %v3435_v33  ;;  %v6436_v56 = vld [vmem:[#allocation27_spill] sm:$0xff] }
 0x80a   :  { %v3419_v22 = vpop.permute.xlu1 %3418  ;;  %3655 = vmatprep.subr.mxu1 %v3368_v40  ;;  %4293 = vmatprep.subr.msk.mxu0 %vm4736_vm8, %v3442_v6 }
 0x80b   :  { %v3433_v29 = vsel %vm404_vm2, %v3403_v41, %v3419_v22  ;;  %v3441_v31 = vsel %vm404_vm2, %v3419_v22, %v3403_v41  ;;  %4273 = vmatpush1.msk.msra.mxu1 %vm4720_vm7, %v3376_v54  ;;  %3789 = vmatpush1.msra.mxu0 %v3434_v45  ;;  %v6437_v41 = vld [vmem:[#allocation29_spill] sm:$0xff] }
 0x80c   :  { %4274 = vmatmul.mubr.msk.f32.vlgmr.msra.gmra.mxu1 %vm1632_vm9, %v3312_v23  ;;  %4295 = vmatprep.subr.msk.mxu0 %vm4736_vm8, %v3441_v31  ;;  %v3401_v46 = vpop.permute.xlu0 %3400 }
 0x80d   :  { %3791 = vmatpush1.msra.mxu0 %v3433_v29  ;;  %3695 = vmatprep.mubr.f32.mxu1 %v6410_v0 }
 0x80e   :  { %v3417_v5 = vpop.permute.xlu1 %3416 }
 0x80f   :  { %v3432_v48 = vsel %vm404_vm2, %v3401_v46, %v3417_v5  ;;  %v3440_v11 = vsel %vm404_vm2, %v3417_v5, %v3401_v46  ;;  %v6438_v46 = vld [vmem:[#allocation22_spill] sm:$0xff] }
 0x810   :  { %4275 = vmatmul.mubr.msk.f32.gmra.mxu1 %vm1632_vm9, %v3313_v37  ;;  %4297 = vmatprep.subr.msk.mxu0 %vm4736_vm8, %v3440_v11 }
 0x811   :  { %3793 = vmatpush1.msra.mxu0 %v3432_v48  ;;  %3701 = vmatprep.mubr.f32.mxu1 %v6410_v0  ;;  %v6439_v48 = vld [vmem:[#allocation21_spill] sm:$0xff] }
 0x812   :  { %4298 = vmatmul.mubr.msk.f32.vlgmr.msra.gmra.mxu0 %vm1632_vm9, %v3328_v35 }
 0x813   :  { %3832 = vmatprep.mubr.f32.mxu0 %v6410_v0 }
 0x814   :  { %4276 = vmatmul.mubr.msk.f32.gmra.mxu1 %vm1632_vm9, %v3314_v17 }
 0x815   :  { %3707 = vmatprep.mubr.f32.mxu1 %v6410_v0 }
 0x816   :  { %4299 = vmatmul.mubr.msk.f32.gmra.mxu0 %vm1632_vm9, %v3329_v32  ;;  %v6440_v32 = vld [vmem:[#allocation32_spill] sm:$0xff] }
 0x817   :  { %3838 = vmatprep.mubr.f32.mxu0 %v6410_v0 }
 0x818   :  { %4277 = vmatmul.mubr.msk.f32.gmra.mxu1 %vm1632_vm9, %v3315_v55 }
 0x819   :  { %v2071_v2 = vpop.permute.xlu0 %2070  ;;  %3713 = vmatprep.mubr.f32.mxu1 %v6410_v0 }
 0x81a   :  { %4300 = vmatmul.mubr.msk.f32.gmra.mxu0 %vm1632_vm9, %v3330_v4  ;;  %v2108_v51 = vmul.f32 %v2071_v2, %v5579_v43  ;;  %v2109_v21 = vmul.f32 %v2071_v2, %v5585_v58  ;;  %v6441_v4 = vld [vmem:[#allocation26_spill] sm:$0xff] }
 0x81b   :  { %v2076_v39 = vpop.permute.xlu1 %2075  ;;  %3844 = vmatprep.mubr.f32.mxu0 %v6410_v0 }
 0x81c   :  { %4278 = vmatmul.mubr.msk.f32.gmra.mxu1 %vm1632_vm9, %v3316_v50  ;;  %v2110_v59 = vmul.f32 %v2076_v39, %v5594_v38  ;;  %v2111_v42 = vmul.f32 %v2076_v39, %v6431_v28 }
 0x81d   :  { %v2081_v60 = vpop.permute.xlu0 %2080  ;;  %3719 = vmatprep.mubr.f32.mxu1 %v6410_v0 }
 0x81e   :  { %4301 = vmatmul.mubr.msk.f32.gmra.mxu0 %vm1632_vm9, %v3331_v30  ;;  %v2112_v43 = vmul.f32 %v2081_v60, %v6432_v14  ;;  %v2113_v58 = vmul.f32 %v2081_v60, %v6433_v36  ;;  %v6442_v60 = vld [vmem:[#allocation28_spill] sm:$0xff] }
 0x81f   :  { %v2086_v61 = vpop.permute.xlu1 %2085  ;;  %3850 = vmatprep.mubr.f32.mxu0 %v6410_v0 }
 0x820   :  { %4279 = vmatmul.mubr.msk.f32.gmra.mxu1 %vm1632_vm9, %v3317_v63  ;;  %v2114_v8 = vmul.f32 %v2086_v61, %v6434_v18  ;;  %v2115_v34 = vmul.f32 %v2086_v61, %v6435_v44  ;;  %v6443_v63 = vld [vmem:[#allocation30_spill] sm:$0xff] }
 0x821   :  { %v2091_v19 = vpop.permute.xlu0 %2090  ;;  %3725 = vmatprep.mubr.f32.mxu1 %v6410_v0  ;;  %v2059_v61 = vadd.f32 %v6443_v63, %v6442_v60 }
 0x822   :  { %4302 = vmatmul.mubr.msk.f32.gmra.mxu0 %vm1632_vm9, %v3332_v53  ;;  %v2116_v33 = vmul.f32 %v2091_v19, %v6436_v56  ;;  %v2117_v6 = vmul.f32 %v2091_v19, %v6437_v41 }
 0x823   :  { %v2096_v20 = vpop.permute.xlu1 %2095  ;;  %3856 = vmatprep.mubr.f32.mxu0 %v6410_v0 }
 0x824   :  { %4280 = vmatmul.mubr.msk.f32.gmra.mxu1 %vm1632_vm9, %v3318_v10  ;;  %v2118_v5 = vmul.f32 %v2096_v20, %v6438_v46  ;;  %v2119_v11 = vmul.f32 %v2096_v20, %v6439_v48 }
 0x825   :  { %v2101_v3 = vpop.permute.xlu0 %2100  ;;  %3731 = vmatprep.mubr.f32.mxu1 %v6410_v0 }
 0x826   :  { %4303 = vmatmul.mubr.msk.f32.gmra.mxu0 %vm1632_vm9, %v3333_v15  ;;  %v2120_v55 = vmul.f32 %v2101_v3, %v6440_v32  ;;  %v2121_v2 = vmul.f32 %v2101_v3, %v6441_v4  ;;  %v6444_v3 = vld [vmem:[#allocation24_spill] sm:$0xff] }
 0x827   :  { %v6172_v9 = vpop.permute.xlu1 %2105  ;;  %3862 = vmatprep.mubr.f32.mxu0 %v6410_v0 }
 0x828   :  { %4281 = vmatmul.mubr.msk.f32.gmra.mxu1 %vm1632_vm9, %v3319_v25  ;;  %v2122_v25 = vmul.f32 %v6172_v9, %v6444_v3 }
 0x829   :  { %v2135_v1 = vpop.permute.xlu0 %2134 }
 0x82a   :  { %v2172_v7 = vadd.f32 %v2135_v1, %v2108_v51  ;;  %v2173_v12 = vadd.f32 %v2135_v1, %v2109_v21  ;;  %4304 = vmatmul.mubr.msk.f32.gmra.mxu0 %vm1632_vm9, %v3334_v62  ;;  %v2123_v51 = vmul.f32 %v6172_v9, %v2059_v61 }
 0x82b   :  { %v2140_v24 = vpop.permute.xlu1 %2139  ;;  %3868 = vmatprep.mubr.f32.mxu0 %v6410_v0 }
 0x82c   :  { %v2188_v52 = vmax.f32 %v2172_v7, 0.0  ;;  %v2189_v27 = vmax.f32 %v2173_v12, 0.0  ;;  %v2174_v57 = vadd.f32 %v2140_v24, %v2110_v59  ;;  %v2175_v49 = vadd.f32 %v2140_v24, %v2111_v42 }
 0x82d   :  { %v2145_v13 = vpop.permute.xlu0 %2144 }
 0x82e   :  { %2204 = vst [vmem:[%s6354_s15] sm:$0xff] %v2188_v52  ;;  %2205 = vst [vmem:[%s6354_s15 + $0x8] sm:$0xff] %v2189_v27  ;;  %v2176_v38 = vadd.f32 %v2145_v13, %v2112_v43  ;;  %v2177_v16 = vadd.f32 %v2145_v13, %v2113_v58  ;;  %v2190_v26 = vmax.f32 %v2174_v57, 0.0  ;;  %v2191_v0 = vmax.f32 %v2175_v49, 0.0  ;;  %4305 = vmatmul.mubr.msk.f32.gmra.mxu0 %vm1632_vm9, %v3335_v47 }
 0x82f   :  { %v2150_v45 = vpop.permute.xlu1 %2149 }
 0x830   :  { %v2192_v40 = vmax.f32 %v2176_v38, 0.0  ;;  %v2193_v23 = vmax.f32 %v2177_v16, 0.0  ;;  %2206 = vst [vmem:[%s6354_s15 + $0x10] sm:$0xff] %v2190_v26  ;;  %2207 = vst [vmem:[%s6354_s15 + $0x18] sm:$0xff] %v2191_v0  ;;  %v2178_v54 = vadd.f32 %v2150_v45, %v2114_v8  ;;  %v2179_v22 = vadd.f32 %v2150_v45, %v2115_v34 }
 0x831   :  { %v2155_v29 = vpop.permute.xlu0 %2154 }
 0x832   :  { %2208 = vst [vmem:[%s6354_s15 + $0x20] sm:$0xff] %v2192_v40  ;;  %2209 = vst [vmem:[%s6354_s15 + $0x28] sm:$0xff] %v2193_v23  ;;  %v2180_v31 = vadd.f32 %v2155_v29, %v2116_v33  ;;  %v2181_v37 = vadd.f32 %v2155_v29, %v2117_v6  ;;  %v2194_v35 = vmax.f32 %v2178_v54, 0.0  ;;  %v2195_v17 = vmax.f32 %v2179_v22, 0.0 }
 0x833   :  { %v2160_v30 = vpop.permute.xlu1 %2159 }
 0x834   :  { %v2196_v50 = vmax.f32 %v2180_v31, 0.0  ;;  %v2197_v39 = vmax.f32 %v2181_v37, 0.0  ;;  %2210 = vst [vmem:[%s6354_s15 + $0x30] sm:$0xff] %v2194_v35  ;;  %2211 = vst [vmem:[%s6354_s15 + $0x38] sm:$0xff] %v2195_v17  ;;  %v2182_v53 = vadd.f32 %v2160_v30, %v2118_v5  ;;  %v2183_v19 = vadd.f32 %v2160_v30, %v2119_v11 }
 0x835   :  { %v2165_v10 = vpop.permute.xlu0 %2164 }
 0x836   :  { %2212 = vst [vmem:[%s6354_s15 + $0x40] sm:$0xff] %v2196_v50  ;;  %2213 = vst [vmem:[%s6354_s15 + $0x48] sm:$0xff] %v2197_v39  ;;  %v2184_v20 = vadd.f32 %v2165_v10, %v2120_v55  ;;  %v2185_v15 = vadd.f32 %v2165_v10, %v2121_v2  ;;  %v2198_v21 = vmax.f32 %v2182_v53, 0.0  ;;  %v2199_v62 = vmax.f32 %v2183_v19, 0.0 }
 0x837   :  { %v2170_v12 = vpop.permute.xlu1 %2169 }
 0x838   :  { %v2200_v1 = vmax.f32 %v2184_v20, 0.0  ;;  %v2201_v7 = vmax.f32 %v2185_v15, 0.0  ;;  %2214 = vst [vmem:[%s6354_s15 + $0x50] sm:$0xff] %v2198_v21  ;;  %2215 = vst [vmem:[%s6354_s15 + $0x58] sm:$0xff] %v2199_v62  ;;  %v2186_v59 = vadd.f32 %v2170_v12, %v2122_v25  ;;  %v2187_v28 = vadd.f32 %v2170_v12, %v2123_v51 }
 0x839   :  { %v3902_v38 = vpop.permute.xlu0 %3901 }
 0x83a   :  { %2216 = vst [vmem:[%s6354_s15 + $0x60] sm:$0xff] %v2200_v1  ;;  %2217 = vst [vmem:[%s6354_s15 + $0x68] sm:$0xff] %v2201_v7  ;;  %v2202_v9 = vmax.f32 %v2186_v59, 0.0  ;;  %v2203_v42 = vmax.f32 %v2187_v28, 0.0 }
 0x83b   :  { %v3907_v18 = vpop.permute.xlu1 %3906 }
 0x83c   :  { %2218 = vst [vmem:[%s6354_s15 + $0x70] sm:$0xff] %v2202_v9  ;;  %2219 = vst [vmem:[%s6354_s15 + $0x78] sm:$0xff] %v2203_v42 }
 0x83d   :  { %v3912_v8 = vpop.permute.xlu0 %3911 }
 0x83f   :  { %v6256_v34 = vpop.permute.xlu1 %3916 }
 0x841   :  { %v6260_v0 = vpop.permute.xlu0 %3921 }
 0x843   :  { %v6264_v41 = vpop.permute.xlu1 %3926 }
 0x845   :  { %v6266_v40 = vpop.permute.xlu0 %3931 }
 0x847   :  { %v6270_v31 = vpop.permute.xlu1 %3936 }
 0x848   :  { %v3554_v14 = vpop.f32.mrf.mxu0 }
 0x849   :  { %v3966_v11 = vpop.permute.xlu0 %3965 }
 0x84a   :  { %v3556_v43 = vpop.f32.mrf.mxu0 }
 0x84b   :  { %v3971_v61 = vpop.permute.xlu1 %3970 }
 0x84c   :  { %v3560_v36 = vpop.f32.mrf.mxu0 }
 0x84d   :  { %v3976_v28 = vpop.permute.xlu0 %3975 }
 0x84e   :  { %v3562_v58 = vpop.f32.mrf.mxu0 }
 0x850   :  { %v3566_v52 = vpop.f32.mrf.mxu0 }
 0x852   :  { %v3568_v27 = vpop.f32.mrf.mxu0 }
 0x854   :  { %v3572_v24 = vpop.f32.mrf.mxu0 }
 0x856   :  { %v6244_v47 = vpop.f32.mrf.mxu0 }
 0x858   :  { %v6246_v57 = vpop.f32.mrf.mxu0 }
 0x85a   :  { %v6248_v49 = vpop.f32.mrf.mxu0 }
 0x85c   :  { %v6250_v13 = vpop.f32.mrf.mxu0 }
 0x85e   :  { %v6252_v16 = vpop.f32.mrf.mxu0 }
 0x860   :  { %v6254_v44 = vpop.f32.mrf.mxu0 }
 0x862   :  { %v6258_v26 = vpop.f32.mrf.mxu0 }
 0x864   :  { %v6262_v33 = vpop.f32.mrf.mxu0 }
 0x866   :  { %v6268_v23 = vpop.f32.mrf.mxu0 }
 0x8cc   :  { %v3691_v56 = vpop.f32.mrf.mxu1 }
 0x8cd   :  { %v3692_v54 = vadd.f32 %v3691_v56, %v3554_v14 }
 0x8ce   :  { %v3693_v6 = vpop.f32.mrf.mxu1 }
 0x8cf   :  { %v3694_v37 = vadd.f32 %v3693_v6, %v3556_v43 }
 0x8d0   :  { %v3697_v45 = vpop.f32.mrf.mxu1 }
 0x8d1   :  { %v3698_v35 = vadd.f32 %v3697_v45, %v3560_v36 }
 0x8d2   :  { %v3699_v22 = vpop.f32.mrf.mxu1  ;;  %v3828_v29 = vpop.f32.mrf.mxu0 }
 0x8d3   :  { %v3875_v46 = vadd.f32 %v3828_v29, %v3692_v54  ;;  %v3700_v30 = vadd.f32 %v3699_v22, %v3562_v58  ;;  %v3981_v22 = vpop.permute.xlu1 %3980 }
 0x8d4   :  { %v3703_v5 = vpop.f32.mrf.mxu1  ;;  %v3830_v48 = vpop.f32.mrf.mxu0 }
 0x8d5   :  { %v3939_v17 = vmul.f32 %v3902_v38, %v3875_v46  ;;  %v3876_v32 = vadd.f32 %v3830_v48, %v3694_v37  ;;  %v3704_v19 = vadd.f32 %v3703_v5, %v3566_v52 }
 0x8d6   :  { %v3705_v55 = vpop.f32.mrf.mxu1  ;;  %v3834_v4 = vpop.f32.mrf.mxu0 }
 0x8d7   :  { %v4003_v2 = vadd.f32 %v3966_v11, %v3939_v17  ;;  %v3940_v50 = vmul.f32 %v3902_v38, %v3876_v32  ;;  %v3877_v39 = vadd.f32 %v3834_v4, %v3698_v35  ;;  %v3706_v21 = vadd.f32 %v3705_v55, %v3568_v27  ;;  %v3986_v4 = vpop.permute.xlu0 %3985 }
 0x8d8   :  { %v3709_v60 = vpop.f32.mrf.mxu1  ;;  %v3836_v63 = vpop.f32.mrf.mxu0 }
 0x8d9   :  { %v4019_v53 = vmax.f32 %v4003_v2, 0.0  ;;  %v4004_v10 = vadd.f32 %v3966_v11, %v3940_v50  ;;  %v3941_v20 = vmul.f32 %v3907_v18, %v3877_v39  ;;  %v3878_v15 = vadd.f32 %v3836_v63, %v3700_v30 }
 0x8da   :  { %v3711_v3 = vpop.f32.mrf.mxu1  ;;  %v3840_v25 = vpop.f32.mrf.mxu0  ;;  %v3710_v42 = vadd.f32 %v3709_v60, %v3572_v24 }
 0x8db   :  { %4306 = vst [vmem:[%s6354_s15 + $0x80] sm:$0xff] %v4019_v53  ;;  %v4020_v51 = vmax.f32 %v4004_v10, 0.0  ;;  %v4005_v62 = vadd.f32 %v3971_v61, %v3941_v20  ;;  %v3879_v1 = vadd.f32 %v3840_v25, %v3704_v19  ;;  %v3942_v7 = vmul.f32 %v3907_v18, %v3878_v15 }
 0x8dc   :  { %v3715_v12 = vpop.f32.mrf.mxu1  ;;  %v3842_v59 = vpop.f32.mrf.mxu0  ;;  %v3712_v6 = vadd.f32 %v3711_v3, %v6244_v47 }
 0x8dd   :  { %4307 = vst [vmem:[%s6354_s15 + $0x88] sm:$0xff] %v4020_v51  ;;  %v4021_v9 = vmax.f32 %v4005_v62, 0.0  ;;  %v3943_v14 = vmul.f32 %v3912_v8, %v3879_v1  ;;  %v3880_v43 = vadd.f32 %v3842_v59, %v3706_v21  ;;  %v4006_v36 = vadd.f32 %v3971_v61, %v3942_v7  ;;  %v3991_v21 = vpop.permute.xlu1 %3990 }
 0x8de   :  { %v3717_v58 = vpop.f32.mrf.mxu1  ;;  %v3846_v52 = vpop.f32.mrf.mxu0  ;;  %v3716_v24 = vadd.f32 %v3715_v12, %v6246_v57 }
 0x8df   :  { %4308 = vst [vmem:[%s6354_s15 + $0x90] sm:$0xff] %v4021_v9  ;;  %v4007_v27 = vadd.f32 %v3976_v28, %v3943_v14  ;;  %v3944_v38 = vmul.f32 %v3912_v8, %v3880_v43  ;;  %v3881_v18 = vadd.f32 %v3846_v52, %v3710_v42  ;;  %v4022_v56 = vmax.f32 %v4006_v36, 0.0  ;;  %v3996_v36 = vpop.permute.xlu0 %3995 }
 0x8e0   :  { %v3721_v45 = vpop.f32.mrf.mxu1  ;;  %v3848_v54 = vpop.f32.mrf.mxu0  ;;  %v3718_v11 = vadd.f32 %v3717_v58, %v6248_v49 }
 0x8e1   :  { %v4023_v29 = vmax.f32 %v4007_v27, 0.0  ;;  %v4008_v37 = vadd.f32 %v3976_v28, %v3944_v38  ;;  %v3945_v46 = vmul.f32 %v6256_v34, %v3881_v18  ;;  %4309 = vst [vmem:[%s6354_s15 + $0x98] sm:$0xff] %v4022_v56  ;;  %v3882_v5 = vadd.f32 %v3848_v54, %v3712_v6 }
 0x8e2   :  { %v3723_v48 = vpop.f32.mrf.mxu1  ;;  %v3852_v8 = vpop.f32.mrf.mxu0  ;;  %v3722_v50 = vadd.f32 %v3721_v45, %v6250_v13 }
 0x8e3   :  { %4310 = vst [vmem:[%s6354_s15 + $0xa0] sm:$0xff] %v4023_v29  ;;  %v4024_v47 = vmax.f32 %v4008_v37, 0.0  ;;  %v4009_v35 = vadd.f32 %v3981_v22, %v3945_v46  ;;  %v3883_v17 = vadd.f32 %v3852_v8, %v3716_v24  ;;  %v3946_v57 = vmul.f32 %v6256_v34, %v3882_v5 }
 0x8e4   :  { %v3727_v32 = vpop.f32.mrf.mxu1  ;;  %v3854_v55 = vpop.f32.mrf.mxu0  ;;  %v3724_v10 = vadd.f32 %v3723_v48, %v6252_v16 }
 0x8e5   :  { %4311 = vst [vmem:[%s6354_s15 + $0xa8] sm:$0xff] %v4024_v47  ;;  %v4025_v2 = vmax.f32 %v4009_v35, 0.0  ;;  %v3947_v39 = vmul.f32 %v6260_v0, %v3883_v17  ;;  %v3884_v30 = vadd.f32 %v3854_v55, %v3718_v11  ;;  %v4010_v60 = vadd.f32 %v3981_v22, %v3946_v57  ;;  %v4001_v22 = vpop.permute.xlu1 %4000 }
 0x8e6   :  { %v3729_v63 = vpop.f32.mrf.mxu1  ;;  %v3858_v49 = vpop.f32.mrf.mxu0  ;;  %v3728_v3 = vadd.f32 %v3727_v32, %v6254_v44 }
 0x8e7   :  { %4312 = vst [vmem:[%s6354_s15 + $0xb0] sm:$0xff] %v4025_v2  ;;  %v4011_v34 = vadd.f32 %v3986_v4, %v3947_v39  ;;  %v3948_v61 = vmul.f32 %v6260_v0, %v3884_v30  ;;  %v3885_v53 = vadd.f32 %v3858_v49, %v3722_v50  ;;  %v4026_v19 = vmax.f32 %v4010_v60, 0.0 }
 0x8e8   :  { %v3733_v20 = vpop.f32.mrf.mxu1  ;;  %v3860_v15 = vpop.f32.mrf.mxu0  ;;  %v3730_v0 = vadd.f32 %v3729_v63, %v6258_v26 }
 0x8e9   :  { %v4027_v13 = vmax.f32 %v4011_v34, 0.0  ;;  %v4012_v25 = vadd.f32 %v3986_v4, %v3948_v61  ;;  %v3949_v51 = vmul.f32 %v6264_v41, %v3885_v53  ;;  %4313 = vst [vmem:[%s6354_s15 + $0xb8] sm:$0xff] %v4026_v19  ;;  %v3886_v62 = vadd.f32 %v3860_v15, %v3724_v10 }
 0x8ea   :  { %v3864_v1 = vpop.f32.mrf.mxu0  ;;  %v3735_v59 = vpop.f32.mrf.mxu1  ;;  %v3734_v42 = vadd.f32 %v3733_v20, %v6262_v33 }
 0x8eb   :  { %4314 = vst [vmem:[%s6354_s15 + $0xc0] sm:$0xff] %v4027_v13  ;;  %v4028_v16 = vmax.f32 %v4012_v25, 0.0  ;;  %v4013_v7 = vadd.f32 %v3991_v21, %v3949_v51  ;;  %v3887_v12 = vadd.f32 %v3864_v1, %v3728_v3  ;;  %v3950_v44 = vmul.f32 %v6264_v41, %v3886_v62 }
 0x8ec   :  { %v3866_v28 = vpop.f32.mrf.mxu0  ;;  %v3736_v26 = vadd.f32 %v3735_v59, %v6268_v23 }
 0x8ed   :  { %4315 = vst [vmem:[%s6354_s15 + $0xc8] sm:$0xff] %v4028_v16  ;;  %v4029_v9 = vmax.f32 %v4013_v7, 0.0  ;;  %v3951_v14 = vmul.f32 %v6266_v40, %v3887_v12  ;;  %v3888_v43 = vadd.f32 %v3866_v28, %v3730_v0  ;;  %v4014_v58 = vadd.f32 %v3991_v21, %v3950_v44 }
 0x8ee   :  { %v3870_v52 = vpop.f32.mrf.mxu0 }
 0x8ef   :  { %4316 = vst [vmem:[%s6354_s15 + $0xd0] sm:$0xff] %v4029_v9  ;;  %v4015_v41 = vadd.f32 %v3996_v36, %v3951_v14  ;;  %v3952_v27 = vmul.f32 %v6266_v40, %v3888_v43  ;;  %v3889_v38 = vadd.f32 %v3870_v52, %v3734_v42  ;;  %v4030_v18 = vmax.f32 %v4014_v58, 0.0 }
 0x8f0   :  { %v3872_v56 = vpop.f32.mrf.mxu0 }
 0x8f1   :  { %v4031_v6 = vmax.f32 %v4015_v41, 0.0  ;;  %v4016_v33 = vadd.f32 %v3996_v36, %v3952_v27  ;;  %v3953_v45 = vmul.f32 %v6270_v31, %v3889_v38  ;;  %v3890_v54 = vadd.f32 %v3872_v56, %v3736_v26  ;;  %4317 = vst [vmem:[%s6354_s15 + $0xd8] sm:$0xff] %v4030_v18 }
 0x8f3   :  { %4318 = vst [vmem:[%s6354_s15 + $0xe0] sm:$0xff] %v4031_v6  ;;  %v4032_v23 = vmax.f32 %v4016_v33, 0.0  ;;  %v4017_v29 = vadd.f32 %v4001_v22, %v3953_v45  ;;  %v3954_v40 = vmul.f32 %v6270_v31, %v3890_v54 }
 0x8f5   :  { %4319 = vst [vmem:[%s6354_s15 + $0xe8] sm:$0xff] %v4032_v23  ;;  %v4033_v24 = vmax.f32 %v4017_v29, 0.0  ;;  %v4018_v37 = vadd.f32 %v4001_v22, %v3954_v40 }
 0x8f7   :  { %4320 = vst [vmem:[%s6354_s15 + $0xf0] sm:$0xff] %v4033_v24  ;;  %v4034_v46 = vmax.f32 %v4018_v37, 0.0 }
 0x8f9   :  { %4321 = vst [vmem:[%s6354_s15 + $0xf8] sm:$0xff] %v4034_v46 }
 0x8fa   :  { %4056 = vsyncpa [#allocation3], 1 }
 0x8fb   :  { %4057 = vsyncpa [#allocation5], 1 }
 0x8fc   :  { %4058 = vsyncpa [#allocation8], 1 }

// kernel: lsdnn_forward.6
= control target key start
LH: loop header
LB: loop body
LE: loop exit
PB: predicated region body
PF: predicated region fallthrough
CT: control target
= control target key end

     0   :  { %s4699_s0 = inlined_call_operand.vmem [shape: f32[2,16384], index: 0, kind: input, shape index: {}]   ;;  %s4700_s1 = inlined_call_operand.hbm [shape: f32[16384,512], index: 1, kind: input, shape index: {}]   ;;  %s4701_s2 = inlined_call_operand.vmem [shape: f32[2,64], index: 2, kind: input, shape index: {}]   ;;  %s4702_s3 = inlined_call_operand.hbm [shape: f32[64,512], index: 3, kind: input, shape index: {}]   ;;  %s4703_s4 = inlined_call_operand.hbm [shape: f32[1,512], index: 4, kind: input, shape index: {}]   ;;  %s4704_s5 = inlined_call_operand.vmem [shape: f32[2,512], index: 5, kind: output, shape index: {}]  }
   0x1   :  { %4716 = sst [smem:[#allocation14_spill]] %s4699_s0 }
   0x2   :  { %4717 = sst [smem:[#allocation15_spill]] %s4700_s1 }
   0x3   :  { %4718 = sst [smem:[#allocation16_spill]] %s4701_s2 }
   0x4   :  { %4719 = sst [smem:[#allocation17_spill]] %s4702_s3 }
   0x5   :  { %4720 = sst [smem:[#allocation18_spill]] %s4704_s5 }
   0x6   :  { %10 = vsyncpa [#allocation3], 0 }
   0x7   :  { %12 = vsyncpa [#allocation3 + $0x1], 0 }
   0x8   :  { %13 = vsyncpa [#allocation5], 0 }
   0x9   :  { %15 = vsyncpa [#allocation5 + $0x1], 0  ;;  %s3364_s18 = smov 0   ;;  %s3366_s19 = smov 0  }
   0xa   :  { %s3368_s20 = smov 0   ;;  %s3370_s21 = smov 0  }
   0xb   :  { %s3372_s22 = smov 0   ;;  %s3374_s23 = smov 0  }
   0xc   :  { %s3376_s24 = smov 0   ;;  %s3378_s25 = smov 0  }
   0xd   :  { %s3380_s26 = smov 0   ;;  %s3382_s27 = smov 0  }
   0xe   :  { %s3384_s28 = smov 0  }
   0xf LB: > { %4721 = sst [smem:[#allocation9_spill]] %s3307_s24  ;;  %s4705_s29 = sadd.s32 4294967295, %s3323_s28   ;;  %s3323_s28 = sphi %s3384_s28, %s21_s28   ;;  %s3319_s27 = sphi %s3382_s27, %s4760_s27   ;;  %s3315_s26 = sphi %s3380_s26, %s4759_s26   ;;  %s3311_s25 = sphi %s3378_s25, %s4758_s25   ;;  %s3307_s24 = sphi %s3376_s24, %s4757_s24   ;;  %s3303_s23 = sphi %s3374_s23, %s4756_s23   ;;  %s3299_s22 = sphi %s3372_s22, %s4755_s22   ;;  %s3295_s21 = sphi %s3370_s21, %s4754_s21   ;;  %s3291_s20 = sphi %s3368_s20, %s4753_s20   ;;  %s3287_s19 = sphi %s3366_s19, %s4752_s19   ;;  %s3283_s18 = sphi %s3364_s18, %s4751_s18  }
  0x10   : > { %4722 = sst [smem:[#allocation10_spill]] %s3311_s25  ;;  %p76_p0 = scmp.eq.s32.totalorder %s3323_s28, 0 }
  0x11   : > { %p3421_p1 = scmp.eq.s32.totalorder %s4705_s29, 0  ;;  %p122_p2 = scmp.ne.s32.totalorder %s3291_s20, %s3287_s19 }
  0x12   : > { %p128_p3 = scmp.ne.s32.totalorder %s3287_s19, %s3283_s18  ;;  %p4706_p4 = scmp.lt.s32.totalorder %s3323_s28, 8 }
  0x13   : > { %p124_p5 = por %p122_p2, %p76_p0  ;;  %s240_s8 = sand.u32 1, %s3323_s28  }
  0x14   : > { %p3434_p6 = por %p128_p3, %p3421_p1  ;;  %s4710_s9 = sand.u32 1, %s3291_s20  }
  0x15   : > { %s3004_s10 = sshll.u32 %s4710_s9, 7  ;;  %s3024_s11 = sshll.u32 %s3319_s27, 8 }
  0x16   : > { %s4724_s7 = scalar_select %p3434_p6, 1, 0 }
  0x17   : > { %s4726_s3 = sld [smem:[#allocation17_spill]]  ;;  %s244_s15 = scalar_lea.vmem [#allocation4], %s3004_s10 }
  0x18   : > { %4725 = sst [smem:[#allocation11_spill]] %s4724_s7  ;;  %s251_s16 = sshll.u32 %s244_s15, 4  ;;  %s252_s16 = int_to_ptr.vmem [resolvable:$true] %s251_s16 }
  0x19   : > { %p3450_p7 = pnand %p4706_p4, %p124_p5  ;;  %p3010_p8 = scmp.ge.s32.totalorder %s3323_s28, 1 }
  0x1a   : > { %p278_p9 = scmp.lt.s32.totalorder %s3323_s28, 9  ;;  %s3456_s18 = scalar_lea.sflag [#allocation5], %s240_s8 }
  0x1b   : > { %p3147_p10 = pneg %p3450_p7  ;;  %s3158_s29 = scalar_lea.vmem %s252_s16, 2048 }
  0x1c   : > { %p3159_p11 = scmp.ne.s32.totalorder %s252_s16, %s3158_s29  ;;  %s3325_s10 = smov [#allocation4]  }
  0x1d   : > { %s3446_s14 = scalar_lea.hbm %s4726_s3, %s3024_s11  ;;  %s3163_s11 = sshll.u32 %s3325_s10, 4  ;;  %s3164_s11 = int_to_ptr.vmem [resolvable:$false] %s3163_s11 }
  0x1e   : > { %p3161_p12 = pnand %p3159_p11, %p3147_p10  ;;  %s3165_s12 = scalar_lea.vmem %s3164_s11, 4096 }
  0x1f   : > { %p3166_p2 = scmp.lt.s32.totalorder %s252_s16, %s3164_s11  ;;  %p3167_p3 = scmp.lt.s32.totalorder %s3165_s12, %s3158_s29 }
  0x20   : > { %p3162_p13 = pneg %p3161_p12 }
  0x21   : > { %p3168_p5 = por %p3167_p3, %p3166_p2 }
  0x23   : > { %p3169_p4 = pnand %p3168_p5, %p3162_p13 }
  0x25   : > { %3172 = shalt.err (!%p3169_p4)
}
  0x26   : > { %s4707_s13 = smov 512   ;;  %s4708_s29 = smov 256  }
  0x27   : > { %s4709_s8 = smov 16   ;;  %p3474_p4 = pnand %p3010_p8, %p278_p9 }
  0x28   : > { %3038 = dma.hbm_to_vmem [thread:$0]  (!%p3450_p7), %s3446_s14, 2048, %s252_s16, %s3456_s18, %s4707_s13, %s4708_s29, %s4709_s8  }
  0x29   : > { %s30_s10 = sadd.s32 1, %s3315_s26  ;;  %s33_s11 = sadd.s32 1, %s3319_s27 }
  0x2a   : > { %p31_p11 = scmp.ge.s32.totalorder %s30_s10, 4  ;;  %s68_s12 = sadd.s32 1, %s3303_s23 }
  0x2b   : > { %p75_p12 = scmp.ne.s32.totalorder %s3303_s23, %s3299_s22  ;;  %p81_p13 = scmp.ne.s32.totalorder %s3299_s22, %s3295_s21 }
  0x2c   : > { %s4762_s10 = smov (%p31_p11, %s30_s10), 0  ;;  %s4764_s11 = smov (!%p31_p11, %s33_s11), %s3319_s27 }
  0x2d   : > { %4729 = sst [smem:[#allocation12_spill]] %s4762_s10  ;;  %s63_s14 = ssub.s32 %s3315_s26, %s4762_s10 }
  0x2e   : > { %p3490_p8 = por %p76_p0, %p75_p12  ;;  %p35_p9 = scmp.ge.s32.totalorder %s4764_s11, 2 }
  0x2f   : > { %s216_s13 = sand.u32 1, %s3303_s23   ;;  %s3001_s29 = sshll.u32 %s3319_s27, 1 }
  0x30   : > { %s4766_s11 = smov (%p35_p9, %s4764_s11), 0  ;;  %p3502_p2 = por %p3421_p1, %p81_p13 }
  0x31   : > { %4731 = sst [smem:[#allocation13_spill]] %s4766_s11  ;;  %s64_s9 = ssub.s32 %s3319_s27, %s4766_s11 }
  0x32   : > { %s2999_s6 = sshll.u32 %s216_s13, 13  ;;  %s65_s3 = sor.u32 %s64_s9, %s63_s14 }
  0x33   : > { %p113_p0 = scmp.eq.s32.totalorder %s64_s9, 0  ;;  %p66_p3 = scmp.eq.s32.totalorder %s65_s3, 0 }
  0x34   : > { %s4733_s10 = sadd.s32 1, %s3291_s20  ;;  %s3023_s5 = sshll.u32 %s3315_s26, 11 }
  0x35   : > { %s3511_s21 = scalar_select %p113_p0, %s3291_s20, %s4733_s10  }
  0x36   : > { %s3514_s2 = scalar_select %p66_p3, %s3303_s23, %s68_s12  }
  0x37   : > { %s220_s0 = scalar_lea.vmem [#allocation2], %s2999_s6  ;;  %s227_s30 = sadd.s32 %s3023_s5, %s3001_s29 }
  0x38   : > { %s230_s25 = sshll.u32 %s220_s0, 4  ;;  %s3003_s24 = sshll.u32 %s227_s30, 7  ;;  %s231_s25 = int_to_ptr.vmem [resolvable:$true] %s230_s25 }
  0x39   : > { %p4734_p1 = scmp.lt.s32.totalorder %s3323_s28, 8  ;;  %s4736_s1 = sld [smem:[#allocation15_spill]] }
  0x3a   : > { %s4737_s10 = sand.u32 1, %s3291_s20   ;;  %s217_s11 = scalar_lea.sflag [#allocation3], %s216_s13 }
  0x3b   : > { %p3521_p5 = pnand %p4734_p1, %p3490_p8  ;;  %s3007_s12 = sshll.u32 %s4737_s10, 1 }
  0x3c   : > { %s3186_s0 = scalar_lea.vmem %s231_s25, 131072  ;;  %s3329_s5 = smov [#allocation2]  }
  0x3d   : > { %p3175_p11 = pneg %p3521_p5  ;;  %p3187_p12 = scmp.ne.s32.totalorder %s231_s25, %s3186_s0 }
  0x3e   : > { %s3191_s6 = sshll.u32 %s3329_s5, 4  ;;  %s3192_s6 = int_to_ptr.vmem [resolvable:$false] %s3191_s6 }
  0x3f   : > { %s229_s3 = scalar_lea.hbm %s4736_s1, %s3003_s24  ;;  %p3189_p9 = pnand %p3187_p12, %p3175_p11 }
  0x40   : > { %s3193_s29 = scalar_lea.vmem %s3192_s6, 262144  ;;  %p3194_p8 = scmp.lt.s32.totalorder %s231_s25, %s3192_s6 }
  0x41   : > { %p3190_p13 = pneg %p3189_p9  ;;  %p3195_p0 = scmp.lt.s32.totalorder %s3193_s29, %s3186_s0 }
  0x43   : > { %p3196_p3 = por %p3195_p0, %p3194_p8 }
  0x45   : > { %p3197_p1 = pnand %p3196_p3, %p3190_p13 }
  0x47   : > { %3200 = shalt.err (!%p3197_p1)
}
  0x48   : > { %s4738_s24 = smov 16   ;;  %s4739_s16 = smov 256  }
  0x49   : > { %s4740_s13 = smov 512   ;;  %s3025_s30 = sshll.u32 %s3319_s27, 5 }
  0x4a   : > { %3035 = dma.hbm_to_vmem [thread:$0]  (!%p3521_p5), %s229_s3, 131072, %s231_s25, %s217_s11, %s4740_s13, %s4739_s16, %s4738_s24  }
  0x4b   : > { %s265_s14 = scalar_lea.vmem [#allocation6], %s3007_s12  ;;  %s271_s1 = scalar_lea.hbm %s4703_s4, %s3025_s30 }
  0x4c   : > { %s273_s9 = sshll.u32 %s265_s14, 4  ;;  %s3330_s7 = smov [#allocation6]   ;;  %s274_s9 = int_to_ptr.vmem [resolvable:$true] %s273_s9 }
  0x4d   : > { %s3214_s0 = scalar_lea.vmem %s274_s9, 32  ;;  %s3219_s6 = sshll.u32 %s3330_s7, 4  ;;  %s3220_s6 = int_to_ptr.vmem [resolvable:$false] %s3219_s6 }
  0x4e   : > { %p3215_p11 = scmp.ne.s32.totalorder %s274_s9, %s3214_s0  ;;  %s3221_s29 = scalar_lea.vmem %s3220_s6, 64 }
  0x4f   : > { %p3222_p13 = scmp.lt.s32.totalorder %s274_s9, %s3220_s6  ;;  %p3223_p5 = scmp.lt.s32.totalorder %s3221_s29, %s3214_s0 }
  0x50   : > { %p3217_p12 = pnand %p3215_p11, %p3147_p10 }
  0x51   : > { %p3224_p8 = por %p3223_p5, %p3222_p13 }
  0x52   : > { %p3218_p9 = pneg %p3217_p12 }
  0x54   : > { %p3225_p0 = pnand %p3224_p8, %p3218_p9 }
  0x56   : > { %3228 = shalt.err (!%p3225_p0)
}
  0x57   : > { %3041 = dma.hbm_to_vmem [thread:$0]  (!%p3450_p7), %s271_s1, 32, %s274_s9, %s3456_s18  }
  0x58   : > { %282 = sbr.rel (%p3474_p4) target bundleno = 1070 (0x42e), region = 40  ;;  %s284_s25 = sand.u32 (!%p3474_p4), 1, %s3299_s22  }
  0x59   : > { %s3011_s11 = sshll.u32 (!%p3474_p4), %s284_s25, 13  ;;  %s285_s3 = scalar_lea.sflag (!%p3474_p4), [#allocation3], %s284_s25 }
  0x5a   : > { %s3550_s12 = scalar_lea.vmem (!%p3474_p4), [#allocation2], %s3011_s11 }
  0x5d   : > { %3274 = dma.done.wait (%p3502_p2), %s285_s3, 131072  }
  0x5e   : > { %3276 = vsyncadd (%p3502_p2), %s285_s3, 4294836224  ;;  %s4741_s24 = sadd.s32 4294967295, %s3323_s28   ;;  %s295_s18 = sand.u32 1, %s3287_s19  }
  0x5f   : > { %s293_s1 = sand.u32 1, %s4741_s24   ;;  %s3012_s15 = sshll.u32 %s295_s18, 7 }
  0x60   : > { %s294_s16 = scalar_lea.sflag [#allocation5], %s293_s1  ;;  %s3559_s13 = scalar_lea.vmem [#allocation4], %s3012_s15 }
  0x61   : > { %3278 = dma.done.wait (%p3434_p6), %s294_s16, 2080  }
  0x62   : > { %3280 = vsyncadd (%p3434_p6), %s294_s16, 4294965216  ;;  %s4743_s30 = sld [smem:[#allocation9_spill]]  ;;  %s3565_s9 = sshll.u32 %s295_s18, 1 }
  0x63   : > { %s4744_s14 = sld [smem:[#allocation10_spill]]  ;;  %s306_s1 = scalar_lea.vmem [#allocation6], %s3565_s9 }
  0x64   : > { %s4745_s6 = sld [smem:[#allocation14_spill]] }
  0x65   : > { %s4746_s24 = sld [smem:[#allocation18_spill]] }
  0x68   : > { %s3014_s8 = sshll.u32 %s4743_s30, 5  ;;  %p3018_p6 = scmp.ne.s32.totalorder %s4743_s30, 0 }
  0x69   : > { %p349_p7 = scmp.lt.s32.totalorder %s3014_s8, 127  ;;  %s3016_s10 = sshll.u32 %s4744_s14, 1 }
  0x6a   : > { %p359_p10 = scmp.lt.s32.totalorder %s3016_s10, 3  ;;  %367 = sbr.rel (%p3018_p6) target bundleno = 113 (0x71), region = 56 }
  0x6b   : > { %s4768_s8 = smov (!%p349_p7, %s3014_s8), 127 }
  0x6c   : > { %s3015_s5 = sshll.u32 %s4768_s8, 1  ;;  %s4770_s10 = smov (!%p359_p10, %s3016_s10), 3 }
  0x6d   : > { %s3572_s29 = scalar_lea.vmem %s4745_s6, %s3015_s5  ;;  %s3017_s25 = sshll.u32 %s4770_s10, 1 }
  0x6e   : > { %s3577_s17 = scalar_lea.vmem %s4746_s24, %s3017_s25 }
  0x6f   : > { %v3331_v0 = vmov 0.0  }
  0x70   : > { %368 = vst [vmem:[%s3577_s17] sm:$0xf] %v3331_v0 }
  0x71 PF: > { %v409_v1 = vld [vmem:[%s3550_s12 + $0xf8] sm:$0xff]  ;;  %v408_v3 = vld [vmem:[%s3550_s12 + $0xf0] sm:$0xff]  ;;  %v407_v5 = vld [vmem:[%s3550_s12 + $0xe8] sm:$0xff] }
  0x72   : > { %v473_v2 = vld [vmem:[%s3550_s12 + $0x2f8] sm:$0xff]  ;;  %1578 = vmatprep.subr.mxu0 %v409_v1  ;;  %v472_v4 = vld [vmem:[%s3550_s12 + $0x2f0] sm:$0xff]  ;;  %v471_v6 = vld [vmem:[%s3550_s12 + $0x2e8] sm:$0xff] }
  0x73   : > { %1649 = vmatprep.subr.mxu1 %v473_v2  ;;  %1579 = vmatpush1.msra.mxu0 %v408_v3  ;;  %v406_v7 = vld [vmem:[%s3550_s12 + $0xe0] sm:$0xff]  ;;  %v405_v9 = vld [vmem:[%s3550_s12 + $0xd8] sm:$0xff]  ;;  %v404_v11 = vld [vmem:[%s3550_s12 + $0xd0] sm:$0xff] }
  0x74   : > { %1650 = vmatpush1.msra.mxu1 %v472_v4  ;;  %v470_v8 = vld [vmem:[%s3550_s12 + $0x2e0] sm:$0xff]  ;;  %1580 = vmatprep.subr.mxu0 %v407_v5  ;;  %v469_v10 = vld [vmem:[%s3550_s12 + $0x2d8] sm:$0xff]  ;;  %v468_v12 = vld [vmem:[%s3550_s12 + $0x2d0] sm:$0xff] }
  0x75   : > { %1651 = vmatprep.subr.mxu1 %v471_v6  ;;  %1581 = vmatpush1.msra.mxu0 %v406_v7  ;;  %v403_v13 = vld [vmem:[%s3550_s12 + $0xc8] sm:$0xff]  ;;  %v402_v15 = vld [vmem:[%s3550_s12 + $0xc0] sm:$0xff]  ;;  %v401_v17 = vld [vmem:[%s3550_s12 + $0xb8] sm:$0xff] }
  0x76   : > { %1652 = vmatpush1.msra.mxu1 %v470_v8  ;;  %v467_v14 = vld [vmem:[%s3550_s12 + $0x2c8] sm:$0xff]  ;;  %1582 = vmatprep.subr.mxu0 %v405_v9  ;;  %v466_v16 = vld [vmem:[%s3550_s12 + $0x2c0] sm:$0xff]  ;;  %v465_v18 = vld [vmem:[%s3550_s12 + $0x2b8] sm:$0xff] }
  0x77   : > { %1653 = vmatprep.subr.mxu1 %v469_v10  ;;  %1583 = vmatpush1.msra.mxu0 %v404_v11  ;;  %v400_v19 = vld [vmem:[%s3550_s12 + $0xb0] sm:$0xff]  ;;  %v399_v21 = vld [vmem:[%s3550_s12 + $0xa8] sm:$0xff]  ;;  %v398_v23 = vld [vmem:[%s3550_s12 + $0xa0] sm:$0xff] }
  0x78   : > { %1654 = vmatpush1.msra.mxu1 %v468_v12  ;;  %1584 = vmatprep.subr.mxu0 %v403_v13  ;;  %v464_v20 = vld [vmem:[%s3550_s12 + $0x2b0] sm:$0xff]  ;;  %v463_v22 = vld [vmem:[%s3550_s12 + $0x2a8] sm:$0xff]  ;;  %v462_v24 = vld [vmem:[%s3550_s12 + $0x2a0] sm:$0xff] }
  0x79   : > { %1655 = vmatprep.subr.mxu1 %v467_v14  ;;  %1585 = vmatpush1.msra.mxu0 %v402_v15  ;;  %v397_v25 = vld [vmem:[%s3550_s12 + $0x98] sm:$0xff]  ;;  %v396_v27 = vld [vmem:[%s3550_s12 + $0x90] sm:$0xff]  ;;  %v395_v29 = vld [vmem:[%s3550_s12 + $0x88] sm:$0xff] }
  0x7a   : > { %1656 = vmatpush1.msra.mxu1 %v466_v16  ;;  %1586 = vmatprep.subr.mxu0 %v401_v17  ;;  %v461_v26 = vld [vmem:[%s3550_s12 + $0x298] sm:$0xff]  ;;  %v460_v28 = vld [vmem:[%s3550_s12 + $0x290] sm:$0xff]  ;;  %v459_v30 = vld [vmem:[%s3550_s12 + $0x288] sm:$0xff] }
  0x7b   : > { %1657 = vmatprep.subr.mxu1 %v465_v18  ;;  %1587 = vmatpush1.msra.mxu0 %v400_v19  ;;  %v394_v31 = vld [vmem:[%s3550_s12 + $0x80] sm:$0xff]  ;;  %v393_v33 = vld [vmem:[%s3550_s12 + $0x78] sm:$0xff]  ;;  %v392_v35 = vld [vmem:[%s3550_s12 + $0x70] sm:$0xff] }
  0x7c   : > { %1658 = vmatpush1.msra.mxu1 %v464_v20  ;;  %1588 = vmatprep.subr.mxu0 %v399_v21  ;;  %v458_v32 = vld [vmem:[%s3550_s12 + $0x280] sm:$0xff]  ;;  %v457_v34 = vld [vmem:[%s3550_s12 + $0x278] sm:$0xff]  ;;  %v456_v36 = vld [vmem:[%s3550_s12 + $0x270] sm:$0xff] }
  0x7d   : > { %1659 = vmatprep.subr.mxu1 %v463_v22  ;;  %1589 = vmatpush1.msra.mxu0 %v398_v23  ;;  %v391_v37 = vld [vmem:[%s3550_s12 + $0x68] sm:$0xff]  ;;  %v390_v39 = vld [vmem:[%s3550_s12 + $0x60] sm:$0xff]  ;;  %v389_v41 = vld [vmem:[%s3550_s12 + $0x58] sm:$0xff] }
  0x7e   : > { %1660 = vmatpush1.msra.mxu1 %v462_v24  ;;  %1590 = vmatprep.subr.mxu0 %v397_v25  ;;  %v455_v38 = vld [vmem:[%s3550_s12 + $0x268] sm:$0xff]  ;;  %v454_v40 = vld [vmem:[%s3550_s12 + $0x260] sm:$0xff]  ;;  %v453_v42 = vld [vmem:[%s3550_s12 + $0x258] sm:$0xff] }
  0x7f   : > { %1661 = vmatprep.subr.mxu1 %v461_v26  ;;  %1591 = vmatpush1.msra.mxu0 %v396_v27  ;;  %v388_v43 = vld [vmem:[%s3550_s12 + $0x50] sm:$0xff]  ;;  %v387_v45 = vld [vmem:[%s3550_s12 + $0x48] sm:$0xff]  ;;  %v386_v47 = vld [vmem:[%s3550_s12 + $0x40] sm:$0xff] }
  0x80   : > { %1662 = vmatpush1.msra.mxu1 %v460_v28  ;;  %1592 = vmatprep.subr.mxu0 %v395_v29  ;;  %v452_v44 = vld [vmem:[%s3550_s12 + $0x250] sm:$0xff]  ;;  %v451_v46 = vld [vmem:[%s3550_s12 + $0x248] sm:$0xff]  ;;  %v450_v48 = vld [vmem:[%s3550_s12 + $0x240] sm:$0xff] }
  0x81   : > { %1663 = vmatprep.subr.mxu1 %v459_v30  ;;  %1593 = vmatpush1.msra.mxu0 %v394_v31  ;;  %v385_v49 = vld [vmem:[%s3550_s12 + $0x38] sm:$0xff]  ;;  %v384_v51 = vld [vmem:[%s3550_s12 + $0x30] sm:$0xff]  ;;  %v383_v53 = vld [vmem:[%s3550_s12 + $0x28] sm:$0xff]  ;;  %v3332_v31 = vmov 1983009808  }
  0x82   : > { %1664 = vmatpush1.msra.mxu1 %v458_v32  ;;  %1594 = vmatprep.subr.mxu0 %v393_v33  ;;  %v449_v50 = vld [vmem:[%s3550_s12 + $0x238] sm:$0xff]  ;;  %v448_v52 = vld [vmem:[%s3550_s12 + $0x230] sm:$0xff]  ;;  %v447_v54 = vld [vmem:[%s3550_s12 + $0x228] sm:$0xff]  ;;  %v1412_v32 = vunpack.c.l.s4 %v3332_v31  ;;  %v1414_v33 = vlaneseq }
  0x83   : > { %1665 = vmatprep.subr.mxu1 %v457_v34  ;;  %1595 = vmatpush1.msra.mxu0 %v392_v35  ;;  %v382_v55 = vld [vmem:[%s3550_s12 + $0x20] sm:$0xff]  ;;  %v381_v57 = vld [vmem:[%s3550_s12 + $0x18] sm:$0xff]  ;;  %v380_v59 = vld [vmem:[%s3550_s12 + $0x10] sm:$0xff] }
  0x84   : > { %1666 = vmatpush1.msra.mxu1 %v456_v36  ;;  %1596 = vmatprep.subr.mxu0 %v391_v37  ;;  %v446_v56 = vld [vmem:[%s3550_s12 + $0x220] sm:$0xff]  ;;  %v445_v58 = vld [vmem:[%s3550_s12 + $0x218] sm:$0xff]  ;;  %v444_v60 = vld [vmem:[%s3550_s12 + $0x210] sm:$0xff] }
  0x85   : > { %1667 = vmatprep.subr.mxu1 %v455_v38  ;;  %1597 = vmatpush1.msra.mxu0 %v390_v39  ;;  %v379_v61 = vld [vmem:[%s3550_s12 + $0x8] sm:$0xff]  ;;  %v378_v63 = vld [vmem:[%s3550_s12] sm:$0xff]  ;;  %v441_v1 = vld [vmem:[%s3550_s12 + $0x1f8] sm:$0xff] }
  0x86   : > { %1668 = vmatpush1.msra.mxu1 %v454_v40  ;;  %1598 = vmatprep.subr.mxu0 %v389_v41  ;;  %v443_v62 = vld [vmem:[%s3550_s12 + $0x208] sm:$0xff]  ;;  %v442_v0 = vld [vmem:[%s3550_s12 + $0x200] sm:$0xff]  ;;  %v505_v2 = vld [vmem:[%s3550_s12 + $0x3f8] sm:$0xff] }
  0x87   : > { %1669 = vmatprep.subr.mxu1 %v453_v42  ;;  %1599 = vmatpush1.msra.mxu0 %v388_v43  ;;  %v440_v3 = vld [vmem:[%s3550_s12 + $0x1f0] sm:$0xff]  ;;  %v439_v5 = vld [vmem:[%s3550_s12 + $0x1e8] sm:$0xff]  ;;  %v438_v7 = vld [vmem:[%s3550_s12 + $0x1e0] sm:$0xff]  ;;  %v1413_v42 = vunpack.c.0.s8 %v1412_v32  ;;  %v3684_v43 = vshrl.u32 %v1414_v33, 7 }
  0x88   : > { %1670 = vmatpush1.msra.mxu1 %v452_v44  ;;  %1600 = vmatprep.subr.mxu0 %v387_v45  ;;  %v504_v4 = vld [vmem:[%s3550_s12 + $0x3f0] sm:$0xff]  ;;  %v503_v6 = vld [vmem:[%s3550_s12 + $0x3e8] sm:$0xff]  ;;  %v502_v8 = vld [vmem:[%s3550_s12 + $0x3e0] sm:$0xff] }
  0x89   : > { %1671 = vmatprep.subr.mxu1 %v451_v46  ;;  %1601 = vmatpush1.msra.mxu0 %v386_v47  ;;  %v437_v9 = vld [vmem:[%s3550_s12 + $0x1d8] sm:$0xff]  ;;  %v436_v11 = vld [vmem:[%s3550_s12 + $0x1d0] sm:$0xff]  ;;  %v435_v13 = vld [vmem:[%s3550_s12 + $0x1c8] sm:$0xff] }
  0x8a   : > { %1672 = vmatpush1.msra.mxu1 %v450_v48  ;;  %1602 = vmatprep.subr.mxu0 %v385_v49  ;;  %v501_v10 = vld [vmem:[%s3550_s12 + $0x3d8] sm:$0xff]  ;;  %v500_v12 = vld [vmem:[%s3550_s12 + $0x3d0] sm:$0xff]  ;;  %v499_v14 = vld [vmem:[%s3550_s12 + $0x3c8] sm:$0xff] }
  0x8b   : > { %1673 = vmatprep.subr.mxu1 %v449_v50  ;;  %1603 = vmatpush1.msra.mxu0 %v384_v51  ;;  %v434_v15 = vld [vmem:[%s3550_s12 + $0x1c0] sm:$0xff]  ;;  %v433_v17 = vld [vmem:[%s3550_s12 + $0x1b8] sm:$0xff]  ;;  %v432_v19 = vld [vmem:[%s3550_s12 + $0x1b0] sm:$0xff] }
  0x8c   : > { %1674 = vmatpush1.msra.mxu1 %v448_v52  ;;  %1604 = vmatprep.subr.mxu0 %v383_v53  ;;  %v498_v16 = vld [vmem:[%s3550_s12 + $0x3c0] sm:$0xff]  ;;  %v497_v18 = vld [vmem:[%s3550_s12 + $0x3b8] sm:$0xff]  ;;  %v496_v20 = vld [vmem:[%s3550_s12 + $0x3b0] sm:$0xff]  ;;  %v3696_v53 = vsub.s32 %v1413_v42, %v3684_v43 }
  0x8d   : > { %1675 = vmatprep.subr.mxu1 %v447_v54  ;;  %1605 = vmatpush1.msra.mxu0 %v382_v55  ;;  %v431_v21 = vld [vmem:[%s3550_s12 + $0x1a8] sm:$0xff]  ;;  %v430_v23 = vld [vmem:[%s3550_s12 + $0x1a0] sm:$0xff]  ;;  %v429_v25 = vld [vmem:[%s3550_s12 + $0x198] sm:$0xff] }
  0x8e   : > { %1676 = vmatpush1.msra.mxu1 %v446_v56  ;;  %1606 = vmatprep.subr.mxu0 %v381_v57  ;;  %v495_v22 = vld [vmem:[%s3550_s12 + $0x3a8] sm:$0xff]  ;;  %v494_v24 = vld [vmem:[%s3550_s12 + $0x3a0] sm:$0xff]  ;;  %v493_v26 = vld [vmem:[%s3550_s12 + $0x398] sm:$0xff] }
  0x8f   : > { %1677 = vmatprep.subr.mxu1 %v445_v58  ;;  %1607 = vmatpush1.msra.mxu0 %v380_v59  ;;  %v428_v27 = vld [vmem:[%s3550_s12 + $0x190] sm:$0xff]  ;;  %v427_v29 = vld [vmem:[%s3550_s12 + $0x188] sm:$0xff]  ;;  %v426_v34 = vld [vmem:[%s3550_s12 + $0x180] sm:$0xff] }
  0x90   : > { %1678 = vmatpush1.msra.mxu1 %v444_v60  ;;  %1608 = vmatprep.subr.mxu0 %v379_v61  ;;  %v492_v28 = vld [vmem:[%s3550_s12 + $0x390] sm:$0xff]  ;;  %v491_v30 = vld [vmem:[%s3550_s12 + $0x388] sm:$0xff]  ;;  %v490_v35 = vld [vmem:[%s3550_s12 + $0x380] sm:$0xff] }
  0x91   : > { %1679 = vmatprep.subr.mxu1 %v443_v62  ;;  %1609 = vmatpush1.msra.mxu0 %v378_v63  ;;  %v425_v36 = vld [vmem:[%s3550_s12 + $0x178] sm:$0xff]  ;;  %v424_v38 = vld [vmem:[%s3550_s12 + $0x170] sm:$0xff]  ;;  %v423_v40 = vld [vmem:[%s3550_s12 + $0x168] sm:$0xff] }
  0x92   : > { %1680 = vmatpush1.msra.mxu1 %v442_v0  ;;  %1610 = vmatprep.subr.mxu0 %v441_v1  ;;  %v489_v37 = vld [vmem:[%s3550_s12 + $0x378] sm:$0xff]  ;;  %v488_v39 = vld [vmem:[%s3550_s12 + $0x370] sm:$0xff]  ;;  %v487_v41 = vld [vmem:[%s3550_s12 + $0x368] sm:$0xff] }
  0x93   : > { %1681 = vmatprep.subr.mxu1 %v505_v2  ;;  %1611 = vmatpush2.msra.mxu0 %v440_v3  ;;  %v422_v44 = vld [vmem:[%s3550_s12 + $0x160] sm:$0xff]  ;;  %v421_v46 = vld [vmem:[%s3550_s12 + $0x158] sm:$0xff]  ;;  %v420_v49 = vld [vmem:[%s3550_s12 + $0x150] sm:$0xff] }
  0x94   : > { %1682 = vmatpush2.msra.mxu1 %v504_v4  ;;  %1612 = vmatprep.subr.mxu0 %v439_v5  ;;  %v486_v45 = vld [vmem:[%s3550_s12 + $0x360] sm:$0xff]  ;;  %v485_v47 = vld [vmem:[%s3550_s12 + $0x358] sm:$0xff]  ;;  %v484_v50 = vld [vmem:[%s3550_s12 + $0x350] sm:$0xff] }
  0x95   : > { %1683 = vmatprep.subr.mxu1 %v503_v6  ;;  %1613 = vmatpush2.msra.mxu0 %v438_v7  ;;  %v370_v48 = vld [vmem:[%s3572_s29] sm:$0xff]  ;;  %v419_v51 = vld [vmem:[%s3550_s12 + $0x148] sm:$0xff]  ;;  %v417_v57 = vld [vmem:[%s3550_s12 + $0x138] sm:$0xff] }
  0x96   : > { %1684 = vmatpush2.msra.mxu1 %v502_v8  ;;  %1614 = vmatprep.subr.mxu0 %v437_v9  ;;  %v483_v52 = vld [vmem:[%s3550_s12 + $0x348] sm:$0xff]  ;;  %v418_v54 = vld [vmem:[%s3550_s12 + $0x140] sm:$0xff]  ;;  %v1410_v56 = vcombine.high %v370_v48, %v370_v48  ;;  %v481_v58 = vld [vmem:[%s3550_s12 + $0x338] sm:$0xff]  ;;  %v1417_v63 = vrot.slane %v370_v48, %v3696_v53 }
  0x97   : > { %1685 = vmatprep.subr.mxu1 %v501_v10  ;;  %1615 = vmatpush2.msra.mxu0 %v436_v11  ;;  %v482_v55 = vld [vmem:[%s3550_s12 + $0x340] sm:$0xff]  ;;  %v416_v59 = vld [vmem:[%s3550_s12 + $0x130] sm:$0xff]  ;;  %v415_v61 = vld [vmem:[%s3550_s12 + $0x128] sm:$0xff] }
  0x98   : > { %1686 = vmatpush2.msra.mxu1 %v500_v12  ;;  %1616 = vmatprep.subr.mxu0 %v435_v13  ;;  %v480_v60 = vld [vmem:[%s3550_s12 + $0x330] sm:$0xff]  ;;  %v479_v62 = vld [vmem:[%s3550_s12 + $0x328] sm:$0xff]  ;;  %v414_v0 = vld [vmem:[%s3550_s12 + $0x120] sm:$0xff]  ;;  %v1424_v2 = vrot.slane %v1410_v56, %v3696_v53  ;;  %v1425_v9 = vcombine.high %v1417_v63, %v1417_v63 }
  0x99   : > { %1687 = vmatprep.subr.mxu1 %v499_v14  ;;  %1617 = vmatpush2.msra.mxu0 %v434_v15  ;;  %v478_v1 = vld [vmem:[%s3550_s12 + $0x320] sm:$0xff]  ;;  %v413_v3 = vld [vmem:[%s3550_s12 + $0x118] sm:$0xff]  ;;  %v412_v5 = vld [vmem:[%s3550_s12 + $0x110] sm:$0xff] }
  0x9a   : > { %1688 = vmatpush2.msra.mxu1 %v498_v16  ;;  %1618 = vmatprep.subr.mxu0 %v433_v17  ;;  %v477_v4 = vld [vmem:[%s3550_s12 + $0x318] sm:$0xff]  ;;  %v476_v6 = vld [vmem:[%s3550_s12 + $0x310] sm:$0xff]  ;;  %v411_v7 = vld [vmem:[%s3550_s12 + $0x108] sm:$0xff]  ;;  %v1426_v11 = vcombine.high %v1424_v2, %v1424_v2 }
  0x9b   : > { %1689 = vmatprep.subr.mxu1 %v497_v18  ;;  %1619 = vmatpush2.msra.mxu0 %v432_v19  ;;  %v475_v8 = vld [vmem:[%s3550_s12 + $0x308] sm:$0xff]  ;;  %v410_v10 = vld [vmem:[%s3550_s12 + $0x100] sm:$0xff]  ;;  %v537_v13 = vld [vmem:[%s3550_s12 + $0x4f8] sm:$0xff] }
  0x9c   : > { %1690 = vmatpush2.msra.mxu1 %v496_v20  ;;  %1620 = vmatprep.subr.mxu0 %v431_v21  ;;  %v474_v12 = vld [vmem:[%s3550_s12 + $0x300] sm:$0xff]  ;;  %v601_v14 = vld [vmem:[%s3550_s12 + $0x6f8] sm:$0xff]  ;;  %v536_v15 = vld [vmem:[%s3550_s12 + $0x4f0] sm:$0xff] }
  0x9d   : > { %1691 = vmatprep.subr.mxu1 %v495_v22  ;;  %1621 = vmatpush2.msra.mxu0 %v430_v23  ;;  %v600_v16 = vld [vmem:[%s3550_s12 + $0x6f0] sm:$0xff]  ;;  %v535_v17 = vld [vmem:[%s3550_s12 + $0x4e8] sm:$0xff]  ;;  %v534_v19 = vld [vmem:[%s3550_s12 + $0x4e0] sm:$0xff] }
  0x9e   : > { %1692 = vmatpush2.msra.mxu1 %v494_v24  ;;  %1622 = vmatprep.subr.mxu0 %v429_v25  ;;  %v599_v18 = vld [vmem:[%s3550_s12 + $0x6e8] sm:$0xff]  ;;  %v598_v20 = vld [vmem:[%s3550_s12 + $0x6e0] sm:$0xff]  ;;  %v533_v21 = vld [vmem:[%s3550_s12 + $0x4d8] sm:$0xff] }
  0x9f   : > { %1693 = vmatprep.subr.mxu1 %v493_v26  ;;  %1623 = vmatpush2.msra.mxu0 %v428_v27  ;;  %v597_v22 = vld [vmem:[%s3550_s12 + $0x6d8] sm:$0xff]  ;;  %v532_v23 = vld [vmem:[%s3550_s12 + $0x4d0] sm:$0xff]  ;;  %v531_v25 = vld [vmem:[%s3550_s12 + $0x4c8] sm:$0xff] }
  0xa0   : > { %1694 = vmatpush2.msra.mxu1 %v492_v28  ;;  %1624 = vmatprep.subr.mxu0 %v427_v29  ;;  %v596_v24 = vld [vmem:[%s3550_s12 + $0x6d0] sm:$0xff]  ;;  %v595_v26 = vld [vmem:[%s3550_s12 + $0x6c8] sm:$0xff]  ;;  %v530_v27 = vld [vmem:[%s3550_s12 + $0x4c0] sm:$0xff] }
  0xa1   : > { %1695 = vmatprep.subr.mxu1 %v491_v30  ;;  %1625 = vmatpush2.msra.mxu0 %v426_v34  ;;  %v594_v28 = vld [vmem:[%s3550_s12 + $0x6c0] sm:$0xff]  ;;  %v529_v29 = vld [vmem:[%s3550_s12 + $0x4b8] sm:$0xff]  ;;  %v528_v31 = vld [vmem:[%s3550_s12 + $0x4b0] sm:$0xff] }
  0xa2   : > { %1696 = vmatpush2.msra.mxu1 %v490_v35  ;;  %1626 = vmatprep.subr.mxu0 %v425_v36  ;;  %v593_v30 = vld [vmem:[%s3550_s12 + $0x6b8] sm:$0xff]  ;;  %v592_v32 = vld [vmem:[%s3550_s12 + $0x6b0] sm:$0xff]  ;;  %v527_v33 = vld [vmem:[%s3550_s12 + $0x4a8] sm:$0xff] }
  0xa3   : > { %1697 = vmatprep.subr.mxu1 %v489_v37  ;;  %1627 = vmatpush2.msra.mxu0 %v424_v38  ;;  %v591_v34 = vld [vmem:[%s3550_s12 + $0x6a8] sm:$0xff]  ;;  %v526_v35 = vld [vmem:[%s3550_s12 + $0x4a0] sm:$0xff]  ;;  %v525_v37 = vld [vmem:[%s3550_s12 + $0x498] sm:$0xff] }
  0xa4   : > { %1698 = vmatpush2.msra.mxu1 %v488_v39  ;;  %1628 = vmatprep.subr.mxu0 %v423_v40  ;;  %v590_v36 = vld [vmem:[%s3550_s12 + $0x6a0] sm:$0xff]  ;;  %v589_v38 = vld [vmem:[%s3550_s12 + $0x698] sm:$0xff]  ;;  %v524_v39 = vld [vmem:[%s3550_s12 + $0x490] sm:$0xff] }
  0xa5   : > { %1699 = vmatprep.subr.mxu1 %v487_v41  ;;  %1629 = vmatpush2.msra.mxu0 %v422_v44  ;;  %v588_v40 = vld [vmem:[%s3550_s12 + $0x690] sm:$0xff]  ;;  %v523_v41 = vld [vmem:[%s3550_s12 + $0x488] sm:$0xff]  ;;  %v522_v44 = vld [vmem:[%s3550_s12 + $0x480] sm:$0xff] }
  0xa6   : > { %1700 = vmatpush2.msra.mxu1 %v486_v45  ;;  %1630 = vmatprep.subr.mxu0 %v421_v46  ;;  %v587_v42 = vld [vmem:[%s3550_s12 + $0x688] sm:$0xff]  ;;  %v586_v45 = vld [vmem:[%s3550_s12 + $0x680] sm:$0xff]  ;;  %v521_v46 = vld [vmem:[%s3550_s12 + $0x478] sm:$0xff] }
  0xa7   : > { %1701 = vmatprep.subr.mxu1 %v485_v47  ;;  %1631 = vmatpush2.msra.mxu0 %v420_v49  ;;  %v585_v47 = vld [vmem:[%s3550_s12 + $0x678] sm:$0xff]  ;;  %v520_v48 = vld [vmem:[%s3550_s12 + $0x470] sm:$0xff] }
  0xa8   : > { %1702 = vmatpush2.msra.mxu1 %v484_v50  ;;  %1632 = vmatprep.subr.mxu0 %v419_v51  ;;  %v584_v49 = vld [vmem:[%s3550_s12 + $0x670] sm:$0xff]  ;;  %v519_v50 = vld [vmem:[%s3550_s12 + $0x468] sm:$0xff]  ;;  %v581_v56 = vld [vmem:[%s3550_s12 + $0x658] sm:$0xff] }
  0xa9   : > { %1703 = vmatprep.subr.mxu1 %v483_v52  ;;  %1633 = vmatpush2.msra.mxu0 %v418_v54  ;;  %v583_v51 = vld [vmem:[%s3550_s12 + $0x668] sm:$0xff]  ;;  %v518_v52 = vld [vmem:[%s3550_s12 + $0x460] sm:$0xff] }
  0xaa   : > { %1704 = vmatpush2.msra.mxu1 %v482_v55  ;;  %1634 = vmatprep.subr.mxu0 %v417_v57  ;;  %v582_v54 = vld [vmem:[%s3550_s12 + $0x660] sm:$0xff]  ;;  %v517_v55 = vld [vmem:[%s3550_s12 + $0x458] sm:$0xff]  ;;  %v516_v57 = vld [vmem:[%s3550_s12 + $0x450] sm:$0xff] }
  0xab   : > { %1705 = vmatprep.subr.mxu1 %v481_v58  ;;  %1635 = vmatpush2.msra.mxu0 %v416_v59  ;;  %v580_v58 = vld [vmem:[%s3550_s12 + $0x650] sm:$0xff]  ;;  %v515_v59 = vld [vmem:[%s3550_s12 + $0x448] sm:$0xff] }
  0xac   : > { %1706 = vmatpush2.msra.mxu1 %v480_v60  ;;  %1636 = vmatprep.subr.mxu0 %v415_v61  ;;  %v579_v60 = vld [vmem:[%s3550_s12 + $0x648] sm:$0xff]  ;;  %v514_v61 = vld [vmem:[%s3550_s12 + $0x440] sm:$0xff] }
  0xad   : > { %1707 = vmatprep.subr.mxu1 %v479_v62  ;;  %1637 = vmatpush2.msra.mxu0 %v414_v0  ;;  %v578_v62 = vld [vmem:[%s3550_s12 + $0x640] sm:$0xff]  ;;  %v577_v0 = vld [vmem:[%s3550_s12 + $0x638] sm:$0xff] }
  0xae   : > { %1708 = vmatpush2.msra.mxu1 %v478_v1  ;;  %1638 = vmatprep.subr.mxu0 %v413_v3  ;;  %v512_v1 = vld [vmem:[%s3550_s12 + $0x430] sm:$0xff]  ;;  %v511_v3 = vld [vmem:[%s3550_s12 + $0x428] sm:$0xff] }
  0xaf   : > { %1709 = vmatprep.subr.mxu1 %v477_v4  ;;  %1639 = vmatpush2.msra.mxu0 %v412_v5  ;;  %v575_v4 = vld [vmem:[%s3550_s12 + $0x628] sm:$0xff]  ;;  %v510_v5 = vld [vmem:[%s3550_s12 + $0x420] sm:$0xff] }
  0xb0   : > { %1710 = vmatpush2.msra.mxu1 %v476_v6  ;;  %1640 = vmatprep.subr.mxu0 %v411_v7  ;;  %v574_v6 = vld [vmem:[%s3550_s12 + $0x620] sm:$0xff]  ;;  %v509_v7 = vld [vmem:[%s3550_s12 + $0x418] sm:$0xff] }
  0xb1   : > { %1711 = vmatprep.subr.mxu1 %v475_v8  ;;  %1641 = vmatpush2.msra.mxu0 %v410_v10  ;;  %v573_v8 = vld [vmem:[%s3550_s12 + $0x618] sm:$0xff]  ;;  %v572_v10 = vld [vmem:[%s3550_s12 + $0x610] sm:$0xff] }
  0xb2   : > { %1642 = vmatprep.mubr.f32.mxu0 %v1425_v9  ;;  %1712 = vmatpush2.msra.mxu1 %v474_v12  ;;  %v508_v9 = vld [vmem:[%s3550_s12 + $0x410] sm:$0xff]  ;;  %v571_v12 = vld [vmem:[%s3550_s12 + $0x608] sm:$0xff] }
  0xb3   : > { %1713 = vmatprep.mubr.f32.mxu1 %v1426_v11  ;;  %1643 = vmatmul.mubr.f32.vlgmr.msra.gmra.mxu0 %v1417_v63  ;;  %v513_v63 = vld [vmem:[%s3550_s12 + $0x438] sm:$0xff]  ;;  %v507_v11 = vld [vmem:[%s3550_s12 + $0x408] sm:$0xff] }
  0xb4   : > { %1714 = vmatmul.mubr.f32.vlgmr.msra.gmra.mxu1 %v1424_v2  ;;  %1720 = vmatprep.subr.mxu0 %v537_v13  ;;  %v576_v2 = vld [vmem:[%s3550_s12 + $0x630] sm:$0xff]  ;;  %v506_v13 = vld [vmem:[%s3550_s12 + $0x400] sm:$0xff] }
  0xb5   : > { %1791 = vmatprep.subr.mxu1 %v601_v14  ;;  %1721 = vmatpush1.msra.mxu0 %v536_v15  ;;  %v570_v14 = vld [vmem:[%s3550_s12 + $0x600] sm:$0xff]  ;;  %v569_v15 = vld [vmem:[%s3550_s12 + $0x5f8] sm:$0xff] }
  0xb6   : > { %1792 = vmatpush1.msra.mxu1 %v600_v16  ;;  %1722 = vmatprep.subr.mxu0 %v535_v17  ;;  %v633_v16 = vld [vmem:[%s3550_s12 + $0x7f8] sm:$0xff]  ;;  %v568_v17 = vld [vmem:[%s3550_s12 + $0x5f0] sm:$0xff] }
  0xb7   : > { %1793 = vmatprep.subr.mxu1 %v599_v18  ;;  %1723 = vmatpush1.msra.mxu0 %v534_v19  ;;  %v632_v18 = vld [vmem:[%s3550_s12 + $0x7f0] sm:$0xff]  ;;  %v567_v19 = vld [vmem:[%s3550_s12 + $0x5e8] sm:$0xff] }
  0xb8   : > { %1794 = vmatpush1.msra.mxu1 %v598_v20  ;;  %1724 = vmatprep.subr.mxu0 %v533_v21  ;;  %v631_v20 = vld [vmem:[%s3550_s12 + $0x7e8] sm:$0xff]  ;;  %v566_v21 = vld [vmem:[%s3550_s12 + $0x5e0] sm:$0xff] }
  0xb9   : > { %1795 = vmatprep.subr.mxu1 %v597_v22  ;;  %1725 = vmatpush1.msra.mxu0 %v532_v23  ;;  %v630_v22 = vld [vmem:[%s3550_s12 + $0x7e0] sm:$0xff]  ;;  %v565_v23 = vld [vmem:[%s3550_s12 + $0x5d8] sm:$0xff] }
  0xba   : > { %1796 = vmatpush1.msra.mxu1 %v596_v24  ;;  %1726 = vmatprep.subr.mxu0 %v531_v25  ;;  %v629_v24 = vld [vmem:[%s3550_s12 + $0x7d8] sm:$0xff]  ;;  %v564_v25 = vld [vmem:[%s3550_s12 + $0x5d0] sm:$0xff] }
  0xbb   : > { %1797 = vmatprep.subr.mxu1 %v595_v26  ;;  %1727 = vmatpush1.msra.mxu0 %v530_v27  ;;  %v628_v26 = vld [vmem:[%s3550_s12 + $0x7d0] sm:$0xff]  ;;  %v563_v27 = vld [vmem:[%s3550_s12 + $0x5c8] sm:$0xff] }
  0xbc   : > { %1798 = vmatpush1.msra.mxu1 %v594_v28  ;;  %1728 = vmatprep.subr.mxu0 %v529_v29  ;;  %v627_v28 = vld [vmem:[%s3550_s12 + $0x7c8] sm:$0xff]  ;;  %v562_v29 = vld [vmem:[%s3550_s12 + $0x5c0] sm:$0xff] }
  0xbd   : > { %1799 = vmatprep.subr.mxu1 %v593_v30  ;;  %1729 = vmatpush1.msra.mxu0 %v528_v31  ;;  %v626_v30 = vld [vmem:[%s3550_s12 + $0x7c0] sm:$0xff]  ;;  %v561_v31 = vld [vmem:[%s3550_s12 + $0x5b8] sm:$0xff] }
  0xbe   : > { %1800 = vmatpush1.msra.mxu1 %v592_v32  ;;  %1730 = vmatprep.subr.mxu0 %v527_v33  ;;  %v625_v32 = vld [vmem:[%s3550_s12 + $0x7b8] sm:$0xff]  ;;  %v560_v33 = vld [vmem:[%s3550_s12 + $0x5b0] sm:$0xff] }
  0xbf   : > { %1801 = vmatprep.subr.mxu1 %v591_v34  ;;  %1731 = vmatpush1.msra.mxu0 %v526_v35  ;;  %v624_v34 = vld [vmem:[%s3550_s12 + $0x7b0] sm:$0xff]  ;;  %v559_v35 = vld [vmem:[%s3550_s12 + $0x5a8] sm:$0xff] }
  0xc0   : > { %1802 = vmatpush1.msra.mxu1 %v590_v36  ;;  %1732 = vmatprep.subr.mxu0 %v525_v37  ;;  %v623_v36 = vld [vmem:[%s3550_s12 + $0x7a8] sm:$0xff]  ;;  %v558_v37 = vld [vmem:[%s3550_s12 + $0x5a0] sm:$0xff] }
  0xc1   : > { %1803 = vmatprep.subr.mxu1 %v589_v38  ;;  %1733 = vmatpush1.msra.mxu0 %v524_v39  ;;  %v622_v38 = vld [vmem:[%s3550_s12 + $0x7a0] sm:$0xff]  ;;  %v557_v39 = vld [vmem:[%s3550_s12 + $0x598] sm:$0xff] }
  0xc2   : > { %1804 = vmatpush1.msra.mxu1 %v588_v40  ;;  %1734 = vmatprep.subr.mxu0 %v523_v41  ;;  %v621_v40 = vld [vmem:[%s3550_s12 + $0x798] sm:$0xff]  ;;  %v556_v41 = vld [vmem:[%s3550_s12 + $0x590] sm:$0xff] }
  0xc3   : > { %1805 = vmatprep.subr.mxu1 %v587_v42  ;;  %1735 = vmatpush1.msra.mxu0 %v522_v44  ;;  %v620_v42 = vld [vmem:[%s3550_s12 + $0x790] sm:$0xff]  ;;  %v555_v44 = vld [vmem:[%s3550_s12 + $0x588] sm:$0xff] }
  0xc4   : > { %1806 = vmatpush1.msra.mxu1 %v586_v45  ;;  %1736 = vmatprep.subr.mxu0 %v521_v46  ;;  %v619_v45 = vld [vmem:[%s3550_s12 + $0x788] sm:$0xff]  ;;  %v554_v46 = vld [vmem:[%s3550_s12 + $0x580] sm:$0xff] }
  0xc5   : > { %1807 = vmatprep.subr.mxu1 %v585_v47  ;;  %1737 = vmatpush1.msra.mxu0 %v520_v48  ;;  %v618_v47 = vld [vmem:[%s3550_s12 + $0x780] sm:$0xff]  ;;  %v553_v48 = vld [vmem:[%s3550_s12 + $0x578] sm:$0xff] }
  0xc6   : > { %1808 = vmatpush1.msra.mxu1 %v584_v49  ;;  %1738 = vmatprep.subr.mxu0 %v519_v50  ;;  %v617_v49 = vld [vmem:[%s3550_s12 + $0x778] sm:$0xff]  ;;  %v552_v50 = vld [vmem:[%s3550_s12 + $0x570] sm:$0xff] }
  0xc7   : > { %1809 = vmatprep.subr.mxu1 %v583_v51  ;;  %1739 = vmatpush1.msra.mxu0 %v518_v52  ;;  %v616_v51 = vld [vmem:[%s3550_s12 + $0x770] sm:$0xff]  ;;  %v551_v52 = vld [vmem:[%s3550_s12 + $0x568] sm:$0xff] }
  0xc8   : > { %1810 = vmatpush1.msra.mxu1 %v582_v54  ;;  %1740 = vmatprep.subr.mxu0 %v517_v55  ;;  %v615_v54 = vld [vmem:[%s3550_s12 + $0x768] sm:$0xff]  ;;  %v550_v55 = vld [vmem:[%s3550_s12 + $0x560] sm:$0xff] }
  0xc9   : > { %1811 = vmatprep.subr.mxu1 %v581_v56  ;;  %1741 = vmatpush1.msra.mxu0 %v516_v57  ;;  %v614_v56 = vld [vmem:[%s3550_s12 + $0x760] sm:$0xff]  ;;  %v549_v57 = vld [vmem:[%s3550_s12 + $0x558] sm:$0xff] }
  0xca   : > { %1812 = vmatpush1.msra.mxu1 %v580_v58  ;;  %1742 = vmatprep.subr.mxu0 %v515_v59  ;;  %v613_v58 = vld [vmem:[%s3550_s12 + $0x758] sm:$0xff]  ;;  %v548_v59 = vld [vmem:[%s3550_s12 + $0x550] sm:$0xff] }
  0xcb   : > { %1813 = vmatprep.subr.mxu1 %v579_v60  ;;  %1743 = vmatpush1.msra.mxu0 %v514_v61  ;;  %v612_v60 = vld [vmem:[%s3550_s12 + $0x750] sm:$0xff]  ;;  %v371_v61 = vld [vmem:[%s3572_s29 + $0x8] sm:$0xff] }
  0xcc   : > { %1814 = vmatpush1.msra.mxu1 %v578_v62  ;;  %1744 = vmatprep.subr.mxu0 %v513_v63  ;;  %v547_v62 = vld [vmem:[%s3550_s12 + $0x548] sm:$0xff] }
  0xcd   : > { %1815 = vmatprep.subr.mxu1 %v577_v0  ;;  %1745 = vmatpush1.msra.mxu0 %v512_v1  ;;  %v611_v63 = vld [vmem:[%s3550_s12 + $0x748] sm:$0xff]  ;;  %v546_v0 = vld [vmem:[%s3550_s12 + $0x540] sm:$0xff] }
  0xce   : > { %1816 = vmatpush1.msra.mxu1 %v576_v2  ;;  %1746 = vmatprep.subr.mxu0 %v511_v3  ;;  %v610_v1 = vld [vmem:[%s3550_s12 + $0x740] sm:$0xff]  ;;  %v545_v2 = vld [vmem:[%s3550_s12 + $0x538] sm:$0xff] }
  0xcf   : > { %1817 = vmatprep.subr.mxu1 %v575_v4  ;;  %1747 = vmatpush1.msra.mxu0 %v510_v5  ;;  %v609_v3 = vld [vmem:[%s3550_s12 + $0x738] sm:$0xff]  ;;  %v1427_v4 = vcombine.high %v371_v61, %v371_v61  ;;  %v544_v5 = vld [vmem:[%s3550_s12 + $0x530] sm:$0xff] }
  0xd0   : > { %1818 = vmatpush1.msra.mxu1 %v574_v6  ;;  %1748 = vmatprep.subr.mxu0 %v509_v7  ;;  %v608_v6 = vld [vmem:[%s3550_s12 + $0x730] sm:$0xff]  ;;  %v543_v7 = vld [vmem:[%s3550_s12 + $0x528] sm:$0xff] }
  0xd1   : > { %1819 = vmatprep.subr.mxu1 %v573_v8  ;;  %1749 = vmatpush1.msra.mxu0 %v508_v9  ;;  %v607_v8 = vld [vmem:[%s3550_s12 + $0x728] sm:$0xff]  ;;  %v1434_v9 = vrot.slane %v371_v61, %v3696_v53 }
  0xd2   : > { %1820 = vmatpush1.msra.mxu1 %v572_v10  ;;  %1750 = vmatprep.subr.mxu0 %v507_v11  ;;  %v542_v10 = vld [vmem:[%s3550_s12 + $0x520] sm:$0xff]  ;;  %v647_v61 = vld [vmem:[%s3550_s12 + $0x868] sm:$0xff] }
  0xd3   : > { %1821 = vmatprep.subr.mxu1 %v571_v12  ;;  %1751 = vmatpush1.msra.mxu0 %v506_v13  ;;  %v606_v11 = vld [vmem:[%s3550_s12 + $0x720] sm:$0xff]  ;;  %v541_v12 = vld [vmem:[%s3550_s12 + $0x518] sm:$0xff] }
  0xd4   : > { %1822 = vmatpush1.msra.mxu1 %v570_v14  ;;  %1752 = vmatprep.subr.mxu0 %v569_v15  ;;  %v605_v13 = vld [vmem:[%s3550_s12 + $0x718] sm:$0xff]  ;;  %v1441_v14 = vrot.slane %v1427_v4, %v3696_v53  ;;  %v540_v15 = vld [vmem:[%s3550_s12 + $0x510] sm:$0xff] }
  0xd5   : > { %1823 = vmatprep.subr.mxu1 %v633_v16  ;;  %1753 = vmatpush2.msra.mxu0 %v568_v17  ;;  %v604_v16 = vld [vmem:[%s3550_s12 + $0x710] sm:$0xff]  ;;  %v539_v17 = vld [vmem:[%s3550_s12 + $0x508] sm:$0xff] }
  0xd6   : > { %1824 = vmatpush2.msra.mxu1 %v632_v18  ;;  %1754 = vmatprep.subr.mxu0 %v567_v19  ;;  %v603_v18 = vld [vmem:[%s3550_s12 + $0x708] sm:$0xff]  ;;  %v1442_v19 = vcombine.high %v1434_v9, %v1434_v9  ;;  %v708_v4 = vld [vmem:[%s3550_s12 + $0xa50] sm:$0xff] }
  0xd7   : > { %1825 = vmatprep.subr.mxu1 %v631_v20  ;;  %1755 = vmatpush2.msra.mxu0 %v566_v21  ;;  %v538_v20 = vld [vmem:[%s3550_s12 + $0x500] sm:$0xff] }
  0xd8   : > { %1826 = vmatpush2.msra.mxu1 %v630_v22  ;;  %1756 = vmatprep.subr.mxu0 %v565_v23  ;;  %v602_v21 = vld [vmem:[%s3550_s12 + $0x700] sm:$0xff]  ;;  %v1443_v22 = vcombine.high %v1441_v14, %v1441_v14  ;;  %v665_v23 = vld [vmem:[%s3550_s12 + $0x8f8] sm:$0xff] }
  0xd9   : > { %1827 = vmatprep.subr.mxu1 %v629_v24  ;;  %1757 = vmatpush2.msra.mxu0 %v564_v25  ;;  %v729_v24 = vld [vmem:[%s3550_s12 + $0xaf8] sm:$0xff]  ;;  %v664_v25 = vld [vmem:[%s3550_s12 + $0x8f0] sm:$0xff] }
  0xda   : > { %1828 = vmatpush2.msra.mxu1 %v628_v26  ;;  %1758 = vmatprep.subr.mxu0 %v563_v27  ;;  %v728_v26 = vld [vmem:[%s3550_s12 + $0xaf0] sm:$0xff]  ;;  %v663_v27 = vld [vmem:[%s3550_s12 + $0x8e8] sm:$0xff] }
  0xdb   : > { %1829 = vmatprep.subr.mxu1 %v627_v28  ;;  %1759 = vmatpush2.msra.mxu0 %v562_v29  ;;  %v727_v28 = vld [vmem:[%s3550_s12 + $0xae8] sm:$0xff]  ;;  %v662_v29 = vld [vmem:[%s3550_s12 + $0x8e0] sm:$0xff] }
  0xdc   : > { %1830 = vmatpush2.msra.mxu1 %v626_v30  ;;  %1760 = vmatprep.subr.mxu0 %v561_v31  ;;  %v726_v30 = vld [vmem:[%s3550_s12 + $0xae0] sm:$0xff]  ;;  %v661_v31 = vld [vmem:[%s3550_s12 + $0x8d8] sm:$0xff] }
  0xdd   : > { %1831 = vmatprep.subr.mxu1 %v625_v32  ;;  %1761 = vmatpush2.msra.mxu0 %v560_v33  ;;  %v725_v32 = vld [vmem:[%s3550_s12 + $0xad8] sm:$0xff]  ;;  %v660_v33 = vld [vmem:[%s3550_s12 + $0x8d0] sm:$0xff] }
  0xde   : > { %1832 = vmatpush2.msra.mxu1 %v624_v34  ;;  %1762 = vmatprep.subr.mxu0 %v559_v35  ;;  %v724_v34 = vld [vmem:[%s3550_s12 + $0xad0] sm:$0xff]  ;;  %v659_v35 = vld [vmem:[%s3550_s12 + $0x8c8] sm:$0xff] }
  0xdf   : > { %1833 = vmatprep.subr.mxu1 %v623_v36  ;;  %1763 = vmatpush2.msra.mxu0 %v558_v37  ;;  %v723_v36 = vld [vmem:[%s3550_s12 + $0xac8] sm:$0xff]  ;;  %v658_v37 = vld [vmem:[%s3550_s12 + $0x8c0] sm:$0xff] }
  0xe0   : > { %1834 = vmatpush2.msra.mxu1 %v622_v38  ;;  %1764 = vmatprep.subr.mxu0 %v557_v39  ;;  %v722_v38 = vld [vmem:[%s3550_s12 + $0xac0] sm:$0xff]  ;;  %v657_v39 = vld [vmem:[%s3550_s12 + $0x8b8] sm:$0xff] }
  0xe1   : > { %1835 = vmatprep.subr.mxu1 %v621_v40  ;;  %1765 = vmatpush2.msra.mxu0 %v556_v41  ;;  %v721_v40 = vld [vmem:[%s3550_s12 + $0xab8] sm:$0xff]  ;;  %v656_v41 = vld [vmem:[%s3550_s12 + $0x8b0] sm:$0xff] }
  0xe2   : > { %1836 = vmatpush2.msra.mxu1 %v620_v42  ;;  %1766 = vmatprep.subr.mxu0 %v555_v44  ;;  %v720_v42 = vld [vmem:[%s3550_s12 + $0xab0] sm:$0xff]  ;;  %v655_v44 = vld [vmem:[%s3550_s12 + $0x8a8] sm:$0xff] }
  0xe3   : > { %1837 = vmatprep.subr.mxu1 %v619_v45  ;;  %1767 = vmatpush2.msra.mxu0 %v554_v46  ;;  %v719_v45 = vld [vmem:[%s3550_s12 + $0xaa8] sm:$0xff]  ;;  %v654_v46 = vld [vmem:[%s3550_s12 + $0x8a0] sm:$0xff] }
  0xe4   : > { %1838 = vmatpush2.msra.mxu1 %v618_v47  ;;  %1768 = vmatprep.subr.mxu0 %v553_v48  ;;  %v718_v47 = vld [vmem:[%s3550_s12 + $0xaa0] sm:$0xff]  ;;  %v653_v48 = vld [vmem:[%s3550_s12 + $0x898] sm:$0xff] }
  0xe5   : > { %1839 = vmatprep.subr.mxu1 %v617_v49  ;;  %1769 = vmatpush2.msra.mxu0 %v552_v50  ;;  %v717_v49 = vld [vmem:[%s3550_s12 + $0xa98] sm:$0xff]  ;;  %v652_v50 = vld [vmem:[%s3550_s12 + $0x890] sm:$0xff] }
  0xe6   : > { %1840 = vmatpush2.msra.mxu1 %v616_v51  ;;  %1770 = vmatprep.subr.mxu0 %v551_v52  ;;  %v716_v51 = vld [vmem:[%s3550_s12 + $0xa90] sm:$0xff]  ;;  %v651_v52 = vld [vmem:[%s3550_s12 + $0x888] sm:$0xff] }
  0xe7   : > { %1841 = vmatprep.subr.mxu1 %v615_v54  ;;  %1771 = vmatpush2.msra.mxu0 %v550_v55  ;;  %v715_v54 = vld [vmem:[%s3550_s12 + $0xa88] sm:$0xff]  ;;  %v650_v55 = vld [vmem:[%s3550_s12 + $0x880] sm:$0xff] }
  0xe8   : > { %1842 = vmatpush2.msra.mxu1 %v614_v56  ;;  %1772 = vmatprep.subr.mxu0 %v549_v57  ;;  %v714_v56 = vld [vmem:[%s3550_s12 + $0xa80] sm:$0xff]  ;;  %v649_v57 = vld [vmem:[%s3550_s12 + $0x878] sm:$0xff] }
  0xe9   : > { %1843 = vmatprep.subr.mxu1 %v613_v58  ;;  %1773 = vmatpush2.msra.mxu0 %v548_v59  ;;  %v713_v58 = vld [vmem:[%s3550_s12 + $0xa78] sm:$0xff]  ;;  %v648_v59 = vld [vmem:[%s3550_s12 + $0x870] sm:$0xff] }
  0xea   : > { %1844 = vmatpush2.msra.mxu1 %v612_v60  ;;  %1774 = vmatprep.subr.mxu0 %v547_v62  ;;  %v712_v60 = vld [vmem:[%s3550_s12 + $0xa70] sm:$0xff]  ;;  %v711_v62 = vld [vmem:[%s3550_s12 + $0xa68] sm:$0xff] }
  0xeb   : > { %1845 = vmatprep.subr.mxu1 %v611_v63  ;;  %1775 = vmatpush2.msra.mxu0 %v546_v0  ;;  %v646_v63 = vld [vmem:[%s3550_s12 + $0x860] sm:$0xff] }
  0xec   : > { %1846 = vmatpush2.msra.mxu1 %v610_v1  ;;  %1776 = vmatprep.subr.mxu0 %v545_v2  ;;  %v710_v0 = vld [vmem:[%s3550_s12 + $0xa60] sm:$0xff]  ;;  %v645_v1 = vld [vmem:[%s3550_s12 + $0x858] sm:$0xff] }
  0xed   : > { %1847 = vmatprep.subr.mxu1 %v609_v3  ;;  %1777 = vmatpush2.msra.mxu0 %v544_v5  ;;  %v709_v2 = vld [vmem:[%s3550_s12 + $0xa58] sm:$0xff]  ;;  %v644_v3 = vld [vmem:[%s3550_s12 + $0x850] sm:$0xff]  ;;  %v643_v5 = vld [vmem:[%s3550_s12 + $0x848] sm:$0xff] }
  0xee   : > { %1848 = vmatpush2.msra.mxu1 %v608_v6  ;;  %1778 = vmatprep.subr.mxu0 %v543_v7  ;;  %v707_v6 = vld [vmem:[%s3550_s12 + $0xa48] sm:$0xff]  ;;  %v642_v7 = vld [vmem:[%s3550_s12 + $0x840] sm:$0xff] }
  0xef   : > { %1849 = vmatprep.subr.mxu1 %v607_v8  ;;  %1779 = vmatpush2.msra.mxu0 %v542_v10  ;;  %v706_v8 = vld [vmem:[%s3550_s12 + $0xa40] sm:$0xff]  ;;  %v705_v10 = vld [vmem:[%s3550_s12 + $0xa38] sm:$0xff] }
  0xf0   : > { %1850 = vmatpush2.msra.mxu1 %v606_v11  ;;  %1780 = vmatprep.subr.mxu0 %v541_v12  ;;  %v640_v11 = vld [vmem:[%s3550_s12 + $0x830] sm:$0xff] }
  0xf1   : > { %1851 = vmatprep.subr.mxu1 %v605_v13  ;;  %1781 = vmatpush2.msra.mxu0 %v540_v15  ;;  %v704_v12 = vld [vmem:[%s3550_s12 + $0xa30] sm:$0xff]  ;;  %v639_v13 = vld [vmem:[%s3550_s12 + $0x828] sm:$0xff]  ;;  %v638_v15 = vld [vmem:[%s3550_s12 + $0x820] sm:$0xff] }
  0xf2   : > { %1852 = vmatpush2.msra.mxu1 %v604_v16  ;;  %1782 = vmatprep.subr.mxu0 %v539_v17  ;;  %v702_v16 = vld [vmem:[%s3550_s12 + $0xa20] sm:$0xff]  ;;  %v637_v17 = vld [vmem:[%s3550_s12 + $0x818] sm:$0xff] }
  0xf3   : > { %1853 = vmatprep.subr.mxu1 %v603_v18  ;;  %1783 = vmatpush2.msra.mxu0 %v538_v20  ;;  %v701_v18 = vld [vmem:[%s3550_s12 + $0xa18] sm:$0xff]  ;;  %v700_v20 = vld [vmem:[%s3550_s12 + $0xa10] sm:$0xff] }
  0xf4   : > { %1784 = vmatprep.mubr.f32.mxu0 %v1442_v19  ;;  %1854 = vmatpush2.msra.mxu1 %v602_v21  ;;  %v636_v19 = vld [vmem:[%s3550_s12 + $0x810] sm:$0xff]  ;;  %v635_v21 = vld [vmem:[%s3550_s12 + $0x808] sm:$0xff] }
  0xf5   : > { %1785 = vmatmul.mubr.f32.vlgmr.msra.gmra.mxu0 %v1434_v9  ;;  %1855 = vmatprep.mubr.f32.mxu1 %v1443_v22  ;;  %v641_v9 = vld [vmem:[%s3550_s12 + $0x838] sm:$0xff]  ;;  %v699_v22 = vld [vmem:[%s3550_s12 + $0xa08] sm:$0xff] }
  0xf6   : > { %1862 = vmatprep.subr.mxu0 %v665_v23  ;;  %1933 = vmatprep.subr.mxu1 %v729_v24  ;;  %v634_v23 = vld [vmem:[%s3550_s12 + $0x800] sm:$0xff] }
  0xf7   : > { %1856 = vmatmul.mubr.f32.vlgmr.msra.gmra.mxu1 %v1441_v14  ;;  %1863 = vmatpush1.msra.mxu0 %v664_v25  ;;  %v703_v14 = vld [vmem:[%s3550_s12 + $0xa28] sm:$0xff]  ;;  %v698_v24 = vld [vmem:[%s3550_s12 + $0xa00] sm:$0xff]  ;;  %v697_v25 = vld [vmem:[%s3550_s12 + $0x9f8] sm:$0xff] }
  0xf8   : > { %1934 = vmatpush1.msra.mxu1 %v728_v26  ;;  %1864 = vmatprep.subr.mxu0 %v663_v27  ;;  %v761_v26 = vld [vmem:[%s3550_s12 + $0xbf8] sm:$0xff]  ;;  %v696_v27 = vld [vmem:[%s3550_s12 + $0x9f0] sm:$0xff] }
  0xf9   : > { %1935 = vmatprep.subr.mxu1 %v727_v28  ;;  %1865 = vmatpush1.msra.mxu0 %v662_v29  ;;  %v760_v28 = vld [vmem:[%s3550_s12 + $0xbf0] sm:$0xff]  ;;  %v695_v29 = vld [vmem:[%s3550_s12 + $0x9e8] sm:$0xff] }
  0xfa   : > { %1936 = vmatpush1.msra.mxu1 %v726_v30  ;;  %1866 = vmatprep.subr.mxu0 %v661_v31  ;;  %v759_v30 = vld [vmem:[%s3550_s12 + $0xbe8] sm:$0xff]  ;;  %v694_v31 = vld [vmem:[%s3550_s12 + $0x9e0] sm:$0xff] }
  0xfb   : > { %1937 = vmatprep.subr.mxu1 %v725_v32  ;;  %1867 = vmatpush1.msra.mxu0 %v660_v33  ;;  %v758_v32 = vld [vmem:[%s3550_s12 + $0xbe0] sm:$0xff]  ;;  %v693_v33 = vld [vmem:[%s3550_s12 + $0x9d8] sm:$0xff] }
  0xfc   : > { %1938 = vmatpush1.msra.mxu1 %v724_v34  ;;  %1868 = vmatprep.subr.mxu0 %v659_v35  ;;  %v757_v34 = vld [vmem:[%s3550_s12 + $0xbd8] sm:$0xff]  ;;  %v692_v35 = vld [vmem:[%s3550_s12 + $0x9d0] sm:$0xff] }
  0xfd   : > { %1939 = vmatprep.subr.mxu1 %v723_v36  ;;  %1869 = vmatpush1.msra.mxu0 %v658_v37  ;;  %v756_v36 = vld [vmem:[%s3550_s12 + $0xbd0] sm:$0xff]  ;;  %v691_v37 = vld [vmem:[%s3550_s12 + $0x9c8] sm:$0xff] }
  0xfe   : > { %1940 = vmatpush1.msra.mxu1 %v722_v38  ;;  %1870 = vmatprep.subr.mxu0 %v657_v39  ;;  %v755_v38 = vld [vmem:[%s3550_s12 + $0xbc8] sm:$0xff]  ;;  %v690_v39 = vld [vmem:[%s3550_s12 + $0x9c0] sm:$0xff] }
  0xff   : > { %1941 = vmatprep.subr.mxu1 %v721_v40  ;;  %1871 = vmatpush1.msra.mxu0 %v656_v41  ;;  %v754_v40 = vld [vmem:[%s3550_s12 + $0xbc0] sm:$0xff]  ;;  %v689_v41 = vld [vmem:[%s3550_s12 + $0x9b8] sm:$0xff] }
 0x100   : > { %1942 = vmatpush1.msra.mxu1 %v720_v42  ;;  %1872 = vmatprep.subr.mxu0 %v655_v44  ;;  %v753_v42 = vld [vmem:[%s3550_s12 + $0xbb8] sm:$0xff]  ;;  %v688_v44 = vld [vmem:[%s3550_s12 + $0x9b0] sm:$0xff] }
 0x101   : > { %1943 = vmatprep.subr.mxu1 %v719_v45  ;;  %1873 = vmatpush1.msra.mxu0 %v654_v46  ;;  %v752_v45 = vld [vmem:[%s3550_s12 + $0xbb0] sm:$0xff]  ;;  %v687_v46 = vld [vmem:[%s3550_s12 + $0x9a8] sm:$0xff] }
 0x102   : > { %1944 = vmatpush1.msra.mxu1 %v718_v47  ;;  %1874 = vmatprep.subr.mxu0 %v653_v48  ;;  %v751_v47 = vld [vmem:[%s3550_s12 + $0xba8] sm:$0xff]  ;;  %v686_v48 = vld [vmem:[%s3550_s12 + $0x9a0] sm:$0xff] }
 0x103   : > { %1945 = vmatprep.subr.mxu1 %v717_v49  ;;  %1875 = vmatpush1.msra.mxu0 %v652_v50  ;;  %v750_v49 = vld [vmem:[%s3550_s12 + $0xba0] sm:$0xff]  ;;  %v685_v50 = vld [vmem:[%s3550_s12 + $0x998] sm:$0xff] }
 0x104   : > { %1946 = vmatpush1.msra.mxu1 %v716_v51  ;;  %1876 = vmatprep.subr.mxu0 %v651_v52  ;;  %v749_v51 = vld [vmem:[%s3550_s12 + $0xb98] sm:$0xff]  ;;  %v684_v52 = vld [vmem:[%s3550_s12 + $0x990] sm:$0xff] }
 0x105   : > { %1947 = vmatprep.subr.mxu1 %v715_v54  ;;  %1877 = vmatpush1.msra.mxu0 %v650_v55  ;;  %v748_v54 = vld [vmem:[%s3550_s12 + $0xb90] sm:$0xff]  ;;  %v683_v55 = vld [vmem:[%s3550_s12 + $0x988] sm:$0xff] }
 0x106   : > { %1948 = vmatpush1.msra.mxu1 %v714_v56  ;;  %1878 = vmatprep.subr.mxu0 %v649_v57  ;;  %v747_v56 = vld [vmem:[%s3550_s12 + $0xb88] sm:$0xff]  ;;  %v682_v57 = vld [vmem:[%s3550_s12 + $0x980] sm:$0xff] }
 0x107   : > { %1949 = vmatprep.subr.mxu1 %v713_v58  ;;  %1879 = vmatpush1.msra.mxu0 %v648_v59  ;;  %v746_v58 = vld [vmem:[%s3550_s12 + $0xb80] sm:$0xff]  ;;  %v681_v59 = vld [vmem:[%s3550_s12 + $0x978] sm:$0xff] }
 0x108   : > { %1950 = vmatpush1.msra.mxu1 %v712_v60  ;;  %1880 = vmatprep.subr.mxu0 %v647_v61  ;;  %v745_v60 = vld [vmem:[%s3550_s12 + $0xb78] sm:$0xff]  ;;  %v680_v61 = vld [vmem:[%s3550_s12 + $0x970] sm:$0xff] }
 0x109   : > { %1951 = vmatprep.subr.mxu1 %v711_v62  ;;  %1881 = vmatpush1.msra.mxu0 %v646_v63  ;;  %v744_v62 = vld [vmem:[%s3550_s12 + $0xb70] sm:$0xff]  ;;  %v679_v63 = vld [vmem:[%s3550_s12 + $0x968] sm:$0xff] }
 0x10a   : > { %1952 = vmatpush1.msra.mxu1 %v710_v0  ;;  %1882 = vmatprep.subr.mxu0 %v645_v1  ;;  %v743_v0 = vld [vmem:[%s3550_s12 + $0xb68] sm:$0xff]  ;;  %v678_v1 = vld [vmem:[%s3550_s12 + $0x960] sm:$0xff] }
 0x10b   : > { %1953 = vmatprep.subr.mxu1 %v709_v2  ;;  %1883 = vmatpush1.msra.mxu0 %v644_v3  ;;  %v742_v2 = vld [vmem:[%s3550_s12 + $0xb60] sm:$0xff]  ;;  %v677_v3 = vld [vmem:[%s3550_s12 + $0x958] sm:$0xff] }
 0x10c   : > { %1954 = vmatpush1.msra.mxu1 %v708_v4  ;;  %1884 = vmatprep.subr.mxu0 %v643_v5  ;;  %v741_v4 = vld [vmem:[%s3550_s12 + $0xb58] sm:$0xff]  ;;  %v676_v5 = vld [vmem:[%s3550_s12 + $0x950] sm:$0xff] }
 0x10d   : > { %1955 = vmatprep.subr.mxu1 %v707_v6  ;;  %1885 = vmatpush1.msra.mxu0 %v642_v7  ;;  %v740_v6 = vld [vmem:[%s3550_s12 + $0xb50] sm:$0xff] }
 0x10e   : > { %1956 = vmatpush1.msra.mxu1 %v706_v8  ;;  %1886 = vmatprep.subr.mxu0 %v641_v9  ;;  %v372_v7 = vld [vmem:[%s3572_s29 + $0x10] sm:$0xff]  ;;  %v675_v8 = vld [vmem:[%s3550_s12 + $0x948] sm:$0xff] }
 0x10f   : > { %1957 = vmatprep.subr.mxu1 %v705_v10  ;;  %1887 = vmatpush1.msra.mxu0 %v640_v11  ;;  %v739_v9 = vld [vmem:[%s3550_s12 + $0xb48] sm:$0xff]  ;;  %v674_v10 = vld [vmem:[%s3550_s12 + $0x940] sm:$0xff] }
 0x110   : > { %1958 = vmatpush1.msra.mxu1 %v704_v12  ;;  %1888 = vmatprep.subr.mxu0 %v639_v13  ;;  %v738_v11 = vld [vmem:[%s3550_s12 + $0xb40] sm:$0xff]  ;;  %v673_v12 = vld [vmem:[%s3550_s12 + $0x938] sm:$0xff] }
 0x111   : > { %1959 = vmatprep.subr.mxu1 %v703_v14  ;;  %1889 = vmatpush1.msra.mxu0 %v638_v15  ;;  %v737_v13 = vld [vmem:[%s3550_s12 + $0xb38] sm:$0xff]  ;;  %v1444_v14 = vcombine.high %v372_v7, %v372_v7  ;;  %v672_v15 = vld [vmem:[%s3550_s12 + $0x930] sm:$0xff] }
 0x112   : > { %1960 = vmatpush1.msra.mxu1 %v702_v16  ;;  %1890 = vmatprep.subr.mxu0 %v637_v17  ;;  %v736_v16 = vld [vmem:[%s3550_s12 + $0xb30] sm:$0xff]  ;;  %v671_v17 = vld [vmem:[%s3550_s12 + $0x928] sm:$0xff] }
 0x113   : > { %1961 = vmatprep.subr.mxu1 %v701_v18  ;;  %1891 = vmatpush1.msra.mxu0 %v636_v19  ;;  %v735_v18 = vld [vmem:[%s3550_s12 + $0xb28] sm:$0xff]  ;;  %v1451_v19 = vrot.slane %v372_v7, %v3696_v53 }
 0x114   : > { %1962 = vmatpush1.msra.mxu1 %v700_v20  ;;  %1892 = vmatprep.subr.mxu0 %v635_v21  ;;  %v670_v20 = vld [vmem:[%s3550_s12 + $0x920] sm:$0xff]  ;;  %v775_v7 = vld [vmem:[%s3550_s12 + $0xc68] sm:$0xff] }
 0x115   : > { %1963 = vmatprep.subr.mxu1 %v699_v22  ;;  %1893 = vmatpush1.msra.mxu0 %v634_v23  ;;  %v734_v21 = vld [vmem:[%s3550_s12 + $0xb20] sm:$0xff]  ;;  %v669_v22 = vld [vmem:[%s3550_s12 + $0x918] sm:$0xff] }
 0x116   : > { %1964 = vmatpush1.msra.mxu1 %v698_v24  ;;  %1894 = vmatprep.subr.mxu0 %v697_v25  ;;  %v733_v23 = vld [vmem:[%s3550_s12 + $0xb18] sm:$0xff]  ;;  %v1458_v24 = vrot.slane %v1444_v14, %v3696_v53  ;;  %v668_v25 = vld [vmem:[%s3550_s12 + $0x910] sm:$0xff] }
 0x117   : > { %1965 = vmatprep.subr.mxu1 %v761_v26  ;;  %1895 = vmatpush2.msra.mxu0 %v696_v27  ;;  %v732_v26 = vld [vmem:[%s3550_s12 + $0xb10] sm:$0xff]  ;;  %v667_v27 = vld [vmem:[%s3550_s12 + $0x908] sm:$0xff] }
 0x118   : > { %1966 = vmatpush2.msra.mxu1 %v760_v28  ;;  %1896 = vmatprep.subr.mxu0 %v695_v29  ;;  %v731_v28 = vld [vmem:[%s3550_s12 + $0xb08] sm:$0xff]  ;;  %v1459_v29 = vcombine.high %v1451_v19, %v1451_v19  ;;  %v836_v14 = vld [vmem:[%s3550_s12 + $0xe50] sm:$0xff] }
 0x119   : > { %1967 = vmatprep.subr.mxu1 %v759_v30  ;;  %1897 = vmatpush2.msra.mxu0 %v694_v31  ;;  %v666_v30 = vld [vmem:[%s3550_s12 + $0x900] sm:$0xff] }
 0x11a   : > { %1968 = vmatpush2.msra.mxu1 %v758_v32  ;;  %1898 = vmatprep.subr.mxu0 %v693_v33  ;;  %v730_v31 = vld [vmem:[%s3550_s12 + $0xb00] sm:$0xff]  ;;  %v1460_v32 = vcombine.high %v1458_v24, %v1458_v24  ;;  %v793_v33 = vld [vmem:[%s3550_s12 + $0xcf8] sm:$0xff] }
 0x11b   : > { %1969 = vmatprep.subr.mxu1 %v757_v34  ;;  %1899 = vmatpush2.msra.mxu0 %v692_v35  ;;  %v857_v34 = vld [vmem:[%s3550_s12 + $0xef8] sm:$0xff]  ;;  %v792_v35 = vld [vmem:[%s3550_s12 + $0xcf0] sm:$0xff] }
 0x11c   : > { %1970 = vmatpush2.msra.mxu1 %v756_v36  ;;  %1900 = vmatprep.subr.mxu0 %v691_v37  ;;  %v856_v36 = vld [vmem:[%s3550_s12 + $0xef0] sm:$0xff]  ;;  %v791_v37 = vld [vmem:[%s3550_s12 + $0xce8] sm:$0xff] }
 0x11d   : > { %1971 = vmatprep.subr.mxu1 %v755_v38  ;;  %1901 = vmatpush2.msra.mxu0 %v690_v39  ;;  %v855_v38 = vld [vmem:[%s3550_s12 + $0xee8] sm:$0xff]  ;;  %v790_v39 = vld [vmem:[%s3550_s12 + $0xce0] sm:$0xff] }
 0x11e   : > { %1972 = vmatpush2.msra.mxu1 %v754_v40  ;;  %1902 = vmatprep.subr.mxu0 %v689_v41  ;;  %v854_v40 = vld [vmem:[%s3550_s12 + $0xee0] sm:$0xff]  ;;  %v789_v41 = vld [vmem:[%s3550_s12 + $0xcd8] sm:$0xff] }
 0x11f   : > { %1973 = vmatprep.subr.mxu1 %v753_v42  ;;  %1903 = vmatpush2.msra.mxu0 %v688_v44  ;;  %v853_v42 = vld [vmem:[%s3550_s12 + $0xed8] sm:$0xff]  ;;  %v788_v44 = vld [vmem:[%s3550_s12 + $0xcd0] sm:$0xff] }
 0x120   : > { %1974 = vmatpush2.msra.mxu1 %v752_v45  ;;  %1904 = vmatprep.subr.mxu0 %v687_v46  ;;  %v852_v45 = vld [vmem:[%s3550_s12 + $0xed0] sm:$0xff]  ;;  %v787_v46 = vld [vmem:[%s3550_s12 + $0xcc8] sm:$0xff] }
 0x121   : > { %1975 = vmatprep.subr.mxu1 %v751_v47  ;;  %1905 = vmatpush2.msra.mxu0 %v686_v48  ;;  %v851_v47 = vld [vmem:[%s3550_s12 + $0xec8] sm:$0xff]  ;;  %v786_v48 = vld [vmem:[%s3550_s12 + $0xcc0] sm:$0xff] }
 0x122   : > { %1976 = vmatpush2.msra.mxu1 %v750_v49  ;;  %1906 = vmatprep.subr.mxu0 %v685_v50  ;;  %v850_v49 = vld [vmem:[%s3550_s12 + $0xec0] sm:$0xff]  ;;  %v785_v50 = vld [vmem:[%s3550_s12 + $0xcb8] sm:$0xff] }
 0x123   : > { %1977 = vmatprep.subr.mxu1 %v749_v51  ;;  %1907 = vmatpush2.msra.mxu0 %v684_v52  ;;  %v849_v51 = vld [vmem:[%s3550_s12 + $0xeb8] sm:$0xff]  ;;  %v784_v52 = vld [vmem:[%s3550_s12 + $0xcb0] sm:$0xff] }
 0x124   : > { %1978 = vmatpush2.msra.mxu1 %v748_v54  ;;  %1908 = vmatprep.subr.mxu0 %v683_v55  ;;  %v848_v54 = vld [vmem:[%s3550_s12 + $0xeb0] sm:$0xff]  ;;  %v783_v55 = vld [vmem:[%s3550_s12 + $0xca8] sm:$0xff] }
 0x125   : > { %1979 = vmatprep.subr.mxu1 %v747_v56  ;;  %1909 = vmatpush2.msra.mxu0 %v682_v57  ;;  %v847_v56 = vld [vmem:[%s3550_s12 + $0xea8] sm:$0xff]  ;;  %v782_v57 = vld [vmem:[%s3550_s12 + $0xca0] sm:$0xff] }
 0x126   : > { %1980 = vmatpush2.msra.mxu1 %v746_v58  ;;  %1910 = vmatprep.subr.mxu0 %v681_v59  ;;  %v846_v58 = vld [vmem:[%s3550_s12 + $0xea0] sm:$0xff]  ;;  %v781_v59 = vld [vmem:[%s3550_s12 + $0xc98] sm:$0xff] }
 0x127   : > { %1981 = vmatprep.subr.mxu1 %v745_v60  ;;  %1911 = vmatpush2.msra.mxu0 %v680_v61  ;;  %v845_v60 = vld [vmem:[%s3550_s12 + $0xe98] sm:$0xff]  ;;  %v780_v61 = vld [vmem:[%s3550_s12 + $0xc90] sm:$0xff] }
 0x128   : > { %1982 = vmatpush2.msra.mxu1 %v744_v62  ;;  %1912 = vmatprep.subr.mxu0 %v679_v63  ;;  %v844_v62 = vld [vmem:[%s3550_s12 + $0xe90] sm:$0xff]  ;;  %v779_v63 = vld [vmem:[%s3550_s12 + $0xc88] sm:$0xff] }
 0x129   : > { %1983 = vmatprep.subr.mxu1 %v743_v0  ;;  %1913 = vmatpush2.msra.mxu0 %v678_v1  ;;  %v843_v0 = vld [vmem:[%s3550_s12 + $0xe88] sm:$0xff]  ;;  %v778_v1 = vld [vmem:[%s3550_s12 + $0xc80] sm:$0xff] }
 0x12a   : > { %1984 = vmatpush2.msra.mxu1 %v742_v2  ;;  %1914 = vmatprep.subr.mxu0 %v677_v3  ;;  %v842_v2 = vld [vmem:[%s3550_s12 + $0xe80] sm:$0xff]  ;;  %v777_v3 = vld [vmem:[%s3550_s12 + $0xc78] sm:$0xff] }
 0x12b   : > { %1985 = vmatprep.subr.mxu1 %v741_v4  ;;  %1915 = vmatpush2.msra.mxu0 %v676_v5  ;;  %v841_v4 = vld [vmem:[%s3550_s12 + $0xe78] sm:$0xff]  ;;  %v776_v5 = vld [vmem:[%s3550_s12 + $0xc70] sm:$0xff] }
 0x12c   : > { %1986 = vmatpush2.msra.mxu1 %v740_v6  ;;  %1916 = vmatprep.subr.mxu0 %v675_v8  ;;  %v840_v6 = vld [vmem:[%s3550_s12 + $0xe70] sm:$0xff]  ;;  %v839_v8 = vld [vmem:[%s3550_s12 + $0xe68] sm:$0xff] }
 0x12d   : > { %1987 = vmatprep.subr.mxu1 %v739_v9  ;;  %1917 = vmatpush2.msra.mxu0 %v674_v10  ;;  %v774_v9 = vld [vmem:[%s3550_s12 + $0xc60] sm:$0xff] }
 0x12e   : > { %1988 = vmatpush2.msra.mxu1 %v738_v11  ;;  %1918 = vmatprep.subr.mxu0 %v673_v12  ;;  %v838_v10 = vld [vmem:[%s3550_s12 + $0xe60] sm:$0xff]  ;;  %v773_v11 = vld [vmem:[%s3550_s12 + $0xc58] sm:$0xff] }
 0x12f   : > { %1989 = vmatprep.subr.mxu1 %v737_v13  ;;  %1919 = vmatpush2.msra.mxu0 %v672_v15  ;;  %v837_v12 = vld [vmem:[%s3550_s12 + $0xe58] sm:$0xff]  ;;  %v772_v13 = vld [vmem:[%s3550_s12 + $0xc50] sm:$0xff]  ;;  %v771_v15 = vld [vmem:[%s3550_s12 + $0xc48] sm:$0xff] }
 0x130   : > { %1990 = vmatpush2.msra.mxu1 %v736_v16  ;;  %1920 = vmatprep.subr.mxu0 %v671_v17  ;;  %v835_v16 = vld [vmem:[%s3550_s12 + $0xe48] sm:$0xff]  ;;  %v770_v17 = vld [vmem:[%s3550_s12 + $0xc40] sm:$0xff] }
 0x131   : > { %1991 = vmatprep.subr.mxu1 %v735_v18  ;;  %1921 = vmatpush2.msra.mxu0 %v670_v20  ;;  %v834_v18 = vld [vmem:[%s3550_s12 + $0xe40] sm:$0xff]  ;;  %v833_v20 = vld [vmem:[%s3550_s12 + $0xe38] sm:$0xff] }
 0x132   : > { %1992 = vmatpush2.msra.mxu1 %v734_v21  ;;  %1922 = vmatprep.subr.mxu0 %v669_v22  ;;  %v768_v21 = vld [vmem:[%s3550_s12 + $0xc30] sm:$0xff] }
 0x133   : > { %1993 = vmatprep.subr.mxu1 %v733_v23  ;;  %1923 = vmatpush2.msra.mxu0 %v668_v25  ;;  %v832_v22 = vld [vmem:[%s3550_s12 + $0xe30] sm:$0xff]  ;;  %v767_v23 = vld [vmem:[%s3550_s12 + $0xc28] sm:$0xff]  ;;  %v766_v25 = vld [vmem:[%s3550_s12 + $0xc20] sm:$0xff] }
 0x134   : > { %1994 = vmatpush2.msra.mxu1 %v732_v26  ;;  %1924 = vmatprep.subr.mxu0 %v667_v27  ;;  %v830_v26 = vld [vmem:[%s3550_s12 + $0xe20] sm:$0xff]  ;;  %v765_v27 = vld [vmem:[%s3550_s12 + $0xc18] sm:$0xff] }
 0x135   : > { %1995 = vmatprep.subr.mxu1 %v731_v28  ;;  %1925 = vmatpush2.msra.mxu0 %v666_v30  ;;  %v829_v28 = vld [vmem:[%s3550_s12 + $0xe18] sm:$0xff]  ;;  %v828_v30 = vld [vmem:[%s3550_s12 + $0xe10] sm:$0xff] }
 0x136   : > { %1926 = vmatprep.mubr.f32.mxu0 %v1459_v29  ;;  %1996 = vmatpush2.msra.mxu1 %v730_v31  ;;  %v764_v29 = vld [vmem:[%s3550_s12 + $0xc10] sm:$0xff]  ;;  %v763_v31 = vld [vmem:[%s3550_s12 + $0xc08] sm:$0xff] }
 0x137   : > { %1927 = vmatmul.mubr.f32.vlgmr.msra.gmra.mxu0 %v1451_v19  ;;  %1997 = vmatprep.mubr.f32.mxu1 %v1460_v32  ;;  %v769_v19 = vld [vmem:[%s3550_s12 + $0xc38] sm:$0xff]  ;;  %v827_v32 = vld [vmem:[%s3550_s12 + $0xe08] sm:$0xff] }
 0x138   : > { %2004 = vmatprep.subr.mxu0 %v793_v33  ;;  %2075 = vmatprep.subr.mxu1 %v857_v34  ;;  %v762_v33 = vld [vmem:[%s3550_s12 + $0xc00] sm:$0xff] }
 0x139   : > { %1998 = vmatmul.mubr.f32.vlgmr.msra.gmra.mxu1 %v1458_v24  ;;  %2005 = vmatpush1.msra.mxu0 %v792_v35  ;;  %v831_v24 = vld [vmem:[%s3550_s12 + $0xe28] sm:$0xff]  ;;  %v826_v34 = vld [vmem:[%s3550_s12 + $0xe00] sm:$0xff]  ;;  %v825_v35 = vld [vmem:[%s3550_s12 + $0xdf8] sm:$0xff] }
 0x13a   : > { %2076 = vmatpush1.msra.mxu1 %v856_v36  ;;  %2006 = vmatprep.subr.mxu0 %v791_v37  ;;  %v889_v36 = vld [vmem:[%s3550_s12 + $0xff8] sm:$0xff]  ;;  %v824_v37 = vld [vmem:[%s3550_s12 + $0xdf0] sm:$0xff] }
 0x13b   : > { %2077 = vmatprep.subr.mxu1 %v855_v38  ;;  %2007 = vmatpush1.msra.mxu0 %v790_v39  ;;  %v888_v38 = vld [vmem:[%s3550_s12 + $0xff0] sm:$0xff]  ;;  %v823_v39 = vld [vmem:[%s3550_s12 + $0xde8] sm:$0xff] }
 0x13c   : > { %2078 = vmatpush1.msra.mxu1 %v854_v40  ;;  %2008 = vmatprep.subr.mxu0 %v789_v41  ;;  %v887_v40 = vld [vmem:[%s3550_s12 + $0xfe8] sm:$0xff]  ;;  %v822_v41 = vld [vmem:[%s3550_s12 + $0xde0] sm:$0xff] }
 0x13d   : > { %2079 = vmatprep.subr.mxu1 %v853_v42  ;;  %2009 = vmatpush1.msra.mxu0 %v788_v44  ;;  %v886_v42 = vld [vmem:[%s3550_s12 + $0xfe0] sm:$0xff]  ;;  %v821_v44 = vld [vmem:[%s3550_s12 + $0xdd8] sm:$0xff] }
 0x13e   : > { %2080 = vmatpush1.msra.mxu1 %v852_v45  ;;  %2010 = vmatprep.subr.mxu0 %v787_v46  ;;  %v885_v45 = vld [vmem:[%s3550_s12 + $0xfd8] sm:$0xff]  ;;  %v820_v46 = vld [vmem:[%s3550_s12 + $0xdd0] sm:$0xff] }
 0x13f   : > { %2081 = vmatprep.subr.mxu1 %v851_v47  ;;  %2011 = vmatpush1.msra.mxu0 %v786_v48  ;;  %v884_v47 = vld [vmem:[%s3550_s12 + $0xfd0] sm:$0xff]  ;;  %v819_v48 = vld [vmem:[%s3550_s12 + $0xdc8] sm:$0xff] }
 0x140   : > { %2082 = vmatpush1.msra.mxu1 %v850_v49  ;;  %2012 = vmatprep.subr.mxu0 %v785_v50  ;;  %v883_v49 = vld [vmem:[%s3550_s12 + $0xfc8] sm:$0xff]  ;;  %v818_v50 = vld [vmem:[%s3550_s12 + $0xdc0] sm:$0xff] }
 0x141   : > { %2083 = vmatprep.subr.mxu1 %v849_v51  ;;  %2013 = vmatpush1.msra.mxu0 %v784_v52  ;;  %v882_v51 = vld [vmem:[%s3550_s12 + $0xfc0] sm:$0xff]  ;;  %v817_v52 = vld [vmem:[%s3550_s12 + $0xdb8] sm:$0xff] }
 0x142   : > { %2084 = vmatpush1.msra.mxu1 %v848_v54  ;;  %2014 = vmatprep.subr.mxu0 %v783_v55  ;;  %v881_v54 = vld [vmem:[%s3550_s12 + $0xfb8] sm:$0xff]  ;;  %v816_v55 = vld [vmem:[%s3550_s12 + $0xdb0] sm:$0xff] }
 0x143   : > { %2085 = vmatprep.subr.mxu1 %v847_v56  ;;  %2015 = vmatpush1.msra.mxu0 %v782_v57  ;;  %v880_v56 = vld [vmem:[%s3550_s12 + $0xfb0] sm:$0xff]  ;;  %v815_v57 = vld [vmem:[%s3550_s12 + $0xda8] sm:$0xff] }
 0x144   : > { %2086 = vmatpush1.msra.mxu1 %v846_v58  ;;  %2016 = vmatprep.subr.mxu0 %v781_v59  ;;  %v879_v58 = vld [vmem:[%s3550_s12 + $0xfa8] sm:$0xff]  ;;  %v814_v59 = vld [vmem:[%s3550_s12 + $0xda0] sm:$0xff] }
 0x145   : > { %2087 = vmatprep.subr.mxu1 %v845_v60  ;;  %2017 = vmatpush1.msra.mxu0 %v780_v61  ;;  %v878_v60 = vld [vmem:[%s3550_s12 + $0xfa0] sm:$0xff]  ;;  %v813_v61 = vld [vmem:[%s3550_s12 + $0xd98] sm:$0xff] }
 0x146   : > { %2088 = vmatpush1.msra.mxu1 %v844_v62  ;;  %2018 = vmatprep.subr.mxu0 %v779_v63  ;;  %v877_v62 = vld [vmem:[%s3550_s12 + $0xf98] sm:$0xff]  ;;  %v812_v63 = vld [vmem:[%s3550_s12 + $0xd90] sm:$0xff] }
 0x147   : > { %2089 = vmatprep.subr.mxu1 %v843_v0  ;;  %2019 = vmatpush1.msra.mxu0 %v778_v1  ;;  %v876_v0 = vld [vmem:[%s3550_s12 + $0xf90] sm:$0xff]  ;;  %v811_v1 = vld [vmem:[%s3550_s12 + $0xd88] sm:$0xff] }
 0x148   : > { %2090 = vmatpush1.msra.mxu1 %v842_v2  ;;  %2020 = vmatprep.subr.mxu0 %v777_v3  ;;  %v875_v2 = vld [vmem:[%s3550_s12 + $0xf88] sm:$0xff]  ;;  %v810_v3 = vld [vmem:[%s3550_s12 + $0xd80] sm:$0xff] }
 0x149   : > { %2091 = vmatprep.subr.mxu1 %v841_v4  ;;  %2021 = vmatpush1.msra.mxu0 %v776_v5  ;;  %v874_v4 = vld [vmem:[%s3550_s12 + $0xf80] sm:$0xff]  ;;  %v809_v5 = vld [vmem:[%s3550_s12 + $0xd78] sm:$0xff] }
 0x14a   : > { %2092 = vmatpush1.msra.mxu1 %v840_v6  ;;  %2022 = vmatprep.subr.mxu0 %v775_v7  ;;  %v873_v6 = vld [vmem:[%s3550_s12 + $0xf78] sm:$0xff]  ;;  %v808_v7 = vld [vmem:[%s3550_s12 + $0xd70] sm:$0xff] }
 0x14b   : > { %2093 = vmatprep.subr.mxu1 %v839_v8  ;;  %2023 = vmatpush1.msra.mxu0 %v774_v9  ;;  %v872_v8 = vld [vmem:[%s3550_s12 + $0xf70] sm:$0xff]  ;;  %v807_v9 = vld [vmem:[%s3550_s12 + $0xd68] sm:$0xff] }
 0x14c   : > { %2094 = vmatpush1.msra.mxu1 %v838_v10  ;;  %2024 = vmatprep.subr.mxu0 %v773_v11  ;;  %v871_v10 = vld [vmem:[%s3550_s12 + $0xf68] sm:$0xff]  ;;  %v806_v11 = vld [vmem:[%s3550_s12 + $0xd60] sm:$0xff] }
 0x14d   : > { %2095 = vmatprep.subr.mxu1 %v837_v12  ;;  %2025 = vmatpush1.msra.mxu0 %v772_v13  ;;  %v870_v12 = vld [vmem:[%s3550_s12 + $0xf60] sm:$0xff]  ;;  %v805_v13 = vld [vmem:[%s3550_s12 + $0xd58] sm:$0xff] }
 0x14e   : > { %2096 = vmatpush1.msra.mxu1 %v836_v14  ;;  %2026 = vmatprep.subr.mxu0 %v771_v15  ;;  %v869_v14 = vld [vmem:[%s3550_s12 + $0xf58] sm:$0xff]  ;;  %v804_v15 = vld [vmem:[%s3550_s12 + $0xd50] sm:$0xff] }
 0x14f   : > { %2097 = vmatprep.subr.mxu1 %v835_v16  ;;  %2027 = vmatpush1.msra.mxu0 %v770_v17  ;;  %v868_v16 = vld [vmem:[%s3550_s12 + $0xf50] sm:$0xff]  ;;  %v373_v17 = vld [vmem:[%s3572_s29 + $0x18] sm:$0xff] }
 0x150   : > { %2098 = vmatpush1.msra.mxu1 %v834_v18  ;;  %2028 = vmatprep.subr.mxu0 %v769_v19  ;;  %v803_v18 = vld [vmem:[%s3550_s12 + $0xd48] sm:$0xff] }
 0x151   : > { %2099 = vmatprep.subr.mxu1 %v833_v20  ;;  %2029 = vmatpush1.msra.mxu0 %v768_v21  ;;  %v867_v19 = vld [vmem:[%s3550_s12 + $0xf48] sm:$0xff]  ;;  %v802_v20 = vld [vmem:[%s3550_s12 + $0xd40] sm:$0xff] }
 0x152   : > { %2100 = vmatpush1.msra.mxu1 %v832_v22  ;;  %2030 = vmatprep.subr.mxu0 %v767_v23  ;;  %v866_v21 = vld [vmem:[%s3550_s12 + $0xf40] sm:$0xff]  ;;  %v801_v22 = vld [vmem:[%s3550_s12 + $0xd38] sm:$0xff] }
 0x153   : > { %2101 = vmatprep.subr.mxu1 %v831_v24  ;;  %2031 = vmatpush1.msra.mxu0 %v766_v25  ;;  %v865_v23 = vld [vmem:[%s3550_s12 + $0xf38] sm:$0xff]  ;;  %v1461_v24 = vcombine.high %v373_v17, %v373_v17  ;;  %v800_v25 = vld [vmem:[%s3550_s12 + $0xd30] sm:$0xff] }
 0x154   : > { %2102 = vmatpush1.msra.mxu1 %v830_v26  ;;  %2032 = vmatprep.subr.mxu0 %v765_v27  ;;  %v864_v26 = vld [vmem:[%s3550_s12 + $0xf30] sm:$0xff]  ;;  %v799_v27 = vld [vmem:[%s3550_s12 + $0xd28] sm:$0xff] }
 0x155   : > { %2103 = vmatprep.subr.mxu1 %v829_v28  ;;  %2033 = vmatpush1.msra.mxu0 %v764_v29  ;;  %v863_v28 = vld [vmem:[%s3550_s12 + $0xf28] sm:$0xff]  ;;  %v1468_v29 = vrot.slane %v373_v17, %v3696_v53 }
 0x156   : > { %2104 = vmatpush1.msra.mxu1 %v828_v30  ;;  %2034 = vmatprep.subr.mxu0 %v763_v31  ;;  %v798_v30 = vld [vmem:[%s3550_s12 + $0xd20] sm:$0xff]  ;;  %v903_v17 = vld [vmem:[%s3550_s12 + $0x1068] sm:$0xff] }
 0x157   : > { %2105 = vmatprep.subr.mxu1 %v827_v32  ;;  %2035 = vmatpush1.msra.mxu0 %v762_v33  ;;  %v862_v31 = vld [vmem:[%s3550_s12 + $0xf20] sm:$0xff]  ;;  %v797_v32 = vld [vmem:[%s3550_s12 + $0xd18] sm:$0xff] }
 0x158   : > { %2106 = vmatpush1.msra.mxu1 %v826_v34  ;;  %2036 = vmatprep.subr.mxu0 %v825_v35  ;;  %v861_v33 = vld [vmem:[%s3550_s12 + $0xf18] sm:$0xff]  ;;  %v1475_v34 = vrot.slane %v1461_v24, %v3696_v53  ;;  %v796_v35 = vld [vmem:[%s3550_s12 + $0xd10] sm:$0xff] }
 0x159   : > { %2107 = vmatprep.subr.mxu1 %v889_v36  ;;  %2037 = vmatpush2.msra.mxu0 %v824_v37  ;;  %v860_v36 = vld [vmem:[%s3550_s12 + $0xf10] sm:$0xff]  ;;  %v795_v37 = vld [vmem:[%s3550_s12 + $0xd08] sm:$0xff] }
 0x15a   : > { %2108 = vmatpush2.msra.mxu1 %v888_v38  ;;  %2038 = vmatprep.subr.mxu0 %v823_v39  ;;  %v859_v38 = vld [vmem:[%s3550_s12 + $0xf08] sm:$0xff]  ;;  %v1476_v39 = vcombine.high %v1468_v29, %v1468_v29  ;;  %v964_v24 = vld [vmem:[%s3550_s12 + $0x1250] sm:$0xff] }
 0x15b   : > { %2109 = vmatprep.subr.mxu1 %v887_v40  ;;  %2039 = vmatpush2.msra.mxu0 %v822_v41  ;;  %v794_v40 = vld [vmem:[%s3550_s12 + $0xd00] sm:$0xff] }
 0x15c   : > { %2110 = vmatpush2.msra.mxu1 %v886_v42  ;;  %2040 = vmatprep.subr.mxu0 %v821_v44  ;;  %v858_v41 = vld [vmem:[%s3550_s12 + $0xf00] sm:$0xff]  ;;  %v1477_v42 = vcombine.high %v1475_v34, %v1475_v34  ;;  %v921_v44 = vld [vmem:[%s3550_s12 + $0x10f8] sm:$0xff] }
 0x15d   : > { %2111 = vmatprep.subr.mxu1 %v885_v45  ;;  %2041 = vmatpush2.msra.mxu0 %v820_v46  ;;  %v985_v45 = vld [vmem:[%s3550_s12 + $0x12f8] sm:$0xff]  ;;  %v920_v46 = vld [vmem:[%s3550_s12 + $0x10f0] sm:$0xff] }
 0x15e   : > { %2112 = vmatpush2.msra.mxu1 %v884_v47  ;;  %2042 = vmatprep.subr.mxu0 %v819_v48  ;;  %v984_v47 = vld [vmem:[%s3550_s12 + $0x12f0] sm:$0xff]  ;;  %v919_v48 = vld [vmem:[%s3550_s12 + $0x10e8] sm:$0xff] }
 0x15f   : > { %2113 = vmatprep.subr.mxu1 %v883_v49  ;;  %2043 = vmatpush2.msra.mxu0 %v818_v50  ;;  %v983_v49 = vld [vmem:[%s3550_s12 + $0x12e8] sm:$0xff]  ;;  %v918_v50 = vld [vmem:[%s3550_s12 + $0x10e0] sm:$0xff] }
 0x160   : > { %2114 = vmatpush2.msra.mxu1 %v882_v51  ;;  %2044 = vmatprep.subr.mxu0 %v817_v52  ;;  %v982_v51 = vld [vmem:[%s3550_s12 + $0x12e0] sm:$0xff]  ;;  %v917_v52 = vld [vmem:[%s3550_s12 + $0x10d8] sm:$0xff] }
 0x161   : > { %2115 = vmatprep.subr.mxu1 %v881_v54  ;;  %2045 = vmatpush2.msra.mxu0 %v816_v55  ;;  %v981_v54 = vld [vmem:[%s3550_s12 + $0x12d8] sm:$0xff]  ;;  %v916_v55 = vld [vmem:[%s3550_s12 + $0x10d0] sm:$0xff] }
 0x162   : > { %2116 = vmatpush2.msra.mxu1 %v880_v56  ;;  %2046 = vmatprep.subr.mxu0 %v815_v57  ;;  %v980_v56 = vld [vmem:[%s3550_s12 + $0x12d0] sm:$0xff]  ;;  %v915_v57 = vld [vmem:[%s3550_s12 + $0x10c8] sm:$0xff] }
 0x163   : > { %2117 = vmatprep.subr.mxu1 %v879_v58  ;;  %2047 = vmatpush2.msra.mxu0 %v814_v59  ;;  %v979_v58 = vld [vmem:[%s3550_s12 + $0x12c8] sm:$0xff]  ;;  %v914_v59 = vld [vmem:[%s3550_s12 + $0x10c0] sm:$0xff] }
 0x164   : > { %2118 = vmatpush2.msra.mxu1 %v878_v60  ;;  %2048 = vmatprep.subr.mxu0 %v813_v61  ;;  %v978_v60 = vld [vmem:[%s3550_s12 + $0x12c0] sm:$0xff]  ;;  %v913_v61 = vld [vmem:[%s3550_s12 + $0x10b8] sm:$0xff] }
 0x165   : > { %2119 = vmatprep.subr.mxu1 %v877_v62  ;;  %2049 = vmatpush2.msra.mxu0 %v812_v63  ;;  %v977_v62 = vld [vmem:[%s3550_s12 + $0x12b8] sm:$0xff]  ;;  %v912_v63 = vld [vmem:[%s3550_s12 + $0x10b0] sm:$0xff] }
 0x166   : > { %2120 = vmatpush2.msra.mxu1 %v876_v0  ;;  %2050 = vmatprep.subr.mxu0 %v811_v1  ;;  %v976_v0 = vld [vmem:[%s3550_s12 + $0x12b0] sm:$0xff]  ;;  %v911_v1 = vld [vmem:[%s3550_s12 + $0x10a8] sm:$0xff] }
 0x167   : > { %2121 = vmatprep.subr.mxu1 %v875_v2  ;;  %2051 = vmatpush2.msra.mxu0 %v810_v3  ;;  %v975_v2 = vld [vmem:[%s3550_s12 + $0x12a8] sm:$0xff]  ;;  %v910_v3 = vld [vmem:[%s3550_s12 + $0x10a0] sm:$0xff] }
 0x168   : > { %2122 = vmatpush2.msra.mxu1 %v874_v4  ;;  %2052 = vmatprep.subr.mxu0 %v809_v5  ;;  %v974_v4 = vld [vmem:[%s3550_s12 + $0x12a0] sm:$0xff]  ;;  %v909_v5 = vld [vmem:[%s3550_s12 + $0x1098] sm:$0xff] }
 0x169   : > { %2123 = vmatprep.subr.mxu1 %v873_v6  ;;  %2053 = vmatpush2.msra.mxu0 %v808_v7  ;;  %v973_v6 = vld [vmem:[%s3550_s12 + $0x1298] sm:$0xff]  ;;  %v908_v7 = vld [vmem:[%s3550_s12 + $0x1090] sm:$0xff] }
 0x16a   : > { %2124 = vmatpush2.msra.mxu1 %v872_v8  ;;  %2054 = vmatprep.subr.mxu0 %v807_v9  ;;  %v972_v8 = vld [vmem:[%s3550_s12 + $0x1290] sm:$0xff]  ;;  %v907_v9 = vld [vmem:[%s3550_s12 + $0x1088] sm:$0xff] }
 0x16b   : > { %2125 = vmatprep.subr.mxu1 %v871_v10  ;;  %2055 = vmatpush2.msra.mxu0 %v806_v11  ;;  %v971_v10 = vld [vmem:[%s3550_s12 + $0x1288] sm:$0xff]  ;;  %v906_v11 = vld [vmem:[%s3550_s12 + $0x1080] sm:$0xff] }
 0x16c   : > { %2126 = vmatpush2.msra.mxu1 %v870_v12  ;;  %2056 = vmatprep.subr.mxu0 %v805_v13  ;;  %v970_v12 = vld [vmem:[%s3550_s12 + $0x1280] sm:$0xff]  ;;  %v905_v13 = vld [vmem:[%s3550_s12 + $0x1078] sm:$0xff] }
 0x16d   : > { %2127 = vmatprep.subr.mxu1 %v869_v14  ;;  %2057 = vmatpush2.msra.mxu0 %v804_v15  ;;  %v969_v14 = vld [vmem:[%s3550_s12 + $0x1278] sm:$0xff]  ;;  %v904_v15 = vld [vmem:[%s3550_s12 + $0x1070] sm:$0xff] }
 0x16e   : > { %2128 = vmatpush2.msra.mxu1 %v868_v16  ;;  %2058 = vmatprep.subr.mxu0 %v803_v18  ;;  %v968_v16 = vld [vmem:[%s3550_s12 + $0x1270] sm:$0xff]  ;;  %v967_v18 = vld [vmem:[%s3550_s12 + $0x1268] sm:$0xff] }
 0x16f   : > { %2129 = vmatprep.subr.mxu1 %v867_v19  ;;  %2059 = vmatpush2.msra.mxu0 %v802_v20  ;;  %v902_v19 = vld [vmem:[%s3550_s12 + $0x1060] sm:$0xff] }
 0x170   : > { %2130 = vmatpush2.msra.mxu1 %v866_v21  ;;  %2060 = vmatprep.subr.mxu0 %v801_v22  ;;  %v966_v20 = vld [vmem:[%s3550_s12 + $0x1260] sm:$0xff]  ;;  %v901_v21 = vld [vmem:[%s3550_s12 + $0x1058] sm:$0xff] }
 0x171   : > { %2131 = vmatprep.subr.mxu1 %v865_v23  ;;  %2061 = vmatpush2.msra.mxu0 %v800_v25  ;;  %v965_v22 = vld [vmem:[%s3550_s12 + $0x1258] sm:$0xff]  ;;  %v900_v23 = vld [vmem:[%s3550_s12 + $0x1050] sm:$0xff]  ;;  %v899_v25 = vld [vmem:[%s3550_s12 + $0x1048] sm:$0xff] }
 0x172   : > { %2132 = vmatpush2.msra.mxu1 %v864_v26  ;;  %2062 = vmatprep.subr.mxu0 %v799_v27  ;;  %v963_v26 = vld [vmem:[%s3550_s12 + $0x1248] sm:$0xff]  ;;  %v898_v27 = vld [vmem:[%s3550_s12 + $0x1040] sm:$0xff] }
 0x173   : > { %2133 = vmatprep.subr.mxu1 %v863_v28  ;;  %2063 = vmatpush2.msra.mxu0 %v798_v30  ;;  %v962_v28 = vld [vmem:[%s3550_s12 + $0x1240] sm:$0xff]  ;;  %v961_v30 = vld [vmem:[%s3550_s12 + $0x1238] sm:$0xff] }
 0x174   : > { %2134 = vmatpush2.msra.mxu1 %v862_v31  ;;  %2064 = vmatprep.subr.mxu0 %v797_v32  ;;  %v896_v31 = vld [vmem:[%s3550_s12 + $0x1030] sm:$0xff] }
 0x175   : > { %2135 = vmatprep.subr.mxu1 %v861_v33  ;;  %2065 = vmatpush2.msra.mxu0 %v796_v35  ;;  %v960_v32 = vld [vmem:[%s3550_s12 + $0x1230] sm:$0xff]  ;;  %v895_v33 = vld [vmem:[%s3550_s12 + $0x1028] sm:$0xff]  ;;  %v894_v35 = vld [vmem:[%s3550_s12 + $0x1020] sm:$0xff] }
 0x176   : > { %2136 = vmatpush2.msra.mxu1 %v860_v36  ;;  %2066 = vmatprep.subr.mxu0 %v795_v37  ;;  %v958_v36 = vld [vmem:[%s3550_s12 + $0x1220] sm:$0xff]  ;;  %v893_v37 = vld [vmem:[%s3550_s12 + $0x1018] sm:$0xff] }
 0x177   : > { %2137 = vmatprep.subr.mxu1 %v859_v38  ;;  %2067 = vmatpush2.msra.mxu0 %v794_v40  ;;  %v957_v38 = vld [vmem:[%s3550_s12 + $0x1218] sm:$0xff]  ;;  %v956_v40 = vld [vmem:[%s3550_s12 + $0x1210] sm:$0xff] }
 0x178   : > { %2068 = vmatprep.mubr.f32.mxu0 %v1476_v39  ;;  %2138 = vmatpush2.msra.mxu1 %v858_v41  ;;  %v892_v39 = vld [vmem:[%s3550_s12 + $0x1010] sm:$0xff]  ;;  %v891_v41 = vld [vmem:[%s3550_s12 + $0x1008] sm:$0xff] }
 0x179   : > { %2069 = vmatmul.mubr.f32.vlgmr.msra.gmra.mxu0 %v1468_v29  ;;  %2139 = vmatprep.mubr.f32.mxu1 %v1477_v42  ;;  %v897_v29 = vld [vmem:[%s3550_s12 + $0x1038] sm:$0xff]  ;;  %v955_v42 = vld [vmem:[%s3550_s12 + $0x1208] sm:$0xff] }
 0x17a   : > { %2146 = vmatprep.subr.mxu0 %v921_v44  ;;  %2217 = vmatprep.subr.mxu1 %v985_v45  ;;  %v890_v44 = vld [vmem:[%s3550_s12 + $0x1000] sm:$0xff] }
 0x17b   : > { %2140 = vmatmul.mubr.f32.vlgmr.msra.gmra.mxu1 %v1475_v34  ;;  %2147 = vmatpush1.msra.mxu0 %v920_v46  ;;  %v959_v34 = vld [vmem:[%s3550_s12 + $0x1228] sm:$0xff]  ;;  %v954_v45 = vld [vmem:[%s3550_s12 + $0x1200] sm:$0xff]  ;;  %v953_v46 = vld [vmem:[%s3550_s12 + $0x11f8] sm:$0xff] }
 0x17c   : > { %2218 = vmatpush1.msra.mxu1 %v984_v47  ;;  %2148 = vmatprep.subr.mxu0 %v919_v48  ;;  %v1017_v47 = vld [vmem:[%s3550_s12 + $0x13f8] sm:$0xff]  ;;  %v952_v48 = vld [vmem:[%s3550_s12 + $0x11f0] sm:$0xff] }
 0x17d   : > { %2219 = vmatprep.subr.mxu1 %v983_v49  ;;  %2149 = vmatpush1.msra.mxu0 %v918_v50  ;;  %v1016_v49 = vld [vmem:[%s3550_s12 + $0x13f0] sm:$0xff]  ;;  %v951_v50 = vld [vmem:[%s3550_s12 + $0x11e8] sm:$0xff] }
 0x17e   : > { %2220 = vmatpush1.msra.mxu1 %v982_v51  ;;  %2150 = vmatprep.subr.mxu0 %v917_v52  ;;  %v1015_v51 = vld [vmem:[%s3550_s12 + $0x13e8] sm:$0xff]  ;;  %v950_v52 = vld [vmem:[%s3550_s12 + $0x11e0] sm:$0xff] }
 0x17f   : > { %2221 = vmatprep.subr.mxu1 %v981_v54  ;;  %2151 = vmatpush1.msra.mxu0 %v916_v55  ;;  %v1014_v54 = vld [vmem:[%s3550_s12 + $0x13e0] sm:$0xff]  ;;  %v949_v55 = vld [vmem:[%s3550_s12 + $0x11d8] sm:$0xff] }
 0x180   : > { %2222 = vmatpush1.msra.mxu1 %v980_v56  ;;  %2152 = vmatprep.subr.mxu0 %v915_v57  ;;  %v1013_v56 = vld [vmem:[%s3550_s12 + $0x13d8] sm:$0xff]  ;;  %v948_v57 = vld [vmem:[%s3550_s12 + $0x11d0] sm:$0xff] }
 0x181   : > { %2223 = vmatprep.subr.mxu1 %v979_v58  ;;  %2153 = vmatpush1.msra.mxu0 %v914_v59  ;;  %v1012_v58 = vld [vmem:[%s3550_s12 + $0x13d0] sm:$0xff]  ;;  %v947_v59 = vld [vmem:[%s3550_s12 + $0x11c8] sm:$0xff] }
 0x182   : > { %2224 = vmatpush1.msra.mxu1 %v978_v60  ;;  %2154 = vmatprep.subr.mxu0 %v913_v61  ;;  %v1011_v60 = vld [vmem:[%s3550_s12 + $0x13c8] sm:$0xff]  ;;  %v946_v61 = vld [vmem:[%s3550_s12 + $0x11c0] sm:$0xff] }
 0x183   : > { %2225 = vmatprep.subr.mxu1 %v977_v62  ;;  %2155 = vmatpush1.msra.mxu0 %v912_v63  ;;  %v1010_v62 = vld [vmem:[%s3550_s12 + $0x13c0] sm:$0xff]  ;;  %v945_v63 = vld [vmem:[%s3550_s12 + $0x11b8] sm:$0xff] }
 0x184   : > { %2226 = vmatpush1.msra.mxu1 %v976_v0  ;;  %2156 = vmatprep.subr.mxu0 %v911_v1  ;;  %v1009_v0 = vld [vmem:[%s3550_s12 + $0x13b8] sm:$0xff]  ;;  %v944_v1 = vld [vmem:[%s3550_s12 + $0x11b0] sm:$0xff] }
 0x185   : > { %2227 = vmatprep.subr.mxu1 %v975_v2  ;;  %2157 = vmatpush1.msra.mxu0 %v910_v3  ;;  %v1008_v2 = vld [vmem:[%s3550_s12 + $0x13b0] sm:$0xff]  ;;  %v943_v3 = vld [vmem:[%s3550_s12 + $0x11a8] sm:$0xff] }
 0x186   : > { %2228 = vmatpush1.msra.mxu1 %v974_v4  ;;  %2158 = vmatprep.subr.mxu0 %v909_v5  ;;  %v1007_v4 = vld [vmem:[%s3550_s12 + $0x13a8] sm:$0xff]  ;;  %v942_v5 = vld [vmem:[%s3550_s12 + $0x11a0] sm:$0xff] }
 0x187   : > { %2229 = vmatprep.subr.mxu1 %v973_v6  ;;  %2159 = vmatpush1.msra.mxu0 %v908_v7  ;;  %v1006_v6 = vld [vmem:[%s3550_s12 + $0x13a0] sm:$0xff]  ;;  %v941_v7 = vld [vmem:[%s3550_s12 + $0x1198] sm:$0xff] }
 0x188   : > { %2230 = vmatpush1.msra.mxu1 %v972_v8  ;;  %2160 = vmatprep.subr.mxu0 %v907_v9  ;;  %v1005_v8 = vld [vmem:[%s3550_s12 + $0x1398] sm:$0xff]  ;;  %v940_v9 = vld [vmem:[%s3550_s12 + $0x1190] sm:$0xff] }
 0x189   : > { %2231 = vmatprep.subr.mxu1 %v971_v10  ;;  %2161 = vmatpush1.msra.mxu0 %v906_v11  ;;  %v1004_v10 = vld [vmem:[%s3550_s12 + $0x1390] sm:$0xff]  ;;  %v939_v11 = vld [vmem:[%s3550_s12 + $0x1188] sm:$0xff] }
 0x18a   : > { %2232 = vmatpush1.msra.mxu1 %v970_v12  ;;  %2162 = vmatprep.subr.mxu0 %v905_v13  ;;  %v1003_v12 = vld [vmem:[%s3550_s12 + $0x1388] sm:$0xff]  ;;  %v938_v13 = vld [vmem:[%s3550_s12 + $0x1180] sm:$0xff] }
 0x18b   : > { %2233 = vmatprep.subr.mxu1 %v969_v14  ;;  %2163 = vmatpush1.msra.mxu0 %v904_v15  ;;  %v1002_v14 = vld [vmem:[%s3550_s12 + $0x1380] sm:$0xff]  ;;  %v937_v15 = vld [vmem:[%s3550_s12 + $0x1178] sm:$0xff] }
 0x18c   : > { %2234 = vmatpush1.msra.mxu1 %v968_v16  ;;  %2164 = vmatprep.subr.mxu0 %v903_v17  ;;  %v1001_v16 = vld [vmem:[%s3550_s12 + $0x1378] sm:$0xff]  ;;  %v936_v17 = vld [vmem:[%s3550_s12 + $0x1170] sm:$0xff] }
 0x18d   : > { %2235 = vmatprep.subr.mxu1 %v967_v18  ;;  %2165 = vmatpush1.msra.mxu0 %v902_v19  ;;  %v1000_v18 = vld [vmem:[%s3550_s12 + $0x1370] sm:$0xff]  ;;  %v935_v19 = vld [vmem:[%s3550_s12 + $0x1168] sm:$0xff] }
 0x18e   : > { %2236 = vmatpush1.msra.mxu1 %v966_v20  ;;  %2166 = vmatprep.subr.mxu0 %v901_v21  ;;  %v999_v20 = vld [vmem:[%s3550_s12 + $0x1368] sm:$0xff]  ;;  %v934_v21 = vld [vmem:[%s3550_s12 + $0x1160] sm:$0xff] }
 0x18f   : > { %2237 = vmatprep.subr.mxu1 %v965_v22  ;;  %2167 = vmatpush1.msra.mxu0 %v900_v23  ;;  %v998_v22 = vld [vmem:[%s3550_s12 + $0x1360] sm:$0xff]  ;;  %v933_v23 = vld [vmem:[%s3550_s12 + $0x1158] sm:$0xff] }
 0x190   : > { %2238 = vmatpush1.msra.mxu1 %v964_v24  ;;  %2168 = vmatprep.subr.mxu0 %v899_v25  ;;  %v997_v24 = vld [vmem:[%s3550_s12 + $0x1358] sm:$0xff]  ;;  %v932_v25 = vld [vmem:[%s3550_s12 + $0x1150] sm:$0xff] }
 0x191   : > { %2239 = vmatprep.subr.mxu1 %v963_v26  ;;  %2169 = vmatpush1.msra.mxu0 %v898_v27  ;;  %v996_v26 = vld [vmem:[%s3550_s12 + $0x1350] sm:$0xff]  ;;  %v374_v27 = vld [vmem:[%s3572_s29 + $0x20] sm:$0xff] }
 0x192   : > { %2240 = vmatpush1.msra.mxu1 %v962_v28  ;;  %2170 = vmatprep.subr.mxu0 %v897_v29  ;;  %v931_v28 = vld [vmem:[%s3550_s12 + $0x1148] sm:$0xff] }
 0x193   : > { %2241 = vmatprep.subr.mxu1 %v961_v30  ;;  %2171 = vmatpush1.msra.mxu0 %v896_v31  ;;  %v995_v29 = vld [vmem:[%s3550_s12 + $0x1348] sm:$0xff]  ;;  %v930_v30 = vld [vmem:[%s3550_s12 + $0x1140] sm:$0xff] }
 0x194   : > { %2242 = vmatpush1.msra.mxu1 %v960_v32  ;;  %2172 = vmatprep.subr.mxu0 %v895_v33  ;;  %v994_v31 = vld [vmem:[%s3550_s12 + $0x1340] sm:$0xff]  ;;  %v929_v32 = vld [vmem:[%s3550_s12 + $0x1138] sm:$0xff] }
 0x195   : > { %2243 = vmatprep.subr.mxu1 %v959_v34  ;;  %2173 = vmatpush1.msra.mxu0 %v894_v35  ;;  %v993_v33 = vld [vmem:[%s3550_s12 + $0x1338] sm:$0xff]  ;;  %v1478_v34 = vcombine.high %v374_v27, %v374_v27  ;;  %v928_v35 = vld [vmem:[%s3550_s12 + $0x1130] sm:$0xff] }
 0x196   : > { %2244 = vmatpush1.msra.mxu1 %v958_v36  ;;  %2174 = vmatprep.subr.mxu0 %v893_v37  ;;  %v992_v36 = vld [vmem:[%s3550_s12 + $0x1330] sm:$0xff]  ;;  %v927_v37 = vld [vmem:[%s3550_s12 + $0x1128] sm:$0xff] }
 0x197   : > { %2245 = vmatprep.subr.mxu1 %v957_v38  ;;  %2175 = vmatpush1.msra.mxu0 %v892_v39  ;;  %v991_v38 = vld [vmem:[%s3550_s12 + $0x1328] sm:$0xff]  ;;  %v1485_v39 = vrot.slane %v374_v27, %v3696_v53 }
 0x198   : > { %2246 = vmatpush1.msra.mxu1 %v956_v40  ;;  %2176 = vmatprep.subr.mxu0 %v891_v41  ;;  %v926_v40 = vld [vmem:[%s3550_s12 + $0x1120] sm:$0xff]  ;;  %v1031_v27 = vld [vmem:[%s3550_s12 + $0x1468] sm:$0xff] }
 0x199   : > { %2247 = vmatprep.subr.mxu1 %v955_v42  ;;  %2177 = vmatpush1.msra.mxu0 %v890_v44  ;;  %v990_v41 = vld [vmem:[%s3550_s12 + $0x1320] sm:$0xff]  ;;  %v925_v42 = vld [vmem:[%s3550_s12 + $0x1118] sm:$0xff] }
 0x19a   : > { %2248 = vmatpush1.msra.mxu1 %v954_v45  ;;  %2178 = vmatprep.subr.mxu0 %v953_v46  ;;  %v989_v44 = vld [vmem:[%s3550_s12 + $0x1318] sm:$0xff]  ;;  %v1492_v45 = vrot.slane %v1478_v34, %v3696_v53  ;;  %v924_v46 = vld [vmem:[%s3550_s12 + $0x1110] sm:$0xff] }
 0x19b   : > { %2249 = vmatprep.subr.mxu1 %v1017_v47  ;;  %2179 = vmatpush2.msra.mxu0 %v952_v48  ;;  %v988_v47 = vld [vmem:[%s3550_s12 + $0x1310] sm:$0xff]  ;;  %v923_v48 = vld [vmem:[%s3550_s12 + $0x1108] sm:$0xff] }
 0x19c   : > { %2250 = vmatpush2.msra.mxu1 %v1016_v49  ;;  %2180 = vmatprep.subr.mxu0 %v951_v50  ;;  %v987_v49 = vld [vmem:[%s3550_s12 + $0x1308] sm:$0xff]  ;;  %v1493_v50 = vcombine.high %v1485_v39, %v1485_v39  ;;  %v1092_v34 = vld [vmem:[%s3550_s12 + $0x1650] sm:$0xff] }
 0x19d   : > { %2251 = vmatprep.subr.mxu1 %v1015_v51  ;;  %2181 = vmatpush2.msra.mxu0 %v950_v52  ;;  %v922_v51 = vld [vmem:[%s3550_s12 + $0x1100] sm:$0xff] }
 0x19e   : > { %2252 = vmatpush2.msra.mxu1 %v1014_v54  ;;  %2182 = vmatprep.subr.mxu0 %v949_v55  ;;  %v986_v52 = vld [vmem:[%s3550_s12 + $0x1300] sm:$0xff]  ;;  %v1494_v54 = vcombine.high %v1492_v45, %v1492_v45  ;;  %v1049_v55 = vld [vmem:[%s3550_s12 + $0x14f8] sm:$0xff] }
 0x19f   : > { %2253 = vmatprep.subr.mxu1 %v1013_v56  ;;  %2183 = vmatpush2.msra.mxu0 %v948_v57  ;;  %v1113_v56 = vld [vmem:[%s3550_s12 + $0x16f8] sm:$0xff]  ;;  %v1048_v57 = vld [vmem:[%s3550_s12 + $0x14f0] sm:$0xff] }
 0x1a0   : > { %2254 = vmatpush2.msra.mxu1 %v1012_v58  ;;  %2184 = vmatprep.subr.mxu0 %v947_v59  ;;  %v1112_v58 = vld [vmem:[%s3550_s12 + $0x16f0] sm:$0xff]  ;;  %v1047_v59 = vld [vmem:[%s3550_s12 + $0x14e8] sm:$0xff] }
 0x1a1   : > { %2255 = vmatprep.subr.mxu1 %v1011_v60  ;;  %2185 = vmatpush2.msra.mxu0 %v946_v61  ;;  %v1111_v60 = vld [vmem:[%s3550_s12 + $0x16e8] sm:$0xff]  ;;  %v1046_v61 = vld [vmem:[%s3550_s12 + $0x14e0] sm:$0xff] }
 0x1a2   : > { %2256 = vmatpush2.msra.mxu1 %v1010_v62  ;;  %2186 = vmatprep.subr.mxu0 %v945_v63  ;;  %v1110_v62 = vld [vmem:[%s3550_s12 + $0x16e0] sm:$0xff]  ;;  %v1045_v63 = vld [vmem:[%s3550_s12 + $0x14d8] sm:$0xff] }
 0x1a3   : > { %2257 = vmatprep.subr.mxu1 %v1009_v0  ;;  %2187 = vmatpush2.msra.mxu0 %v944_v1  ;;  %v1109_v0 = vld [vmem:[%s3550_s12 + $0x16d8] sm:$0xff]  ;;  %v1044_v1 = vld [vmem:[%s3550_s12 + $0x14d0] sm:$0xff] }
 0x1a4   : > { %2258 = vmatpush2.msra.mxu1 %v1008_v2  ;;  %2188 = vmatprep.subr.mxu0 %v943_v3  ;;  %v1108_v2 = vld [vmem:[%s3550_s12 + $0x16d0] sm:$0xff]  ;;  %v1043_v3 = vld [vmem:[%s3550_s12 + $0x14c8] sm:$0xff] }
 0x1a5   : > { %2259 = vmatprep.subr.mxu1 %v1007_v4  ;;  %2189 = vmatpush2.msra.mxu0 %v942_v5  ;;  %v1107_v4 = vld [vmem:[%s3550_s12 + $0x16c8] sm:$0xff]  ;;  %v1042_v5 = vld [vmem:[%s3550_s12 + $0x14c0] sm:$0xff] }
 0x1a6   : > { %2260 = vmatpush2.msra.mxu1 %v1006_v6  ;;  %2190 = vmatprep.subr.mxu0 %v941_v7  ;;  %v1106_v6 = vld [vmem:[%s3550_s12 + $0x16c0] sm:$0xff]  ;;  %v1041_v7 = vld [vmem:[%s3550_s12 + $0x14b8] sm:$0xff] }
 0x1a7   : > { %2261 = vmatprep.subr.mxu1 %v1005_v8  ;;  %2191 = vmatpush2.msra.mxu0 %v940_v9  ;;  %v1105_v8 = vld [vmem:[%s3550_s12 + $0x16b8] sm:$0xff]  ;;  %v1040_v9 = vld [vmem:[%s3550_s12 + $0x14b0] sm:$0xff] }
 0x1a8   : > { %2262 = vmatpush2.msra.mxu1 %v1004_v10  ;;  %2192 = vmatprep.subr.mxu0 %v939_v11  ;;  %v1104_v10 = vld [vmem:[%s3550_s12 + $0x16b0] sm:$0xff]  ;;  %v1039_v11 = vld [vmem:[%s3550_s12 + $0x14a8] sm:$0xff] }
 0x1a9   : > { %2263 = vmatprep.subr.mxu1 %v1003_v12  ;;  %2193 = vmatpush2.msra.mxu0 %v938_v13  ;;  %v1103_v12 = vld [vmem:[%s3550_s12 + $0x16a8] sm:$0xff]  ;;  %v1038_v13 = vld [vmem:[%s3550_s12 + $0x14a0] sm:$0xff] }
 0x1aa   : > { %2264 = vmatpush2.msra.mxu1 %v1002_v14  ;;  %2194 = vmatprep.subr.mxu0 %v937_v15  ;;  %v1102_v14 = vld [vmem:[%s3550_s12 + $0x16a0] sm:$0xff]  ;;  %v1037_v15 = vld [vmem:[%s3550_s12 + $0x1498] sm:$0xff] }
 0x1ab   : > { %2265 = vmatprep.subr.mxu1 %v1001_v16  ;;  %2195 = vmatpush2.msra.mxu0 %v936_v17  ;;  %v1101_v16 = vld [vmem:[%s3550_s12 + $0x1698] sm:$0xff]  ;;  %v1036_v17 = vld [vmem:[%s3550_s12 + $0x1490] sm:$0xff] }
 0x1ac   : > { %2266 = vmatpush2.msra.mxu1 %v1000_v18  ;;  %2196 = vmatprep.subr.mxu0 %v935_v19  ;;  %v1100_v18 = vld [vmem:[%s3550_s12 + $0x1690] sm:$0xff]  ;;  %v1035_v19 = vld [vmem:[%s3550_s12 + $0x1488] sm:$0xff] }
 0x1ad   : > { %2267 = vmatprep.subr.mxu1 %v999_v20  ;;  %2197 = vmatpush2.msra.mxu0 %v934_v21  ;;  %v1099_v20 = vld [vmem:[%s3550_s12 + $0x1688] sm:$0xff]  ;;  %v1034_v21 = vld [vmem:[%s3550_s12 + $0x1480] sm:$0xff] }
 0x1ae   : > { %2268 = vmatpush2.msra.mxu1 %v998_v22  ;;  %2198 = vmatprep.subr.mxu0 %v933_v23  ;;  %v1098_v22 = vld [vmem:[%s3550_s12 + $0x1680] sm:$0xff]  ;;  %v1033_v23 = vld [vmem:[%s3550_s12 + $0x1478] sm:$0xff] }
 0x1af   : > { %2269 = vmatprep.subr.mxu1 %v997_v24  ;;  %2199 = vmatpush2.msra.mxu0 %v932_v25  ;;  %v1097_v24 = vld [vmem:[%s3550_s12 + $0x1678] sm:$0xff]  ;;  %v1032_v25 = vld [vmem:[%s3550_s12 + $0x1470] sm:$0xff] }
 0x1b0   : > { %2270 = vmatpush2.msra.mxu1 %v996_v26  ;;  %2200 = vmatprep.subr.mxu0 %v931_v28  ;;  %v1096_v26 = vld [vmem:[%s3550_s12 + $0x1670] sm:$0xff]  ;;  %v1095_v28 = vld [vmem:[%s3550_s12 + $0x1668] sm:$0xff] }
 0x1b1   : > { %2271 = vmatprep.subr.mxu1 %v995_v29  ;;  %2201 = vmatpush2.msra.mxu0 %v930_v30  ;;  %v1030_v29 = vld [vmem:[%s3550_s12 + $0x1460] sm:$0xff] }
 0x1b2   : > { %2272 = vmatpush2.msra.mxu1 %v994_v31  ;;  %2202 = vmatprep.subr.mxu0 %v929_v32  ;;  %v1094_v30 = vld [vmem:[%s3550_s12 + $0x1660] sm:$0xff]  ;;  %v1029_v31 = vld [vmem:[%s3550_s12 + $0x1458] sm:$0xff] }
 0x1b3   : > { %2273 = vmatprep.subr.mxu1 %v993_v33  ;;  %2203 = vmatpush2.msra.mxu0 %v928_v35  ;;  %v1093_v32 = vld [vmem:[%s3550_s12 + $0x1658] sm:$0xff]  ;;  %v1028_v33 = vld [vmem:[%s3550_s12 + $0x1450] sm:$0xff]  ;;  %v1027_v35 = vld [vmem:[%s3550_s12 + $0x1448] sm:$0xff] }
 0x1b4   : > { %2274 = vmatpush2.msra.mxu1 %v992_v36  ;;  %2204 = vmatprep.subr.mxu0 %v927_v37  ;;  %v1091_v36 = vld [vmem:[%s3550_s12 + $0x1648] sm:$0xff]  ;;  %v1026_v37 = vld [vmem:[%s3550_s12 + $0x1440] sm:$0xff] }
 0x1b5   : > { %2275 = vmatprep.subr.mxu1 %v991_v38  ;;  %2205 = vmatpush2.msra.mxu0 %v926_v40  ;;  %v1090_v38 = vld [vmem:[%s3550_s12 + $0x1640] sm:$0xff]  ;;  %v1089_v40 = vld [vmem:[%s3550_s12 + $0x1638] sm:$0xff] }
 0x1b6   : > { %2276 = vmatpush2.msra.mxu1 %v990_v41  ;;  %2206 = vmatprep.subr.mxu0 %v925_v42  ;;  %v1024_v41 = vld [vmem:[%s3550_s12 + $0x1430] sm:$0xff] }
 0x1b7   : > { %2277 = vmatprep.subr.mxu1 %v989_v44  ;;  %2207 = vmatpush2.msra.mxu0 %v924_v46  ;;  %v1088_v42 = vld [vmem:[%s3550_s12 + $0x1630] sm:$0xff]  ;;  %v1023_v44 = vld [vmem:[%s3550_s12 + $0x1428] sm:$0xff]  ;;  %v1022_v46 = vld [vmem:[%s3550_s12 + $0x1420] sm:$0xff] }
 0x1b8   : > { %2278 = vmatpush2.msra.mxu1 %v988_v47  ;;  %2208 = vmatprep.subr.mxu0 %v923_v48  ;;  %v1086_v47 = vld [vmem:[%s3550_s12 + $0x1620] sm:$0xff]  ;;  %v1021_v48 = vld [vmem:[%s3550_s12 + $0x1418] sm:$0xff] }
 0x1b9   : > { %2279 = vmatprep.subr.mxu1 %v987_v49  ;;  %2209 = vmatpush2.msra.mxu0 %v922_v51  ;;  %v1085_v49 = vld [vmem:[%s3550_s12 + $0x1618] sm:$0xff]  ;;  %v1084_v51 = vld [vmem:[%s3550_s12 + $0x1610] sm:$0xff] }
 0x1ba   : > { %2210 = vmatprep.mubr.f32.mxu0 %v1493_v50  ;;  %2280 = vmatpush2.msra.mxu1 %v986_v52  ;;  %v1020_v50 = vld [vmem:[%s3550_s12 + $0x1410] sm:$0xff]  ;;  %v1019_v52 = vld [vmem:[%s3550_s12 + $0x1408] sm:$0xff] }
 0x1bb   : > { %2211 = vmatmul.mubr.f32.vlgmr.msra.gmra.mxu0 %v1485_v39  ;;  %2281 = vmatprep.mubr.f32.mxu1 %v1494_v54  ;;  %v1025_v39 = vld [vmem:[%s3550_s12 + $0x1438] sm:$0xff]  ;;  %v1083_v54 = vld [vmem:[%s3550_s12 + $0x1608] sm:$0xff] }
 0x1bc   : > { %2288 = vmatprep.subr.mxu0 %v1049_v55  ;;  %2359 = vmatprep.subr.mxu1 %v1113_v56  ;;  %v1018_v55 = vld [vmem:[%s3550_s12 + $0x1400] sm:$0xff] }
 0x1bd   : > { %2282 = vmatmul.mubr.f32.vlgmr.msra.gmra.mxu1 %v1492_v45  ;;  %2289 = vmatpush1.msra.mxu0 %v1048_v57  ;;  %v1087_v45 = vld [vmem:[%s3550_s12 + $0x1628] sm:$0xff]  ;;  %v1082_v56 = vld [vmem:[%s3550_s12 + $0x1600] sm:$0xff]  ;;  %v1081_v57 = vld [vmem:[%s3550_s12 + $0x15f8] sm:$0xff] }
 0x1be   : > { %2360 = vmatpush1.msra.mxu1 %v1112_v58  ;;  %2290 = vmatprep.subr.mxu0 %v1047_v59  ;;  %v1145_v58 = vld [vmem:[%s3550_s12 + $0x17f8] sm:$0xff]  ;;  %v1080_v59 = vld [vmem:[%s3550_s12 + $0x15f0] sm:$0xff] }
 0x1bf   : > { %2361 = vmatprep.subr.mxu1 %v1111_v60  ;;  %2291 = vmatpush1.msra.mxu0 %v1046_v61  ;;  %v1144_v60 = vld [vmem:[%s3550_s12 + $0x17f0] sm:$0xff]  ;;  %v1079_v61 = vld [vmem:[%s3550_s12 + $0x15e8] sm:$0xff] }
 0x1c0   : > { %2362 = vmatpush1.msra.mxu1 %v1110_v62  ;;  %2292 = vmatprep.subr.mxu0 %v1045_v63  ;;  %v1143_v62 = vld [vmem:[%s3550_s12 + $0x17e8] sm:$0xff]  ;;  %v1078_v63 = vld [vmem:[%s3550_s12 + $0x15e0] sm:$0xff] }
 0x1c1   : > { %2363 = vmatprep.subr.mxu1 %v1109_v0  ;;  %2293 = vmatpush1.msra.mxu0 %v1044_v1  ;;  %v1142_v0 = vld [vmem:[%s3550_s12 + $0x17e0] sm:$0xff]  ;;  %v1077_v1 = vld [vmem:[%s3550_s12 + $0x15d8] sm:$0xff] }
 0x1c2   : > { %2364 = vmatpush1.msra.mxu1 %v1108_v2  ;;  %2294 = vmatprep.subr.mxu0 %v1043_v3  ;;  %v1141_v2 = vld [vmem:[%s3550_s12 + $0x17d8] sm:$0xff]  ;;  %v1076_v3 = vld [vmem:[%s3550_s12 + $0x15d0] sm:$0xff] }
 0x1c3   : > { %2365 = vmatprep.subr.mxu1 %v1107_v4  ;;  %2295 = vmatpush1.msra.mxu0 %v1042_v5  ;;  %v1140_v4 = vld [vmem:[%s3550_s12 + $0x17d0] sm:$0xff]  ;;  %v1075_v5 = vld [vmem:[%s3550_s12 + $0x15c8] sm:$0xff] }
 0x1c4   : > { %2366 = vmatpush1.msra.mxu1 %v1106_v6  ;;  %2296 = vmatprep.subr.mxu0 %v1041_v7  ;;  %v1139_v6 = vld [vmem:[%s3550_s12 + $0x17c8] sm:$0xff]  ;;  %v1074_v7 = vld [vmem:[%s3550_s12 + $0x15c0] sm:$0xff] }
 0x1c5   : > { %2367 = vmatprep.subr.mxu1 %v1105_v8  ;;  %2297 = vmatpush1.msra.mxu0 %v1040_v9  ;;  %v1138_v8 = vld [vmem:[%s3550_s12 + $0x17c0] sm:$0xff]  ;;  %v1073_v9 = vld [vmem:[%s3550_s12 + $0x15b8] sm:$0xff] }
 0x1c6   : > { %2368 = vmatpush1.msra.mxu1 %v1104_v10  ;;  %2298 = vmatprep.subr.mxu0 %v1039_v11  ;;  %v1137_v10 = vld [vmem:[%s3550_s12 + $0x17b8] sm:$0xff]  ;;  %v1072_v11 = vld [vmem:[%s3550_s12 + $0x15b0] sm:$0xff] }
 0x1c7   : > { %2369 = vmatprep.subr.mxu1 %v1103_v12  ;;  %2299 = vmatpush1.msra.mxu0 %v1038_v13  ;;  %v1136_v12 = vld [vmem:[%s3550_s12 + $0x17b0] sm:$0xff]  ;;  %v1071_v13 = vld [vmem:[%s3550_s12 + $0x15a8] sm:$0xff] }
 0x1c8   : > { %2370 = vmatpush1.msra.mxu1 %v1102_v14  ;;  %2300 = vmatprep.subr.mxu0 %v1037_v15  ;;  %v1135_v14 = vld [vmem:[%s3550_s12 + $0x17a8] sm:$0xff]  ;;  %v1070_v15 = vld [vmem:[%s3550_s12 + $0x15a0] sm:$0xff] }
 0x1c9   : > { %2371 = vmatprep.subr.mxu1 %v1101_v16  ;;  %2301 = vmatpush1.msra.mxu0 %v1036_v17  ;;  %v1134_v16 = vld [vmem:[%s3550_s12 + $0x17a0] sm:$0xff]  ;;  %v1069_v17 = vld [vmem:[%s3550_s12 + $0x1598] sm:$0xff] }
 0x1ca   : > { %2372 = vmatpush1.msra.mxu1 %v1100_v18  ;;  %2302 = vmatprep.subr.mxu0 %v1035_v19  ;;  %v1133_v18 = vld [vmem:[%s3550_s12 + $0x1798] sm:$0xff]  ;;  %v1068_v19 = vld [vmem:[%s3550_s12 + $0x1590] sm:$0xff] }
 0x1cb   : > { %2373 = vmatprep.subr.mxu1 %v1099_v20  ;;  %2303 = vmatpush1.msra.mxu0 %v1034_v21  ;;  %v1132_v20 = vld [vmem:[%s3550_s12 + $0x1790] sm:$0xff]  ;;  %v1067_v21 = vld [vmem:[%s3550_s12 + $0x1588] sm:$0xff] }
 0x1cc   : > { %2374 = vmatpush1.msra.mxu1 %v1098_v22  ;;  %2304 = vmatprep.subr.mxu0 %v1033_v23  ;;  %v1131_v22 = vld [vmem:[%s3550_s12 + $0x1788] sm:$0xff]  ;;  %v1066_v23 = vld [vmem:[%s3550_s12 + $0x1580] sm:$0xff] }
 0x1cd   : > { %2375 = vmatprep.subr.mxu1 %v1097_v24  ;;  %2305 = vmatpush1.msra.mxu0 %v1032_v25  ;;  %v1130_v24 = vld [vmem:[%s3550_s12 + $0x1780] sm:$0xff]  ;;  %v1065_v25 = vld [vmem:[%s3550_s12 + $0x1578] sm:$0xff] }
 0x1ce   : > { %2376 = vmatpush1.msra.mxu1 %v1096_v26  ;;  %2306 = vmatprep.subr.mxu0 %v1031_v27  ;;  %v1129_v26 = vld [vmem:[%s3550_s12 + $0x1778] sm:$0xff]  ;;  %v1064_v27 = vld [vmem:[%s3550_s12 + $0x1570] sm:$0xff] }
 0x1cf   : > { %2377 = vmatprep.subr.mxu1 %v1095_v28  ;;  %2307 = vmatpush1.msra.mxu0 %v1030_v29  ;;  %v1128_v28 = vld [vmem:[%s3550_s12 + $0x1770] sm:$0xff]  ;;  %v1063_v29 = vld [vmem:[%s3550_s12 + $0x1568] sm:$0xff] }
 0x1d0   : > { %2378 = vmatpush1.msra.mxu1 %v1094_v30  ;;  %2308 = vmatprep.subr.mxu0 %v1029_v31  ;;  %v1127_v30 = vld [vmem:[%s3550_s12 + $0x1768] sm:$0xff]  ;;  %v1062_v31 = vld [vmem:[%s3550_s12 + $0x1560] sm:$0xff] }
 0x1d1   : > { %2379 = vmatprep.subr.mxu1 %v1093_v32  ;;  %2309 = vmatpush1.msra.mxu0 %v1028_v33  ;;  %v1126_v32 = vld [vmem:[%s3550_s12 + $0x1760] sm:$0xff]  ;;  %v1061_v33 = vld [vmem:[%s3550_s12 + $0x1558] sm:$0xff] }
 0x1d2   : > { %2380 = vmatpush1.msra.mxu1 %v1092_v34  ;;  %2310 = vmatprep.subr.mxu0 %v1027_v35  ;;  %v1125_v34 = vld [vmem:[%s3550_s12 + $0x1758] sm:$0xff]  ;;  %v1060_v35 = vld [vmem:[%s3550_s12 + $0x1550] sm:$0xff] }
 0x1d3   : > { %2381 = vmatprep.subr.mxu1 %v1091_v36  ;;  %2311 = vmatpush1.msra.mxu0 %v1026_v37  ;;  %v1124_v36 = vld [vmem:[%s3550_s12 + $0x1750] sm:$0xff]  ;;  %v375_v37 = vld [vmem:[%s3572_s29 + $0x28] sm:$0xff] }
 0x1d4   : > { %2382 = vmatpush1.msra.mxu1 %v1090_v38  ;;  %2312 = vmatprep.subr.mxu0 %v1025_v39  ;;  %v1059_v38 = vld [vmem:[%s3550_s12 + $0x1548] sm:$0xff] }
 0x1d5   : > { %2383 = vmatprep.subr.mxu1 %v1089_v40  ;;  %2313 = vmatpush1.msra.mxu0 %v1024_v41  ;;  %v1123_v39 = vld [vmem:[%s3550_s12 + $0x1748] sm:$0xff]  ;;  %v1058_v40 = vld [vmem:[%s3550_s12 + $0x1540] sm:$0xff] }
 0x1d6   : > { %2384 = vmatpush1.msra.mxu1 %v1088_v42  ;;  %2314 = vmatprep.subr.mxu0 %v1023_v44  ;;  %v1122_v41 = vld [vmem:[%s3550_s12 + $0x1740] sm:$0xff]  ;;  %v1057_v42 = vld [vmem:[%s3550_s12 + $0x1538] sm:$0xff] }
 0x1d7   : > { %2385 = vmatprep.subr.mxu1 %v1087_v45  ;;  %2315 = vmatpush1.msra.mxu0 %v1022_v46  ;;  %v1121_v44 = vld [vmem:[%s3550_s12 + $0x1738] sm:$0xff]  ;;  %v1495_v45 = vcombine.high %v375_v37, %v375_v37  ;;  %v1056_v46 = vld [vmem:[%s3550_s12 + $0x1530] sm:$0xff] }
 0x1d8   : > { %2386 = vmatpush1.msra.mxu1 %v1086_v47  ;;  %2316 = vmatprep.subr.mxu0 %v1021_v48  ;;  %v1120_v47 = vld [vmem:[%s3550_s12 + $0x1730] sm:$0xff]  ;;  %v1055_v48 = vld [vmem:[%s3550_s12 + $0x1528] sm:$0xff] }
 0x1d9   : > { %2387 = vmatprep.subr.mxu1 %v1085_v49  ;;  %2317 = vmatpush1.msra.mxu0 %v1020_v50  ;;  %v1119_v49 = vld [vmem:[%s3550_s12 + $0x1728] sm:$0xff]  ;;  %v1502_v50 = vrot.slane %v375_v37, %v3696_v53 }
 0x1da   : > { %2388 = vmatpush1.msra.mxu1 %v1084_v51  ;;  %2318 = vmatprep.subr.mxu0 %v1019_v52  ;;  %v1054_v51 = vld [vmem:[%s3550_s12 + $0x1520] sm:$0xff]  ;;  %v1159_v37 = vld [vmem:[%s3550_s12 + $0x1868] sm:$0xff] }
 0x1db   : > { %2389 = vmatprep.subr.mxu1 %v1083_v54  ;;  %2319 = vmatpush1.msra.mxu0 %v1018_v55  ;;  %v1118_v52 = vld [vmem:[%s3550_s12 + $0x1720] sm:$0xff]  ;;  %v1053_v54 = vld [vmem:[%s3550_s12 + $0x1518] sm:$0xff] }
 0x1dc   : > { %2390 = vmatpush1.msra.mxu1 %v1082_v56  ;;  %2320 = vmatprep.subr.mxu0 %v1081_v57  ;;  %v1117_v55 = vld [vmem:[%s3550_s12 + $0x1718] sm:$0xff]  ;;  %v1509_v56 = vrot.slane %v1495_v45, %v3696_v53  ;;  %v1052_v57 = vld [vmem:[%s3550_s12 + $0x1510] sm:$0xff] }
 0x1dd   : > { %2391 = vmatprep.subr.mxu1 %v1145_v58  ;;  %2321 = vmatpush2.msra.mxu0 %v1080_v59  ;;  %v1116_v58 = vld [vmem:[%s3550_s12 + $0x1710] sm:$0xff]  ;;  %v1051_v59 = vld [vmem:[%s3550_s12 + $0x1508] sm:$0xff] }
 0x1de   : > { %2392 = vmatpush2.msra.mxu1 %v1144_v60  ;;  %2322 = vmatprep.subr.mxu0 %v1079_v61  ;;  %v1115_v60 = vld [vmem:[%s3550_s12 + $0x1708] sm:$0xff]  ;;  %v1510_v61 = vcombine.high %v1502_v50, %v1502_v50  ;;  %v1220_v45 = vld [vmem:[%s3550_s12 + $0x1a50] sm:$0xff] }
 0x1df   : > { %2393 = vmatprep.subr.mxu1 %v1143_v62  ;;  %2323 = vmatpush2.msra.mxu0 %v1078_v63  ;;  %v1050_v62 = vld [vmem:[%s3550_s12 + $0x1500] sm:$0xff] }
 0x1e0   : > { %2394 = vmatpush2.msra.mxu1 %v1142_v0  ;;  %2324 = vmatprep.subr.mxu0 %v1077_v1  ;;  %v1114_v63 = vld [vmem:[%s3550_s12 + $0x1700] sm:$0xff]  ;;  %v1511_v0 = vcombine.high %v1509_v56, %v1509_v56  ;;  %v1177_v1 = vld [vmem:[%s3550_s12 + $0x18f8] sm:$0xff] }
 0x1e1   : > { %2395 = vmatprep.subr.mxu1 %v1141_v2  ;;  %2325 = vmatpush2.msra.mxu0 %v1076_v3  ;;  %v1241_v2 = vld [vmem:[%s3550_s12 + $0x1af8] sm:$0xff]  ;;  %v1176_v3 = vld [vmem:[%s3550_s12 + $0x18f0] sm:$0xff] }
 0x1e2   : > { %2396 = vmatpush2.msra.mxu1 %v1140_v4  ;;  %2326 = vmatprep.subr.mxu0 %v1075_v5  ;;  %v1240_v4 = vld [vmem:[%s3550_s12 + $0x1af0] sm:$0xff]  ;;  %v1175_v5 = vld [vmem:[%s3550_s12 + $0x18e8] sm:$0xff] }
 0x1e3   : > { %2397 = vmatprep.subr.mxu1 %v1139_v6  ;;  %2327 = vmatpush2.msra.mxu0 %v1074_v7  ;;  %v1239_v6 = vld [vmem:[%s3550_s12 + $0x1ae8] sm:$0xff]  ;;  %v1174_v7 = vld [vmem:[%s3550_s12 + $0x18e0] sm:$0xff] }
 0x1e4   : > { %2398 = vmatpush2.msra.mxu1 %v1138_v8  ;;  %2328 = vmatprep.subr.mxu0 %v1073_v9  ;;  %v1238_v8 = vld [vmem:[%s3550_s12 + $0x1ae0] sm:$0xff]  ;;  %v1173_v9 = vld [vmem:[%s3550_s12 + $0x18d8] sm:$0xff] }
 0x1e5   : > { %2399 = vmatprep.subr.mxu1 %v1137_v10  ;;  %2329 = vmatpush2.msra.mxu0 %v1072_v11  ;;  %v1237_v10 = vld [vmem:[%s3550_s12 + $0x1ad8] sm:$0xff]  ;;  %v1172_v11 = vld [vmem:[%s3550_s12 + $0x18d0] sm:$0xff] }
 0x1e6   : > { %2400 = vmatpush2.msra.mxu1 %v1136_v12  ;;  %2330 = vmatprep.subr.mxu0 %v1071_v13  ;;  %v1236_v12 = vld [vmem:[%s3550_s12 + $0x1ad0] sm:$0xff]  ;;  %v1171_v13 = vld [vmem:[%s3550_s12 + $0x18c8] sm:$0xff] }
 0x1e7   : > { %2401 = vmatprep.subr.mxu1 %v1135_v14  ;;  %2331 = vmatpush2.msra.mxu0 %v1070_v15  ;;  %v1235_v14 = vld [vmem:[%s3550_s12 + $0x1ac8] sm:$0xff]  ;;  %v1170_v15 = vld [vmem:[%s3550_s12 + $0x18c0] sm:$0xff] }
 0x1e8   : > { %2402 = vmatpush2.msra.mxu1 %v1134_v16  ;;  %2332 = vmatprep.subr.mxu0 %v1069_v17  ;;  %v1234_v16 = vld [vmem:[%s3550_s12 + $0x1ac0] sm:$0xff]  ;;  %v1169_v17 = vld [vmem:[%s3550_s12 + $0x18b8] sm:$0xff] }
 0x1e9   : > { %2403 = vmatprep.subr.mxu1 %v1133_v18  ;;  %2333 = vmatpush2.msra.mxu0 %v1068_v19  ;;  %v1233_v18 = vld [vmem:[%s3550_s12 + $0x1ab8] sm:$0xff]  ;;  %v1168_v19 = vld [vmem:[%s3550_s12 + $0x18b0] sm:$0xff] }
 0x1ea   : > { %2404 = vmatpush2.msra.mxu1 %v1132_v20  ;;  %2334 = vmatprep.subr.mxu0 %v1067_v21  ;;  %v1232_v20 = vld [vmem:[%s3550_s12 + $0x1ab0] sm:$0xff]  ;;  %v1167_v21 = vld [vmem:[%s3550_s12 + $0x18a8] sm:$0xff] }
 0x1eb   : > { %2405 = vmatprep.subr.mxu1 %v1131_v22  ;;  %2335 = vmatpush2.msra.mxu0 %v1066_v23  ;;  %v1231_v22 = vld [vmem:[%s3550_s12 + $0x1aa8] sm:$0xff]  ;;  %v1166_v23 = vld [vmem:[%s3550_s12 + $0x18a0] sm:$0xff] }
 0x1ec   : > { %2406 = vmatpush2.msra.mxu1 %v1130_v24  ;;  %2336 = vmatprep.subr.mxu0 %v1065_v25  ;;  %v1230_v24 = vld [vmem:[%s3550_s12 + $0x1aa0] sm:$0xff]  ;;  %v1165_v25 = vld [vmem:[%s3550_s12 + $0x1898] sm:$0xff] }
 0x1ed   : > { %2407 = vmatprep.subr.mxu1 %v1129_v26  ;;  %2337 = vmatpush2.msra.mxu0 %v1064_v27  ;;  %v1229_v26 = vld [vmem:[%s3550_s12 + $0x1a98] sm:$0xff]  ;;  %v1164_v27 = vld [vmem:[%s3550_s12 + $0x1890] sm:$0xff] }
 0x1ee   : > { %2408 = vmatpush2.msra.mxu1 %v1128_v28  ;;  %2338 = vmatprep.subr.mxu0 %v1063_v29  ;;  %v1228_v28 = vld [vmem:[%s3550_s12 + $0x1a90] sm:$0xff]  ;;  %v1163_v29 = vld [vmem:[%s3550_s12 + $0x1888] sm:$0xff] }
 0x1ef   : > { %2409 = vmatprep.subr.mxu1 %v1127_v30  ;;  %2339 = vmatpush2.msra.mxu0 %v1062_v31  ;;  %v1227_v30 = vld [vmem:[%s3550_s12 + $0x1a88] sm:$0xff]  ;;  %v1162_v31 = vld [vmem:[%s3550_s12 + $0x1880] sm:$0xff] }
 0x1f0   : > { %2410 = vmatpush2.msra.mxu1 %v1126_v32  ;;  %2340 = vmatprep.subr.mxu0 %v1061_v33  ;;  %v1226_v32 = vld [vmem:[%s3550_s12 + $0x1a80] sm:$0xff]  ;;  %v1161_v33 = vld [vmem:[%s3550_s12 + $0x1878] sm:$0xff] }
 0x1f1   : > { %2411 = vmatprep.subr.mxu1 %v1125_v34  ;;  %2341 = vmatpush2.msra.mxu0 %v1060_v35  ;;  %v1225_v34 = vld [vmem:[%s3550_s12 + $0x1a78] sm:$0xff]  ;;  %v1160_v35 = vld [vmem:[%s3550_s12 + $0x1870] sm:$0xff] }
 0x1f2   : > { %2412 = vmatpush2.msra.mxu1 %v1124_v36  ;;  %2342 = vmatprep.subr.mxu0 %v1059_v38  ;;  %v1224_v36 = vld [vmem:[%s3550_s12 + $0x1a70] sm:$0xff]  ;;  %v1223_v38 = vld [vmem:[%s3550_s12 + $0x1a68] sm:$0xff] }
 0x1f3   : > { %2413 = vmatprep.subr.mxu1 %v1123_v39  ;;  %2343 = vmatpush2.msra.mxu0 %v1058_v40  ;;  %v1158_v39 = vld [vmem:[%s3550_s12 + $0x1860] sm:$0xff] }
 0x1f4   : > { %2414 = vmatpush2.msra.mxu1 %v1122_v41  ;;  %2344 = vmatprep.subr.mxu0 %v1057_v42  ;;  %v1222_v40 = vld [vmem:[%s3550_s12 + $0x1a60] sm:$0xff]  ;;  %v1157_v41 = vld [vmem:[%s3550_s12 + $0x1858] sm:$0xff] }
 0x1f5   : > { %2415 = vmatprep.subr.mxu1 %v1121_v44  ;;  %2345 = vmatpush2.msra.mxu0 %v1056_v46  ;;  %v1221_v42 = vld [vmem:[%s3550_s12 + $0x1a58] sm:$0xff]  ;;  %v1156_v44 = vld [vmem:[%s3550_s12 + $0x1850] sm:$0xff]  ;;  %v1155_v46 = vld [vmem:[%s3550_s12 + $0x1848] sm:$0xff] }
 0x1f6   : > { %2416 = vmatpush2.msra.mxu1 %v1120_v47  ;;  %2346 = vmatprep.subr.mxu0 %v1055_v48  ;;  %v1219_v47 = vld [vmem:[%s3550_s12 + $0x1a48] sm:$0xff]  ;;  %v1154_v48 = vld [vmem:[%s3550_s12 + $0x1840] sm:$0xff] }
 0x1f7   : > { %2417 = vmatprep.subr.mxu1 %v1119_v49  ;;  %2347 = vmatpush2.msra.mxu0 %v1054_v51  ;;  %v1218_v49 = vld [vmem:[%s3550_s12 + $0x1a40] sm:$0xff]  ;;  %v1217_v51 = vld [vmem:[%s3550_s12 + $0x1a38] sm:$0xff] }
 0x1f8   : > { %2418 = vmatpush2.msra.mxu1 %v1118_v52  ;;  %2348 = vmatprep.subr.mxu0 %v1053_v54  ;;  %v1152_v52 = vld [vmem:[%s3550_s12 + $0x1830] sm:$0xff] }
 0x1f9   : > { %2419 = vmatprep.subr.mxu1 %v1117_v55  ;;  %2349 = vmatpush2.msra.mxu0 %v1052_v57  ;;  %v1216_v54 = vld [vmem:[%s3550_s12 + $0x1a30] sm:$0xff]  ;;  %v1151_v55 = vld [vmem:[%s3550_s12 + $0x1828] sm:$0xff]  ;;  %v1150_v57 = vld [vmem:[%s3550_s12 + $0x1820] sm:$0xff] }
 0x1fa   : > { %2420 = vmatpush2.msra.mxu1 %v1116_v58  ;;  %2350 = vmatprep.subr.mxu0 %v1051_v59  ;;  %v1214_v58 = vld [vmem:[%s3550_s12 + $0x1a20] sm:$0xff]  ;;  %v1149_v59 = vld [vmem:[%s3550_s12 + $0x1818] sm:$0xff] }
 0x1fb   : > { %2421 = vmatprep.subr.mxu1 %v1115_v60  ;;  %2351 = vmatpush2.msra.mxu0 %v1050_v62  ;;  %v1213_v60 = vld [vmem:[%s3550_s12 + $0x1a18] sm:$0xff]  ;;  %v1212_v62 = vld [vmem:[%s3550_s12 + $0x1a10] sm:$0xff] }
 0x1fc   : > { %2352 = vmatprep.mubr.f32.mxu0 %v1510_v61  ;;  %2422 = vmatpush2.msra.mxu1 %v1114_v63  ;;  %v1148_v61 = vld [vmem:[%s3550_s12 + $0x1810] sm:$0xff]  ;;  %v1147_v63 = vld [vmem:[%s3550_s12 + $0x1808] sm:$0xff] }
 0x1fd   : > { %2353 = vmatmul.mubr.f32.vlgmr.msra.gmra.mxu0 %v1502_v50  ;;  %2423 = vmatprep.mubr.f32.mxu1 %v1511_v0  ;;  %v1153_v50 = vld [vmem:[%s3550_s12 + $0x1838] sm:$0xff]  ;;  %v1211_v0 = vld [vmem:[%s3550_s12 + $0x1a08] sm:$0xff] }
 0x1fe   : > { %2430 = vmatprep.subr.mxu0 %v1177_v1  ;;  %2501 = vmatprep.subr.mxu1 %v1241_v2  ;;  %v1146_v1 = vld [vmem:[%s3550_s12 + $0x1800] sm:$0xff] }
 0x1ff   : > { %2424 = vmatmul.mubr.f32.vlgmr.msra.gmra.mxu1 %v1509_v56  ;;  %2431 = vmatpush1.msra.mxu0 %v1176_v3  ;;  %v1215_v56 = vld [vmem:[%s3550_s12 + $0x1a28] sm:$0xff]  ;;  %v1210_v2 = vld [vmem:[%s3550_s12 + $0x1a00] sm:$0xff]  ;;  %v1209_v3 = vld [vmem:[%s3550_s12 + $0x19f8] sm:$0xff] }
 0x200   : > { %2502 = vmatpush1.msra.mxu1 %v1240_v4  ;;  %2432 = vmatprep.subr.mxu0 %v1175_v5  ;;  %v1273_v4 = vld [vmem:[%s3550_s12 + $0x1bf8] sm:$0xff]  ;;  %v1208_v5 = vld [vmem:[%s3550_s12 + $0x19f0] sm:$0xff] }
 0x201   : > { %2503 = vmatprep.subr.mxu1 %v1239_v6  ;;  %2433 = vmatpush1.msra.mxu0 %v1174_v7  ;;  %v1272_v6 = vld [vmem:[%s3550_s12 + $0x1bf0] sm:$0xff]  ;;  %v1207_v7 = vld [vmem:[%s3550_s12 + $0x19e8] sm:$0xff] }
 0x202   : > { %2504 = vmatpush1.msra.mxu1 %v1238_v8  ;;  %2434 = vmatprep.subr.mxu0 %v1173_v9  ;;  %v1271_v8 = vld [vmem:[%s3550_s12 + $0x1be8] sm:$0xff]  ;;  %v1206_v9 = vld [vmem:[%s3550_s12 + $0x19e0] sm:$0xff] }
 0x203   : > { %2505 = vmatprep.subr.mxu1 %v1237_v10  ;;  %2435 = vmatpush1.msra.mxu0 %v1172_v11  ;;  %v1270_v10 = vld [vmem:[%s3550_s12 + $0x1be0] sm:$0xff]  ;;  %v1205_v11 = vld [vmem:[%s3550_s12 + $0x19d8] sm:$0xff] }
 0x204   : > { %2506 = vmatpush1.msra.mxu1 %v1236_v12  ;;  %2436 = vmatprep.subr.mxu0 %v1171_v13  ;;  %v1269_v12 = vld [vmem:[%s3550_s12 + $0x1bd8] sm:$0xff]  ;;  %v1204_v13 = vld [vmem:[%s3550_s12 + $0x19d0] sm:$0xff] }
 0x205   : > { %2507 = vmatprep.subr.mxu1 %v1235_v14  ;;  %2437 = vmatpush1.msra.mxu0 %v1170_v15  ;;  %v1268_v14 = vld [vmem:[%s3550_s12 + $0x1bd0] sm:$0xff]  ;;  %v1203_v15 = vld [vmem:[%s3550_s12 + $0x19c8] sm:$0xff] }
 0x206   : > { %2508 = vmatpush1.msra.mxu1 %v1234_v16  ;;  %2438 = vmatprep.subr.mxu0 %v1169_v17  ;;  %v1267_v16 = vld [vmem:[%s3550_s12 + $0x1bc8] sm:$0xff]  ;;  %v1202_v17 = vld [vmem:[%s3550_s12 + $0x19c0] sm:$0xff] }
 0x207   : > { %2509 = vmatprep.subr.mxu1 %v1233_v18  ;;  %2439 = vmatpush1.msra.mxu0 %v1168_v19  ;;  %v1266_v18 = vld [vmem:[%s3550_s12 + $0x1bc0] sm:$0xff]  ;;  %v1201_v19 = vld [vmem:[%s3550_s12 + $0x19b8] sm:$0xff] }
 0x208   : > { %2510 = vmatpush1.msra.mxu1 %v1232_v20  ;;  %2440 = vmatprep.subr.mxu0 %v1167_v21  ;;  %v1265_v20 = vld [vmem:[%s3550_s12 + $0x1bb8] sm:$0xff]  ;;  %v1200_v21 = vld [vmem:[%s3550_s12 + $0x19b0] sm:$0xff] }
 0x209   : > { %2511 = vmatprep.subr.mxu1 %v1231_v22  ;;  %2441 = vmatpush1.msra.mxu0 %v1166_v23  ;;  %v1264_v22 = vld [vmem:[%s3550_s12 + $0x1bb0] sm:$0xff]  ;;  %v1199_v23 = vld [vmem:[%s3550_s12 + $0x19a8] sm:$0xff] }
 0x20a   : > { %2512 = vmatpush1.msra.mxu1 %v1230_v24  ;;  %2442 = vmatprep.subr.mxu0 %v1165_v25  ;;  %v1263_v24 = vld [vmem:[%s3550_s12 + $0x1ba8] sm:$0xff]  ;;  %v1198_v25 = vld [vmem:[%s3550_s12 + $0x19a0] sm:$0xff] }
 0x20b   : > { %2513 = vmatprep.subr.mxu1 %v1229_v26  ;;  %2443 = vmatpush1.msra.mxu0 %v1164_v27  ;;  %v1262_v26 = vld [vmem:[%s3550_s12 + $0x1ba0] sm:$0xff]  ;;  %v1197_v27 = vld [vmem:[%s3550_s12 + $0x1998] sm:$0xff] }
 0x20c   : > { %2514 = vmatpush1.msra.mxu1 %v1228_v28  ;;  %2444 = vmatprep.subr.mxu0 %v1163_v29  ;;  %v1261_v28 = vld [vmem:[%s3550_s12 + $0x1b98] sm:$0xff]  ;;  %v1196_v29 = vld [vmem:[%s3550_s12 + $0x1990] sm:$0xff] }
 0x20d   : > { %2515 = vmatprep.subr.mxu1 %v1227_v30  ;;  %2445 = vmatpush1.msra.mxu0 %v1162_v31  ;;  %v1260_v30 = vld [vmem:[%s3550_s12 + $0x1b90] sm:$0xff]  ;;  %v1195_v31 = vld [vmem:[%s3550_s12 + $0x1988] sm:$0xff] }
 0x20e   : > { %2516 = vmatpush1.msra.mxu1 %v1226_v32  ;;  %2446 = vmatprep.subr.mxu0 %v1161_v33  ;;  %v1259_v32 = vld [vmem:[%s3550_s12 + $0x1b88] sm:$0xff]  ;;  %v1194_v33 = vld [vmem:[%s3550_s12 + $0x1980] sm:$0xff] }
 0x20f   : > { %2517 = vmatprep.subr.mxu1 %v1225_v34  ;;  %2447 = vmatpush1.msra.mxu0 %v1160_v35  ;;  %v1258_v34 = vld [vmem:[%s3550_s12 + $0x1b80] sm:$0xff]  ;;  %v1193_v35 = vld [vmem:[%s3550_s12 + $0x1978] sm:$0xff] }
 0x210   : > { %2518 = vmatpush1.msra.mxu1 %v1224_v36  ;;  %2448 = vmatprep.subr.mxu0 %v1159_v37  ;;  %v1257_v36 = vld [vmem:[%s3550_s12 + $0x1b78] sm:$0xff]  ;;  %v1192_v37 = vld [vmem:[%s3550_s12 + $0x1970] sm:$0xff] }
 0x211   : > { %2519 = vmatprep.subr.mxu1 %v1223_v38  ;;  %2449 = vmatpush1.msra.mxu0 %v1158_v39  ;;  %v1256_v38 = vld [vmem:[%s3550_s12 + $0x1b70] sm:$0xff]  ;;  %v1191_v39 = vld [vmem:[%s3550_s12 + $0x1968] sm:$0xff] }
 0x212   : > { %2520 = vmatpush1.msra.mxu1 %v1222_v40  ;;  %2450 = vmatprep.subr.mxu0 %v1157_v41  ;;  %v1255_v40 = vld [vmem:[%s3550_s12 + $0x1b68] sm:$0xff]  ;;  %v1190_v41 = vld [vmem:[%s3550_s12 + $0x1960] sm:$0xff] }
 0x213   : > { %2521 = vmatprep.subr.mxu1 %v1221_v42  ;;  %2451 = vmatpush1.msra.mxu0 %v1156_v44  ;;  %v1254_v42 = vld [vmem:[%s3550_s12 + $0x1b60] sm:$0xff]  ;;  %v1189_v44 = vld [vmem:[%s3550_s12 + $0x1958] sm:$0xff] }
 0x214   : > { %2522 = vmatpush1.msra.mxu1 %v1220_v45  ;;  %2452 = vmatprep.subr.mxu0 %v1155_v46  ;;  %v1253_v45 = vld [vmem:[%s3550_s12 + $0x1b58] sm:$0xff]  ;;  %v1188_v46 = vld [vmem:[%s3550_s12 + $0x1950] sm:$0xff] }
 0x215   : > { %2523 = vmatprep.subr.mxu1 %v1219_v47  ;;  %2453 = vmatpush1.msra.mxu0 %v1154_v48  ;;  %v1252_v47 = vld [vmem:[%s3550_s12 + $0x1b50] sm:$0xff] }
 0x216   : > { %2524 = vmatpush1.msra.mxu1 %v1218_v49  ;;  %2454 = vmatprep.subr.mxu0 %v1153_v50  ;;  %v376_v48 = vld [vmem:[%s3572_s29 + $0x30] sm:$0xff]  ;;  %v1187_v49 = vld [vmem:[%s3550_s12 + $0x1948] sm:$0xff] }
 0x217   : > { %2525 = vmatprep.subr.mxu1 %v1217_v51  ;;  %2455 = vmatpush1.msra.mxu0 %v1152_v52  ;;  %v1251_v50 = vld [vmem:[%s3550_s12 + $0x1b48] sm:$0xff]  ;;  %v1186_v51 = vld [vmem:[%s3550_s12 + $0x1940] sm:$0xff] }
 0x218   : > { %2526 = vmatpush1.msra.mxu1 %v1216_v54  ;;  %2456 = vmatprep.subr.mxu0 %v1151_v55  ;;  %v1250_v52 = vld [vmem:[%s3550_s12 + $0x1b40] sm:$0xff]  ;;  %v1185_v54 = vld [vmem:[%s3550_s12 + $0x1938] sm:$0xff] }
 0x219   : > { %2527 = vmatprep.subr.mxu1 %v1215_v56  ;;  %2457 = vmatpush1.msra.mxu0 %v1150_v57  ;;  %v1249_v55 = vld [vmem:[%s3550_s12 + $0x1b38] sm:$0xff]  ;;  %v1512_v56 = vcombine.high %v376_v48, %v376_v48  ;;  %v1184_v57 = vld [vmem:[%s3550_s12 + $0x1930] sm:$0xff] }
 0x21a   : > { %2528 = vmatpush1.msra.mxu1 %v1214_v58  ;;  %2458 = vmatprep.subr.mxu0 %v1149_v59  ;;  %v1248_v58 = vld [vmem:[%s3550_s12 + $0x1b30] sm:$0xff]  ;;  %v1183_v59 = vld [vmem:[%s3550_s12 + $0x1928] sm:$0xff] }
 0x21b   : > { %2529 = vmatprep.subr.mxu1 %v1213_v60  ;;  %2459 = vmatpush1.msra.mxu0 %v1148_v61  ;;  %v1247_v60 = vld [vmem:[%s3550_s12 + $0x1b28] sm:$0xff]  ;;  %v1519_v61 = vrot.slane %v376_v48, %v3696_v53 }
 0x21c   : > { %2530 = vmatpush1.msra.mxu1 %v1212_v62  ;;  %2460 = vmatprep.subr.mxu0 %v1147_v63  ;;  %v1182_v62 = vld [vmem:[%s3550_s12 + $0x1920] sm:$0xff]  ;;  %v1287_v48 = vld [vmem:[%s3550_s12 + $0x1c68] sm:$0xff] }
 0x21d   : > { %2531 = vmatprep.subr.mxu1 %v1211_v0  ;;  %2461 = vmatpush1.msra.mxu0 %v1146_v1  ;;  %v1246_v63 = vld [vmem:[%s3550_s12 + $0x1b20] sm:$0xff]  ;;  %v1181_v0 = vld [vmem:[%s3550_s12 + $0x1918] sm:$0xff] }
 0x21e   : > { %2532 = vmatpush1.msra.mxu1 %v1210_v2  ;;  %2462 = vmatprep.subr.mxu0 %v1209_v3  ;;  %v1245_v1 = vld [vmem:[%s3550_s12 + $0x1b18] sm:$0xff]  ;;  %v1526_v2 = vrot.slane %v1512_v56, %v3696_v53  ;;  %v1180_v3 = vld [vmem:[%s3550_s12 + $0x1910] sm:$0xff] }
 0x21f   : > { %2533 = vmatprep.subr.mxu1 %v1273_v4  ;;  %2463 = vmatpush2.msra.mxu0 %v1208_v5  ;;  %v1244_v4 = vld [vmem:[%s3550_s12 + $0x1b10] sm:$0xff]  ;;  %v1179_v5 = vld [vmem:[%s3550_s12 + $0x1908] sm:$0xff] }
 0x220   : > { %2534 = vmatpush2.msra.mxu1 %v1272_v6  ;;  %2464 = vmatprep.subr.mxu0 %v1207_v7  ;;  %v1243_v6 = vld [vmem:[%s3550_s12 + $0x1b08] sm:$0xff]  ;;  %v1527_v7 = vcombine.high %v1519_v61, %v1519_v61  ;;  %v1348_v56 = vld [vmem:[%s3550_s12 + $0x1e50] sm:$0xff] }
 0x221   : > { %2535 = vmatprep.subr.mxu1 %v1271_v8  ;;  %2465 = vmatpush2.msra.mxu0 %v1206_v9  ;;  %v1178_v8 = vld [vmem:[%s3550_s12 + $0x1900] sm:$0xff] }
 0x222   : > { %2536 = vmatpush2.msra.mxu1 %v1270_v10  ;;  %2466 = vmatprep.subr.mxu0 %v1205_v11  ;;  %v1242_v9 = vld [vmem:[%s3550_s12 + $0x1b00] sm:$0xff]  ;;  %v1528_v10 = vcombine.high %v1526_v2, %v1526_v2  ;;  %v1305_v11 = vld [vmem:[%s3550_s12 + $0x1cf8] sm:$0xff] }
 0x223   : > { %2537 = vmatprep.subr.mxu1 %v1269_v12  ;;  %2467 = vmatpush2.msra.mxu0 %v1204_v13  ;;  %v1369_v12 = vld [vmem:[%s3550_s12 + $0x1ef8] sm:$0xff]  ;;  %v1304_v13 = vld [vmem:[%s3550_s12 + $0x1cf0] sm:$0xff] }
 0x224   : > { %2538 = vmatpush2.msra.mxu1 %v1268_v14  ;;  %2468 = vmatprep.subr.mxu0 %v1203_v15  ;;  %v1368_v14 = vld [vmem:[%s3550_s12 + $0x1ef0] sm:$0xff]  ;;  %v1303_v15 = vld [vmem:[%s3550_s12 + $0x1ce8] sm:$0xff] }
 0x225   : > { %2539 = vmatprep.subr.mxu1 %v1267_v16  ;;  %2469 = vmatpush2.msra.mxu0 %v1202_v17  ;;  %v1367_v16 = vld [vmem:[%s3550_s12 + $0x1ee8] sm:$0xff]  ;;  %v1302_v17 = vld [vmem:[%s3550_s12 + $0x1ce0] sm:$0xff] }
 0x226   : > { %2540 = vmatpush2.msra.mxu1 %v1266_v18  ;;  %2470 = vmatprep.subr.mxu0 %v1201_v19  ;;  %v1366_v18 = vld [vmem:[%s3550_s12 + $0x1ee0] sm:$0xff]  ;;  %v1301_v19 = vld [vmem:[%s3550_s12 + $0x1cd8] sm:$0xff] }
 0x227   : > { %2541 = vmatprep.subr.mxu1 %v1265_v20  ;;  %2471 = vmatpush2.msra.mxu0 %v1200_v21  ;;  %v1365_v20 = vld [vmem:[%s3550_s12 + $0x1ed8] sm:$0xff]  ;;  %v1300_v21 = vld [vmem:[%s3550_s12 + $0x1cd0] sm:$0xff] }
 0x228   : > { %2542 = vmatpush2.msra.mxu1 %v1264_v22  ;;  %2472 = vmatprep.subr.mxu0 %v1199_v23  ;;  %v1364_v22 = vld [vmem:[%s3550_s12 + $0x1ed0] sm:$0xff]  ;;  %v1299_v23 = vld [vmem:[%s3550_s12 + $0x1cc8] sm:$0xff] }
 0x229   : > { %2543 = vmatprep.subr.mxu1 %v1263_v24  ;;  %2473 = vmatpush2.msra.mxu0 %v1198_v25  ;;  %v1363_v24 = vld [vmem:[%s3550_s12 + $0x1ec8] sm:$0xff]  ;;  %v1298_v25 = vld [vmem:[%s3550_s12 + $0x1cc0] sm:$0xff] }
 0x22a   : > { %2544 = vmatpush2.msra.mxu1 %v1262_v26  ;;  %2474 = vmatprep.subr.mxu0 %v1197_v27  ;;  %v1362_v26 = vld [vmem:[%s3550_s12 + $0x1ec0] sm:$0xff]  ;;  %v1297_v27 = vld [vmem:[%s3550_s12 + $0x1cb8] sm:$0xff] }
 0x22b   : > { %2545 = vmatprep.subr.mxu1 %v1261_v28  ;;  %2475 = vmatpush2.msra.mxu0 %v1196_v29  ;;  %v1361_v28 = vld [vmem:[%s3550_s12 + $0x1eb8] sm:$0xff]  ;;  %v1296_v29 = vld [vmem:[%s3550_s12 + $0x1cb0] sm:$0xff] }
 0x22c   : > { %2546 = vmatpush2.msra.mxu1 %v1260_v30  ;;  %2476 = vmatprep.subr.mxu0 %v1195_v31  ;;  %v1360_v30 = vld [vmem:[%s3550_s12 + $0x1eb0] sm:$0xff]  ;;  %v1295_v31 = vld [vmem:[%s3550_s12 + $0x1ca8] sm:$0xff] }
 0x22d   : > { %2547 = vmatprep.subr.mxu1 %v1259_v32  ;;  %2477 = vmatpush2.msra.mxu0 %v1194_v33  ;;  %v1359_v32 = vld [vmem:[%s3550_s12 + $0x1ea8] sm:$0xff]  ;;  %v1294_v33 = vld [vmem:[%s3550_s12 + $0x1ca0] sm:$0xff] }
 0x22e   : > { %2548 = vmatpush2.msra.mxu1 %v1258_v34  ;;  %2478 = vmatprep.subr.mxu0 %v1193_v35  ;;  %v1358_v34 = vld [vmem:[%s3550_s12 + $0x1ea0] sm:$0xff]  ;;  %v1293_v35 = vld [vmem:[%s3550_s12 + $0x1c98] sm:$0xff] }
 0x22f   : > { %2549 = vmatprep.subr.mxu1 %v1257_v36  ;;  %2479 = vmatpush2.msra.mxu0 %v1192_v37  ;;  %v1357_v36 = vld [vmem:[%s3550_s12 + $0x1e98] sm:$0xff]  ;;  %v1292_v37 = vld [vmem:[%s3550_s12 + $0x1c90] sm:$0xff] }
 0x230   : > { %2550 = vmatpush2.msra.mxu1 %v1256_v38  ;;  %2480 = vmatprep.subr.mxu0 %v1191_v39  ;;  %v1356_v38 = vld [vmem:[%s3550_s12 + $0x1e90] sm:$0xff]  ;;  %v1291_v39 = vld [vmem:[%s3550_s12 + $0x1c88] sm:$0xff] }
 0x231   : > { %2551 = vmatprep.subr.mxu1 %v1255_v40  ;;  %2481 = vmatpush2.msra.mxu0 %v1190_v41  ;;  %v1355_v40 = vld [vmem:[%s3550_s12 + $0x1e88] sm:$0xff]  ;;  %v1290_v41 = vld [vmem:[%s3550_s12 + $0x1c80] sm:$0xff] }
 0x232   : > { %2552 = vmatpush2.msra.mxu1 %v1254_v42  ;;  %2482 = vmatprep.subr.mxu0 %v1189_v44  ;;  %v1354_v42 = vld [vmem:[%s3550_s12 + $0x1e80] sm:$0xff]  ;;  %v1289_v44 = vld [vmem:[%s3550_s12 + $0x1c78] sm:$0xff] }
 0x233   : > { %2553 = vmatprep.subr.mxu1 %v1253_v45  ;;  %2483 = vmatpush2.msra.mxu0 %v1188_v46  ;;  %v1353_v45 = vld [vmem:[%s3550_s12 + $0x1e78] sm:$0xff]  ;;  %v1288_v46 = vld [vmem:[%s3550_s12 + $0x1c70] sm:$0xff] }
 0x234   : > { %2554 = vmatpush2.msra.mxu1 %v1252_v47  ;;  %2484 = vmatprep.subr.mxu0 %v1187_v49  ;;  %v1352_v47 = vld [vmem:[%s3550_s12 + $0x1e70] sm:$0xff]  ;;  %v1351_v49 = vld [vmem:[%s3550_s12 + $0x1e68] sm:$0xff] }
 0x235   : > { %2555 = vmatprep.subr.mxu1 %v1251_v50  ;;  %2485 = vmatpush2.msra.mxu0 %v1186_v51  ;;  %v1286_v50 = vld [vmem:[%s3550_s12 + $0x1c60] sm:$0xff] }
 0x236   : > { %2556 = vmatpush2.msra.mxu1 %v1250_v52  ;;  %2486 = vmatprep.subr.mxu0 %v1185_v54  ;;  %v1350_v51 = vld [vmem:[%s3550_s12 + $0x1e60] sm:$0xff]  ;;  %v1285_v52 = vld [vmem:[%s3550_s12 + $0x1c58] sm:$0xff] }
 0x237   : > { %2557 = vmatprep.subr.mxu1 %v1249_v55  ;;  %2487 = vmatpush2.msra.mxu0 %v1184_v57  ;;  %v1349_v54 = vld [vmem:[%s3550_s12 + $0x1e58] sm:$0xff]  ;;  %v1284_v55 = vld [vmem:[%s3550_s12 + $0x1c50] sm:$0xff]  ;;  %v1283_v57 = vld [vmem:[%s3550_s12 + $0x1c48] sm:$0xff] }
 0x238   : > { %2558 = vmatpush2.msra.mxu1 %v1248_v58  ;;  %2488 = vmatprep.subr.mxu0 %v1183_v59  ;;  %v1347_v58 = vld [vmem:[%s3550_s12 + $0x1e48] sm:$0xff]  ;;  %v1282_v59 = vld [vmem:[%s3550_s12 + $0x1c40] sm:$0xff] }
 0x239   : > { %2559 = vmatprep.subr.mxu1 %v1247_v60  ;;  %2489 = vmatpush2.msra.mxu0 %v1182_v62  ;;  %v1346_v60 = vld [vmem:[%s3550_s12 + $0x1e40] sm:$0xff]  ;;  %v1345_v62 = vld [vmem:[%s3550_s12 + $0x1e38] sm:$0xff] }
 0x23a   : > { %2560 = vmatpush2.msra.mxu1 %v1246_v63  ;;  %2490 = vmatprep.subr.mxu0 %v1181_v0  ;;  %v1280_v63 = vld [vmem:[%s3550_s12 + $0x1c30] sm:$0xff] }
 0x23b   : > { %2561 = vmatprep.subr.mxu1 %v1245_v1  ;;  %2491 = vmatpush2.msra.mxu0 %v1180_v3  ;;  %v1344_v0 = vld [vmem:[%s3550_s12 + $0x1e30] sm:$0xff]  ;;  %v1279_v1 = vld [vmem:[%s3550_s12 + $0x1c28] sm:$0xff]  ;;  %v1278_v3 = vld [vmem:[%s3550_s12 + $0x1c20] sm:$0xff] }
 0x23c   : > { %2562 = vmatpush2.msra.mxu1 %v1244_v4  ;;  %2492 = vmatprep.subr.mxu0 %v1179_v5  ;;  %v1342_v4 = vld [vmem:[%s3550_s12 + $0x1e20] sm:$0xff]  ;;  %v1277_v5 = vld [vmem:[%s3550_s12 + $0x1c18] sm:$0xff] }
 0x23d   : > { %2563 = vmatprep.subr.mxu1 %v1243_v6  ;;  %2493 = vmatpush2.msra.mxu0 %v1178_v8  ;;  %v1341_v6 = vld [vmem:[%s3550_s12 + $0x1e18] sm:$0xff]  ;;  %v1340_v8 = vld [vmem:[%s3550_s12 + $0x1e10] sm:$0xff] }
 0x23e   : > { %2494 = vmatprep.mubr.f32.mxu0 %v1527_v7  ;;  %2564 = vmatpush2.msra.mxu1 %v1242_v9  ;;  %v1276_v7 = vld [vmem:[%s3550_s12 + $0x1c10] sm:$0xff]  ;;  %v1275_v9 = vld [vmem:[%s3550_s12 + $0x1c08] sm:$0xff] }
 0x23f   : > { %2495 = vmatmul.mubr.f32.vlgmr.msra.gmra.mxu0 %v1519_v61  ;;  %2565 = vmatprep.mubr.f32.mxu1 %v1528_v10  ;;  %v1281_v61 = vld [vmem:[%s3550_s12 + $0x1c38] sm:$0xff]  ;;  %v1339_v10 = vld [vmem:[%s3550_s12 + $0x1e08] sm:$0xff] }
 0x240   : > { %2572 = vmatprep.subr.mxu0 %v1305_v11  ;;  %2643 = vmatprep.subr.mxu1 %v1369_v12  ;;  %v1274_v11 = vld [vmem:[%s3550_s12 + $0x1c00] sm:$0xff] }
 0x241   : > { %2566 = vmatmul.mubr.f32.vlgmr.msra.gmra.mxu1 %v1526_v2  ;;  %2573 = vmatpush1.msra.mxu0 %v1304_v13  ;;  %v1343_v2 = vld [vmem:[%s3550_s12 + $0x1e28] sm:$0xff]  ;;  %v1338_v12 = vld [vmem:[%s3550_s12 + $0x1e00] sm:$0xff]  ;;  %v1337_v13 = vld [vmem:[%s3550_s12 + $0x1df8] sm:$0xff] }
 0x242   : > { %2644 = vmatpush1.msra.mxu1 %v1368_v14  ;;  %2574 = vmatprep.subr.mxu0 %v1303_v15  ;;  %v1401_v14 = vld [vmem:[%s3550_s12 + $0x1ff8] sm:$0xff]  ;;  %v1336_v15 = vld [vmem:[%s3550_s12 + $0x1df0] sm:$0xff] }
 0x243   : > { %2645 = vmatprep.subr.mxu1 %v1367_v16  ;;  %2575 = vmatpush1.msra.mxu0 %v1302_v17  ;;  %v1400_v16 = vld [vmem:[%s3550_s12 + $0x1ff0] sm:$0xff]  ;;  %v1335_v17 = vld [vmem:[%s3550_s12 + $0x1de8] sm:$0xff] }
 0x244   : > { %2646 = vmatpush1.msra.mxu1 %v1366_v18  ;;  %2576 = vmatprep.subr.mxu0 %v1301_v19  ;;  %v1399_v18 = vld [vmem:[%s3550_s12 + $0x1fe8] sm:$0xff]  ;;  %v1334_v19 = vld [vmem:[%s3550_s12 + $0x1de0] sm:$0xff] }
 0x245   : > { %2647 = vmatprep.subr.mxu1 %v1365_v20  ;;  %2577 = vmatpush1.msra.mxu0 %v1300_v21  ;;  %v1398_v20 = vld [vmem:[%s3550_s12 + $0x1fe0] sm:$0xff]  ;;  %v1333_v21 = vld [vmem:[%s3550_s12 + $0x1dd8] sm:$0xff] }
 0x246   : > { %2648 = vmatpush1.msra.mxu1 %v1364_v22  ;;  %2578 = vmatprep.subr.mxu0 %v1299_v23  ;;  %v1397_v22 = vld [vmem:[%s3550_s12 + $0x1fd8] sm:$0xff]  ;;  %v1332_v23 = vld [vmem:[%s3550_s12 + $0x1dd0] sm:$0xff] }
 0x247   : > { %2649 = vmatprep.subr.mxu1 %v1363_v24  ;;  %2579 = vmatpush1.msra.mxu0 %v1298_v25  ;;  %v1396_v24 = vld [vmem:[%s3550_s12 + $0x1fd0] sm:$0xff]  ;;  %v1331_v25 = vld [vmem:[%s3550_s12 + $0x1dc8] sm:$0xff] }
 0x248   : > { %2650 = vmatpush1.msra.mxu1 %v1362_v26  ;;  %2580 = vmatprep.subr.mxu0 %v1297_v27  ;;  %v1395_v26 = vld [vmem:[%s3550_s12 + $0x1fc8] sm:$0xff]  ;;  %v1330_v27 = vld [vmem:[%s3550_s12 + $0x1dc0] sm:$0xff] }
 0x249   : > { %2651 = vmatprep.subr.mxu1 %v1361_v28  ;;  %2581 = vmatpush1.msra.mxu0 %v1296_v29  ;;  %v1394_v28 = vld [vmem:[%s3550_s12 + $0x1fc0] sm:$0xff]  ;;  %v1329_v29 = vld [vmem:[%s3550_s12 + $0x1db8] sm:$0xff] }
 0x24a   : > { %2652 = vmatpush1.msra.mxu1 %v1360_v30  ;;  %2582 = vmatprep.subr.mxu0 %v1295_v31  ;;  %v1393_v30 = vld [vmem:[%s3550_s12 + $0x1fb8] sm:$0xff]  ;;  %v1328_v31 = vld [vmem:[%s3550_s12 + $0x1db0] sm:$0xff] }
 0x24b   : > { %2653 = vmatprep.subr.mxu1 %v1359_v32  ;;  %2583 = vmatpush1.msra.mxu0 %v1294_v33  ;;  %v1392_v32 = vld [vmem:[%s3550_s12 + $0x1fb0] sm:$0xff]  ;;  %v1327_v33 = vld [vmem:[%s3550_s12 + $0x1da8] sm:$0xff] }
 0x24c   : > { %2654 = vmatpush1.msra.mxu1 %v1358_v34  ;;  %2584 = vmatprep.subr.mxu0 %v1293_v35  ;;  %v1391_v34 = vld [vmem:[%s3550_s12 + $0x1fa8] sm:$0xff]  ;;  %v1326_v35 = vld [vmem:[%s3550_s12 + $0x1da0] sm:$0xff] }
 0x24d   : > { %2655 = vmatprep.subr.mxu1 %v1357_v36  ;;  %2585 = vmatpush1.msra.mxu0 %v1292_v37  ;;  %v1390_v36 = vld [vmem:[%s3550_s12 + $0x1fa0] sm:$0xff]  ;;  %v1325_v37 = vld [vmem:[%s3550_s12 + $0x1d98] sm:$0xff] }
 0x24e   : > { %2656 = vmatpush1.msra.mxu1 %v1356_v38  ;;  %2586 = vmatprep.subr.mxu0 %v1291_v39  ;;  %v1389_v38 = vld [vmem:[%s3550_s12 + $0x1f98] sm:$0xff]  ;;  %v1324_v39 = vld [vmem:[%s3550_s12 + $0x1d90] sm:$0xff] }
 0x24f   : > { %2657 = vmatprep.subr.mxu1 %v1355_v40  ;;  %2587 = vmatpush1.msra.mxu0 %v1290_v41  ;;  %v1388_v40 = vld [vmem:[%s3550_s12 + $0x1f90] sm:$0xff]  ;;  %v1323_v41 = vld [vmem:[%s3550_s12 + $0x1d88] sm:$0xff] }
 0x250   : > { %2658 = vmatpush1.msra.mxu1 %v1354_v42  ;;  %2588 = vmatprep.subr.mxu0 %v1289_v44  ;;  %v1387_v42 = vld [vmem:[%s3550_s12 + $0x1f88] sm:$0xff]  ;;  %v1322_v44 = vld [vmem:[%s3550_s12 + $0x1d80] sm:$0xff] }
 0x251   : > { %2659 = vmatprep.subr.mxu1 %v1353_v45  ;;  %2589 = vmatpush1.msra.mxu0 %v1288_v46  ;;  %v1386_v45 = vld [vmem:[%s3550_s12 + $0x1f80] sm:$0xff]  ;;  %v1321_v46 = vld [vmem:[%s3550_s12 + $0x1d78] sm:$0xff] }
 0x252   : > { %2660 = vmatpush1.msra.mxu1 %v1352_v47  ;;  %2590 = vmatprep.subr.mxu0 %v1287_v48  ;;  %v1385_v47 = vld [vmem:[%s3550_s12 + $0x1f78] sm:$0xff]  ;;  %v1320_v48 = vld [vmem:[%s3550_s12 + $0x1d70] sm:$0xff] }
 0x253   : > { %2661 = vmatprep.subr.mxu1 %v1351_v49  ;;  %2591 = vmatpush1.msra.mxu0 %v1286_v50  ;;  %v1384_v49 = vld [vmem:[%s3550_s12 + $0x1f70] sm:$0xff]  ;;  %v1319_v50 = vld [vmem:[%s3550_s12 + $0x1d68] sm:$0xff] }
 0x254   : > { %2662 = vmatpush1.msra.mxu1 %v1350_v51  ;;  %2592 = vmatprep.subr.mxu0 %v1285_v52  ;;  %v1383_v51 = vld [vmem:[%s3550_s12 + $0x1f68] sm:$0xff]  ;;  %v1318_v52 = vld [vmem:[%s3550_s12 + $0x1d60] sm:$0xff] }
 0x255   : > { %2663 = vmatprep.subr.mxu1 %v1349_v54  ;;  %2593 = vmatpush1.msra.mxu0 %v1284_v55  ;;  %v1382_v54 = vld [vmem:[%s3550_s12 + $0x1f60] sm:$0xff]  ;;  %v1317_v55 = vld [vmem:[%s3550_s12 + $0x1d58] sm:$0xff] }
 0x256   : > { %2664 = vmatpush1.msra.mxu1 %v1348_v56  ;;  %2594 = vmatprep.subr.mxu0 %v1283_v57  ;;  %v1381_v56 = vld [vmem:[%s3550_s12 + $0x1f58] sm:$0xff] }
 0x257   : > { %2665 = vmatprep.subr.mxu1 %v1347_v58  ;;  %2595 = vmatpush1.msra.mxu0 %v1282_v59  ;;  %v377_v57 = vld [vmem:[%s3572_s29 + $0x38] sm:$0xff]  ;;  %v1316_v58 = vld [vmem:[%s3550_s12 + $0x1d50] sm:$0xff] }
 0x258   : > { %2666 = vmatpush1.msra.mxu1 %v1346_v60  ;;  %2596 = vmatprep.subr.mxu0 %v1281_v61  ;;  %v1380_v59 = vld [vmem:[%s3550_s12 + $0x1f50] sm:$0xff]  ;;  %v1315_v60 = vld [vmem:[%s3550_s12 + $0x1d48] sm:$0xff] }
 0x259   : > { %2667 = vmatprep.subr.mxu1 %v1345_v62  ;;  %2597 = vmatpush1.msra.mxu0 %v1280_v63  ;;  %v1379_v61 = vld [vmem:[%s3550_s12 + $0x1f48] sm:$0xff]  ;;  %v1314_v62 = vld [vmem:[%s3550_s12 + $0x1d40] sm:$0xff] }
 0x25a   : > { %2668 = vmatpush1.msra.mxu1 %v1344_v0  ;;  %2598 = vmatprep.subr.mxu0 %v1279_v1  ;;  %v1378_v63 = vld [vmem:[%s3550_s12 + $0x1f40] sm:$0xff]  ;;  %v1529_v0 = vcombine.high %v377_v57, %v377_v57  ;;  %v1313_v1 = vld [vmem:[%s3550_s12 + $0x1d38] sm:$0xff] }
 0x25b   : > { %2669 = vmatprep.subr.mxu1 %v1343_v2  ;;  %2599 = vmatpush1.msra.mxu0 %v1278_v3  ;;  %v1377_v2 = vld [vmem:[%s3550_s12 + $0x1f38] sm:$0xff]  ;;  %v1312_v3 = vld [vmem:[%s3550_s12 + $0x1d30] sm:$0xff] }
 0x25c   : > { %2670 = vmatpush1.msra.mxu1 %v1342_v4  ;;  %2600 = vmatprep.subr.mxu0 %v1277_v5  ;;  %v1376_v4 = vld [vmem:[%s3550_s12 + $0x1f30] sm:$0xff]  ;;  %v1311_v5 = vld [vmem:[%s3550_s12 + $0x1d28] sm:$0xff] }
 0x25d   : > { %2671 = vmatprep.subr.mxu1 %v1341_v6  ;;  %2601 = vmatpush1.msra.mxu0 %v1276_v7  ;;  %v1375_v6 = vld [vmem:[%s3550_s12 + $0x1f28] sm:$0xff]  ;;  %v1536_v7 = vrot.slane %v377_v57, %v3696_v53 }
 0x25e   : > { %2672 = vmatpush1.msra.mxu1 %v1340_v8  ;;  %2602 = vmatprep.subr.mxu0 %v1275_v9  ;;  %v1310_v8 = vld [vmem:[%s3550_s12 + $0x1d20] sm:$0xff] }
 0x25f   : > { %2673 = vmatprep.subr.mxu1 %v1339_v10  ;;  %2603 = vmatpush1.msra.mxu0 %v1274_v11  ;;  %v1374_v9 = vld [vmem:[%s3550_s12 + $0x1f20] sm:$0xff]  ;;  %v1543_v10 = vrot.slane %v1529_v0, %v3696_v53  ;;  %v1309_v11 = vld [vmem:[%s3550_s12 + $0x1d18] sm:$0xff] }
 0x260   : > { %2674 = vmatpush1.msra.mxu1 %v1338_v12  ;;  %2604 = vmatprep.subr.mxu0 %v1337_v13  ;;  %v1373_v12 = vld [vmem:[%s3550_s12 + $0x1f18] sm:$0xff]  ;;  %v1308_v13 = vld [vmem:[%s3550_s12 + $0x1d10] sm:$0xff] }
 0x261   : > { %2675 = vmatprep.subr.mxu1 %v1401_v14  ;;  %2605 = vmatpush2.msra.mxu0 %v1336_v15  ;;  %v1372_v14 = vld [vmem:[%s3550_s12 + $0x1f10] sm:$0xff]  ;;  %v1307_v15 = vld [vmem:[%s3550_s12 + $0x1d08] sm:$0xff] }
 0x262   : > { %2676 = vmatpush2.msra.mxu1 %v1400_v16  ;;  %2606 = vmatprep.subr.mxu0 %v1335_v17  ;;  %v1371_v16 = vld [vmem:[%s3550_s12 + $0x1f08] sm:$0xff]  ;;  %v1544_v17 = vcombine.high %v1536_v7, %v1536_v7 }
 0x263   : > { %2677 = vmatprep.subr.mxu1 %v1399_v18  ;;  %2607 = vmatpush2.msra.mxu0 %v1334_v19  ;;  %v1306_v18 = vld [vmem:[%s3550_s12 + $0x1d00] sm:$0xff]  ;;  %v1545_v19 = vcombine.high %v1543_v10, %v1543_v10 }
 0x264   : > { %2678 = vmatpush2.msra.mxu1 %v1398_v20  ;;  %2608 = vmatprep.subr.mxu0 %v1333_v21  ;;  %v1370_v20 = vld [vmem:[%s3550_s12 + $0x1f00] sm:$0xff]  ;;  %v1644_v21 = vpop.f32.mrf.mxu0  ;;  %s4747_s12 = sld [smem:[#allocation9_spill]] }
 0x265   : > { %2679 = vmatprep.subr.mxu1 %v1397_v22  ;;  %2609 = vmatpush2.msra.mxu0 %v1332_v23  ;;  %v1715_v22 = vpop.f32.mrf.mxu1 }
 0x266   : > { %2680 = vmatpush2.msra.mxu1 %v1396_v24  ;;  %2610 = vmatprep.subr.mxu0 %v1331_v25  ;;  %v1646_v23 = vpop.f32.mrf.mxu0 }
 0x267   : > { %2681 = vmatprep.subr.mxu1 %v1395_v26  ;;  %2611 = vmatpush2.msra.mxu0 %v1330_v27  ;;  %v1717_v25 = vpop.f32.mrf.mxu1  ;;  %v1716_v26 = vadd.f32 %v1715_v22, %v1644_v21  ;;  %v369_v22 = vld [vmem:[%s3577_s17] sm:$0xf] }
 0x268   : > { %2682 = vmatpush2.msra.mxu1 %v1394_v28  ;;  %2612 = vmatprep.subr.mxu0 %v1329_v29  ;;  %v1786_v24 = vpop.f32.mrf.mxu0  ;;  %v1718_v29 = vadd.f32 %v1717_v25, %v1646_v23 }
 0x269   : > { %2683 = vmatprep.subr.mxu1 %v1393_v30  ;;  %2613 = vmatpush2.msra.mxu0 %v1328_v31  ;;  %v1857_v27 = vpop.f32.mrf.mxu1  ;;  %v1787_v30 = vadd.f32 %v1786_v24, %v1716_v26 }
 0x26a   : > { %2684 = vmatpush2.msra.mxu1 %v1392_v32  ;;  %2614 = vmatprep.subr.mxu0 %v1327_v33  ;;  %v1788_v28 = vpop.f32.mrf.mxu0  ;;  %p3019_p4 = scmp.ne.s32.totalorder %s4747_s12, 3 }
 0x26b   : > { %2685 = vmatprep.subr.mxu1 %v1391_v34  ;;  %2615 = vmatpush2.msra.mxu0 %v1326_v35  ;;  %v1789_v32 = vadd.f32 %v1788_v28, %v1718_v29  ;;  %v1859_v33 = vpop.f32.mrf.mxu1  ;;  %v1858_v34 = vadd.f32 %v1857_v27, %v1787_v30  ;;  %s4748_s16 = sld [smem:[#allocation16_spill]] (!%p3019_p4) }
 0x26c   : > { %2686 = vmatpush2.msra.mxu1 %v1390_v36  ;;  %2616 = vmatprep.subr.mxu0 %v1325_v37  ;;  %v1928_v31 = vpop.f32.mrf.mxu0 }
 0x26d   : > { %2687 = vmatprep.subr.mxu1 %v1389_v38  ;;  %2617 = vmatpush2.msra.mxu0 %v1324_v39  ;;  %v1999_v35 = vpop.f32.mrf.mxu1  ;;  %v1860_v37 = vadd.f32 %v1859_v33, %v1789_v32  ;;  %v1929_v38 = vadd.f32 %v1928_v31, %v1858_v34 }
 0x26e   : > { %2688 = vmatpush2.msra.mxu1 %v1388_v40  ;;  %2618 = vmatprep.subr.mxu0 %v1323_v41  ;;  %v1930_v36 = vpop.f32.mrf.mxu0 }
 0x26f   : > { %2689 = vmatprep.subr.mxu1 %v1387_v42  ;;  %2619 = vmatpush2.msra.mxu0 %v1322_v44  ;;  %v1931_v40 = vadd.f32 %v1930_v36, %v1860_v37  ;;  %v2001_v41 = vpop.f32.mrf.mxu1  ;;  %v2000_v42 = vadd.f32 %v1999_v35, %v1929_v38 }
 0x270   : > { %2690 = vmatpush2.msra.mxu1 %v1386_v45  ;;  %2620 = vmatprep.subr.mxu0 %v1321_v46  ;;  %v2070_v39 = vpop.f32.mrf.mxu0 }
 0x271   : > { %2691 = vmatprep.subr.mxu1 %v1385_v47  ;;  %2621 = vmatpush2.msra.mxu0 %v1320_v48  ;;  %v2141_v44 = vpop.f32.mrf.mxu1  ;;  %v2002_v46 = vadd.f32 %v2001_v41, %v1931_v40  ;;  %v2071_v47 = vadd.f32 %v2070_v39, %v2000_v42 }
 0x272   : > { %2692 = vmatpush2.msra.mxu1 %v1384_v49  ;;  %2622 = vmatprep.subr.mxu0 %v1319_v50  ;;  %v2072_v45 = vpop.f32.mrf.mxu0 }
 0x273   : > { %2693 = vmatprep.subr.mxu1 %v1383_v51  ;;  %2623 = vmatpush2.msra.mxu0 %v1318_v52  ;;  %v2073_v49 = vadd.f32 %v2072_v45, %v2002_v46  ;;  %v2143_v50 = vpop.f32.mrf.mxu1  ;;  %v2142_v51 = vadd.f32 %v2141_v44, %v2071_v47 }
 0x274   : > { %2694 = vmatpush2.msra.mxu1 %v1382_v54  ;;  %2624 = vmatprep.subr.mxu0 %v1317_v55 }
 0x275   : > { %2695 = vmatprep.subr.mxu1 %v1381_v56  ;;  %2625 = vmatpush2.msra.mxu0 %v1316_v58  ;;  %v2144_v55 = vadd.f32 %v2143_v50, %v2073_v49 }
 0x276   : > { %2696 = vmatpush2.msra.mxu1 %v1380_v59  ;;  %2626 = vmatprep.subr.mxu0 %v1315_v60 }
 0x277   : > { %2697 = vmatprep.subr.mxu1 %v1379_v61  ;;  %2627 = vmatpush2.msra.mxu0 %v1314_v62 }
 0x278   : > { %2698 = vmatpush2.msra.mxu1 %v1378_v63  ;;  %2628 = vmatprep.subr.mxu0 %v1313_v1 }
 0x279   : > { %2699 = vmatprep.subr.mxu1 %v1377_v2  ;;  %2629 = vmatpush2.msra.mxu0 %v1312_v3 }
 0x27a   : > { %2700 = vmatpush2.msra.mxu1 %v1376_v4  ;;  %2630 = vmatprep.subr.mxu0 %v1311_v5 }
 0x27b   : > { %2701 = vmatprep.subr.mxu1 %v1375_v6  ;;  %2631 = vmatpush2.msra.mxu0 %v1310_v8  ;;  %v2212_v48 = vpop.f32.mrf.mxu0 }
 0x27c   : > { %2702 = vmatpush2.msra.mxu1 %v1374_v9  ;;  %2632 = vmatprep.subr.mxu0 %v1309_v11  ;;  %v2213_v56 = vadd.f32 %v2212_v48, %v2142_v51 }
 0x27d   : > { %2703 = vmatprep.subr.mxu1 %v1373_v12  ;;  %2633 = vmatpush2.msra.mxu0 %v1308_v13  ;;  %v2283_v52 = vpop.f32.mrf.mxu1  ;;  %v2214_v54 = vpop.f32.mrf.mxu0 }
 0x27e   : > { %2704 = vmatpush2.msra.mxu1 %v1372_v14  ;;  %2634 = vmatprep.subr.mxu0 %v1307_v15  ;;  %v2215_v58 = vadd.f32 %v2214_v54, %v2144_v55  ;;  %v2284_v60 = vadd.f32 %v2283_v52, %v2213_v56 }
 0x27f   : > { %2705 = vmatprep.subr.mxu1 %v1371_v16  ;;  %2635 = vmatpush2.msra.mxu0 %v1306_v18  ;;  %v2285_v59 = vpop.f32.mrf.mxu1 }
 0x280   : > { %2636 = vmatprep.mubr.f32.mxu0 %v1544_v17  ;;  %2706 = vmatpush2.msra.mxu1 %v1370_v20  ;;  %v2286_v63 = vadd.f32 %v2285_v59, %v2215_v58 }
 0x281   : > { %2707 = vmatprep.mubr.f32.mxu1 %v1545_v19  ;;  %2637 = vmatmul.mubr.f32.vlgmr.msra.gmra.mxu0 %v1536_v7 }
 0x282   : > { %2708 = vmatmul.mubr.f32.vlgmr.msra.gmra.mxu1 %v1543_v10 }
 0x2bd   : > { %v2354_v57 = vpop.f32.mrf.mxu0 }
 0x2be   : > { %v2355_v0 = vadd.f32 %v2354_v57, %v2284_v60 }
 0x2bf   : > { %v2425_v61 = vpop.f32.mrf.mxu1  ;;  %v2356_v62 = vpop.f32.mrf.mxu0 }
 0x2c0   : > { %v2357_v2 = vadd.f32 %v2356_v62, %v2286_v63  ;;  %v2426_v4 = vadd.f32 %v2425_v61, %v2355_v0 }
 0x2c1   : > { %v2427_v3 = vpop.f32.mrf.mxu1 }
 0x2c2   : > { %v2428_v7 = vadd.f32 %v2427_v3, %v2357_v2 }
 0x2ff   : > { %v2496_v1 = vpop.f32.mrf.mxu0 }
 0x300   : > { %v2497_v8 = vadd.f32 %v2496_v1, %v2426_v4 }
 0x301   : > { %v2567_v5 = vpop.f32.mrf.mxu1  ;;  %v2498_v6 = vpop.f32.mrf.mxu0 }
 0x302   : > { %v2499_v9 = vadd.f32 %v2498_v6, %v2428_v7  ;;  %v2568_v11 = vadd.f32 %v2567_v5, %v2497_v8 }
 0x303   : > { %v2569_v10 = vpop.f32.mrf.mxu1 }
 0x304   : > { %v2570_v14 = vadd.f32 %v2569_v10, %v2499_v9 }
 0x341   : > { %v2638_v12 = vpop.f32.mrf.mxu0 }
 0x342   : > { %v2709_v13 = vpop.f32.mrf.mxu1  ;;  %v2639_v15 = vadd.f32 %v2638_v12, %v2568_v11 }
 0x343   : > { %v2640_v16 = vpop.f32.mrf.mxu0 }
 0x344   : > { %v2641_v17 = vadd.f32 %v2640_v16, %v2570_v14  ;;  %v2711_v18 = vpop.f32.mrf.mxu1  ;;  %v2710_v19 = vadd.f32 %v2709_v13, %v2639_v15 }
 0x346   : > { %v2712_v20 = vadd.f32 %v2711_v18, %v2641_v17 }
 0x348   : > { %v2716_v21 = vcombine.low %v2710_v19, %v2712_v20 }
 0x34a   : > { %v2723_v23 = vrot.slane %v2716_v21, %v3696_v53  ;;  %2730 = sbr.rel (%p3019_p4) target bundleno = 1070 (0x42e), region = 60 }
 0x34c   : > { %v2725_v24 = vadd.f32 %v2723_v23, %v369_v22 }
 0x34e   : > { %2726 = vst [vmem:[%s3577_s17] sm:$0xf] %v2725_v24 }
 0x34f   : > { %v2748_v25 = vld [vmem:[%s3559_s13 + $0x78] sm:$0xff]  ;;  %v2747_v26 = vld [vmem:[%s3559_s13 + $0x70] sm:$0xff]  ;;  %v2746_v27 = vld [vmem:[%s3559_s13 + $0x68] sm:$0xff]  ;;  %v3333_v29 = vmov 0.0   ;;  %vm2749_vm0 = vcmask 523264   ;;  %v2840_v44 = vsub.s32 0, %v3684_v43 }
 0x350   : > { %2769 = vmatprep.subr.mxu0 %v2748_v25  ;;  %v2745_v28 = vld [vmem:[%s3559_s13 + $0x60] sm:$0xff]  ;;  %2817 = vmatprep.mubr.f32.mxu0 %v3333_v29  ;;  %v2744_v30 = vld [vmem:[%s3559_s13 + $0x58] sm:$0xff]  ;;  %v2743_v31 = vld [vmem:[%s3559_s13 + $0x50] sm:$0xff]  ;;  %v2844_v45 = vsub.s32 1, %v3684_v43 }
 0x351   : > { %2770 = vmatpush1.msra.mxu0 %v2747_v26  ;;  %v2742_v32 = vld [vmem:[%s3559_s13 + $0x48] sm:$0xff]  ;;  %v2741_v33 = vld [vmem:[%s3559_s13 + $0x40] sm:$0xff]  ;;  %v2740_v34 = vld [vmem:[%s3559_s13 + $0x38] sm:$0xff] }
 0x352   : > { %2771 = vmatprep.subr.mxu0 %v2746_v27  ;;  %v2739_v35 = vld [vmem:[%s3559_s13 + $0x30] sm:$0xff]  ;;  %v2738_v36 = vld [vmem:[%s3559_s13 + $0x28] sm:$0xff]  ;;  %v2737_v37 = vld [vmem:[%s3559_s13 + $0x20] sm:$0xff] }
 0x353   : > { %2772 = vmatpush1.msra.mxu0 %v2745_v28  ;;  %v2736_v38 = vld [vmem:[%s3559_s13 + $0x18] sm:$0xff]  ;;  %v2735_v39 = vld [vmem:[%s3559_s13 + $0x10] sm:$0xff]  ;;  %v2734_v40 = vld [vmem:[%s3559_s13 + $0x8] sm:$0xff] }
 0x354   : > { %2773 = vmatprep.subr.mxu0 %v2744_v30  ;;  %v2733_v41 = vld [vmem:[%s3559_s13] sm:$0xff] }
 0x355   : > { %2774 = vmatpush1.msra.mxu0 %v2743_v31  ;;  %v2732_v42 = vld [vmem:[%s4748_s16] sm:$0x3] }
 0x356   : > { %2775 = vmatprep.subr.mxu0 %v2742_v32  ;;  %v2836_v46 = vld [vmem:[%s306_s1] sm:$0x3] }
 0x357   : > { %2776 = vmatpush1.msra.mxu0 %v2741_v33  ;;  %v2841_v47 = vrot.slane %v2836_v46, %v2840_v44  ;;  %v2845_v48 = vrot.slane %v2836_v46, %v2844_v45  ;;  %v2731_v54 = vld [vmem:[%s3577_s17] sm:$0xf] }
 0x358   : > { %2777 = vmatprep.subr.mxu0 %v2740_v34 }
 0x359   : > { %2778 = vmatpush1.msra.mxu0 %v2739_v35  ;;  %v2846_v50 = vcombine.low %v2841_v47, %v2845_v48 }
 0x35a   : > { %2779 = vmatprep.subr.mxu0 %v2738_v36 }
 0x35b   : > { %2780 = vmatpush1.msra.mxu0 %v2737_v37  ;;  %v2853_v56 = vrot.slane %v2846_v50, %v3696_v53 }
 0x35c   : > { %2781 = vmatprep.subr.mxu0 %v2736_v38 }
 0x35d   : > { %2782 = vmatpush1.msra.mxu0 %v2735_v39 }
 0x35e   : > { %2783 = vmatprep.subr.mxu0 %v2734_v40 }
 0x35f   : > { %2784 = vmatpush1.msra.mxu0 %v2733_v41 }
 0x360   : > { %3020 = vmatmul.mubr.msk.f32.vlgmr.msra.gmra.mxu0 %vm2749_vm0, %v2732_v42 }
 0x420   : > { %v2819_v49 = vpop.f32.mrf.mxu0 }
 0x422   : > { %v2821_v51 = vpop.f32.mrf.mxu0 }
 0x423   : > { %v2826_v52 = vcombine.low %v2819_v49, %v2821_v51 }
 0x425   : > { %v2833_v55 = vrot.slane %v2826_v52, %v3696_v53 }
 0x427   : > { %v2835_v57 = vadd.f32 %v2833_v55, %v2731_v54 }
 0x429   : > { %v2855_v58 = vadd.f32 %v2853_v56, %v2835_v57 }
 0x42b   : > { %v2856_v59 = vmax.f32 %v2855_v58, 0.0 }
 0x42d   : > { %2857 = vst [vmem:[%s3577_s17] sm:$0xf] %v2856_v59 }
 0x42e PF: > { %s21_s28 = sadd.s32 1, %s3323_s28   ;;  %s4749_s13 = sld [smem:[#allocation12_spill]] }
 0x42f   : > { %p18_p2 = scmp.ge.s32.totalorder %s21_s28, 10   ;;  %s4750_s30 = sld [smem:[#allocation13_spill]] }
 0x430   : > { %s4751_s18 = smov %s3287_s19  ;;  %s4752_s19 = smov %s3291_s20 }
 0x431   : > { %s4753_s20 = smov %s3511_s21  ;;  %s4754_s21 = smov %s3299_s22 }
 0x432   : > { %s4755_s22 = smov %s3303_s23  ;;  %s4756_s23 = smov %s3514_s2 }
 0x433   : > { %s4757_s24 = smov %s3315_s26  ;;  %s4758_s25 = smov %s3319_s27 }
 0x434   : > { %s4759_s26 = smov %s4749_s13  ;;  %20 = sbr.rel (!%p18_p2) target bundleno = 15 (0xf), region = 115 }
 0x435   : > { %s4760_s27 = smov %s4750_s30 }
 0x439   :  { %2880 = vsyncpa [#allocation3], 1 }
 0x43a   :  { %2882 = vsyncpa [#allocation3 + $0x1], 1 }
 0x43b   :  { %2883 = vsyncpa [#allocation5], 1 }
 0x43c   :  { %2885 = vsyncpa [#allocation5 + $0x1], 1 }

</bundles_post_ra>
